<compile_context>
chip_gen: v6e
topology: v6e:2x2x1
jax: 0.10.0
libtpu: 0.0.40
codegen_flags: <defaults>
</compile_context>

<pallas_src>
import jax
import jax.numpy as jnp
from jax import lax
from jax.experimental import pallas as pl
from jax.experimental.pallas import tpu as pltpu


# ------------------------------ fused kernel ------------------------------

def _detect_fused_kernel(x_ref, w_ref, b_ref, out_ref, xpad_ref, slab_ref):
    """Whole DetectModule for one image.

    x_ref:    (1, H+2, W+2, Cp)  spatially padded NHWC input, Cin padded to Cp
    w_ref:    (3, 9*Cp, OCP)     bf16 folded weights for the 3 fused matmuls
                                   [0] cols 0:C    = upconv,     cols C:2C  = ctx_inconv
                                   [1] cols 0:C/2  = ctx_upconv, cols C/2:C = ctx_downconv
                                   [2] cols 0:C/2  = ctx_downconv2
    b_ref:    (3, 1, OCP)        f32 folded BN biases, same column layout
    out_ref:  (1, H*W, 2C)       final output rows  [up | cu | cd]
    xpad_ref: (H+2, W+2, Cp)     f32 scratch: padded activation for matmuls 2/3
    slab_ref: (H*W, 9*Cp)        f32 scratch: on-chip im2col patch slab
    """
    _, hp2, wp2, cp = x_ref.shape
    h, w = hp2 - 2, wp2 - 2
    hw = h * w
    c2 = out_ref.shape[-1]          # 2*C (real output channels)
    c = c2 // 2
    half = c // 2

    def build_slab(tap_src):
        # Pack the 9 shifted 3x3 windows along the contraction dim so each
        # conv is a single K = 9*cp matmul (no HBM im2col, copies stay VMEM).
        for di in range(3):
            for dj in range(3):
                k0 = (di * 3 + dj) * cp
                slab_ref[:, k0:k0 + cp] = tap_src(di, dj).reshape(hw, cp)

    def conv_hswish(idx):
        # bf16 MXU operands, f32 accumulation, f32 bias + HSwish epilogue.
        acc = jnp.dot(slab_ref[...].astype(jnp.bfloat16), w_ref[idx],
                      preferred_element_type=jnp.float32)
        y = acc + b_ref[idx]
        return y * jnp.clip(y + 3.0, 0.0, 6.0) * (1.0 / 6.0)

    def stage_padded(val, nch):
        # Place a (hw, nch) activation into the zeroed halo scratch
        # (conv padding=1 handled entirely on-chip).
        xpad_ref[...] = jnp.zeros_like(xpad_ref)
        xpad_ref[1:h + 1, 1:w + 1, 0:nch] = val.reshape(h, w, nch)

    # ---- matmul 1: [upconv | ctx_inconv] on x (shared x-slab) ------------
    build_slab(lambda di, dj: x_ref[0, di:di + h, dj:dj + w, :])
    r1 = conv_hswish(0)
    out_ref[0, :, 0:c] = r1[:, 0:c].astype(out_ref.dtype)

    # ---- matmul 2: [ctx_upconv | ctx_downconv] on t (block-diag weights) --
    stage_padded(r1[:, c:2 * c], c)
    build_slab(lambda di, dj: xpad_ref[di:di + h, dj:dj + w, :])
    r2 = conv_hswish(1)
    out_ref[0, :, c:c + half] = r2[:, 0:half].astype(out_ref.dtype)

    # ---- matmul 3: ctx_downconv2 on cd1 -----------------------------------
    stage_padded(r2[:, half:c], half)
    build_slab(lambda di, dj: xpad_ref[di:di + h, dj:dj + w, :])
    r3 = conv_hswish(2)
    out_ref[0, :, c + half:c2] = r3[:, 0:half].astype(out_ref.dtype)


# ------------------------------ wrapper ------------------------------------

def _fold_bn(w, gamma, beta, mean, var, eps=1e-5):
    scale = gamma / jnp.sqrt(var + eps)                     # (OC,)
    return w * scale[:, None, None, None], beta - mean * scale


def _taps(wf):
    # (OC, Cin, 3, 3) -> (9, Cin, OC), tap index = di*3 + dj.
    oc, cin = wf.shape[0], wf.shape[1]
    return jnp.transpose(wf, (2, 3, 1, 0)).reshape(9, cin, oc)


def _pack_params(params, c, cp, ocp):
    """Fold BN + pack the 5 convs into 3 fused (9*Cp, OCP) matmul weights."""
    half = c // 2
    w_up, b_up = _fold_bn(*params["upconv"])
    w_in, b_in = _fold_bn(*params["ctx_inconv"])
    w_cu, b_cu = _fold_bn(*params["ctx_upconv"])
    w_cd, b_cd = _fold_bn(*params["ctx_downconv"])
    w_d2, b_d2 = _fold_bn(*params["ctx_downconv2"])

    wa = jnp.zeros((9, cp, ocp), jnp.float32)
    wa = wa.at[:, 0:c, 0:c].set(_taps(w_up))                # up  <- x
    wa = wa.at[:, 0:c, c:2 * c].set(_taps(w_in))            # t   <- x
    wb = jnp.zeros((9, cp, ocp), jnp.float32)
    wb = wb.at[:, 0:half, 0:half].set(_taps(w_cu))          # cu  <- t[:, :half]
    wb = wb.at[:, half:c, half:c].set(_taps(w_cd))          # cd1 <- t[:, half:]
    wc = jnp.zeros((9, cp, ocp), jnp.float32)
    wc = wc.at[:, 0:half, 0:half].set(_taps(w_d2))          # cd  <- cd1
    w_all = jnp.stack([wa, wb, wc]).reshape(3, 9 * cp, ocp).astype(jnp.bfloat16)

    ba = jnp.zeros((ocp,), jnp.float32).at[0:c].set(b_up).at[c:2 * c].set(b_in)
    bb = jnp.zeros((ocp,), jnp.float32).at[0:half].set(b_cu).at[half:c].set(b_cd)
    bc = jnp.zeros((ocp,), jnp.float32).at[0:half].set(b_d2)
    b_all = jnp.stack([ba, bb, bc]).reshape(3, 1, ocp)
    return w_all, b_all


@jax.jit
def detect_module_forward(x_nchw, params):
    """DetectModule forward (eval BN).  x: (N, C, H, W) f32 -> (N, 2C, H, W)."""
    n, c, h, w = x_nchw.shape
    assert c % 2 == 0
    cp = max(8, -(-c // 8) * 8)             # Cin slots per tap (sublane aligned)
    ocp = max(8, -(-(2 * c) // 8) * 8)      # matmul result columns (>= 2C)

    w_all, b_all = _pack_params(params, c, cp, ocp)

    # One NCHW->NHWC transpose + one halo/channel pad on the module input;
    # all intermediate halos are handled in VMEM scratch inside the kernel.
    x = jnp.transpose(x_nchw, (0, 2, 3, 1))
    xpad = jnp.pad(x, ((0, 0), (1, 1), (1, 1), (0, cp - c)))

    out = pl.pallas_call(
        _detect_fused_kernel,
        out_shape=jax.ShapeDtypeStruct((n, h * w, 2 * c), jnp.float32),
        grid_spec=pltpu.PrefetchScalarGridSpec(
            num_scalar_prefetch=0,
            grid=(n,),                      # one image per grid step
            in_specs=[
                pl.BlockSpec((1, h + 2, w + 2, cp), lambda b: (b, 0, 0, 0)),
                pl.BlockSpec((3, 9 * cp, ocp), lambda b: (0, 0, 0)),
                pl.BlockSpec((3, 1, ocp), lambda b: (0, 0, 0)),
            ],
            out_specs=pl.BlockSpec((1, h * w, 2 * c), lambda b: (b, 0, 0)),
            scratch_shapes=[
                pltpu.VMEM((h + 2, w + 2, cp), jnp.float32),   # padded activation
                pltpu.VMEM((h * w, 9 * cp), jnp.float32),      # im2col patch slab
            ],
        ),
        compiler_params=pltpu.CompilerParams(
            dimension_semantics=("parallel",),   # batch axis -> megacore sharding
        ),
    )(xpad, w_all, b_all)

    out = out.reshape(n, h, w, 2 * c)
    return jnp.transpose(out, (0, 3, 1, 2))     # NHWC -> NCHW (once)


# ----------------------------- pure-JAX reference -----------------------------

def _ref_cbn(x, w, gamma, beta, mean, var, eps=1e-5):
    y = lax.conv_general_dilated(
        x, w, window_strides=(1, 1), padding=[(1, 1), (1, 1)],
        dimension_numbers=("NCHW", "OIHW", "NCHW"))
    scale = (gamma / jnp.sqrt(var + eps))[None, :, None, None]
    bias = (beta - mean * gamma / jnp.sqrt(var + eps))[None, :, None, None]
    y = y * scale + bias
    return y * jnp.clip(y + 3.0, 0.0, 6.0) / 6.0


def _ref_detect(x, params):
    up = _ref_cbn(x, *params["upconv"])
    t = _ref_cbn(x, *params["ctx_inconv"])
    half = t.shape[1] // 2
    cu = _ref_cbn(t[:, :half], *params["ctx_upconv"])
    cd = _ref_cbn(t[:, half:], *params["ctx_downconv"])
    cd = _ref_cbn(cd, *params["ctx_downconv2"])
    return jnp.concatenate([up, cu, cd], axis=1)


def _make_cbn_params(key, cin, cout):
    k1, k2, k3, k4, k5 = jax.random.split(key, 5)
    w = jax.random.normal(k1, (cout, cin, 3, 3), jnp.float32) * 0.2
    gamma = 1.0 + 0.1 * jax.random.normal(k2, (cout,), jnp.float32)
    beta = 0.1 * jax.random.normal(k3, (cout,), jnp.float32)
    mean = 0.1 * jax.random.normal(k4, (cout,), jnp.float32)
    var = jnp.abs(jax.random.normal(k5, (cout,), jnp.float32)) + 0.5
    return (w, gamma, beta, mean, var)


if __name__ == "__main__":
    key = jax.random.PRNGKey(0)
    kx, k_up, k_in, k_cu, k_cd, k_cd2 = jax.random.split(key, 6)

    # DetectModule(inchannel=4) on a (2, 4, 16, 16) input.
    N, C, H, W = 2, 4, 16, 16
    HALF = C // 2

    x = jax.random.normal(kx, (N, C, H, W), dtype=jnp.float32)
    params = {
        "upconv": _make_cbn_params(k_up, C, C),
        "ctx_inconv": _make_cbn_params(k_in, C, C),
        "ctx_upconv": _make_cbn_params(k_cu, HALF, HALF),
        "ctx_downconv": _make_cbn_params(k_cd, HALF, HALF),
        "ctx_downconv2": _make_cbn_params(k_cd2, HALF, HALF),
    }

    out = detect_module_forward(x, params)
    out = jax.block_until_ready(out)

    ref = _ref_detect(x, params)
    assert out.shape == (N, 2 * C, H, W), out.shape
    max_err = float(jnp.max(jnp.abs(out - ref)))
    # bf16 MXU operands (f32 accumulation) across 5 stacked layers: ~1e-2 error
    # expected vs. the f32 reference (tolerance per perf-review guidance).
    assert jnp.allclose(out, ref, atol=5e-2, rtol=5e-2), max_err

    print("KERNEL_OK")
</pallas_src>

<mosaic_0001>
module attributes {stable_mosaic.version = 11 : i64} {
  func.func @_detect_fused_kernel(%arg0: i32, %arg1: memref<1x18x18x8xf32, #tpu.memory_space<vmem>>, %arg2: memref<3x72x8xbf16, #tpu.memory_space<vmem>>, %arg3: memref<3x1x8xf32, #tpu.memory_space<vmem>>, %arg4: memref<1x256x8xf32, #tpu.memory_space<vmem>>, %arg5: memref<18x18x8xf32, #tpu.memory_space<vmem>>, %arg6: memref<256x72xf32, #tpu.memory_space<vmem>>) attributes {dimension_semantics = [#tpu.dimension_semantics<parallel>], iteration_bounds = array<i64: 2>, scalar_prefetch = 0 : i64, scratch_operands = 2 : i64, tpu.core_type = #tpu.core_type<tc>, window_params = [{transform_indices = @transform_0, window_bounds = array<i64: 1, 18, 18, 8>}, {pipeline_mode = #tpu.pipeline_mode<synchronous>, transform_indices = @transform_1, window_bounds = array<i64: 3, 72, 8>}, {pipeline_mode = #tpu.pipeline_mode<synchronous>, transform_indices = @transform_2, window_bounds = array<i64: 3, 1, 8>}, {transform_indices = @transform_3, window_bounds = array<i64: 1, 256, 8>}]} {
    %c0 = arith.constant 0 : index
    %c0_0 = arith.constant 0 : index
    %c0_1 = arith.constant 0 : index
    %c0_2 = arith.constant 0 : index
    %0 = vector.load %arg1[%c0, %c0_0, %c0_1, %c0_2] : memref<1x18x18x8xf32, #tpu.memory_space<vmem>>, vector<1x16x16x8xf32>
    %1 = vector.shape_cast %0 : vector<1x16x16x8xf32> to vector<16x16x8xf32>
    %2 = vector.shape_cast %1 : vector<16x16x8xf32> to vector<256x8xf32>
    %c0_3 = arith.constant 0 : index
    %c0_4 = arith.constant 0 : index
    %3 = vector.load %arg6[%c0_3, %c0_4] : memref<256x72xf32, #tpu.memory_space<vmem>>, vector<256x8xf32>
    tpu.vector_store %arg6[%c0_3, %c0_4], %2 {strides = array<i32>} : memref<256x72xf32, #tpu.memory_space<vmem>>, vector<256x8xf32>,
    %c0_5 = arith.constant 0 : index
    %c0_6 = arith.constant 0 : index
    %c1 = arith.constant 1 : index
    %c0_7 = arith.constant 0 : index
    %4 = vector.load %arg1[%c0_5, %c0_6, %c1, %c0_7] : memref<1x18x18x8xf32, #tpu.memory_space<vmem>>, vector<1x16x16x8xf32>
    %5 = vector.shape_cast %4 : vector<1x16x16x8xf32> to vector<16x16x8xf32>
    %6 = vector.shape_cast %5 : vector<16x16x8xf32> to vector<256x8xf32>
    %c0_8 = arith.constant 0 : index
    %c8 = arith.constant 8 : index
    %7 = vector.load %arg6[%c0_8, %c8] : memref<256x72xf32, #tpu.memory_space<vmem>>, vector<256x8xf32>
    tpu.vector_store %arg6[%c0_8, %c8], %6 {strides = array<i32>} : memref<256x72xf32, #tpu.memory_space<vmem>>, vector<256x8xf32>,
    %c0_9 = arith.constant 0 : index
    %c0_10 = arith.constant 0 : index
    %c2 = arith.constant 2 : index
    %c0_11 = arith.constant 0 : index
    %8 = vector.load %arg1[%c0_9, %c0_10, %c2, %c0_11] : memref<1x18x18x8xf32, #tpu.memory_space<vmem>>, vector<1x16x16x8xf32>
    %9 = vector.shape_cast %8 : vector<1x16x16x8xf32> to vector<16x16x8xf32>
    %10 = vector.shape_cast %9 : vector<16x16x8xf32> to vector<256x8xf32>
    %c0_12 = arith.constant 0 : index
    %c16 = arith.constant 16 : index
    %11 = vector.load %arg6[%c0_12, %c16] : memref<256x72xf32, #tpu.memory_space<vmem>>, vector<256x8xf32>
    tpu.vector_store %arg6[%c0_12, %c16], %10 {strides = array<i32>} : memref<256x72xf32, #tpu.memory_space<vmem>>, vector<256x8xf32>,
    %c0_13 = arith.constant 0 : index
    %c1_14 = arith.constant 1 : index
    %c0_15 = arith.constant 0 : index
    %c0_16 = arith.constant 0 : index
    %12 = vector.load %arg1[%c0_13, %c1_14, %c0_15, %c0_16] : memref<1x18x18x8xf32, #tpu.memory_space<vmem>>, vector<1x16x16x8xf32>
    %13 = vector.shape_cast %12 : vector<1x16x16x8xf32> to vector<16x16x8xf32>
    %14 = vector.shape_cast %13 : vector<16x16x8xf32> to vector<256x8xf32>
    %c0_17 = arith.constant 0 : index
    %c24 = arith.constant 24 : index
    %15 = vector.load %arg6[%c0_17, %c24] : memref<256x72xf32, #tpu.memory_space<vmem>>, vector<256x8xf32>
    tpu.vector_store %arg6[%c0_17, %c24], %14 {strides = array<i32>} : memref<256x72xf32, #tpu.memory_space<vmem>>, vector<256x8xf32>,
    %c0_18 = arith.constant 0 : index
    %c1_19 = arith.constant 1 : index
    %c1_20 = arith.constant 1 : index
    %c0_21 = arith.constant 0 : index
    %16 = vector.load %arg1[%c0_18, %c1_19, %c1_20, %c0_21] : memref<1x18x18x8xf32, #tpu.memory_space<vmem>>, vector<1x16x16x8xf32>
    %17 = vector.shape_cast %16 : vector<1x16x16x8xf32> to vector<16x16x8xf32>
    %18 = vector.shape_cast %17 : vector<16x16x8xf32> to vector<256x8xf32>
    %c0_22 = arith.constant 0 : index
    %c32 = arith.constant 32 : index
    %19 = vector.load %arg6[%c0_22, %c32] : memref<256x72xf32, #tpu.memory_space<vmem>>, vector<256x8xf32>
    tpu.vector_store %arg6[%c0_22, %c32], %18 {strides = array<i32>} : memref<256x72xf32, #tpu.memory_space<vmem>>, vector<256x8xf32>,
    %c0_23 = arith.constant 0 : index
    %c1_24 = arith.constant 1 : index
    %c2_25 = arith.constant 2 : index
    %c0_26 = arith.constant 0 : index
    %20 = vector.load %arg1[%c0_23, %c1_24, %c2_25, %c0_26] : memref<1x18x18x8xf32, #tpu.memory_space<vmem>>, vector<1x16x16x8xf32>
    %21 = vector.shape_cast %20 : vector<1x16x16x8xf32> to vector<16x16x8xf32>
    %22 = vector.shape_cast %21 : vector<16x16x8xf32> to vector<256x8xf32>
    %c0_27 = arith.constant 0 : index
    %c40 = arith.constant 40 : index
    %23 = vector.load %arg6[%c0_27, %c40] : memref<256x72xf32, #tpu.memory_space<vmem>>, vector<256x8xf32>
    tpu.vector_store %arg6[%c0_27, %c40], %22 {strides = array<i32>} : memref<256x72xf32, #tpu.memory_space<vmem>>, vector<256x8xf32>,
    %c0_28 = arith.constant 0 : index
    %c2_29 = arith.constant 2 : index
    %c0_30 = arith.constant 0 : index
    %c0_31 = arith.constant 0 : index
    %24 = vector.load %arg1[%c0_28, %c2_29, %c0_30, %c0_31] : memref<1x18x18x8xf32, #tpu.memory_space<vmem>>, vector<1x16x16x8xf32>
    %25 = vector.shape_cast %24 : vector<1x16x16x8xf32> to vector<16x16x8xf32>
    %26 = vector.shape_cast %25 : vector<16x16x8xf32> to vector<256x8xf32>
    %c0_32 = arith.constant 0 : index
    %c48 = arith.constant 48 : index
    %27 = vector.load %arg6[%c0_32, %c48] : memref<256x72xf32, #tpu.memory_space<vmem>>, vector<256x8xf32>
    tpu.vector_store %arg6[%c0_32, %c48], %26 {strides = array<i32>} : memref<256x72xf32, #tpu.memory_space<vmem>>, vector<256x8xf32>,
    %c0_33 = arith.constant 0 : index
    %c2_34 = arith.constant 2 : index
    %c1_35 = arith.constant 1 : index
    %c0_36 = arith.constant 0 : index
    %28 = vector.load %arg1[%c0_33, %c2_34, %c1_35, %c0_36] : memref<1x18x18x8xf32, #tpu.memory_space<vmem>>, vector<1x16x16x8xf32>
    %29 = vector.shape_cast %28 : vector<1x16x16x8xf32> to vector<16x16x8xf32>
    %30 = vector.shape_cast %29 : vector<16x16x8xf32> to vector<256x8xf32>
    %c0_37 = arith.constant 0 : index
    %c56 = arith.constant 56 : index
    %31 = vector.load %arg6[%c0_37, %c56] : memref<256x72xf32, #tpu.memory_space<vmem>>, vector<256x8xf32>
    tpu.vector_store %arg6[%c0_37, %c56], %30 {strides = array<i32>} : memref<256x72xf32, #tpu.memory_space<vmem>>, vector<256x8xf32>,
    %c0_38 = arith.constant 0 : index
    %c2_39 = arith.constant 2 : index
    %c2_40 = arith.constant 2 : index
    %c0_41 = arith.constant 0 : index
    %32 = vector.load %arg1[%c0_38, %c2_39, %c2_40, %c0_41] : memref<1x18x18x8xf32, #tpu.memory_space<vmem>>, vector<1x16x16x8xf32>
    %33 = vector.shape_cast %32 : vector<1x16x16x8xf32> to vector<16x16x8xf32>
    %34 = vector.shape_cast %33 : vector<16x16x8xf32> to vector<256x8xf32>
    %c0_42 = arith.constant 0 : index
    %c64 = arith.constant 64 : index
    %35 = vector.load %arg6[%c0_42, %c64] : memref<256x72xf32, #tpu.memory_space<vmem>>, vector<256x8xf32>
    tpu.vector_store %arg6[%c0_42, %c64], %34 {strides = array<i32>} : memref<256x72xf32, #tpu.memory_space<vmem>>, vector<256x8xf32>,
    %c0_43 = arith.constant 0 : index
    %c0_44 = arith.constant 0 : index
    %36 = vector.load %arg6[%c0_43, %c0_44] : memref<256x72xf32, #tpu.memory_space<vmem>>, vector<256x72xf32>
    %37 = arith.truncf %36 : vector<256x72xf32> to vector<256x72xbf16>
    %c0_45 = arith.constant 0 : index
    %c0_46 = arith.constant 0 : index
    %c0_47 = arith.constant 0 : index
    %38 = vector.load %arg2[%c0_45, %c0_46, %c0_47] : memref<3x72x8xbf16, #tpu.memory_space<vmem>>, vector<1x72x8xbf16>
    %39 = vector.shape_cast %38 : vector<1x72x8xbf16> to vector<72x8xbf16>
    %cst = arith.constant dense<0.000000e+00> : vector<256x8xf32>
    %40 = tpu.matmul %37, %39, %cst {dimension_numbers = #tpu.dot_dimension_numbers<[1], [0], [0], [1], [0, 0, 1, 1], [], []>} : vector<256x72xbf16>, vector<72x8xbf16>, vector<256x8xf32> -> vector<256x8xf32>
    %c0_48 = arith.constant 0 : index
    %c0_49 = arith.constant 0 : index
    %c0_50 = arith.constant 0 : index
    %41 = vector.load %arg3[%c0_48, %c0_49, %c0_50] : memref<3x1x8xf32, #tpu.memory_space<vmem>>, vector<1x1x8xf32>
    %42 = vector.shape_cast %41 : vector<1x1x8xf32> to vector<1x8xf32>
    %43 = vector.broadcast %42 : vector<1x8xf32> to vector<256x8xf32>
    %44 = arith.addf %40, %43 : vector<256x8xf32>
    %cst_51 = arith.constant 3.000000e+00 : f32
    %45 = vector.broadcast %cst_51 : f32 to vector<256x8xf32>
    %46 = arith.addf %44, %45 : vector<256x8xf32>
    %cst_52 = arith.constant 0.000000e+00 : f32
    %cst_53 = arith.constant 6.000000e+00 : f32
    %47 = vector.broadcast %cst_52 : f32 to vector<256x8xf32>
    %48 = arith.maximumf %47, %46 : vector<256x8xf32>
    %49 = vector.broadcast %cst_53 : f32 to vector<256x8xf32>
    %50 = arith.minimumf %49, %48 : vector<256x8xf32>
    %51 = arith.mulf %44, %50 : vector<256x8xf32>
    %cst_54 = arith.constant 0.166666672 : f32
    %52 = vector.broadcast %cst_54 : f32 to vector<256x8xf32>
    %53 = arith.mulf %51, %52 : vector<256x8xf32>
    %54 = vector.extract_strided_slice %53 {offsets = [0, 0], sizes = [256, 4], strides = [1, 1]} : vector<256x8xf32> to vector<256x4xf32>
    %c0_55 = arith.constant 0 : index
    %c0_56 = arith.constant 0 : index
    %c0_57 = arith.constant 0 : index
    %55 = vector.load %arg4[%c0_55, %c0_56, %c0_57] : memref<1x256x8xf32, #tpu.memory_space<vmem>>, vector<1x256x4xf32>
    %56 = vector.shape_cast %55 : vector<1x256x4xf32> to vector<256x4xf32>
    %57 = vector.shape_cast %54 : vector<256x4xf32> to vector<1x256x4xf32>
    tpu.vector_store %arg4[%c0_55, %c0_56, %c0_57], %57 {strides = array<i32>} : memref<1x256x8xf32, #tpu.memory_space<vmem>>, vector<1x256x4xf32>,
    %58 = vector.extract_strided_slice %53 {offsets = [0, 4], sizes = [256, 4], strides = [1, 1]} : vector<256x8xf32> to vector<256x4xf32>
    %cst_58 = arith.constant 0.000000e+00 : f32
    %59 = vector.broadcast %cst_58 : f32 to vector<18x18x8xf32>
    %c0_59 = arith.constant 0 : index
    %c0_60 = arith.constant 0 : index
    %c0_61 = arith.constant 0 : index
    %60 = vector.load %arg5[%c0_59, %c0_60, %c0_61] : memref<18x18x8xf32, #tpu.memory_space<vmem>>, vector<18x18x8xf32>
    tpu.vector_store %arg5[%c0_59, %c0_60, %c0_61], %59 {strides = array<i32>} : memref<18x18x8xf32, #tpu.memory_space<vmem>>, vector<18x18x8xf32>,
    %61 = vector.shape_cast %58 : vector<256x4xf32> to vector<16x16x4xf32>
    %c1_62 = arith.constant 1 : index
    %c1_63 = arith.constant 1 : index
    %c0_64 = arith.constant 0 : index
    %62 = vector.load %arg5[%c1_62, %c1_63, %c0_64] : memref<18x18x8xf32, #tpu.memory_space<vmem>>, vector<16x16x4xf32>
    tpu.vector_store %arg5[%c1_62, %c1_63, %c0_64], %61 {strides = array<i32>} : memref<18x18x8xf32, #tpu.memory_space<vmem>>, vector<16x16x4xf32>,
    %c0_65 = arith.constant 0 : index
    %c0_66 = arith.constant 0 : index
    %c0_67 = arith.constant 0 : index
    %63 = vector.load %arg5[%c0_65, %c0_66, %c0_67] : memref<18x18x8xf32, #tpu.memory_space<vmem>>, vector<16x16x8xf32>
    %64 = vector.shape_cast %63 : vector<16x16x8xf32> to vector<256x8xf32>
    %c0_68 = arith.constant 0 : index
    %c0_69 = arith.constant 0 : index
    %65 = vector.load %arg6[%c0_68, %c0_69] : memref<256x72xf32, #tpu.memory_space<vmem>>, vector<256x8xf32>
    tpu.vector_store %arg6[%c0_68, %c0_69], %64 {strides = array<i32>} : memref<256x72xf32, #tpu.memory_space<vmem>>, vector<256x8xf32>,
    %c0_70 = arith.constant 0 : index
    %c1_71 = arith.constant 1 : index
    %c0_72 = arith.constant 0 : index
    %66 = vector.load %arg5[%c0_70, %c1_71, %c0_72] : memref<18x18x8xf32, #tpu.memory_space<vmem>>, vector<16x16x8xf32>
    %67 = vector.shape_cast %66 : vector<16x16x8xf32> to vector<256x8xf32>
    %c0_73 = arith.constant 0 : index
    %c8_74 = arith.constant 8 : index
    %68 = vector.load %arg6[%c0_73, %c8_74] : memref<256x72xf32, #tpu.memory_space<vmem>>, vector<256x8xf32>
    tpu.vector_store %arg6[%c0_73, %c8_74], %67 {strides = array<i32>} : memref<256x72xf32, #tpu.memory_space<vmem>>, vector<256x8xf32>,
    %c0_75 = arith.constant 0 : index
    %c2_76 = arith.constant 2 : index
    %c0_77 = arith.constant 0 : index
    %69 = vector.load %arg5[%c0_75, %c2_76, %c0_77] : memref<18x18x8xf32, #tpu.memory_space<vmem>>, vector<16x16x8xf32>
    %70 = vector.shape_cast %69 : vector<16x16x8xf32> to vector<256x8xf32>
    %c0_78 = arith.constant 0 : index
    %c16_79 = arith.constant 16 : index
    %71 = vector.load %arg6[%c0_78, %c16_79] : memref<256x72xf32, #tpu.memory_space<vmem>>, vector<256x8xf32>
    tpu.vector_store %arg6[%c0_78, %c16_79], %70 {strides = array<i32>} : memref<256x72xf32, #tpu.memory_space<vmem>>, vector<256x8xf32>,
    %c1_80 = arith.constant 1 : index
    %c0_81 = arith.constant 0 : index
    %c0_82 = arith.constant 0 : index
    %72 = vector.load %arg5[%c1_80, %c0_81, %c0_82] : memref<18x18x8xf32, #tpu.memory_space<vmem>>, vector<16x16x8xf32>
    %73 = vector.shape_cast %72 : vector<16x16x8xf32> to vector<256x8xf32>
    %c0_83 = arith.constant 0 : index
    %c24_84 = arith.constant 24 : index
    %74 = vector.load %arg6[%c0_83, %c24_84] : memref<256x72xf32, #tpu.memory_space<vmem>>, vector<256x8xf32>
    tpu.vector_store %arg6[%c0_83, %c24_84], %73 {strides = array<i32>} : memref<256x72xf32, #tpu.memory_space<vmem>>, vector<256x8xf32>,
    %c1_85 = arith.constant 1 : index
    %c1_86 = arith.constant 1 : index
    %c0_87 = arith.constant 0 : index
    %75 = vector.load %arg5[%c1_85, %c1_86, %c0_87] : memref<18x18x8xf32, #tpu.memory_space<vmem>>, vector<16x16x8xf32>
    %76 = vector.shape_cast %75 : vector<16x16x8xf32> to vector<256x8xf32>
    %c0_88 = arith.constant 0 : index
    %c32_89 = arith.constant 32 : index
    %77 = vector.load %arg6[%c0_88, %c32_89] : memref<256x72xf32, #tpu.memory_space<vmem>>, vector<256x8xf32>
    tpu.vector_store %arg6[%c0_88, %c32_89], %76 {strides = array<i32>} : memref<256x72xf32, #tpu.memory_space<vmem>>, vector<256x8xf32>,
    %c1_90 = arith.constant 1 : index
    %c2_91 = arith.constant 2 : index
    %c0_92 = arith.constant 0 : index
    %78 = vector.load %arg5[%c1_90, %c2_91, %c0_92] : memref<18x18x8xf32, #tpu.memory_space<vmem>>, vector<16x16x8xf32>
    %79 = vector.shape_cast %78 : vector<16x16x8xf32> to vector<256x8xf32>
    %c0_93 = arith.constant 0 : index
    %c40_94 = arith.constant 40 : index
    %80 = vector.load %arg6[%c0_93, %c40_94] : memref<256x72xf32, #tpu.memory_space<vmem>>, vector<256x8xf32>
    tpu.vector_store %arg6[%c0_93, %c40_94], %79 {strides = array<i32>} : memref<256x72xf32, #tpu.memory_space<vmem>>, vector<256x8xf32>,
    %c2_95 = arith.constant 2 : index
    %c0_96 = arith.constant 0 : index
    %c0_97 = arith.constant 0 : index
    %81 = vector.load %arg5[%c2_95, %c0_96, %c0_97] : memref<18x18x8xf32, #tpu.memory_space<vmem>>, vector<16x16x8xf32>
    %82 = vector.shape_cast %81 : vector<16x16x8xf32> to vector<256x8xf32>
    %c0_98 = arith.constant 0 : index
    %c48_99 = arith.constant 48 : index
    %83 = vector.load %arg6[%c0_98, %c48_99] : memref<256x72xf32, #tpu.memory_space<vmem>>, vector<256x8xf32>
    tpu.vector_store %arg6[%c0_98, %c48_99], %82 {strides = array<i32>} : memref<256x72xf32, #tpu.memory_space<vmem>>, vector<256x8xf32>,
    %c2_100 = arith.constant 2 : index
    %c1_101 = arith.constant 1 : index
    %c0_102 = arith.constant 0 : index
    %84 = vector.load %arg5[%c2_100, %c1_101, %c0_102] : memref<18x18x8xf32, #tpu.memory_space<vmem>>, vector<16x16x8xf32>
    %85 = vector.shape_cast %84 : vector<16x16x8xf32> to vector<256x8xf32>
    %c0_103 = arith.constant 0 : index
    %c56_104 = arith.constant 56 : index
    %86 = vector.load %arg6[%c0_103, %c56_104] : memref<256x72xf32, #tpu.memory_space<vmem>>, vector<256x8xf32>
    tpu.vector_store %arg6[%c0_103, %c56_104], %85 {strides = array<i32>} : memref<256x72xf32, #tpu.memory_space<vmem>>, vector<256x8xf32>,
    %c2_105 = arith.constant 2 : index
    %c2_106 = arith.constant 2 : index
    %c0_107 = arith.constant 0 : index
    %87 = vector.load %arg5[%c2_105, %c2_106, %c0_107] : memref<18x18x8xf32, #tpu.memory_space<vmem>>, vector<16x16x8xf32>
    %88 = vector.shape_cast %87 : vector<16x16x8xf32> to vector<256x8xf32>
    %c0_108 = arith.constant 0 : index
    %c64_109 = arith.constant 64 : index
    %89 = vector.load %arg6[%c0_108, %c64_109] : memref<256x72xf32, #tpu.memory_space<vmem>>, vector<256x8xf32>
    tpu.vector_store %arg6[%c0_108, %c64_109], %88 {strides = array<i32>} : memref<256x72xf32, #tpu.memory_space<vmem>>, vector<256x8xf32>,
    %c0_110 = arith.constant 0 : index
    %c0_111 = arith.constant 0 : index
    %90 = vector.load %arg6[%c0_110, %c0_111] : memref<256x72xf32, #tpu.memory_space<vmem>>, vector<256x72xf32>
    %91 = arith.truncf %90 : vector<256x72xf32> to vector<256x72xbf16>
    %c1_112 = arith.constant 1 : index
    %c0_113 = arith.constant 0 : index
    %c0_114 = arith.constant 0 : index
    %92 = vector.load %arg2[%c1_112, %c0_113, %c0_114] : memref<3x72x8xbf16, #tpu.memory_space<vmem>>, vector<1x72x8xbf16>
    %93 = vector.shape_cast %92 : vector<1x72x8xbf16> to vector<72x8xbf16>
    %cst_115 = arith.constant dense<0.000000e+00> : vector<256x8xf32>
    %94 = tpu.matmul %91, %93, %cst_115 {dimension_numbers = #tpu.dot_dimension_numbers<[1], [0], [0], [1], [0, 0, 1, 1], [], []>} : vector<256x72xbf16>, vector<72x8xbf16>, vector<256x8xf32> -> vector<256x8xf32>
    %c1_116 = arith.constant 1 : index
    %c0_117 = arith.constant 0 : index
    %c0_118 = arith.constant 0 : index
    %95 = vector.load %arg3[%c1_116, %c0_117, %c0_118] : memref<3x1x8xf32, #tpu.memory_space<vmem>>, vector<1x1x8xf32>
    %96 = vector.shape_cast %95 : vector<1x1x8xf32> to vector<1x8xf32>
    %97 = vector.broadcast %96 : vector<1x8xf32> to vector<256x8xf32>
    %98 = arith.addf %94, %97 : vector<256x8xf32>
    %cst_119 = arith.constant 3.000000e+00 : f32
    %99 = vector.broadcast %cst_119 : f32 to vector<256x8xf32>
    %100 = arith.addf %98, %99 : vector<256x8xf32>
    %cst_120 = arith.constant 0.000000e+00 : f32
    %cst_121 = arith.constant 6.000000e+00 : f32
    %101 = vector.broadcast %cst_120 : f32 to vector<256x8xf32>
    %102 = arith.maximumf %101, %100 : vector<256x8xf32>
    %103 = vector.broadcast %cst_121 : f32 to vector<256x8xf32>
    %104 = arith.minimumf %103, %102 : vector<256x8xf32>
    %105 = arith.mulf %98, %104 : vector<256x8xf32>
    %cst_122 = arith.constant 0.166666672 : f32
    %106 = vector.broadcast %cst_122 : f32 to vector<256x8xf32>
    %107 = arith.mulf %105, %106 : vector<256x8xf32>
    %108 = vector.extract_strided_slice %107 {offsets = [0, 0], sizes = [256, 2], strides = [1, 1]} : vector<256x8xf32> to vector<256x2xf32>
    %c0_123 = arith.constant 0 : index
    %c0_124 = arith.constant 0 : index
    %c4 = arith.constant 4 : index
    %109 = vector.load %arg4[%c0_123, %c0_124, %c4] : memref<1x256x8xf32, #tpu.memory_space<vmem>>, vector<1x256x2xf32>
    %110 = vector.shape_cast %109 : vector<1x256x2xf32> to vector<256x2xf32>
    %111 = vector.shape_cast %108 : vector<256x2xf32> to vector<1x256x2xf32>
    tpu.vector_store %arg4[%c0_123, %c0_124, %c4], %111 {strides = array<i32>} : memref<1x256x8xf32, #tpu.memory_space<vmem>>, vector<1x256x2xf32>,
    %112 = vector.extract_strided_slice %107 {offsets = [0, 2], sizes = [256, 2], strides = [1, 1]} : vector<256x8xf32> to vector<256x2xf32>
    %cst_125 = arith.constant 0.000000e+00 : f32
    %113 = vector.broadcast %cst_125 : f32 to vector<18x18x8xf32>
    %c0_126 = arith.constant 0 : index
    %c0_127 = arith.constant 0 : index
    %c0_128 = arith.constant 0 : index
    %114 = vector.load %arg5[%c0_126, %c0_127, %c0_128] : memref<18x18x8xf32, #tpu.memory_space<vmem>>, vector<18x18x8xf32>
    tpu.vector_store %arg5[%c0_126, %c0_127, %c0_128], %113 {strides = array<i32>} : memref<18x18x8xf32, #tpu.memory_space<vmem>>, vector<18x18x8xf32>,
    %115 = vector.shape_cast %112 : vector<256x2xf32> to vector<16x16x2xf32>
    %c1_129 = arith.constant 1 : index
    %c1_130 = arith.constant 1 : index
    %c0_131 = arith.constant 0 : index
    %116 = vector.load %arg5[%c1_129, %c1_130, %c0_131] : memref<18x18x8xf32, #tpu.memory_space<vmem>>, vector<16x16x2xf32>
    tpu.vector_store %arg5[%c1_129, %c1_130, %c0_131], %115 {strides = array<i32>} : memref<18x18x8xf32, #tpu.memory_space<vmem>>, vector<16x16x2xf32>,
    %c0_132 = arith.constant 0 : index
    %c0_133 = arith.constant 0 : index
    %c0_134 = arith.constant 0 : index
    %117 = vector.load %arg5[%c0_132, %c0_133, %c0_134] : memref<18x18x8xf32, #tpu.memory_space<vmem>>, vector<16x16x8xf32>
    %118 = vector.shape_cast %117 : vector<16x16x8xf32> to vector<256x8xf32>
    %c0_135 = arith.constant 0 : index
    %c0_136 = arith.constant 0 : index
    %119 = vector.load %arg6[%c0_135, %c0_136] : memref<256x72xf32, #tpu.memory_space<vmem>>, vector<256x8xf32>
    tpu.vector_store %arg6[%c0_135, %c0_136], %118 {strides = array<i32>} : memref<256x72xf32, #tpu.memory_space<vmem>>, vector<256x8xf32>,
    %c0_137 = arith.constant 0 : index
    %c1_138 = arith.constant 1 : index
    %c0_139 = arith.constant 0 : index
    %120 = vector.load %arg5[%c0_137, %c1_138, %c0_139] : memref<18x18x8xf32, #tpu.memory_space<vmem>>, vector<16x16x8xf32>
    %121 = vector.shape_cast %120 : vector<16x16x8xf32> to vector<256x8xf32>
    %c0_140 = arith.constant 0 : index
    %c8_141 = arith.constant 8 : index
    %122 = vector.load %arg6[%c0_140, %c8_141] : memref<256x72xf32, #tpu.memory_space<vmem>>, vector<256x8xf32>
    tpu.vector_store %arg6[%c0_140, %c8_141], %121 {strides = array<i32>} : memref<256x72xf32, #tpu.memory_space<vmem>>, vector<256x8xf32>,
    %c0_142 = arith.constant 0 : index
    %c2_143 = arith.constant 2 : index
    %c0_144 = arith.constant 0 : index
    %123 = vector.load %arg5[%c0_142, %c2_143, %c0_144] : memref<18x18x8xf32, #tpu.memory_space<vmem>>, vector<16x16x8xf32>
    %124 = vector.shape_cast %123 : vector<16x16x8xf32> to vector<256x8xf32>
    %c0_145 = arith.constant 0 : index
    %c16_146 = arith.constant 16 : index
    %125 = vector.load %arg6[%c0_145, %c16_146] : memref<256x72xf32, #tpu.memory_space<vmem>>, vector<256x8xf32>
    tpu.vector_store %arg6[%c0_145, %c16_146], %124 {strides = array<i32>} : memref<256x72xf32, #tpu.memory_space<vmem>>, vector<256x8xf32>,
    %c1_147 = arith.constant 1 : index
    %c0_148 = arith.constant 0 : index
    %c0_149 = arith.constant 0 : index
    %126 = vector.load %arg5[%c1_147, %c0_148, %c0_149] : memref<18x18x8xf32, #tpu.memory_space<vmem>>, vector<16x16x8xf32>
    %127 = vector.shape_cast %126 : vector<16x16x8xf32> to vector<256x8xf32>
    %c0_150 = arith.constant 0 : index
    %c24_151 = arith.constant 24 : index
    %128 = vector.load %arg6[%c0_150, %c24_151] : memref<256x72xf32, #tpu.memory_space<vmem>>, vector<256x8xf32>
    tpu.vector_store %arg6[%c0_150, %c24_151], %127 {strides = array<i32>} : memref<256x72xf32, #tpu.memory_space<vmem>>, vector<256x8xf32>,
    %c1_152 = arith.constant 1 : index
    %c1_153 = arith.constant 1 : index
    %c0_154 = arith.constant 0 : index
    %129 = vector.load %arg5[%c1_152, %c1_153, %c0_154] : memref<18x18x8xf32, #tpu.memory_space<vmem>>, vector<16x16x8xf32>
    %130 = vector.shape_cast %129 : vector<16x16x8xf32> to vector<256x8xf32>
    %c0_155 = arith.constant 0 : index
    %c32_156 = arith.constant 32 : index
    %131 = vector.load %arg6[%c0_155, %c32_156] : memref<256x72xf32, #tpu.memory_space<vmem>>, vector<256x8xf32>
    tpu.vector_store %arg6[%c0_155, %c32_156], %130 {strides = array<i32>} : memref<256x72xf32, #tpu.memory_space<vmem>>, vector<256x8xf32>,
    %c1_157 = arith.constant 1 : index
    %c2_158 = arith.constant 2 : index
    %c0_159 = arith.constant 0 : index
    %132 = vector.load %arg5[%c1_157, %c2_158, %c0_159] : memref<18x18x8xf32, #tpu.memory_space<vmem>>, vector<16x16x8xf32>
    %133 = vector.shape_cast %132 : vector<16x16x8xf32> to vector<256x8xf32>
    %c0_160 = arith.constant 0 : index
    %c40_161 = arith.constant 40 : index
    %134 = vector.load %arg6[%c0_160, %c40_161] : memref<256x72xf32, #tpu.memory_space<vmem>>, vector<256x8xf32>
    tpu.vector_store %arg6[%c0_160, %c40_161], %133 {strides = array<i32>} : memref<256x72xf32, #tpu.memory_space<vmem>>, vector<256x8xf32>,
    %c2_162 = arith.constant 2 : index
    %c0_163 = arith.constant 0 : index
    %c0_164 = arith.constant 0 : index
    %135 = vector.load %arg5[%c2_162, %c0_163, %c0_164] : memref<18x18x8xf32, #tpu.memory_space<vmem>>, vector<16x16x8xf32>
    %136 = vector.shape_cast %135 : vector<16x16x8xf32> to vector<256x8xf32>
    %c0_165 = arith.constant 0 : index
    %c48_166 = arith.constant 48 : index
    %137 = vector.load %arg6[%c0_165, %c48_166] : memref<256x72xf32, #tpu.memory_space<vmem>>, vector<256x8xf32>
    tpu.vector_store %arg6[%c0_165, %c48_166], %136 {strides = array<i32>} : memref<256x72xf32, #tpu.memory_space<vmem>>, vector<256x8xf32>,
    %c2_167 = arith.constant 2 : index
    %c1_168 = arith.constant 1 : index
    %c0_169 = arith.constant 0 : index
    %138 = vector.load %arg5[%c2_167, %c1_168, %c0_169] : memref<18x18x8xf32, #tpu.memory_space<vmem>>, vector<16x16x8xf32>
    %139 = vector.shape_cast %138 : vector<16x16x8xf32> to vector<256x8xf32>
    %c0_170 = arith.constant 0 : index
    %c56_171 = arith.constant 56 : index
    %140 = vector.load %arg6[%c0_170, %c56_171] : memref<256x72xf32, #tpu.memory_space<vmem>>, vector<256x8xf32>
    tpu.vector_store %arg6[%c0_170, %c56_171], %139 {strides = array<i32>} : memref<256x72xf32, #tpu.memory_space<vmem>>, vector<256x8xf32>,
    %c2_172 = arith.constant 2 : index
    %c2_173 = arith.constant 2 : index
    %c0_174 = arith.constant 0 : index
    %141 = vector.load %arg5[%c2_172, %c2_173, %c0_174] : memref<18x18x8xf32, #tpu.memory_space<vmem>>, vector<16x16x8xf32>
    %142 = vector.shape_cast %141 : vector<16x16x8xf32> to vector<256x8xf32>
    %c0_175 = arith.constant 0 : index
    %c64_176 = arith.constant 64 : index
    %143 = vector.load %arg6[%c0_175, %c64_176] : memref<256x72xf32, #tpu.memory_space<vmem>>, vector<256x8xf32>
    tpu.vector_store %arg6[%c0_175, %c64_176], %142 {strides = array<i32>} : memref<256x72xf32, #tpu.memory_space<vmem>>, vector<256x8xf32>,
    %c0_177 = arith.constant 0 : index
    %c0_178 = arith.constant 0 : index
    %144 = vector.load %arg6[%c0_177, %c0_178] : memref<256x72xf32, #tpu.memory_space<vmem>>, vector<256x72xf32>
    %145 = arith.truncf %144 : vector<256x72xf32> to vector<256x72xbf16>
    %c2_179 = arith.constant 2 : index
    %c0_180 = arith.constant 0 : index
    %c0_181 = arith.constant 0 : index
    %146 = vector.load %arg2[%c2_179, %c0_180, %c0_181] : memref<3x72x8xbf16, #tpu.memory_space<vmem>>, vector<1x72x8xbf16>
    %147 = vector.shape_cast %146 : vector<1x72x8xbf16> to vector<72x8xbf16>
    %cst_182 = arith.constant dense<0.000000e+00> : vector<256x8xf32>
    %148 = tpu.matmul %145, %147, %cst_182 {dimension_numbers = #tpu.dot_dimension_numbers<[1], [0], [0], [1], [0, 0, 1, 1], [], []>} : vector<256x72xbf16>, vector<72x8xbf16>, vector<256x8xf32> -> vector<256x8xf32>
    %c2_183 = arith.constant 2 : index
    %c0_184 = arith.constant 0 : index
    %c0_185 = arith.constant 0 : index
    %149 = vector.load %arg3[%c2_183, %c0_184, %c0_185] : memref<3x1x8xf32, #tpu.memory_space<vmem>>, vector<1x1x8xf32>
    %150 = vector.shape_cast %149 : vector<1x1x8xf32> to vector<1x8xf32>
    %151 = vector.broadcast %150 : vector<1x8xf32> to vector<256x8xf32>
    %152 = arith.addf %148, %151 : vector<256x8xf32>
    %cst_186 = arith.constant 3.000000e+00 : f32
    %153 = vector.broadcast %cst_186 : f32 to vector<256x8xf32>
    %154 = arith.addf %152, %153 : vector<256x8xf32>
    %cst_187 = arith.constant 0.000000e+00 : f32
    %cst_188 = arith.constant 6.000000e+00 : f32
    %155 = vector.broadcast %cst_187 : f32 to vector<256x8xf32>
    %156 = arith.maximumf %155, %154 : vector<256x8xf32>
    %157 = vector.broadcast %cst_188 : f32 to vector<256x8xf32>
    %158 = arith.minimumf %157, %156 : vector<256x8xf32>
    %159 = arith.mulf %152, %158 : vector<256x8xf32>
    %cst_189 = arith.constant 0.166666672 : f32
    %160 = vector.broadcast %cst_189 : f32 to vector<256x8xf32>
    %161 = arith.mulf %159, %160 : vector<256x8xf32>
    %162 = vector.extract_strided_slice %161 {offsets = [0, 0], sizes = [256, 2], strides = [1, 1]} : vector<256x8xf32> to vector<256x2xf32>
    %c0_190 = arith.constant 0 : index
    %c0_191 = arith.constant 0 : index
    %c6 = arith.constant 6 : index
    %163 = vector.load %arg4[%c0_190, %c0_191, %c6] : memref<1x256x8xf32, #tpu.memory_space<vmem>>, vector<1x256x2xf32>
    %164 = vector.shape_cast %163 : vector<1x256x2xf32> to vector<256x2xf32>
    %165 = vector.shape_cast %162 : vector<256x2xf32> to vector<1x256x2xf32>
    tpu.vector_store %arg4[%c0_190, %c0_191, %c6], %165 {strides = array<i32>} : memref<1x256x8xf32, #tpu.memory_space<vmem>>, vector<1x256x2xf32>,
    return
  }
  func.func @transform_0(%arg0: i32) -> (i32, i32, i32, i32) {
    %c0_i32 = arith.constant 0 : i32
    %c0_i32_0 = arith.constant 0 : i32
    %c0_i32_1 = arith.constant 0 : i32
    %c0_i32_2 = arith.constant 0 : i32
    return %arg0, %c0_i32, %c0_i32_0, %c0_i32_1 : i32, i32, i32, i32
  }
  func.func @transform_1(%arg0: i32) -> (i32, i32, i32) {
    %c0_i32 = arith.constant 0 : i32
    %c0_i32_0 = arith.constant 0 : i32
    %c0_i32_1 = arith.constant 0 : i32
    %c0_i32_2 = arith.constant 0 : i32
    return %c0_i32, %c0_i32_0, %c0_i32_1 : i32, i32, i32
  }
  func.func @transform_2(%arg0: i32) -> (i32, i32, i32) {
    %c0_i32 = arith.constant 0 : i32
    %c0_i32_0 = arith.constant 0 : i32
    %c0_i32_1 = arith.constant 0 : i32
    %c0_i32_2 = arith.constant 0 : i32
    return %c0_i32, %c0_i32_0, %c0_i32_1 : i32, i32, i32
  }
  func.func @transform_3(%arg0: i32) -> (i32, i32, i32) {
    %c0_i32 = arith.constant 0 : i32
    %c0_i32_0 = arith.constant 0 : i32
    %c0_i32_1 = arith.constant 0 : i32
    return %arg0, %c0_i32, %c0_i32_0 : i32, i32, i32
  }
}

</mosaic_0001>

<bundles_post_ra>
// kernel: detect_module_forward.1
= control target key start
LH: loop header
LB: loop body
LE: loop exit
PB: predicated region body
PF: predicated region fallthrough
CT: control target
= control target key end

     0   :  { %s7758_s12 = smov 0   ;;  %s11752_s0 = inlined_call_operand.vmem [shape: f32[2,18,18,8], index: 0, kind: input, shape index: {}]   ;;  %s11753_s1 = inlined_call_operand.vmem [shape: bf16[3,72,8], index: 1, kind: input, shape index: {}]   ;;  %s11754_s2 = inlined_call_operand.vmem [shape: f32[3,1,8], index: 2, kind: input, shape index: {}]   ;;  %s11755_s3 = inlined_call_operand.vmem [shape: f32[2,256,8], index: 3, kind: output, shape index: {}]  }
   0x1 LB: > { %s7188_s13 = sadd.s32 4294967295, %s7723_s12   ;;  %p7192_p0 = scmp.ge.s32.totalorder %s7723_s12, 1  ;;  %s7723_s12 = sphi %s7758_s12, %s13_s12  }
   0x2   : > { %p137_p1 = scmp.lt.s32.totalorder %s7723_s12, 3 }
   0x4   : > { %p138_p2 = pnand %p7192_p0, %p137_p1 }
   0x6   : > { %141 = sbr.rel (%p138_p2) target bundleno = 2893 (0xb4d), region = 32 }
   0xb   : > { %p161_p3 = scmp.lt.s32.totalorder %s7188_s13, 1  ;;  %s7725_s18 = smov 8   ;;  %vm204_vm0 = vcmask 64512   ;;  %vm397_vm1 = vcmask 130112   ;;  %vm590_vm2 = vcmask 195712   ;;  %vm784_vm3 = vcmask 261312  }
   0xc   : > { %s7726_s19 = smov 16   ;;  %s7727_s20 = smov 24   ;;  %vm977_vm4 = vcmask 326912   ;;  %vm1170_vm5 = vcmask 392512   ;;  %vm1923_vm6 = vcmask 1043456   ;;  %vm1364_vm7 = vcmask 458112  }
   0xd   : > { %s12092_s13 = smov (!%p161_p3, %s7188_s13), 1  ;;  %s7728_s21 = smov 32   ;;  %vm1557_vm8 = vcmask 523712   ;;  %vm1750_vm9 = vcmask 589312   ;;  %vm1874_vm10 = vcmask 588800   ;;  %vm2283_vm11 = vcmask 58368  }
   0xe   : > { %s7680_s14 = smul.u32 432, %s12092_s13  ;;  %s7729_s22 = smov 40   ;;  %vm2248_vm12 = vcmask 31744   ;;  %vm4691_vm13 = vcmask 48160   ;;  %vm4874_vm14 = vcmask 15360   ;;  %vm7100_vm15 = vcmask 64560  }
   0xf   : > { %s7730_s23 = smov 48   ;;  %s7731_s24 = smov 56  }
  0x10   : > { %s7772_s17 = scalar_lea.vmem %s11752_s0, %s7680_s14  ;;  %s7732_s8 = smov 64  }
  0x11   : > { %v7775_v0 = vld [vmem:[%s7772_s17 + $0x19] sm:$0xff]  ;;  %v237_v1 = vld [vmem:[%s7772_s17 + $0x1] sm:$0xff]  ;;  %v238_v3 = vld [vmem:[%s7772_s17 + $0x9] sm:$0xff]  ;;  %s7476_s11 = sshll.u32 %s12092_s13, 8  ;;  %s7734_s13 = smov 124  }
  0x12   : > { %305 = vrot.lane.b32.xlu1 %v7775_v0, %s7725_s18  ;;  %301 = vrot.lane.b32.xlu0 %v237_v1, %s7725_s18  ;;  %v7782_v2 = vld [vmem:[%s7772_s17 + $0x21] sm:$0xff]  ;;  %v7789_v4 = vld [vmem:[%s7772_s17 + $0x39] sm:$0xff]  ;;  %s9050_s16 = scalar_lea.vmem %s11755_s3, %s7476_s11  ;;  %s7735_s10 = smov 4  }
  0x13   : > { %v7792_v5 = vld [vmem:[%s7772_s17 + $0x31] sm:$0xff]  ;;  %v7802_v7 = vld [vmem:[%s7772_s17 + $0x49] sm:$0xff]  ;;  %v7812_v9 = vld [vmem:[%s7772_s17 + $0x61] sm:$0xff]  ;;  %s7736_s11 = smov 126  }
  0x14   : > { %v7799_v6 = vld [vmem:[%s7772_s17 + $0x51] sm:$0xff]  ;;  %v7809_v8 = vld [vmem:[%s7772_s17 + $0x69] sm:$0xff]  ;;  %v7819_v10 = vld [vmem:[%s7772_s17 + $0x81] sm:$0xff] }
  0x15   : > { %v7822_v11 = vld [vmem:[%s7772_s17 + $0x79] sm:$0xff]  ;;  %v7836_v15 = vld [vmem:[%s7772_s17 + $0x91] sm:$0xff]  ;;  %v173_v17 = vld [vmem:[%s7772_s17 + $0x8] sm:$0xff] }
  0x16   : > { %307 = vrot.lane.b32.xlu1 %v7782_v2, %s7725_s18  ;;  %303 = vrot.lane.b32.xlu0 %v238_v3, %s7725_s18  ;;  %v7829_v12 = vld [vmem:[%s7772_s17 + $0x18] sm:$0xff]  ;;  %v172_v13 = vld [vmem:[%s7772_s17] sm:$0xff]  ;;  %206 = vst.msk [vmem:[#allocation3 + $0x8] sm:$0xff] %vm204_vm0, %v173_v17 }
  0x17   : > { %v7833_v14 = vld [vmem:[%s7772_s17 + $0x99] sm:$0xff]  ;;  %207 = vst.msk [vmem:[#allocation3 + $0x10] sm:$0xff] %vm204_vm0, %v7829_v12  ;;  %205 = vst.msk [vmem:[#allocation3] sm:$0xff] %vm204_vm0, %v172_v13  ;;  %v7848_v18 = vld [vmem:[%s7772_s17 + $0xb1] sm:$0xff] }
  0x18   : > { %v7842_v16 = vld [vmem:[%s7772_s17 + $0x20] sm:$0xff]  ;;  %v7852_v19 = vld [vmem:[%s7772_s17 + $0x38] sm:$0xff]  ;;  %v7855_v20 = vld [vmem:[%s7772_s17 + $0x30] sm:$0xff] }
  0x19   : > { %208 = vst.msk [vmem:[#allocation3 + $0x18] sm:$0xff] %vm204_vm0, %v7842_v16  ;;  %v7862_v21 = vld [vmem:[%s7772_s17 + $0xa9] sm:$0xff]  ;;  %210 = vst.msk [vmem:[#allocation3 + $0x28] sm:$0xff] %vm204_vm0, %v7852_v19  ;;  %v7880_v25 = vld [vmem:[%s7772_s17 + $0x60] sm:$0xff] }
  0x1a   : > { %311 = vrot.lane.b32.xlu1 %v7789_v4, %s7725_s18  ;;  %309 = vrot.lane.b32.xlu0 %v7792_v5, %s7725_s18  ;;  %209 = vst.msk [vmem:[#allocation3 + $0x20] sm:$0xff] %vm204_vm0, %v7855_v20  ;;  %v7869_v22 = vld [vmem:[%s7772_s17 + $0x50] sm:$0xff]  ;;  %v7874_v23 = vld [vmem:[%s7772_s17 + $0x48] sm:$0xff]  ;;  %213 = vst.msk [vmem:[#allocation3 + $0x40] sm:$0xff] %vm204_vm0, %v7880_v25 }
  0x1b   : > { %212 = vst.msk [vmem:[#allocation3 + $0x38] sm:$0xff] %vm204_vm0, %v7869_v22  ;;  %v7877_v24 = vld [vmem:[%s7772_s17 + $0x68] sm:$0xff]  ;;  %211 = vst.msk [vmem:[#allocation3 + $0x30] sm:$0xff] %vm204_vm0, %v7874_v23  ;;  %v7889_v26 = vld [vmem:[%s7772_s17 + $0x80] sm:$0xff] }
  0x1c   : > { %214 = vst.msk [vmem:[#allocation3 + $0x48] sm:$0xff] %vm204_vm0, %v7877_v24  ;;  %v7892_v27 = vld [vmem:[%s7772_s17 + $0x78] sm:$0xff]  ;;  %v7898_v29 = vld [vmem:[%s7772_s17 + $0xc9] sm:$0xff]  ;;  %v7901_v30 = vld [vmem:[%s7772_s17 + $0xc1] sm:$0xff] }
  0x1d   : > { %v7895_v28 = vld [vmem:[%s7772_s17 + $0x98] sm:$0xff]  ;;  %216 = vst.msk [vmem:[#allocation3 + $0x58] sm:$0xff] %vm204_vm0, %v7889_v26  ;;  %215 = vst.msk [vmem:[#allocation3 + $0x50] sm:$0xff] %vm204_vm0, %v7892_v27  ;;  %v7910_v31 = vld [vmem:[%s7772_s17 + $0x90] sm:$0xff] }
  0x1e   : > { %315 = vrot.lane.b32.xlu1 %v7799_v6, %s7725_s18  ;;  %313 = vrot.lane.b32.xlu0 %v7802_v7, %s7725_s18  ;;  %218 = vst.msk [vmem:[#allocation3 + $0x68] sm:$0xff] %vm204_vm0, %v7895_v28  ;;  %v7913_v32 = vld [vmem:[%s7772_s17 + $0xb0] sm:$0xff]  ;;  %v7916_v33 = vld [vmem:[%s7772_s17 + $0xa8] sm:$0xff]  ;;  %217 = vst.msk [vmem:[#allocation3 + $0x60] sm:$0xff] %vm204_vm0, %v7910_v31 }
  0x1f   : > { %220 = vst.msk [vmem:[#allocation3 + $0x78] sm:$0xff] %vm204_vm0, %v7913_v32  ;;  %219 = vst.msk [vmem:[#allocation3 + $0x70] sm:$0xff] %vm204_vm0, %v7916_v33  ;;  %v7929_v34 = vld [vmem:[%s7772_s17 + $0xc8] sm:$0xff]  ;;  %v7932_v35 = vld [vmem:[%s7772_s17 + $0xc0] sm:$0xff] }
  0x20   : > { %222 = vst.msk [vmem:[#allocation3 + $0x88] sm:$0xff] %vm204_vm0, %v7929_v34  ;;  %221 = vst.msk [vmem:[#allocation3 + $0x80] sm:$0xff] %vm204_vm0, %v7932_v35  ;;  %v7939_v36 = vld [vmem:[%s7772_s17 + $0xe0] sm:$0xff]  ;;  %v7942_v37 = vld [vmem:[%s7772_s17 + $0xd8] sm:$0xff] }
  0x21   : > { %v7945_v38 = vld [vmem:[%s7772_s17 + $0xf8] sm:$0xff]  ;;  %224 = vst.msk [vmem:[#allocation3 + $0x98] sm:$0xff] %vm204_vm0, %v7939_v36  ;;  %223 = vst.msk [vmem:[#allocation3 + $0x90] sm:$0xff] %vm204_vm0, %v7942_v37  ;;  %v7954_v39 = vld [vmem:[%s7772_s17 + $0xf0] sm:$0xff] }
  0x22   : > { %319 = vrot.lane.b32.xlu1 %v7809_v8, %s7725_s18  ;;  %317 = vrot.lane.b32.xlu0 %v7812_v9, %s7725_s18  ;;  %226 = vst.msk [vmem:[#allocation3 + $0xa8] sm:$0xff] %vm204_vm0, %v7945_v38  ;;  %v7957_v40 = vld [vmem:[%s7772_s17 + $0x110] sm:$0xff]  ;;  %v7960_v41 = vld [vmem:[%s7772_s17 + $0x108] sm:$0xff]  ;;  %225 = vst.msk [vmem:[#allocation3 + $0xa0] sm:$0xff] %vm204_vm0, %v7954_v39 }
  0x23   : > { %v7963_v42 = vld [vmem:[%s7772_s17 + $0xe1] sm:$0xff]  ;;  %v7966_v43 = vld [vmem:[%s7772_s17 + $0xd9] sm:$0xff]  ;;  %228 = vst.msk [vmem:[#allocation3 + $0xb8] sm:$0xff] %vm204_vm0, %v7957_v40  ;;  %227 = vst.msk [vmem:[#allocation3 + $0xb0] sm:$0xff] %vm204_vm0, %v7960_v41 }
  0x24   : > { %v7979_v44 = vld [vmem:[%s7772_s17 + $0x128] sm:$0xff]  ;;  %v7982_v45 = vld [vmem:[%s7772_s17 + $0x120] sm:$0xff]  ;;  %v7996_v47 = vld [vmem:[%s7772_s17 + $0xf1] sm:$0xff] }
  0x25   : > { %230 = vst.msk [vmem:[#allocation3 + $0xc8] sm:$0xff] %vm204_vm0, %v7979_v44  ;;  %229 = vst.msk [vmem:[#allocation3 + $0xc0] sm:$0xff] %vm204_vm0, %v7982_v45  ;;  %v7993_v46 = vld [vmem:[%s7772_s17 + $0xf9] sm:$0xff]  ;;  %v8013_v50 = vld [vmem:[%s7772_s17 + $0x111] sm:$0xff] }
  0x26   : > { %323 = vrot.lane.b32.xlu1 %v7819_v10, %s7725_s18  ;;  %321 = vrot.lane.b32.xlu0 %v7822_v11, %s7725_s18  ;;  %v7999_v48 = vld [vmem:[%s7772_s17 + $0x140] sm:$0xff]  ;;  %v8002_v49 = vld [vmem:[%s7772_s17 + $0x138] sm:$0xff] }
  0x27   : > { %232 = vst.msk [vmem:[#allocation3 + $0xd8] sm:$0xff] %vm204_vm0, %v7999_v48  ;;  %231 = vst.msk [vmem:[#allocation3 + $0xd0] sm:$0xff] %vm204_vm0, %v8002_v49  ;;  %v8016_v51 = vld [vmem:[%s7772_s17 + $0x109] sm:$0xff]  ;;  %v8019_v52 = vld [vmem:[%s7772_s17 + $0x158] sm:$0xff] }
  0x28   : > { %v8022_v53 = vld [vmem:[%s7772_s17 + $0x150] sm:$0xff]  ;;  %234 = vst.msk [vmem:[#allocation3 + $0xe8] sm:$0xff] %vm204_vm0, %v8019_v52  ;;  %v8036_v55 = vld [vmem:[%s7772_s17 + $0x121] sm:$0xff]  ;;  %v8056_v59 = vld [vmem:[%s7772_s17 + $0x139] sm:$0xff] }
  0x29   : > { %233 = vst.msk [vmem:[#allocation3 + $0xe0] sm:$0xff] %vm204_vm0, %v8022_v53  ;;  %v8033_v54 = vld [vmem:[%s7772_s17 + $0x129] sm:$0xff]  ;;  %v8053_v58 = vld [vmem:[%s7772_s17 + $0x141] sm:$0xff]  ;;  %v8063_v60 = vld [vmem:[%s7772_s17 + $0x159] sm:$0xff] }
  0x2a   : > { %327 = vrot.lane.b32.xlu1 %v7833_v14, %s7725_s18  ;;  %325 = vrot.lane.b32.xlu0 %v7836_v15, %s7725_s18  ;;  %v8039_v56 = vld [vmem:[%s7772_s17 + $0x170] sm:$0xff]  ;;  %v8042_v57 = vld [vmem:[%s7772_s17 + $0x168] sm:$0xff]  ;;  %11834 = vst [vmem:[#allocation4_spill] sm:$0xff] %v8063_v60 }
  0x2b   : > { %236 = vst.msk [vmem:[#allocation3 + $0xf8] sm:$0xff] %vm204_vm0, %v8039_v56  ;;  %235 = vst.msk [vmem:[#allocation3 + $0xf0] sm:$0xff] %vm204_vm0, %v8042_v57  ;;  %v8066_v61 = vld [vmem:[%s7772_s17 + $0x151] sm:$0xff]  ;;  %v8076_v63 = vld [vmem:[%s7772_s17 + $0x169] sm:$0xff] }
  0x2c   : > { %11835 = vst [vmem:[#allocation5_spill] sm:$0xff] %v8066_v61  ;;  %v8073_v62 = vld [vmem:[%s7772_s17 + $0x171] sm:$0xff]  ;;  %11837 = vst [vmem:[#allocation7_spill] sm:$0xff] %v8076_v63  ;;  %v430_v3 = vld [vmem:[%s7772_s17 + $0x2] sm:$0xff] }
  0x2d   : > { %11836 = vst [vmem:[#allocation6_spill] sm:$0xff] %v8073_v62  ;;  %v431_v1 = vld [vmem:[%s7772_s17 + $0xa] sm:$0xff]  ;;  %v8087_v13 = vld [vmem:[%s7772_s17 + $0x22] sm:$0xff]  ;;  %v8090_v17 = vld [vmem:[%s7772_s17 + $0x1a] sm:$0xff] }
  0x2e   : > { %331 = vrot.lane.b32.xlu1 %v7848_v18, %s7725_s18  ;;  %329 = vrot.lane.b32.xlu0 %v7862_v21, %s7725_s18  ;;  %11838 = vst [vmem:[#allocation8_spill] sm:$0xff] %v8087_v13  ;;  %11839 = vst [vmem:[#allocation9_spill] sm:$0xff] %v8090_v17 }
  0x32   : > { %335 = vrot.lane.b32.xlu1 %v7898_v29, %s7725_s18  ;;  %333 = vrot.lane.b32.xlu0 %v7901_v30, %s7725_s18 }
  0x36   : > { %339 = vrot.lane.b32.xlu1 %v7963_v42, %s7725_s18  ;;  %337 = vrot.lane.b32.xlu0 %v7966_v43, %s7725_s18 }
  0x3a   : > { %343 = vrot.lane.b32.xlu1 %v7993_v46, %s7725_s18  ;;  %341 = vrot.lane.b32.xlu0 %v7996_v47, %s7725_s18 }
  0x3e   : > { %347 = vrot.lane.b32.xlu1 %v8013_v50, %s7725_s18  ;;  %345 = vrot.lane.b32.xlu0 %v8016_v51, %s7725_s18 }
  0x42   : > { %351 = vrot.lane.b32.xlu1 %v8033_v54, %s7725_s18  ;;  %349 = vrot.lane.b32.xlu0 %v8036_v55, %s7725_s18 }
  0x46   : > { %355 = vrot.lane.b32.xlu1 %v8053_v58, %s7725_s18  ;;  %353 = vrot.lane.b32.xlu0 %v8056_v59, %s7725_s18 }
  0x4a   : > { %359 = vrot.lane.b32.xlu1 %v8063_v60, %s7725_s18  ;;  %357 = vrot.lane.b32.xlu0 %v8066_v61, %s7725_s18 }
  0x4e   : > { %363 = vrot.lane.b32.xlu1 %v8073_v62, %s7725_s18  ;;  %361 = vrot.lane.b32.xlu0 %v8076_v63, %s7725_s18  ;;  %v8097_v63 = vld [vmem:[%s7772_s17 + $0x3a] sm:$0xff]  ;;  %v8100_v62 = vld [vmem:[%s7772_s17 + $0x32] sm:$0xff] }
  0x4f   : > { %11840 = vst [vmem:[#allocation10_spill] sm:$0xff] %v8097_v63  ;;  %11841 = vst [vmem:[#allocation11_spill] sm:$0xff] %v8100_v62 }
  0x52   : > { %496 = vrot.lane.b32.xlu1 %v431_v1, %s7726_s19  ;;  %494 = vrot.lane.b32.xlu0 %v430_v3, %s7726_s19  ;;  %v8107_v1 = vld [vmem:[%s7772_s17 + $0x52] sm:$0xff]  ;;  %v8110_v3 = vld [vmem:[%s7772_s17 + $0x4a] sm:$0xff] }
  0x53   : > { %11842 = vst [vmem:[#allocation12_spill] sm:$0xff] %v8107_v1  ;;  %11843 = vst [vmem:[#allocation13_spill] sm:$0xff] %v8110_v3 }
  0x56   : > { %500 = vrot.lane.b32.xlu1 %v8087_v13, %s7726_s19  ;;  %498 = vrot.lane.b32.xlu0 %v8090_v17, %s7726_s19  ;;  %v8117_v17 = vld [vmem:[%s7772_s17 + $0x6a] sm:$0xff]  ;;  %v8120_v13 = vld [vmem:[%s7772_s17 + $0x62] sm:$0xff] }
  0x57   : > { %11844 = vst [vmem:[#allocation14_spill] sm:$0xff] %v8117_v17  ;;  %11845 = vst [vmem:[#allocation15_spill] sm:$0xff] %v8120_v13 }
  0x5a   : > { %504 = vrot.lane.b32.xlu1 %v8097_v63, %s7726_s19  ;;  %502 = vrot.lane.b32.xlu0 %v8100_v62, %s7726_s19  ;;  %v8127_v62 = vld [vmem:[%s7772_s17 + $0x82] sm:$0xff]  ;;  %v8130_v63 = vld [vmem:[%s7772_s17 + $0x7a] sm:$0xff] }
  0x5b   : > { %11846 = vst [vmem:[#allocation16_spill] sm:$0xff] %v8127_v62  ;;  %11847 = vst [vmem:[#allocation17_spill] sm:$0xff] %v8130_v63 }
  0x5e   : > { %508 = vrot.lane.b32.xlu1 %v8107_v1, %s7726_s19  ;;  %506 = vrot.lane.b32.xlu0 %v8110_v3, %s7726_s19  ;;  %v8137_v3 = vld [vmem:[%s7772_s17 + $0x9a] sm:$0xff]  ;;  %v8140_v1 = vld [vmem:[%s7772_s17 + $0x92] sm:$0xff] }
  0x5f   : > { %11848 = vst [vmem:[#allocation18_spill] sm:$0xff] %v8137_v3  ;;  %11849 = vst [vmem:[#allocation19_spill] sm:$0xff] %v8140_v1 }
  0x62   : > { %512 = vrot.lane.b32.xlu1 %v8117_v17, %s7726_s19  ;;  %510 = vrot.lane.b32.xlu0 %v8120_v13, %s7726_s19  ;;  %v8147_v13 = vld [vmem:[%s7772_s17 + $0xb2] sm:$0xff]  ;;  %v8150_v17 = vld [vmem:[%s7772_s17 + $0xaa] sm:$0xff] }
  0x63   : > { %11850 = vst [vmem:[#allocation20_spill] sm:$0xff] %v8147_v13  ;;  %11851 = vst [vmem:[#allocation21_spill] sm:$0xff] %v8150_v17 }
  0x66   : > { %516 = vrot.lane.b32.xlu1 %v8127_v62, %s7726_s19  ;;  %514 = vrot.lane.b32.xlu0 %v8130_v63, %s7726_s19  ;;  %v8157_v63 = vld [vmem:[%s7772_s17 + $0xca] sm:$0xff]  ;;  %v8160_v62 = vld [vmem:[%s7772_s17 + $0xc2] sm:$0xff] }
  0x67   : > { %11852 = vst [vmem:[#allocation22_spill] sm:$0xff] %v8157_v63  ;;  %11853 = vst [vmem:[#allocation23_spill] sm:$0xff] %v8160_v62 }
  0x6a   : > { %520 = vrot.lane.b32.xlu1 %v8137_v3, %s7726_s19  ;;  %518 = vrot.lane.b32.xlu0 %v8140_v1, %s7726_s19  ;;  %v8167_v1 = vld [vmem:[%s7772_s17 + $0xe2] sm:$0xff]  ;;  %v8170_v3 = vld [vmem:[%s7772_s17 + $0xda] sm:$0xff] }
  0x6b   : > { %11854 = vst [vmem:[#allocation24_spill] sm:$0xff] %v8167_v1  ;;  %11855 = vst [vmem:[#allocation25_spill] sm:$0xff] %v8170_v3 }
  0x6e   : > { %524 = vrot.lane.b32.xlu1 %v8147_v13, %s7726_s19  ;;  %522 = vrot.lane.b32.xlu0 %v8150_v17, %s7726_s19  ;;  %v8177_v17 = vld [vmem:[%s7772_s17 + $0xfa] sm:$0xff]  ;;  %v8180_v13 = vld [vmem:[%s7772_s17 + $0xf2] sm:$0xff] }
  0x6f   : > { %11856 = vst [vmem:[#allocation26_spill] sm:$0xff] %v8177_v17  ;;  %11857 = vst [vmem:[#allocation27_spill] sm:$0xff] %v8180_v13 }
  0x72   : > { %528 = vrot.lane.b32.xlu1 %v8157_v63, %s7726_s19  ;;  %526 = vrot.lane.b32.xlu0 %v8160_v62, %s7726_s19  ;;  %v8187_v62 = vld [vmem:[%s7772_s17 + $0x112] sm:$0xff]  ;;  %v8190_v63 = vld [vmem:[%s7772_s17 + $0x10a] sm:$0xff] }
  0x73   : > { %11858 = vst [vmem:[#allocation28_spill] sm:$0xff] %v8187_v62  ;;  %11859 = vst [vmem:[#allocation29_spill] sm:$0xff] %v8190_v63 }
  0x76   : > { %532 = vrot.lane.b32.xlu1 %v8167_v1, %s7726_s19  ;;  %530 = vrot.lane.b32.xlu0 %v8170_v3, %s7726_s19  ;;  %v8197_v3 = vld [vmem:[%s7772_s17 + $0x12a] sm:$0xff]  ;;  %v8200_v1 = vld [vmem:[%s7772_s17 + $0x122] sm:$0xff] }
  0x77   : > { %11860 = vst [vmem:[#allocation30_spill] sm:$0xff] %v8197_v3  ;;  %11861 = vst [vmem:[#allocation31_spill] sm:$0xff] %v8200_v1 }
  0x7a   : > { %536 = vrot.lane.b32.xlu1 %v8177_v17, %s7726_s19  ;;  %534 = vrot.lane.b32.xlu0 %v8180_v13, %s7726_s19  ;;  %v8207_v13 = vld [vmem:[%s7772_s17 + $0x142] sm:$0xff]  ;;  %v8210_v17 = vld [vmem:[%s7772_s17 + $0x13a] sm:$0xff] }
  0x7b   : > { %11862 = vst [vmem:[#allocation32_spill] sm:$0xff] %v8207_v13  ;;  %11863 = vst [vmem:[#allocation33_spill] sm:$0xff] %v8210_v17 }
  0x7e   : > { %540 = vrot.lane.b32.xlu1 %v8187_v62, %s7726_s19  ;;  %538 = vrot.lane.b32.xlu0 %v8190_v63, %s7726_s19 }
  0x82   : > { %544 = vrot.lane.b32.xlu1 %v8197_v3, %s7726_s19  ;;  %542 = vrot.lane.b32.xlu0 %v8200_v1, %s7726_s19  ;;  %v8219_v1 = vld [vmem:[%s7772_s17 + $0x15a] sm:$0xff]  ;;  %v8222_v3 = vld [vmem:[%s7772_s17 + $0x152] sm:$0xff] }
  0x84   : > { %v306_v62 = vpop.permute.xlu1 %305  ;;  %v302_v61 = vpop.permute.xlu0 %301 }
  0x85   : > { %400 = vst.msk [vmem:[#allocation3 + $0x10] sm:$0xff] %vm397_vm1, %v306_v62  ;;  %398 = vst.msk [vmem:[#allocation3] sm:$0xff] %vm397_vm1, %v302_v61  ;;  %v8231_v61 = vld [vmem:[%s7772_s17 + $0x172] sm:$0xff]  ;;  %v8234_v62 = vld [vmem:[%s7772_s17 + $0x16a] sm:$0xff] }
  0x86   : > { %548 = vrot.lane.b32.xlu1 %v8207_v13, %s7726_s19  ;;  %546 = vrot.lane.b32.xlu0 %v8210_v17, %s7726_s19 }
  0x88   : > { %v308_v63 = vpop.permute.xlu1 %307  ;;  %v304_v60 = vpop.permute.xlu0 %303 }
  0x89   : > { %401 = vst.msk [vmem:[#allocation3 + $0x18] sm:$0xff] %vm397_vm1, %v308_v63  ;;  %399 = vst.msk [vmem:[#allocation3 + $0x8] sm:$0xff] %vm397_vm1, %v304_v60 }
  0x8a   : > { %552 = vrot.lane.b32.xlu1 %v8219_v1, %s7726_s19  ;;  %550 = vrot.lane.b32.xlu0 %v8222_v3, %s7726_s19 }
  0x8c   : > { %v312_v17 = vpop.permute.xlu1 %311  ;;  %v310_v13 = vpop.permute.xlu0 %309 }
  0x8d   : > { %403 = vst.msk [vmem:[#allocation3 + $0x28] sm:$0xff] %vm397_vm1, %v312_v17  ;;  %402 = vst.msk [vmem:[#allocation3 + $0x20] sm:$0xff] %vm397_vm1, %v310_v13 }
  0x8e   : > { %556 = vrot.lane.b32.xlu1 %v8231_v61, %s7726_s19  ;;  %554 = vrot.lane.b32.xlu0 %v8234_v62, %s7726_s19 }
  0x90   : > { %v316_v60 = vpop.permute.xlu1 %315  ;;  %v314_v63 = vpop.permute.xlu0 %313 }
  0x91   : > { %405 = vst.msk [vmem:[#allocation3 + $0x38] sm:$0xff] %vm397_vm1, %v316_v60  ;;  %404 = vst.msk [vmem:[#allocation3 + $0x30] sm:$0xff] %vm397_vm1, %v314_v63 }
  0x92   : > { %690 = vrot.lane.b32.xlu1 %v7842_v16, %s7727_s20  ;;  %688 = vrot.lane.b32.xlu0 %v7829_v12, %s7727_s20 }
  0x94   : > { %v320_v13 = vpop.permute.xlu1 %319  ;;  %v318_v17 = vpop.permute.xlu0 %317 }
  0x95   : > { %407 = vst.msk [vmem:[#allocation3 + $0x48] sm:$0xff] %vm397_vm1, %v320_v13  ;;  %406 = vst.msk [vmem:[#allocation3 + $0x40] sm:$0xff] %vm397_vm1, %v318_v17 }
  0x96   : > { %694 = vrot.lane.b32.xlu1 %v7852_v19, %s7727_s20  ;;  %692 = vrot.lane.b32.xlu0 %v7855_v20, %s7727_s20 }
  0x98   : > { %v324_v60 = vpop.permute.xlu1 %323  ;;  %v322_v63 = vpop.permute.xlu0 %321 }
  0x99   : > { %409 = vst.msk [vmem:[#allocation3 + $0x58] sm:$0xff] %vm397_vm1, %v324_v60  ;;  %408 = vst.msk [vmem:[#allocation3 + $0x50] sm:$0xff] %vm397_vm1, %v322_v63 }
  0x9a   : > { %698 = vrot.lane.b32.xlu1 %v7869_v22, %s7727_s20  ;;  %696 = vrot.lane.b32.xlu0 %v7874_v23, %s7727_s20 }
  0x9c   : > { %v328_v12 = vpop.permute.xlu1 %327  ;;  %v326_v16 = vpop.permute.xlu0 %325 }
  0x9d   : > { %411 = vst.msk [vmem:[#allocation3 + $0x68] sm:$0xff] %vm397_vm1, %v328_v12  ;;  %410 = vst.msk [vmem:[#allocation3 + $0x60] sm:$0xff] %vm397_vm1, %v326_v16 }
  0x9e   : > { %702 = vrot.lane.b32.xlu1 %v7877_v24, %s7727_s20  ;;  %700 = vrot.lane.b32.xlu0 %v7880_v25, %s7727_s20 }
  0xa0   : > { %v332_v13 = vpop.permute.xlu1 %331  ;;  %v330_v17 = vpop.permute.xlu0 %329 }
  0xa1   : > { %413 = vst.msk [vmem:[#allocation3 + $0x78] sm:$0xff] %vm397_vm1, %v332_v13  ;;  %412 = vst.msk [vmem:[#allocation3 + $0x70] sm:$0xff] %vm397_vm1, %v330_v17 }
  0xa2   : > { %706 = vrot.lane.b32.xlu1 %v7889_v26, %s7727_s20  ;;  %704 = vrot.lane.b32.xlu0 %v7892_v27, %s7727_s20 }
  0xa4   : > { %v336_v60 = vpop.permute.xlu1 %335  ;;  %v334_v63 = vpop.permute.xlu0 %333 }
  0xa5   : > { %415 = vst.msk [vmem:[#allocation3 + $0x88] sm:$0xff] %vm397_vm1, %v336_v60  ;;  %414 = vst.msk [vmem:[#allocation3 + $0x80] sm:$0xff] %vm397_vm1, %v334_v63 }
  0xa6   : > { %710 = vrot.lane.b32.xlu1 %v7895_v28, %s7727_s20  ;;  %708 = vrot.lane.b32.xlu0 %v7910_v31, %s7727_s20 }
  0xa8   : > { %v340_v12 = vpop.permute.xlu1 %339  ;;  %v338_v16 = vpop.permute.xlu0 %337 }
  0xa9   : > { %417 = vst.msk [vmem:[#allocation3 + $0x98] sm:$0xff] %vm397_vm1, %v340_v12  ;;  %416 = vst.msk [vmem:[#allocation3 + $0x90] sm:$0xff] %vm397_vm1, %v338_v16 }
  0xaa   : > { %714 = vrot.lane.b32.xlu1 %v7913_v32, %s7727_s20  ;;  %712 = vrot.lane.b32.xlu0 %v7916_v33, %s7727_s20 }
  0xac   : > { %v344_v13 = vpop.permute.xlu1 %343  ;;  %v342_v17 = vpop.permute.xlu0 %341 }
  0xad   : > { %419 = vst.msk [vmem:[#allocation3 + $0xa8] sm:$0xff] %vm397_vm1, %v344_v13  ;;  %418 = vst.msk [vmem:[#allocation3 + $0xa0] sm:$0xff] %vm397_vm1, %v342_v17 }
  0xae   : > { %718 = vrot.lane.b32.xlu1 %v7929_v34, %s7727_s20  ;;  %716 = vrot.lane.b32.xlu0 %v7932_v35, %s7727_s20 }
  0xb0   : > { %v348_v60 = vpop.permute.xlu1 %347  ;;  %v346_v63 = vpop.permute.xlu0 %345 }
  0xb1   : > { %421 = vst.msk [vmem:[#allocation3 + $0xb8] sm:$0xff] %vm397_vm1, %v348_v60  ;;  %420 = vst.msk [vmem:[#allocation3 + $0xb0] sm:$0xff] %vm397_vm1, %v346_v63 }
  0xb2   : > { %722 = vrot.lane.b32.xlu1 %v7939_v36, %s7727_s20  ;;  %720 = vrot.lane.b32.xlu0 %v7942_v37, %s7727_s20 }
  0xb4   : > { %v352_v12 = vpop.permute.xlu1 %351  ;;  %v350_v16 = vpop.permute.xlu0 %349 }
  0xb5   : > { %423 = vst.msk [vmem:[#allocation3 + $0xc8] sm:$0xff] %vm397_vm1, %v352_v12  ;;  %422 = vst.msk [vmem:[#allocation3 + $0xc0] sm:$0xff] %vm397_vm1, %v350_v16 }
  0xb6   : > { %726 = vrot.lane.b32.xlu1 %v7945_v38, %s7727_s20  ;;  %724 = vrot.lane.b32.xlu0 %v7954_v39, %s7727_s20 }
  0xb8   : > { %v356_v13 = vpop.permute.xlu1 %355  ;;  %v354_v17 = vpop.permute.xlu0 %353 }
  0xb9   : > { %425 = vst.msk [vmem:[#allocation3 + $0xd8] sm:$0xff] %vm397_vm1, %v356_v13  ;;  %424 = vst.msk [vmem:[#allocation3 + $0xd0] sm:$0xff] %vm397_vm1, %v354_v17 }
  0xba   : > { %730 = vrot.lane.b32.xlu1 %v7957_v40, %s7727_s20  ;;  %728 = vrot.lane.b32.xlu0 %v7960_v41, %s7727_s20 }
  0xbc   : > { %v360_v60 = vpop.permute.xlu1 %359  ;;  %v358_v63 = vpop.permute.xlu0 %357 }
  0xbd   : > { %427 = vst.msk [vmem:[#allocation3 + $0xe8] sm:$0xff] %vm397_vm1, %v360_v60  ;;  %426 = vst.msk [vmem:[#allocation3 + $0xe0] sm:$0xff] %vm397_vm1, %v358_v63 }
  0xbe   : > { %734 = vrot.lane.b32.xlu1 %v7979_v44, %s7727_s20  ;;  %732 = vrot.lane.b32.xlu0 %v7982_v45, %s7727_s20 }
  0xc0   : > { %v364_v12 = vpop.permute.xlu1 %363  ;;  %v362_v16 = vpop.permute.xlu0 %361 }
  0xc1   : > { %429 = vst.msk [vmem:[#allocation3 + $0xf8] sm:$0xff] %vm397_vm1, %v364_v12  ;;  %428 = vst.msk [vmem:[#allocation3 + $0xf0] sm:$0xff] %vm397_vm1, %v362_v16  ;;  %v8333_v12 = vld [vmem:[%s7772_s17 + $0x188] sm:$0xff]  ;;  %v8336_v16 = vld [vmem:[%s7772_s17 + $0x180] sm:$0xff] }
  0xc2   : > { %738 = vrot.lane.b32.xlu1 %v7999_v48, %s7727_s20  ;;  %736 = vrot.lane.b32.xlu0 %v8002_v49, %s7727_s20 }
  0xc4   : > { %v497_v13 = vpop.permute.xlu1 %496  ;;  %v495_v17 = vpop.permute.xlu0 %494 }
  0xc5   : > { %592 = vst.msk [vmem:[#allocation3 + $0x8] sm:$0xff] %vm590_vm2, %v497_v13  ;;  %591 = vst.msk [vmem:[#allocation3] sm:$0xff] %vm590_vm2, %v495_v17 }
  0xc6   : > { %742 = vrot.lane.b32.xlu1 %v8019_v52, %s7727_s20  ;;  %740 = vrot.lane.b32.xlu0 %v8022_v53, %s7727_s20 }
  0xc8   : > { %v501_v60 = vpop.permute.xlu1 %500  ;;  %v499_v63 = vpop.permute.xlu0 %498 }
  0xc9   : > { %594 = vst.msk [vmem:[#allocation3 + $0x18] sm:$0xff] %vm590_vm2, %v501_v60  ;;  %593 = vst.msk [vmem:[#allocation3 + $0x10] sm:$0xff] %vm590_vm2, %v499_v63 }
  0xca   : > { %746 = vrot.lane.b32.xlu1 %v8039_v56, %s7727_s20  ;;  %744 = vrot.lane.b32.xlu0 %v8042_v57, %s7727_s20 }
  0xcc   : > { %v505_v13 = vpop.permute.xlu1 %504  ;;  %v503_v17 = vpop.permute.xlu0 %502 }
  0xcd   : > { %596 = vst.msk [vmem:[#allocation3 + $0x28] sm:$0xff] %vm590_vm2, %v505_v13  ;;  %595 = vst.msk [vmem:[#allocation3 + $0x20] sm:$0xff] %vm590_vm2, %v503_v17 }
  0xce   : > { %750 = vrot.lane.b32.xlu1 %v8333_v12, %s7727_s20  ;;  %748 = vrot.lane.b32.xlu0 %v8336_v16, %s7727_s20 }
  0xd0   : > { %v509_v60 = vpop.permute.xlu1 %508  ;;  %v507_v63 = vpop.permute.xlu0 %506 }
  0xd1   : > { %598 = vst.msk [vmem:[#allocation3 + $0x38] sm:$0xff] %vm590_vm2, %v509_v60  ;;  %597 = vst.msk [vmem:[#allocation3 + $0x30] sm:$0xff] %vm590_vm2, %v507_v63 }
  0xd2   : > { %883 = vrot.lane.b32.xlu1 %v7782_v2, %s7728_s21  ;;  %881 = vrot.lane.b32.xlu0 %v7775_v0, %s7728_s21 }
  0xd4   : > { %v513_v13 = vpop.permute.xlu1 %512  ;;  %v511_v17 = vpop.permute.xlu0 %510 }
  0xd5   : > { %600 = vst.msk [vmem:[#allocation3 + $0x48] sm:$0xff] %vm590_vm2, %v513_v13  ;;  %599 = vst.msk [vmem:[#allocation3 + $0x40] sm:$0xff] %vm590_vm2, %v511_v17 }
  0xd6   : > { %887 = vrot.lane.b32.xlu1 %v7789_v4, %s7728_s21  ;;  %885 = vrot.lane.b32.xlu0 %v7792_v5, %s7728_s21 }
  0xd8   : > { %v517_v60 = vpop.permute.xlu1 %516  ;;  %v515_v63 = vpop.permute.xlu0 %514 }
  0xd9   : > { %602 = vst.msk [vmem:[#allocation3 + $0x58] sm:$0xff] %vm590_vm2, %v517_v60  ;;  %601 = vst.msk [vmem:[#allocation3 + $0x50] sm:$0xff] %vm590_vm2, %v515_v63  ;;  %v8435_v60 = vld [vmem:[%s7772_s17 + $0x189] sm:$0xff]  ;;  %v8438_v63 = vld [vmem:[%s7772_s17 + $0x181] sm:$0xff] }
  0xda   : > { %891 = vrot.lane.b32.xlu1 %v7799_v6, %s7728_s21  ;;  %889 = vrot.lane.b32.xlu0 %v7802_v7, %s7728_s21 }
  0xdc   : > { %v521_v0 = vpop.permute.xlu1 %520  ;;  %v519_v2 = vpop.permute.xlu0 %518 }
  0xdd   : > { %604 = vst.msk [vmem:[#allocation3 + $0x68] sm:$0xff] %vm590_vm2, %v521_v0  ;;  %603 = vst.msk [vmem:[#allocation3 + $0x60] sm:$0xff] %vm590_vm2, %v519_v2 }
  0xde   : > { %895 = vrot.lane.b32.xlu1 %v7809_v8, %s7728_s21  ;;  %893 = vrot.lane.b32.xlu0 %v7812_v9, %s7728_s21 }
  0xe0   : > { %v525_v4 = vpop.permute.xlu1 %524  ;;  %v523_v5 = vpop.permute.xlu0 %522 }
  0xe1   : > { %606 = vst.msk [vmem:[#allocation3 + $0x78] sm:$0xff] %vm590_vm2, %v525_v4  ;;  %605 = vst.msk [vmem:[#allocation3 + $0x70] sm:$0xff] %vm590_vm2, %v523_v5 }
  0xe2   : > { %899 = vrot.lane.b32.xlu1 %v7819_v10, %s7728_s21  ;;  %897 = vrot.lane.b32.xlu0 %v7822_v11, %s7728_s21 }
  0xe4   : > { %v529_v6 = vpop.permute.xlu1 %528  ;;  %v527_v7 = vpop.permute.xlu0 %526 }
  0xe5   : > { %608 = vst.msk [vmem:[#allocation3 + $0x88] sm:$0xff] %vm590_vm2, %v529_v6  ;;  %607 = vst.msk [vmem:[#allocation3 + $0x80] sm:$0xff] %vm590_vm2, %v527_v7  ;;  %v11868_v6 = vld [vmem:[#allocation8_spill] sm:$0xff]  ;;  %v11869_v7 = vld [vmem:[#allocation9_spill] sm:$0xff] }
  0xe6   : > { %903 = vrot.lane.b32.xlu1 %v7833_v14, %s7728_s21  ;;  %901 = vrot.lane.b32.xlu0 %v7836_v15, %s7728_s21 }
  0xe8   : > { %v533_v8 = vpop.permute.xlu1 %532  ;;  %v531_v9 = vpop.permute.xlu0 %530 }
  0xe9   : > { %610 = vst.msk [vmem:[#allocation3 + $0x98] sm:$0xff] %vm590_vm2, %v533_v8  ;;  %609 = vst.msk [vmem:[#allocation3 + $0x90] sm:$0xff] %vm590_vm2, %v531_v9 }
  0xea   : > { %907 = vrot.lane.b32.xlu1 %v7848_v18, %s7728_s21  ;;  %905 = vrot.lane.b32.xlu0 %v7862_v21, %s7728_s21 }
  0xec   : > { %v537_v10 = vpop.permute.xlu1 %536  ;;  %v535_v11 = vpop.permute.xlu0 %534 }
  0xed   : > { %612 = vst.msk [vmem:[#allocation3 + $0xa8] sm:$0xff] %vm590_vm2, %v537_v10  ;;  %611 = vst.msk [vmem:[#allocation3 + $0xa0] sm:$0xff] %vm590_vm2, %v535_v11  ;;  %v11870_v10 = vld [vmem:[#allocation10_spill] sm:$0xff]  ;;  %v11871_v11 = vld [vmem:[#allocation11_spill] sm:$0xff] }
  0xee   : > { %911 = vrot.lane.b32.xlu1 %v7898_v29, %s7728_s21  ;;  %909 = vrot.lane.b32.xlu0 %v7901_v30, %s7728_s21 }
  0xf0   : > { %v541_v14 = vpop.permute.xlu1 %540  ;;  %v539_v15 = vpop.permute.xlu0 %538 }
  0xf1   : > { %614 = vst.msk [vmem:[#allocation3 + $0xb8] sm:$0xff] %vm590_vm2, %v541_v14  ;;  %613 = vst.msk [vmem:[#allocation3 + $0xb0] sm:$0xff] %vm590_vm2, %v539_v15 }
  0xf2   : > { %915 = vrot.lane.b32.xlu1 %v7963_v42, %s7728_s21  ;;  %913 = vrot.lane.b32.xlu0 %v7966_v43, %s7728_s21 }
  0xf4   : > { %v545_v18 = vpop.permute.xlu1 %544  ;;  %v543_v21 = vpop.permute.xlu0 %542 }
  0xf5   : > { %616 = vst.msk [vmem:[#allocation3 + $0xc8] sm:$0xff] %vm590_vm2, %v545_v18  ;;  %615 = vst.msk [vmem:[#allocation3 + $0xc0] sm:$0xff] %vm590_vm2, %v543_v21  ;;  %v11872_v18 = vld [vmem:[#allocation12_spill] sm:$0xff]  ;;  %v11873_v21 = vld [vmem:[#allocation13_spill] sm:$0xff] }
  0xf6   : > { %919 = vrot.lane.b32.xlu1 %v7993_v46, %s7728_s21  ;;  %917 = vrot.lane.b32.xlu0 %v7996_v47, %s7728_s21 }
  0xf8   : > { %v549_v29 = vpop.permute.xlu1 %548  ;;  %v547_v30 = vpop.permute.xlu0 %546 }
  0xf9   : > { %618 = vst.msk [vmem:[#allocation3 + $0xd8] sm:$0xff] %vm590_vm2, %v549_v29  ;;  %617 = vst.msk [vmem:[#allocation3 + $0xd0] sm:$0xff] %vm590_vm2, %v547_v30 }
  0xfa   : > { %923 = vrot.lane.b32.xlu1 %v8013_v50, %s7728_s21  ;;  %921 = vrot.lane.b32.xlu0 %v8016_v51, %s7728_s21 }
  0xfc   : > { %v553_v42 = vpop.permute.xlu1 %552  ;;  %v551_v43 = vpop.permute.xlu0 %550 }
  0xfd   : > { %620 = vst.msk [vmem:[#allocation3 + $0xe8] sm:$0xff] %vm590_vm2, %v553_v42  ;;  %619 = vst.msk [vmem:[#allocation3 + $0xe0] sm:$0xff] %vm590_vm2, %v551_v43  ;;  %v11874_v42 = vld [vmem:[#allocation14_spill] sm:$0xff]  ;;  %v11875_v43 = vld [vmem:[#allocation15_spill] sm:$0xff] }
  0xfe   : > { %927 = vrot.lane.b32.xlu1 %v8033_v54, %s7728_s21  ;;  %925 = vrot.lane.b32.xlu0 %v8036_v55, %s7728_s21  ;;  %v11864_v54 = vld [vmem:[#allocation4_spill] sm:$0xff]  ;;  %v11865_v55 = vld [vmem:[#allocation5_spill] sm:$0xff] }
 0x100   : > { %v557_v46 = vpop.permute.xlu1 %556  ;;  %v555_v47 = vpop.permute.xlu0 %554 }
 0x101   : > { %622 = vst.msk [vmem:[#allocation3 + $0xf8] sm:$0xff] %vm590_vm2, %v557_v46  ;;  %621 = vst.msk [vmem:[#allocation3 + $0xf0] sm:$0xff] %vm590_vm2, %v555_v47 }
 0x102   : > { %931 = vrot.lane.b32.xlu1 %v8053_v58, %s7728_s21  ;;  %929 = vrot.lane.b32.xlu0 %v8056_v59, %s7728_s21  ;;  %v11866_v58 = vld [vmem:[#allocation6_spill] sm:$0xff]  ;;  %v11867_v59 = vld [vmem:[#allocation7_spill] sm:$0xff] }
 0x104   : > { %v691_v50 = vpop.permute.xlu1 %690  ;;  %v689_v51 = vpop.permute.xlu0 %688 }
 0x105   : > { %786 = vst.msk [vmem:[#allocation3 + $0x8] sm:$0xff] %vm784_vm3, %v691_v50  ;;  %785 = vst.msk [vmem:[#allocation3] sm:$0xff] %vm784_vm3, %v689_v51  ;;  %v11876_v50 = vld [vmem:[#allocation16_spill] sm:$0xff]  ;;  %v11877_v51 = vld [vmem:[#allocation17_spill] sm:$0xff] }
 0x106   : > { %935 = vrot.lane.b32.xlu1 %v11864_v54, %s7728_s21  ;;  %933 = vrot.lane.b32.xlu0 %v11865_v55, %s7728_s21 }
 0x108   : > { %v695_v13 = vpop.permute.xlu1 %694  ;;  %v693_v17 = vpop.permute.xlu0 %692 }
 0x109   : > { %788 = vst.msk [vmem:[#allocation3 + $0x18] sm:$0xff] %vm784_vm3, %v695_v13  ;;  %787 = vst.msk [vmem:[#allocation3 + $0x10] sm:$0xff] %vm784_vm3, %v693_v17  ;;  %v11878_v13 = vld [vmem:[#allocation18_spill] sm:$0xff]  ;;  %v11879_v17 = vld [vmem:[#allocation19_spill] sm:$0xff] }
 0x10a   : > { %939 = vrot.lane.b32.xlu1 %v11866_v58, %s7728_s21  ;;  %937 = vrot.lane.b32.xlu0 %v11867_v59, %s7728_s21 }
 0x10c   : > { %v699_v0 = vpop.permute.xlu1 %698  ;;  %v697_v2 = vpop.permute.xlu0 %696 }
 0x10d   : > { %790 = vst.msk [vmem:[#allocation3 + $0x28] sm:$0xff] %vm784_vm3, %v699_v0  ;;  %789 = vst.msk [vmem:[#allocation3 + $0x20] sm:$0xff] %vm784_vm3, %v697_v2  ;;  %v11880_v0 = vld [vmem:[#allocation20_spill] sm:$0xff]  ;;  %v11881_v2 = vld [vmem:[#allocation21_spill] sm:$0xff] }
 0x10e   : > { %943 = vrot.lane.b32.xlu1 %v8435_v60, %s7728_s21  ;;  %941 = vrot.lane.b32.xlu0 %v8438_v63, %s7728_s21 }
 0x110   : > { %v703_v4 = vpop.permute.xlu1 %702  ;;  %v701_v5 = vpop.permute.xlu0 %700 }
 0x111   : > { %792 = vst.msk [vmem:[#allocation3 + $0x38] sm:$0xff] %vm784_vm3, %v703_v4  ;;  %791 = vst.msk [vmem:[#allocation3 + $0x30] sm:$0xff] %vm784_vm3, %v701_v5 }
 0x112   : > { %1076 = vrot.lane.b32.xlu1 %v11868_v6, %s7729_s22  ;;  %1074 = vrot.lane.b32.xlu0 %v11869_v7, %s7729_s22  ;;  %v11882_v6 = vld [vmem:[#allocation22_spill] sm:$0xff]  ;;  %v11883_v7 = vld [vmem:[#allocation23_spill] sm:$0xff] }
 0x114   : > { %v707_v8 = vpop.permute.xlu1 %706  ;;  %v705_v9 = vpop.permute.xlu0 %704 }
 0x115   : > { %794 = vst.msk [vmem:[#allocation3 + $0x48] sm:$0xff] %vm784_vm3, %v707_v8  ;;  %793 = vst.msk [vmem:[#allocation3 + $0x40] sm:$0xff] %vm784_vm3, %v705_v9 }
 0x116   : > { %1080 = vrot.lane.b32.xlu1 %v11870_v10, %s7729_s22  ;;  %1078 = vrot.lane.b32.xlu0 %v11871_v11, %s7729_s22  ;;  %v11884_v10 = vld [vmem:[#allocation24_spill] sm:$0xff]  ;;  %v11885_v11 = vld [vmem:[#allocation25_spill] sm:$0xff] }
 0x118   : > { %v711_v14 = vpop.permute.xlu1 %710  ;;  %v709_v15 = vpop.permute.xlu0 %708 }
 0x119   : > { %796 = vst.msk [vmem:[#allocation3 + $0x58] sm:$0xff] %vm784_vm3, %v711_v14  ;;  %795 = vst.msk [vmem:[#allocation3 + $0x50] sm:$0xff] %vm784_vm3, %v709_v15 }
 0x11a   : > { %1084 = vrot.lane.b32.xlu1 %v11872_v18, %s7729_s22  ;;  %1082 = vrot.lane.b32.xlu0 %v11873_v21, %s7729_s22  ;;  %v11886_v18 = vld [vmem:[#allocation26_spill] sm:$0xff]  ;;  %v11887_v21 = vld [vmem:[#allocation27_spill] sm:$0xff] }
 0x11c   : > { %v715_v29 = vpop.permute.xlu1 %714  ;;  %v713_v30 = vpop.permute.xlu0 %712 }
 0x11d   : > { %798 = vst.msk [vmem:[#allocation3 + $0x68] sm:$0xff] %vm784_vm3, %v715_v29  ;;  %797 = vst.msk [vmem:[#allocation3 + $0x60] sm:$0xff] %vm784_vm3, %v713_v30 }
 0x11e   : > { %1088 = vrot.lane.b32.xlu1 %v11874_v42, %s7729_s22  ;;  %1086 = vrot.lane.b32.xlu0 %v11875_v43, %s7729_s22  ;;  %v11888_v42 = vld [vmem:[#allocation28_spill] sm:$0xff]  ;;  %v11889_v43 = vld [vmem:[#allocation29_spill] sm:$0xff] }
 0x120   : > { %v719_v46 = vpop.permute.xlu1 %718  ;;  %v717_v47 = vpop.permute.xlu0 %716 }
 0x121   : > { %800 = vst.msk [vmem:[#allocation3 + $0x78] sm:$0xff] %vm784_vm3, %v719_v46  ;;  %799 = vst.msk [vmem:[#allocation3 + $0x70] sm:$0xff] %vm784_vm3, %v717_v47 }
 0x122   : > { %1092 = vrot.lane.b32.xlu1 %v11876_v50, %s7729_s22  ;;  %1090 = vrot.lane.b32.xlu0 %v11877_v51, %s7729_s22  ;;  %v11890_v50 = vld [vmem:[#allocation30_spill] sm:$0xff]  ;;  %v11891_v51 = vld [vmem:[#allocation31_spill] sm:$0xff] }
 0x124   : > { %v723_v54 = vpop.permute.xlu1 %722  ;;  %v721_v55 = vpop.permute.xlu0 %720 }
 0x125   : > { %802 = vst.msk [vmem:[#allocation3 + $0x88] sm:$0xff] %vm784_vm3, %v723_v54  ;;  %801 = vst.msk [vmem:[#allocation3 + $0x80] sm:$0xff] %vm784_vm3, %v721_v55 }
 0x126   : > { %1096 = vrot.lane.b32.xlu1 %v11878_v13, %s7729_s22  ;;  %1094 = vrot.lane.b32.xlu0 %v11879_v17, %s7729_s22  ;;  %v11892_v13 = vld [vmem:[#allocation32_spill] sm:$0xff]  ;;  %v11893_v17 = vld [vmem:[#allocation33_spill] sm:$0xff] }
 0x128   : > { %v727_v58 = vpop.permute.xlu1 %726  ;;  %v725_v59 = vpop.permute.xlu0 %724 }
 0x129   : > { %804 = vst.msk [vmem:[#allocation3 + $0x98] sm:$0xff] %vm784_vm3, %v727_v58  ;;  %803 = vst.msk [vmem:[#allocation3 + $0x90] sm:$0xff] %vm784_vm3, %v725_v59 }
 0x12a   : > { %1100 = vrot.lane.b32.xlu1 %v11880_v0, %s7729_s22  ;;  %1098 = vrot.lane.b32.xlu0 %v11881_v2, %s7729_s22 }
 0x12c   : > { %v731_v4 = vpop.permute.xlu1 %730  ;;  %v729_v5 = vpop.permute.xlu0 %728 }
 0x12d   : > { %806 = vst.msk [vmem:[#allocation3 + $0xa8] sm:$0xff] %vm784_vm3, %v731_v4  ;;  %805 = vst.msk [vmem:[#allocation3 + $0xa0] sm:$0xff] %vm784_vm3, %v729_v5  ;;  %v8537_v4 = vld [vmem:[%s7772_s17 + $0x18a] sm:$0xff]  ;;  %v8540_v5 = vld [vmem:[%s7772_s17 + $0x182] sm:$0xff] }
 0x12e   : > { %1104 = vrot.lane.b32.xlu1 %v11882_v6, %s7729_s22  ;;  %1102 = vrot.lane.b32.xlu0 %v11883_v7, %s7729_s22 }
 0x130   : > { %v735_v8 = vpop.permute.xlu1 %734  ;;  %v733_v9 = vpop.permute.xlu0 %732 }
 0x131   : > { %808 = vst.msk [vmem:[#allocation3 + $0xb8] sm:$0xff] %vm784_vm3, %v735_v8  ;;  %807 = vst.msk [vmem:[#allocation3 + $0xb0] sm:$0xff] %vm784_vm3, %v733_v9 }
 0x132   : > { %1108 = vrot.lane.b32.xlu1 %v11884_v10, %s7729_s22  ;;  %1106 = vrot.lane.b32.xlu0 %v11885_v11, %s7729_s22  ;;  %v7324_v11 = vld [vmem:[%s7772_s17 + $0x31] sm:$0xff] }
 0x134   : > { %v739_v14 = vpop.permute.xlu1 %738  ;;  %v737_v15 = vpop.permute.xlu0 %736 }
 0x135   : > { %810 = vst.msk [vmem:[#allocation3 + $0xc8] sm:$0xff] %vm784_vm3, %v739_v14  ;;  %809 = vst.msk [vmem:[#allocation3 + $0xc0] sm:$0xff] %vm784_vm3, %v737_v15  ;;  %v7327_v14 = vld [vmem:[%s7772_s17 + $0x51] sm:$0xff]  ;;  %v7326_v15 = vld [vmem:[%s7772_s17 + $0x49] sm:$0xff] }
 0x136   : > { %1112 = vrot.lane.b32.xlu1 %v11886_v18, %s7729_s22  ;;  %1110 = vrot.lane.b32.xlu0 %v11887_v21, %s7729_s22 }
 0x138   : > { %v743_v29 = vpop.permute.xlu1 %742  ;;  %v741_v30 = vpop.permute.xlu0 %740 }
 0x139   : > { %812 = vst.msk [vmem:[#allocation3 + $0xd8] sm:$0xff] %vm784_vm3, %v743_v29  ;;  %811 = vst.msk [vmem:[#allocation3 + $0xd0] sm:$0xff] %vm784_vm3, %v741_v30  ;;  %v7329_v29 = vld [vmem:[%s7772_s17 + $0x69] sm:$0xff]  ;;  %v7328_v30 = vld [vmem:[%s7772_s17 + $0x61] sm:$0xff] }
 0x13a   : > { %1116 = vrot.lane.b32.xlu1 %v11888_v42, %s7729_s22  ;;  %1114 = vrot.lane.b32.xlu0 %v11889_v43, %s7729_s22 }
 0x13c   : > { %v747_v46 = vpop.permute.xlu1 %746  ;;  %v745_v47 = vpop.permute.xlu0 %744 }
 0x13d   : > { %814 = vst.msk [vmem:[#allocation3 + $0xe8] sm:$0xff] %vm784_vm3, %v747_v46  ;;  %813 = vst.msk [vmem:[#allocation3 + $0xe0] sm:$0xff] %vm784_vm3, %v745_v47  ;;  %v7331_v46 = vld [vmem:[%s7772_s17 + $0x81] sm:$0xff]  ;;  %v7330_v47 = vld [vmem:[%s7772_s17 + $0x79] sm:$0xff] }
 0x13e   : > { %1120 = vrot.lane.b32.xlu1 %v11890_v50, %s7729_s22  ;;  %1118 = vrot.lane.b32.xlu0 %v11891_v51, %s7729_s22 }
 0x140   : > { %v751_v54 = vpop.permute.xlu1 %750  ;;  %v749_v55 = vpop.permute.xlu0 %748 }
 0x141   : > { %816 = vst.msk [vmem:[#allocation3 + $0xf8] sm:$0xff] %vm784_vm3, %v751_v54  ;;  %815 = vst.msk [vmem:[#allocation3 + $0xf0] sm:$0xff] %vm784_vm3, %v749_v55  ;;  %v7333_v54 = vld [vmem:[%s7772_s17 + $0x99] sm:$0xff]  ;;  %v7332_v55 = vld [vmem:[%s7772_s17 + $0x91] sm:$0xff] }
 0x142   : > { %1124 = vrot.lane.b32.xlu1 %v11892_v13, %s7729_s22  ;;  %1122 = vrot.lane.b32.xlu0 %v11893_v17, %s7729_s22 }
 0x144   : > { %v884_v58 = vpop.permute.xlu1 %883  ;;  %v882_v59 = vpop.permute.xlu0 %881 }
 0x145   : > { %979 = vst.msk [vmem:[#allocation3 + $0x8] sm:$0xff] %vm977_vm4, %v884_v58  ;;  %978 = vst.msk [vmem:[#allocation3] sm:$0xff] %vm977_vm4, %v882_v59  ;;  %v7335_v58 = vld [vmem:[%s7772_s17 + $0xb1] sm:$0xff]  ;;  %v7334_v59 = vld [vmem:[%s7772_s17 + $0xa9] sm:$0xff] }
 0x146   : > { %1128 = vrot.lane.b32.xlu1 %v8219_v1, %s7729_s22  ;;  %1126 = vrot.lane.b32.xlu0 %v8222_v3, %s7729_s22 }
 0x148   : > { %v888_v0 = vpop.permute.xlu1 %887  ;;  %v886_v2 = vpop.permute.xlu0 %885 }
 0x149   : > { %981 = vst.msk [vmem:[#allocation3 + $0x18] sm:$0xff] %vm977_vm4, %v888_v0  ;;  %980 = vst.msk [vmem:[#allocation3 + $0x10] sm:$0xff] %vm977_vm4, %v886_v2 }
 0x14a   : > { %1132 = vrot.lane.b32.xlu1 %v8231_v61, %s7729_s22  ;;  %1130 = vrot.lane.b32.xlu0 %v8234_v62, %s7729_s22 }
 0x14c   : > { %v892_v1 = vpop.permute.xlu1 %891  ;;  %v890_v6 = vpop.permute.xlu0 %889 }
 0x14d   : > { %983 = vst.msk [vmem:[#allocation3 + $0x28] sm:$0xff] %vm977_vm4, %v892_v1  ;;  %982 = vst.msk [vmem:[#allocation3 + $0x20] sm:$0xff] %vm977_vm4, %v890_v6  ;;  %v7337_v1 = vld [vmem:[%s7772_s17 + $0xc9] sm:$0xff]  ;;  %v7336_v6 = vld [vmem:[%s7772_s17 + $0xc1] sm:$0xff] }
 0x14e   : > { %1136 = vrot.lane.b32.xlu1 %v8537_v4, %s7729_s22  ;;  %1134 = vrot.lane.b32.xlu0 %v8540_v5, %s7729_s22 }
 0x150   : > { %v896_v3 = vpop.permute.xlu1 %895  ;;  %v894_v61 = vpop.permute.xlu0 %893 }
 0x151   : > { %985 = vst.msk [vmem:[#allocation3 + $0x38] sm:$0xff] %vm977_vm4, %v896_v3  ;;  %984 = vst.msk [vmem:[#allocation3 + $0x30] sm:$0xff] %vm977_vm4, %v894_v61 }
 0x152   : > { %1270 = vrot.lane.b32.xlu1 %v7852_v19, %s7730_s23  ;;  %1268 = vrot.lane.b32.xlu0 %v7855_v20, %s7730_s23 }
 0x154   : > { %v900_v62 = vpop.permute.xlu1 %899  ;;  %v898_v7 = vpop.permute.xlu0 %897 }
 0x155   : > { %987 = vst.msk [vmem:[#allocation3 + $0x48] sm:$0xff] %vm977_vm4, %v900_v62  ;;  %986 = vst.msk [vmem:[#allocation3 + $0x40] sm:$0xff] %vm977_vm4, %v898_v7  ;;  %v7339_v62 = vld [vmem:[%s7772_s17 + $0xe1] sm:$0xff]  ;;  %v7338_v7 = vld [vmem:[%s7772_s17 + $0xd9] sm:$0xff] }
 0x156   : > { %1274 = vrot.lane.b32.xlu1 %v7869_v22, %s7730_s23  ;;  %1272 = vrot.lane.b32.xlu0 %v7874_v23, %s7730_s23 }
 0x158   : > { %v904_v8 = vpop.permute.xlu1 %903  ;;  %v902_v9 = vpop.permute.xlu0 %901 }
 0x159   : > { %989 = vst.msk [vmem:[#allocation3 + $0x58] sm:$0xff] %vm977_vm4, %v904_v8  ;;  %988 = vst.msk [vmem:[#allocation3 + $0x50] sm:$0xff] %vm977_vm4, %v902_v9 }
 0x15a   : > { %1278 = vrot.lane.b32.xlu1 %v7877_v24, %s7730_s23  ;;  %1276 = vrot.lane.b32.xlu0 %v7880_v25, %s7730_s23 }
 0x15c   : > { %v908_v19 = vpop.permute.xlu1 %907  ;;  %v906_v20 = vpop.permute.xlu0 %905 }
 0x15d   : > { %991 = vst.msk [vmem:[#allocation3 + $0x68] sm:$0xff] %vm977_vm4, %v908_v19  ;;  %990 = vst.msk [vmem:[#allocation3 + $0x60] sm:$0xff] %vm977_vm4, %v906_v20  ;;  %v7341_v19 = vld [vmem:[%s7772_s17 + $0xf9] sm:$0xff]  ;;  %v7340_v20 = vld [vmem:[%s7772_s17 + $0xf1] sm:$0xff] }
 0x15e   : > { %1282 = vrot.lane.b32.xlu1 %v7889_v26, %s7730_s23  ;;  %1280 = vrot.lane.b32.xlu0 %v7892_v27, %s7730_s23 }
 0x160   : > { %v912_v22 = vpop.permute.xlu1 %911  ;;  %v910_v23 = vpop.permute.xlu0 %909 }
 0x161   : > { %993 = vst.msk [vmem:[#allocation3 + $0x78] sm:$0xff] %vm977_vm4, %v912_v22  ;;  %992 = vst.msk [vmem:[#allocation3 + $0x70] sm:$0xff] %vm977_vm4, %v910_v23 }
 0x162   : > { %1286 = vrot.lane.b32.xlu1 %v7895_v28, %s7730_s23  ;;  %1284 = vrot.lane.b32.xlu0 %v7910_v31, %s7730_s23 }
 0x164   : > { %v916_v24 = vpop.permute.xlu1 %915  ;;  %v914_v25 = vpop.permute.xlu0 %913 }
 0x165   : > { %995 = vst.msk [vmem:[#allocation3 + $0x88] sm:$0xff] %vm977_vm4, %v916_v24  ;;  %994 = vst.msk [vmem:[#allocation3 + $0x80] sm:$0xff] %vm977_vm4, %v914_v25  ;;  %v7343_v24 = vld [vmem:[%s7772_s17 + $0x111] sm:$0xff]  ;;  %v7342_v25 = vld [vmem:[%s7772_s17 + $0x109] sm:$0xff] }
 0x166   : > { %1290 = vrot.lane.b32.xlu1 %v7913_v32, %s7730_s23  ;;  %1288 = vrot.lane.b32.xlu0 %v7916_v33, %s7730_s23 }
 0x168   : > { %v920_v26 = vpop.permute.xlu1 %919  ;;  %v918_v27 = vpop.permute.xlu0 %917 }
 0x169   : > { %997 = vst.msk [vmem:[#allocation3 + $0x98] sm:$0xff] %vm977_vm4, %v920_v26  ;;  %996 = vst.msk [vmem:[#allocation3 + $0x90] sm:$0xff] %vm977_vm4, %v918_v27 }
 0x16a   : > { %1294 = vrot.lane.b32.xlu1 %v7929_v34, %s7730_s23  ;;  %1292 = vrot.lane.b32.xlu0 %v7932_v35, %s7730_s23 }
 0x16c   : > { %v924_v28 = vpop.permute.xlu1 %923  ;;  %v922_v31 = vpop.permute.xlu0 %921 }
 0x16d   : > { %999 = vst.msk [vmem:[#allocation3 + $0xa8] sm:$0xff] %vm977_vm4, %v924_v28  ;;  %998 = vst.msk [vmem:[#allocation3 + $0xa0] sm:$0xff] %vm977_vm4, %v922_v31  ;;  %v7345_v28 = vld [vmem:[%s7772_s17 + $0x129] sm:$0xff]  ;;  %v7344_v31 = vld [vmem:[%s7772_s17 + $0x121] sm:$0xff] }
 0x16e   : > { %1298 = vrot.lane.b32.xlu1 %v7939_v36, %s7730_s23  ;;  %1296 = vrot.lane.b32.xlu0 %v7942_v37, %s7730_s23 }
 0x170   : > { %v928_v32 = vpop.permute.xlu1 %927  ;;  %v926_v33 = vpop.permute.xlu0 %925 }
 0x171   : > { %1001 = vst.msk [vmem:[#allocation3 + $0xb8] sm:$0xff] %vm977_vm4, %v928_v32  ;;  %1000 = vst.msk [vmem:[#allocation3 + $0xb0] sm:$0xff] %vm977_vm4, %v926_v33 }
 0x172   : > { %1302 = vrot.lane.b32.xlu1 %v7945_v38, %s7730_s23  ;;  %1300 = vrot.lane.b32.xlu0 %v7954_v39, %s7730_s23 }
 0x174   : > { %v932_v34 = vpop.permute.xlu1 %931  ;;  %v930_v35 = vpop.permute.xlu0 %929 }
 0x175   : > { %1003 = vst.msk [vmem:[#allocation3 + $0xc8] sm:$0xff] %vm977_vm4, %v932_v34  ;;  %1002 = vst.msk [vmem:[#allocation3 + $0xc0] sm:$0xff] %vm977_vm4, %v930_v35  ;;  %v7347_v34 = vld [vmem:[%s7772_s17 + $0x141] sm:$0xff]  ;;  %v7346_v35 = vld [vmem:[%s7772_s17 + $0x139] sm:$0xff] }
 0x176   : > { %1306 = vrot.lane.b32.xlu1 %v7957_v40, %s7730_s23  ;;  %1304 = vrot.lane.b32.xlu0 %v7960_v41, %s7730_s23 }
 0x178   : > { %v936_v36 = vpop.permute.xlu1 %935  ;;  %v934_v37 = vpop.permute.xlu0 %933 }
 0x179   : > { %1005 = vst.msk [vmem:[#allocation3 + $0xd8] sm:$0xff] %vm977_vm4, %v936_v36  ;;  %1004 = vst.msk [vmem:[#allocation3 + $0xd0] sm:$0xff] %vm977_vm4, %v934_v37 }
 0x17a   : > { %1310 = vrot.lane.b32.xlu1 %v7979_v44, %s7730_s23  ;;  %1308 = vrot.lane.b32.xlu0 %v7982_v45, %s7730_s23 }
 0x17c   : > { %v940_v38 = vpop.permute.xlu1 %939  ;;  %v938_v39 = vpop.permute.xlu0 %937 }
 0x17d   : > { %1007 = vst.msk [vmem:[#allocation3 + $0xe8] sm:$0xff] %vm977_vm4, %v940_v38  ;;  %1006 = vst.msk [vmem:[#allocation3 + $0xe0] sm:$0xff] %vm977_vm4, %v938_v39  ;;  %v7702_v38 = vld [vmem:[%s11753_s1 + $0x20] ss:$0 sps:$4 sm:$0xff]  }
 0x17e   : > { %1314 = vrot.lane.b32.xlu1 %v7999_v48, %s7730_s23  ;;  %1312 = vrot.lane.b32.xlu0 %v8002_v49, %s7730_s23  ;;  %v7349_v39 = vld [vmem:[%s7772_s17 + $0x159] sm:$0xff] }
 0x17f   : > { %7676 = vmatprep.subr.msk.bf16.mxu0 %vm1923_vm6, %v7702_v38  ;;  %7677 = vmatprep.subr.msk.bf16.mxu1 %vm1923_vm6, %v7702_v38 }
 0x180   : > { %v944_v40 = vpop.permute.xlu1 %943  ;;  %v942_v41 = vpop.permute.xlu0 %941 }
 0x181   : > { %1009 = vst.msk [vmem:[#allocation3 + $0xf8] sm:$0xff] %vm977_vm4, %v944_v40  ;;  %1008 = vst.msk [vmem:[#allocation3 + $0xf0] sm:$0xff] %vm977_vm4, %v942_v41  ;;  %v7348_v40 = vld [vmem:[%s7772_s17 + $0x151] sm:$0xff]  ;;  %v1925_v41 = vsel %vm1923_vm6, %v7702_v38, 0 }
 0x182   : > { %1318 = vrot.lane.b32.xlu1 %v8019_v52, %s7730_s23  ;;  %1316 = vrot.lane.b32.xlu0 %v8022_v53, %s7730_s23  ;;  %v7323_v52 = vld [vmem:[%s7772_s17 + $0x1a0] sm:$0xff]  ;;  %v7322_v53 = vld [vmem:[%s7772_s17 + $0x198] sm:$0xff] }
 0x183   : > { %7541 = vmatpush3.bf16.msra.mxu0 %v1925_v41  ;;  %7671 = vmatpush3.bf16.msra.mxu1 %v1925_v41  ;;  %v7378_v41 = vld [vmem:[%s7772_s17 + $0x13a] sm:$0xff] }
 0x184   : > { %v1077_v44 = vpop.permute.xlu1 %1076  ;;  %v1075_v45 = vpop.permute.xlu0 %1074 }
 0x185   : > { %1172 = vst.msk [vmem:[#allocation3 + $0x8] sm:$0xff] %vm1170_vm5, %v1077_v44  ;;  %1171 = vst.msk [vmem:[#allocation3] sm:$0xff] %vm1170_vm5, %v1075_v45 }
 0x186   : > { %1322 = vrot.lane.b32.xlu1 %v8039_v56, %s7730_s23  ;;  %1320 = vrot.lane.b32.xlu0 %v8042_v57, %s7730_s23  ;;  %v7325_v57 = vld [vmem:[%s7772_s17 + $0x39] sm:$0xff] }
 0x188   : > { %v1081_v48 = vpop.permute.xlu1 %1080  ;;  %v1079_v49 = vpop.permute.xlu0 %1078 }
 0x189   : > { %1174 = vst.msk [vmem:[#allocation3 + $0x18] sm:$0xff] %vm1170_vm5, %v1081_v48  ;;  %1173 = vst.msk [vmem:[#allocation3 + $0x10] sm:$0xff] %vm1170_vm5, %v1079_v49  ;;  %v7703_v48 = vld [vmem:[%s11753_s1 + $0x18] sm:$0xff]  }
 0x18a   : > { %1326 = vrot.lane.b32.xlu1 %v8333_v12, %s7730_s23  ;;  %1324 = vrot.lane.b32.xlu0 %v8336_v16, %s7730_s23  ;;  %v7351_v49 = vld [vmem:[%s7772_s17 + $0x171] sm:$0xff] }
 0x18b   : > { %7542 = vmatprep.subr.bf16.mxu0 %v7703_v48  ;;  %7667 = vmatprep.subr.bf16.mxu1 %v7703_v48 }
 0x18c   : > { %v1085_v56 = vpop.permute.xlu1 %1084  ;;  %v1083_v10 = vpop.permute.xlu0 %1082  ;;  %7543 = vmatpush3.bf16.msra.mxu0 %v7703_v48  ;;  %7672 = vmatpush3.bf16.msra.mxu1 %v7703_v48  ;;  %v7381_v48 = vld [vmem:[%s7772_s17 + $0x15a] sm:$0xff] }
 0x18d   : > { %1176 = vst.msk [vmem:[#allocation3 + $0x28] sm:$0xff] %vm1170_vm5, %v1085_v56  ;;  %1175 = vst.msk [vmem:[#allocation3 + $0x20] sm:$0xff] %vm1170_vm5, %v1083_v10  ;;  %v7704_v10 = vld [vmem:[%s11753_s1 + $0x10] sm:$0xff]  }
 0x18e   : > { %1330 = vrot.lane.b32.xlu1 %v7323_v52, %s7730_s23  ;;  %1328 = vrot.lane.b32.xlu0 %v7322_v53, %s7730_s23  ;;  %v7350_v52 = vld [vmem:[%s7772_s17 + $0x169] sm:$0xff] }
 0x18f   : > { %7544 = vmatprep.subr.bf16.mxu0 %v7704_v10  ;;  %7668 = vmatprep.subr.bf16.mxu1 %v7704_v10 }
 0x190   : > { %v1089_v12 = vpop.permute.xlu1 %1088  ;;  %v1087_v16 = vpop.permute.xlu0 %1086  ;;  %7545 = vmatpush3.bf16.msra.mxu0 %v7704_v10  ;;  %7673 = vmatpush3.bf16.msra.mxu1 %v7704_v10  ;;  %v7382_v10 = vld [vmem:[%s7772_s17 + $0x16a] sm:$0xff] }
 0x191   : > { %1178 = vst.msk [vmem:[#allocation3 + $0x38] sm:$0xff] %vm1170_vm5, %v1089_v12  ;;  %1177 = vst.msk [vmem:[#allocation3 + $0x30] sm:$0xff] %vm1170_vm5, %v1087_v16  ;;  %v7705_v12 = vld [vmem:[%s11753_s1 + $0x8] sm:$0xff]  }
 0x192   : > { %1463 = vrot.lane.b32.xlu1 %v7325_v57, %s7731_s24  ;;  %1461 = vrot.lane.b32.xlu0 %v7324_v11, %s7731_s24  ;;  %v7355_v16 = vld [vmem:[%s7772_s17 + $0x1a1] sm:$0xff] }
 0x193   : > { %7546 = vmatprep.subr.bf16.mxu0 %v7705_v12  ;;  %7669 = vmatprep.subr.bf16.mxu1 %v7705_v12 }
 0x194   : > { %v1093_v18 = vpop.permute.xlu1 %1092  ;;  %v1091_v21 = vpop.permute.xlu0 %1090  ;;  %7547 = vmatpush3.bf16.msra.mxu0 %v7705_v12  ;;  %7674 = vmatpush3.bf16.msra.mxu1 %v7705_v12 }
 0x195   : > { %1180 = vst.msk [vmem:[#allocation3 + $0x48] sm:$0xff] %vm1170_vm5, %v1093_v18  ;;  %1179 = vst.msk [vmem:[#allocation3 + $0x40] sm:$0xff] %vm1170_vm5, %v1091_v21  ;;  %v7356_v21 = vld [vmem:[%s7772_s17 + $0x32] sm:$0xff] }
 0x196   : > { %1467 = vrot.lane.b32.xlu1 %v7327_v14, %s7731_s24  ;;  %1465 = vrot.lane.b32.xlu0 %v7326_v15, %s7731_s24  ;;  %v7354_v14 = vld [vmem:[%s7772_s17 + $0x199] sm:$0xff] }
 0x198   : > { %v1097_v42 = vpop.permute.xlu1 %1096  ;;  %v1095_v43 = vpop.permute.xlu0 %1094 }
 0x199   : > { %1182 = vst.msk [vmem:[#allocation3 + $0x58] sm:$0xff] %vm1170_vm5, %v1097_v42  ;;  %1181 = vst.msk [vmem:[#allocation3 + $0x50] sm:$0xff] %vm1170_vm5, %v1095_v43  ;;  %v7359_v42 = vld [vmem:[%s7772_s17 + $0x52] sm:$0xff]  ;;  %v7358_v43 = vld [vmem:[%s7772_s17 + $0x4a] sm:$0xff] }
 0x19a   : > { %1471 = vrot.lane.b32.xlu1 %v7329_v29, %s7731_s24  ;;  %1469 = vrot.lane.b32.xlu0 %v7328_v30, %s7731_s24 }
 0x19c   : > { %v1101_v50 = vpop.permute.xlu1 %1100  ;;  %v1099_v51 = vpop.permute.xlu0 %1098 }
 0x19d   : > { %1184 = vst.msk [vmem:[#allocation3 + $0x68] sm:$0xff] %vm1170_vm5, %v1101_v50  ;;  %1183 = vst.msk [vmem:[#allocation3 + $0x60] sm:$0xff] %vm1170_vm5, %v1099_v51  ;;  %v7361_v50 = vld [vmem:[%s7772_s17 + $0x6a] sm:$0xff]  ;;  %v7360_v51 = vld [vmem:[%s7772_s17 + $0x62] sm:$0xff] }
 0x19e   : > { %1475 = vrot.lane.b32.xlu1 %v7331_v46, %s7731_s24  ;;  %1473 = vrot.lane.b32.xlu0 %v7330_v47, %s7731_s24 }
 0x1a0   : > { %v1105_v13 = vpop.permute.xlu1 %1104  ;;  %v1103_v17 = vpop.permute.xlu0 %1102 }
 0x1a1   : > { %1186 = vst.msk [vmem:[#allocation3 + $0x78] sm:$0xff] %vm1170_vm5, %v1105_v13  ;;  %1185 = vst.msk [vmem:[#allocation3 + $0x70] sm:$0xff] %vm1170_vm5, %v1103_v17  ;;  %v7363_v13 = vld [vmem:[%s7772_s17 + $0x82] sm:$0xff]  ;;  %v7362_v17 = vld [vmem:[%s7772_s17 + $0x7a] sm:$0xff] }
 0x1a2   : > { %1479 = vrot.lane.b32.xlu1 %v7333_v54, %s7731_s24  ;;  %1477 = vrot.lane.b32.xlu0 %v7332_v55, %s7731_s24 }
 0x1a4   : > { %v1109_v0 = vpop.permute.xlu1 %1108  ;;  %v1107_v2 = vpop.permute.xlu0 %1106 }
 0x1a5   : > { %1188 = vst.msk [vmem:[#allocation3 + $0x88] sm:$0xff] %vm1170_vm5, %v1109_v0  ;;  %1187 = vst.msk [vmem:[#allocation3 + $0x80] sm:$0xff] %vm1170_vm5, %v1107_v2  ;;  %v7365_v0 = vld [vmem:[%s7772_s17 + $0x9a] sm:$0xff]  ;;  %v7364_v2 = vld [vmem:[%s7772_s17 + $0x92] sm:$0xff] }
 0x1a6   : > { %1483 = vrot.lane.b32.xlu1 %v7335_v58, %s7731_s24  ;;  %1481 = vrot.lane.b32.xlu0 %v7334_v59, %s7731_s24 }
 0x1a8   : > { %v1113_v3 = vpop.permute.xlu1 %1112  ;;  %v1111_v61 = vpop.permute.xlu0 %1110 }
 0x1a9   : > { %1190 = vst.msk [vmem:[#allocation3 + $0x98] sm:$0xff] %vm1170_vm5, %v1113_v3  ;;  %1189 = vst.msk [vmem:[#allocation3 + $0x90] sm:$0xff] %vm1170_vm5, %v1111_v61  ;;  %v7367_v3 = vld [vmem:[%s7772_s17 + $0xb2] sm:$0xff]  ;;  %v7366_v61 = vld [vmem:[%s7772_s17 + $0xaa] sm:$0xff] }
 0x1aa   : > { %1487 = vrot.lane.b32.xlu1 %v7337_v1, %s7731_s24  ;;  %1485 = vrot.lane.b32.xlu0 %v7336_v6, %s7731_s24 }
 0x1ac   : > { %v1117_v8 = vpop.permute.xlu1 %1116  ;;  %v1115_v9 = vpop.permute.xlu0 %1114 }
 0x1ad   : > { %1192 = vst.msk [vmem:[#allocation3 + $0xa8] sm:$0xff] %vm1170_vm5, %v1117_v8  ;;  %1191 = vst.msk [vmem:[#allocation3 + $0xa0] sm:$0xff] %vm1170_vm5, %v1115_v9  ;;  %v7369_v8 = vld [vmem:[%s7772_s17 + $0xca] sm:$0xff]  ;;  %v7368_v9 = vld [vmem:[%s7772_s17 + $0xc2] sm:$0xff] }
 0x1ae   : > { %1491 = vrot.lane.b32.xlu1 %v7339_v62, %s7731_s24  ;;  %1489 = vrot.lane.b32.xlu0 %v7338_v7, %s7731_s24 }
 0x1b0   : > { %v1121_v22 = vpop.permute.xlu1 %1120  ;;  %v1119_v23 = vpop.permute.xlu0 %1118 }
 0x1b1   : > { %1194 = vst.msk [vmem:[#allocation3 + $0xb8] sm:$0xff] %vm1170_vm5, %v1121_v22  ;;  %1193 = vst.msk [vmem:[#allocation3 + $0xb0] sm:$0xff] %vm1170_vm5, %v1119_v23  ;;  %v7371_v22 = vld [vmem:[%s7772_s17 + $0xe2] sm:$0xff]  ;;  %v7370_v23 = vld [vmem:[%s7772_s17 + $0xda] sm:$0xff] }
 0x1b2   : > { %1495 = vrot.lane.b32.xlu1 %v7341_v19, %s7731_s24  ;;  %1493 = vrot.lane.b32.xlu0 %v7340_v20, %s7731_s24 }
 0x1b4   : > { %v1125_v26 = vpop.permute.xlu1 %1124  ;;  %v1123_v27 = vpop.permute.xlu0 %1122 }
 0x1b5   : > { %1196 = vst.msk [vmem:[#allocation3 + $0xc8] sm:$0xff] %vm1170_vm5, %v1125_v26  ;;  %1195 = vst.msk [vmem:[#allocation3 + $0xc0] sm:$0xff] %vm1170_vm5, %v1123_v27  ;;  %v7373_v26 = vld [vmem:[%s7772_s17 + $0xfa] sm:$0xff]  ;;  %v7372_v27 = vld [vmem:[%s7772_s17 + $0xf2] sm:$0xff] }
 0x1b6   : > { %1499 = vrot.lane.b32.xlu1 %v7343_v24, %s7731_s24  ;;  %1497 = vrot.lane.b32.xlu0 %v7342_v25, %s7731_s24 }
 0x1b8   : > { %v1129_v32 = vpop.permute.xlu1 %1128  ;;  %v1127_v33 = vpop.permute.xlu0 %1126 }
 0x1b9   : > { %1198 = vst.msk [vmem:[#allocation3 + $0xd8] sm:$0xff] %vm1170_vm5, %v1129_v32  ;;  %1197 = vst.msk [vmem:[#allocation3 + $0xd0] sm:$0xff] %vm1170_vm5, %v1127_v33  ;;  %v7375_v32 = vld [vmem:[%s7772_s17 + $0x112] sm:$0xff]  ;;  %v7374_v33 = vld [vmem:[%s7772_s17 + $0x10a] sm:$0xff] }
 0x1ba   : > { %1503 = vrot.lane.b32.xlu1 %v7345_v28, %s7731_s24  ;;  %1501 = vrot.lane.b32.xlu0 %v7344_v31, %s7731_s24 }
 0x1bc   : > { %v1133_v36 = vpop.permute.xlu1 %1132  ;;  %v1131_v37 = vpop.permute.xlu0 %1130 }
 0x1bd   : > { %1200 = vst.msk [vmem:[#allocation3 + $0xe8] sm:$0xff] %vm1170_vm5, %v1133_v36  ;;  %1199 = vst.msk [vmem:[#allocation3 + $0xe0] sm:$0xff] %vm1170_vm5, %v1131_v37  ;;  %v7377_v36 = vld [vmem:[%s7772_s17 + $0x12a] sm:$0xff]  ;;  %v7376_v37 = vld [vmem:[%s7772_s17 + $0x122] sm:$0xff] }
 0x1be   : > { %1507 = vrot.lane.b32.xlu1 %v7347_v34, %s7731_s24  ;;  %1505 = vrot.lane.b32.xlu0 %v7346_v35, %s7731_s24 }
 0x1c0   : > { %v1137_v44 = vpop.permute.xlu1 %1136  ;;  %v1135_v45 = vpop.permute.xlu0 %1134 }
 0x1c1   : > { %1202 = vst.msk [vmem:[#allocation3 + $0xf8] sm:$0xff] %vm1170_vm5, %v1137_v44  ;;  %1201 = vst.msk [vmem:[#allocation3 + $0xf0] sm:$0xff] %vm1170_vm5, %v1135_v45 }
 0x1c2   : > { %1511 = vrot.lane.b32.xlu1 %v7349_v39, %s7731_s24  ;;  %1509 = vrot.lane.b32.xlu0 %v7348_v40, %s7731_s24  ;;  %v7379_v40 = vld [vmem:[%s7772_s17 + $0x142] sm:$0xff] }
 0x1c4   : > { %v1271_v53 = vpop.permute.xlu1 %1270  ;;  %v1269_v56 = vpop.permute.xlu0 %1268 }
 0x1c5   : > { %1366 = vst.msk [vmem:[#allocation3 + $0x8] sm:$0xff] %vm1364_vm7, %v1271_v53  ;;  %1365 = vst.msk [vmem:[#allocation3] sm:$0xff] %vm1364_vm7, %v1269_v56  ;;  %v7383_v56 = vld [vmem:[%s7772_s17 + $0x172] sm:$0xff] }
 0x1c6   : > { %1515 = vrot.lane.b32.xlu1 %v7351_v49, %s7731_s24  ;;  %1513 = vrot.lane.b32.xlu0 %v7350_v52, %s7731_s24  ;;  %v7380_v49 = vld [vmem:[%s7772_s17 + $0x152] sm:$0xff] }
 0x1c8   : > { %v1275_v57 = vpop.permute.xlu1 %1274  ;;  %v1273_v11 = vpop.permute.xlu0 %1272 }
 0x1c9   : > { %1368 = vst.msk [vmem:[#allocation3 + $0x18] sm:$0xff] %vm1364_vm7, %v1275_v57  ;;  %1367 = vst.msk [vmem:[#allocation3 + $0x10] sm:$0xff] %vm1364_vm7, %v1273_v11 }
 0x1ca   : > { %1519 = vrot.lane.b32.xlu1 %v8435_v60, %s7731_s24  ;;  %1517 = vrot.lane.b32.xlu0 %v8438_v63, %s7731_s24  ;;  %v7706_v60 = vld [vmem:[%s11753_s1] sm:$0xff]  }
 0x1cb   : > { %v7357_v63 = vld [vmem:[%s7772_s17 + $0x3a] sm:$0xff]  ;;  %7548 = vmatprep.subr.bf16.mxu0 %v7706_v60  ;;  %7670 = vmatprep.subr.bf16.mxu1 %v7706_v60 }
 0x1cc   : > { %v1279_v15 = vpop.permute.xlu1 %1278  ;;  %v1277_v18 = vpop.permute.xlu0 %1276  ;;  %7549 = vmatpush3.bf16.msra.mxu0 %v7706_v60  ;;  %7675 = vmatpush3.bf16.msra.mxu1 %v7706_v60 }
 0x1cd   : > { %1370 = vst.msk [vmem:[#allocation3 + $0x28] sm:$0xff] %vm1364_vm7, %v1279_v15  ;;  %1369 = vst.msk [vmem:[#allocation3 + $0x20] sm:$0xff] %vm1364_vm7, %v1277_v18  ;;  %v7386_v15 = vld [vmem:[%s7772_s17 + $0x19a] sm:$0xff] }
 0x1ce   : > { %1523 = vrot.lane.b32.xlu1 %v7355_v16, %s7731_s24  ;;  %1521 = vrot.lane.b32.xlu0 %v7354_v14, %s7731_s24  ;;  %v7387_v14 = vld [vmem:[%s7772_s17 + $0x1a2] sm:$0xff] }
 0x1d0   : > { %v1283_v29 = vpop.permute.xlu1 %1282  ;;  %v1281_v30 = vpop.permute.xlu0 %1280 }
 0x1d1   : > { %1372 = vst.msk [vmem:[#allocation3 + $0x38] sm:$0xff] %vm1364_vm7, %v1283_v29  ;;  %1371 = vst.msk [vmem:[#allocation3 + $0x30] sm:$0xff] %vm1364_vm7, %v1281_v30 }
 0x1d2   : > { %1656 = vrot.lane.b32.xlu1 %v7357_v63, %s7732_s8  ;;  %1654 = vrot.lane.b32.xlu0 %v7356_v21, %s7732_s8 }
 0x1d4   : > { %v1287_v46 = vpop.permute.xlu1 %1286  ;;  %v1285_v47 = vpop.permute.xlu0 %1284 }
 0x1d5   : > { %1374 = vst.msk [vmem:[#allocation3 + $0x48] sm:$0xff] %vm1364_vm7, %v1287_v46  ;;  %1373 = vst.msk [vmem:[#allocation3 + $0x40] sm:$0xff] %vm1364_vm7, %v1285_v47 }
 0x1d6   : > { %1660 = vrot.lane.b32.xlu1 %v7359_v42, %s7732_s8  ;;  %1658 = vrot.lane.b32.xlu0 %v7358_v43, %s7732_s8 }
 0x1d8   : > { %v1291_v54 = vpop.permute.xlu1 %1290  ;;  %v1289_v55 = vpop.permute.xlu0 %1288 }
 0x1d9   : > { %1376 = vst.msk [vmem:[#allocation3 + $0x58] sm:$0xff] %vm1364_vm7, %v1291_v54  ;;  %1375 = vst.msk [vmem:[#allocation3 + $0x50] sm:$0xff] %vm1364_vm7, %v1289_v55 }
 0x1da   : > { %1664 = vrot.lane.b32.xlu1 %v7361_v50, %s7732_s8  ;;  %1662 = vrot.lane.b32.xlu0 %v7360_v51, %s7732_s8 }
 0x1dc   : > { %v1295_v58 = vpop.permute.xlu1 %1294  ;;  %v1293_v59 = vpop.permute.xlu0 %1292 }
 0x1dd   : > { %1378 = vst.msk [vmem:[#allocation3 + $0x68] sm:$0xff] %vm1364_vm7, %v1295_v58  ;;  %1377 = vst.msk [vmem:[#allocation3 + $0x60] sm:$0xff] %vm1364_vm7, %v1293_v59 }
 0x1de   : > { %1668 = vrot.lane.b32.xlu1 %v7363_v13, %s7732_s8  ;;  %1666 = vrot.lane.b32.xlu0 %v7362_v17, %s7732_s8 }
 0x1e0   : > { %v1299_v1 = vpop.permute.xlu1 %1298  ;;  %v1297_v6 = vpop.permute.xlu0 %1296 }
 0x1e1   : > { %1380 = vst.msk [vmem:[#allocation3 + $0x78] sm:$0xff] %vm1364_vm7, %v1299_v1  ;;  %1379 = vst.msk [vmem:[#allocation3 + $0x70] sm:$0xff] %vm1364_vm7, %v1297_v6 }
 0x1e2   : > { %1672 = vrot.lane.b32.xlu1 %v7365_v0, %s7732_s8  ;;  %1670 = vrot.lane.b32.xlu0 %v7364_v2, %s7732_s8 }
 0x1e4   : > { %v1303_v62 = vpop.permute.xlu1 %1302  ;;  %v1301_v7 = vpop.permute.xlu0 %1300 }
 0x1e5   : > { %1382 = vst.msk [vmem:[#allocation3 + $0x88] sm:$0xff] %vm1364_vm7, %v1303_v62  ;;  %1381 = vst.msk [vmem:[#allocation3 + $0x80] sm:$0xff] %vm1364_vm7, %v1301_v7 }
 0x1e6   : > { %1676 = vrot.lane.b32.xlu1 %v7367_v3, %s7732_s8  ;;  %1674 = vrot.lane.b32.xlu0 %v7366_v61, %s7732_s8 }
 0x1e8   : > { %v1307_v19 = vpop.permute.xlu1 %1306  ;;  %v1305_v20 = vpop.permute.xlu0 %1304 }
 0x1e9   : > { %1384 = vst.msk [vmem:[#allocation3 + $0x98] sm:$0xff] %vm1364_vm7, %v1307_v19  ;;  %1383 = vst.msk [vmem:[#allocation3 + $0x90] sm:$0xff] %vm1364_vm7, %v1305_v20 }
 0x1ea   : > { %1680 = vrot.lane.b32.xlu1 %v7369_v8, %s7732_s8  ;;  %1678 = vrot.lane.b32.xlu0 %v7368_v9, %s7732_s8 }
 0x1ec   : > { %v1311_v24 = vpop.permute.xlu1 %1310  ;;  %v1309_v25 = vpop.permute.xlu0 %1308 }
 0x1ed   : > { %1386 = vst.msk [vmem:[#allocation3 + $0xa8] sm:$0xff] %vm1364_vm7, %v1311_v24  ;;  %1385 = vst.msk [vmem:[#allocation3 + $0xa0] sm:$0xff] %vm1364_vm7, %v1309_v25 }
 0x1ee   : > { %1684 = vrot.lane.b32.xlu1 %v7371_v22, %s7732_s8  ;;  %1682 = vrot.lane.b32.xlu0 %v7370_v23, %s7732_s8 }
 0x1f0   : > { %v1315_v28 = vpop.permute.xlu1 %1314  ;;  %v1313_v31 = vpop.permute.xlu0 %1312 }
 0x1f1   : > { %1388 = vst.msk [vmem:[#allocation3 + $0xb8] sm:$0xff] %vm1364_vm7, %v1315_v28  ;;  %1387 = vst.msk [vmem:[#allocation3 + $0xb0] sm:$0xff] %vm1364_vm7, %v1313_v31 }
 0x1f2   : > { %1688 = vrot.lane.b32.xlu1 %v7373_v26, %s7732_s8  ;;  %1686 = vrot.lane.b32.xlu0 %v7372_v27, %s7732_s8 }
 0x1f4   : > { %v1319_v34 = vpop.permute.xlu1 %1318  ;;  %v1317_v35 = vpop.permute.xlu0 %1316 }
 0x1f5   : > { %1390 = vst.msk [vmem:[#allocation3 + $0xc8] sm:$0xff] %vm1364_vm7, %v1319_v34  ;;  %1389 = vst.msk [vmem:[#allocation3 + $0xc0] sm:$0xff] %vm1364_vm7, %v1317_v35 }
 0x1f6   : > { %1692 = vrot.lane.b32.xlu1 %v7375_v32, %s7732_s8  ;;  %1690 = vrot.lane.b32.xlu0 %v7374_v33, %s7732_s8 }
 0x1f8   : > { %v1323_v38 = vpop.permute.xlu1 %1322  ;;  %v1321_v39 = vpop.permute.xlu0 %1320 }
 0x1f9   : > { %1392 = vst.msk [vmem:[#allocation3 + $0xd8] sm:$0xff] %vm1364_vm7, %v1323_v38  ;;  %1391 = vst.msk [vmem:[#allocation3 + $0xd0] sm:$0xff] %vm1364_vm7, %v1321_v39 }
 0x1fa   : > { %1696 = vrot.lane.b32.xlu1 %v7377_v36, %s7732_s8  ;;  %1694 = vrot.lane.b32.xlu0 %v7376_v37, %s7732_s8 }
 0x1fc   : > { %v1327_v44 = vpop.permute.xlu1 %1326  ;;  %v1325_v45 = vpop.permute.xlu0 %1324 }
 0x1fd   : > { %1394 = vst.msk [vmem:[#allocation3 + $0xe8] sm:$0xff] %vm1364_vm7, %v1327_v44  ;;  %1393 = vst.msk [vmem:[#allocation3 + $0xe0] sm:$0xff] %vm1364_vm7, %v1325_v45 }
 0x1fe   : > { %1700 = vrot.lane.b32.xlu1 %v7379_v40, %s7732_s8  ;;  %1698 = vrot.lane.b32.xlu0 %v7378_v41, %s7732_s8 }
 0x200   : > { %v1331_v52 = vpop.permute.xlu1 %1330  ;;  %v1329_v53 = vpop.permute.xlu0 %1328 }
 0x201   : > { %1396 = vst.msk [vmem:[#allocation3 + $0xf8] sm:$0xff] %vm1364_vm7, %v1331_v52  ;;  %1395 = vst.msk [vmem:[#allocation3 + $0xf0] sm:$0xff] %vm1364_vm7, %v1329_v53 }
 0x202   : > { %1704 = vrot.lane.b32.xlu1 %v7381_v48, %s7732_s8  ;;  %1702 = vrot.lane.b32.xlu0 %v7380_v49, %s7732_s8 }
 0x204   : > { %v1464_v57 = vpop.permute.xlu1 %1463  ;;  %v1462_v11 = vpop.permute.xlu0 %1461 }
 0x205   : > { %1559 = vst.msk [vmem:[#allocation3 + $0x8] sm:$0xff] %vm1557_vm8, %v1464_v57  ;;  %1558 = vst.msk [vmem:[#allocation3] sm:$0xff] %vm1557_vm8, %v1462_v11 }
 0x206   : > { %1708 = vrot.lane.b32.xlu1 %v7383_v56, %s7732_s8  ;;  %1706 = vrot.lane.b32.xlu0 %v7382_v10, %s7732_s8 }
 0x208   : > { %v1468_v12 = vpop.permute.xlu1 %1467  ;;  %v1466_v16 = vpop.permute.xlu0 %1465 }
 0x209   : > { %1561 = vst.msk [vmem:[#allocation3 + $0x18] sm:$0xff] %vm1557_vm8, %v1468_v12  ;;  %1560 = vst.msk [vmem:[#allocation3 + $0x10] sm:$0xff] %vm1557_vm8, %v1466_v16 }
 0x20a   : > { %1712 = vrot.lane.b32.xlu1 %v8537_v4, %s7732_s8  ;;  %1710 = vrot.lane.b32.xlu0 %v8540_v5, %s7732_s8 }
 0x20c   : > { %v1472_v18 = vpop.permute.xlu1 %1471  ;;  %v1470_v60 = vpop.permute.xlu0 %1469 }
 0x20d   : > { %1563 = vst.msk [vmem:[#allocation3 + $0x28] sm:$0xff] %vm1557_vm8, %v1472_v18  ;;  %1562 = vst.msk [vmem:[#allocation3 + $0x20] sm:$0xff] %vm1557_vm8, %v1470_v60 }
 0x20e   : > { %1716 = vrot.lane.b32.xlu1 %v7387_v14, %s7732_s8  ;;  %1714 = vrot.lane.b32.xlu0 %v7386_v15, %s7732_s8 }
 0x210   : > { %v1476_v63 = vpop.permute.xlu1 %1475  ;;  %v1474_v21 = vpop.permute.xlu0 %1473 }
 0x211   : > { %1565 = vst.msk [vmem:[#allocation3 + $0x38] sm:$0xff] %vm1557_vm8, %v1476_v63  ;;  %1564 = vst.msk [vmem:[#allocation3 + $0x30] sm:$0xff] %vm1557_vm8, %v1474_v21 }
 0x214   : > { %v1480_v4 = vpop.permute.xlu1 %1479  ;;  %v1478_v5 = vpop.permute.xlu0 %1477 }
 0x215   : > { %1567 = vst.msk [vmem:[#allocation3 + $0x48] sm:$0xff] %vm1557_vm8, %v1480_v4  ;;  %1566 = vst.msk [vmem:[#allocation3 + $0x40] sm:$0xff] %vm1557_vm8, %v1478_v5 }
 0x218   : > { %v1484_v29 = vpop.permute.xlu1 %1483  ;;  %v1482_v30 = vpop.permute.xlu0 %1481 }
 0x219   : > { %1569 = vst.msk [vmem:[#allocation3 + $0x58] sm:$0xff] %vm1557_vm8, %v1484_v29  ;;  %1568 = vst.msk [vmem:[#allocation3 + $0x50] sm:$0xff] %vm1557_vm8, %v1482_v30 }
 0x21c   : > { %v1488_v42 = vpop.permute.xlu1 %1487  ;;  %v1486_v43 = vpop.permute.xlu0 %1485 }
 0x21d   : > { %1571 = vst.msk [vmem:[#allocation3 + $0x68] sm:$0xff] %vm1557_vm8, %v1488_v42  ;;  %1570 = vst.msk [vmem:[#allocation3 + $0x60] sm:$0xff] %vm1557_vm8, %v1486_v43 }
 0x220   : > { %v1492_v46 = vpop.permute.xlu1 %1491  ;;  %v1490_v47 = vpop.permute.xlu0 %1489 }
 0x221   : > { %1573 = vst.msk [vmem:[#allocation3 + $0x78] sm:$0xff] %vm1557_vm8, %v1492_v46  ;;  %1572 = vst.msk [vmem:[#allocation3 + $0x70] sm:$0xff] %vm1557_vm8, %v1490_v47 }
 0x224   : > { %v1496_v50 = vpop.permute.xlu1 %1495  ;;  %v1494_v51 = vpop.permute.xlu0 %1493 }
 0x225   : > { %1575 = vst.msk [vmem:[#allocation3 + $0x88] sm:$0xff] %vm1557_vm8, %v1496_v50  ;;  %1574 = vst.msk [vmem:[#allocation3 + $0x80] sm:$0xff] %vm1557_vm8, %v1494_v51 }
 0x228   : > { %v1500_v54 = vpop.permute.xlu1 %1499  ;;  %v1498_v55 = vpop.permute.xlu0 %1497 }
 0x229   : > { %1577 = vst.msk [vmem:[#allocation3 + $0x98] sm:$0xff] %vm1557_vm8, %v1500_v54  ;;  %1576 = vst.msk [vmem:[#allocation3 + $0x90] sm:$0xff] %vm1557_vm8, %v1498_v55 }
 0x22c   : > { %v1504_v13 = vpop.permute.xlu1 %1503  ;;  %v1502_v17 = vpop.permute.xlu0 %1501 }
 0x22d   : > { %1579 = vst.msk [vmem:[#allocation3 + $0xa8] sm:$0xff] %vm1557_vm8, %v1504_v13  ;;  %1578 = vst.msk [vmem:[#allocation3 + $0xa0] sm:$0xff] %vm1557_vm8, %v1502_v17 }
 0x230   : > { %v1508_v58 = vpop.permute.xlu1 %1507  ;;  %v1506_v59 = vpop.permute.xlu0 %1505 }
 0x231   : > { %1581 = vst.msk [vmem:[#allocation3 + $0xb8] sm:$0xff] %vm1557_vm8, %v1508_v58  ;;  %1580 = vst.msk [vmem:[#allocation3 + $0xb0] sm:$0xff] %vm1557_vm8, %v1506_v59 }
 0x234   : > { %v1512_v0 = vpop.permute.xlu1 %1511  ;;  %v1510_v2 = vpop.permute.xlu0 %1509 }
 0x235   : > { %1583 = vst.msk [vmem:[#allocation3 + $0xc8] sm:$0xff] %vm1557_vm8, %v1512_v0  ;;  %1582 = vst.msk [vmem:[#allocation3 + $0xc0] sm:$0xff] %vm1557_vm8, %v1510_v2 }
 0x238   : > { %v1516_v1 = vpop.permute.xlu1 %1515  ;;  %v1514_v6 = vpop.permute.xlu0 %1513 }
 0x239   : > { %1585 = vst.msk [vmem:[#allocation3 + $0xd8] sm:$0xff] %vm1557_vm8, %v1516_v1  ;;  %1584 = vst.msk [vmem:[#allocation3 + $0xd0] sm:$0xff] %vm1557_vm8, %v1514_v6 }
 0x23c   : > { %v1520_v3 = vpop.permute.xlu1 %1519  ;;  %v1518_v61 = vpop.permute.xlu0 %1517 }
 0x23d   : > { %1587 = vst.msk [vmem:[#allocation3 + $0xe8] sm:$0xff] %vm1557_vm8, %v1520_v3  ;;  %1586 = vst.msk [vmem:[#allocation3 + $0xe0] sm:$0xff] %vm1557_vm8, %v1518_v61 }
 0x240   : > { %v1524_v62 = vpop.permute.xlu1 %1523  ;;  %v1522_v7 = vpop.permute.xlu0 %1521 }
 0x241   : > { %1589 = vst.msk [vmem:[#allocation3 + $0xf8] sm:$0xff] %vm1557_vm8, %v1524_v62  ;;  %1588 = vst.msk [vmem:[#allocation3 + $0xf0] sm:$0xff] %vm1557_vm8, %v1522_v7 }
 0x244   : > { %v1657_v8 = vpop.permute.xlu1 %1656  ;;  %v1655_v9 = vpop.permute.xlu0 %1654 }
 0x245   : > { %1752 = vst.msk [vmem:[#allocation3 + $0x8] sm:$0xff] %vm1750_vm9, %v1657_v8  ;;  %1751 = vst.msk [vmem:[#allocation3] sm:$0xff] %vm1750_vm9, %v1655_v9 }
 0x248   : > { %v1661_v19 = vpop.permute.xlu1 %1660  ;;  %v1659_v20 = vpop.permute.xlu0 %1658 }
 0x249   : > { %1754 = vst.msk [vmem:[#allocation3 + $0x18] sm:$0xff] %vm1750_vm9, %v1661_v19  ;;  %1753 = vst.msk [vmem:[#allocation3 + $0x10] sm:$0xff] %vm1750_vm9, %v1659_v20 }
 0x24c   : > { %v1665_v22 = vpop.permute.xlu1 %1664  ;;  %v1663_v23 = vpop.permute.xlu0 %1662  ;;  %v1783_v24 = vld [vmem:[#allocation3] sm:$0xff]  ;;  %v1784_v25 = vld [vmem:[#allocation3 + $0x8] sm:$0xff] }
 0x24d   : > { %1756 = vst.msk [vmem:[#allocation3 + $0x28] sm:$0xff] %vm1750_vm9, %v1665_v22  ;;  %1755 = vst.msk [vmem:[#allocation3 + $0x20] sm:$0xff] %vm1750_vm9, %v1663_v23  ;;  %v1815_v26 = vpack.c.bf16 %v1784_v25, %v1783_v24 }
 0x24f   : > { %7550 = vmatprep.mubr.msk.bf16.mxu0 %vm1874_vm10, %v1815_v26 }
 0x250   : > { %v1669_v27 = vpop.permute.xlu1 %1668  ;;  %v1667_v28 = vpop.permute.xlu0 %1666  ;;  %v1785_v31 = vld [vmem:[#allocation3 + $0x10] sm:$0xff]  ;;  %v1786_v32 = vld [vmem:[#allocation3 + $0x18] sm:$0xff] }
 0x251   : > { %1758 = vst.msk [vmem:[#allocation3 + $0x38] sm:$0xff] %vm1750_vm9, %v1669_v27  ;;  %1757 = vst.msk [vmem:[#allocation3 + $0x30] sm:$0xff] %vm1750_vm9, %v1667_v28  ;;  %v1816_v33 = vpack.c.bf16 %v1786_v32, %v1785_v31 }
 0x253   : > { %7551 = vmatmul.mubr.msk.bf16.vlgmr.msra.gmra.mxu0 %vm1874_vm10, %v1816_v33 }
 0x254   : > { %v1673_v34 = vpop.permute.xlu1 %1672  ;;  %v1671_v35 = vpop.permute.xlu0 %1670  ;;  %v1787_v36 = vld [vmem:[#allocation3 + $0x20] sm:$0xff]  ;;  %v1788_v37 = vld [vmem:[#allocation3 + $0x28] sm:$0xff] }
 0x255   : > { %1760 = vst.msk [vmem:[#allocation3 + $0x48] sm:$0xff] %vm1750_vm9, %v1673_v34  ;;  %1759 = vst.msk [vmem:[#allocation3 + $0x40] sm:$0xff] %vm1750_vm9, %v1671_v35  ;;  %v1817_v38 = vpack.c.bf16 %v1788_v37, %v1787_v36  ;;  %v11786_v36 = vmov 0.0   ;;  %v9003_v37 = vld [vmem:[%s11754_s2] ss:$0 sm:$0xff] }
 0x256   : > { %2285 = vst.msk [vmem:[#allocation2 + $0x18] sm:$0xff] %vm204_vm0, %v11786_v36  ;;  %2286 = vst.msk [vmem:[#allocation2 + $0x20] sm:$0xff] %vm204_vm0, %v11786_v36 }
 0x257   : > { %7554 = vmatprep.mubr.msk.bf16.mxu0 %vm1874_vm10, %v1817_v38  ;;  %2281 = vst.msk [vmem:[#allocation2] sm:$0xff] %vm204_vm0, %v11786_v36  ;;  %2282 = vst.msk [vmem:[#allocation2 + $0x8] sm:$0xff] %vm204_vm0, %v11786_v36 }
 0x258   : > { %v1677_v39 = vpop.permute.xlu1 %1676  ;;  %v1675_v40 = vpop.permute.xlu0 %1674  ;;  %v1789_v41 = vld [vmem:[#allocation3 + $0x30] sm:$0xff]  ;;  %v1790_v44 = vld [vmem:[#allocation3 + $0x38] sm:$0xff]  ;;  %2288 = vst.msk [vmem:[#allocation2 + $0x30] sm:$0xff] %vm204_vm0, %v11786_v36  ;;  %2289 = vst.msk [vmem:[#allocation2 + $0x38] sm:$0xff] %vm204_vm0, %v11786_v36 }
 0x259   : > { %1762 = vst.msk [vmem:[#allocation3 + $0x58] sm:$0xff] %vm1750_vm9, %v1677_v39  ;;  %1761 = vst.msk [vmem:[#allocation3 + $0x50] sm:$0xff] %vm1750_vm9, %v1675_v40  ;;  %v1818_v45 = vpack.c.bf16 %v1790_v44, %v1789_v41 }
 0x25a   : > { %2291 = vst.msk [vmem:[#allocation2 + $0x48] sm:$0xff] %vm204_vm0, %v11786_v36  ;;  %2292 = vst.msk [vmem:[#allocation2 + $0x50] sm:$0xff] %vm204_vm0, %v11786_v36 }
 0x25b   : > { %7555 = vmatmul.mubr.msk.bf16.gmra.mxu0 %vm1874_vm10, %v1818_v45  ;;  %2294 = vst.msk [vmem:[#allocation2 + $0x60] sm:$0xff] %vm204_vm0, %v11786_v36  ;;  %2295 = vst.msk [vmem:[#allocation2 + $0x68] sm:$0xff] %vm204_vm0, %v11786_v36 }
 0x25c   : > { %v1681_v48 = vpop.permute.xlu1 %1680  ;;  %v1679_v49 = vpop.permute.xlu0 %1678  ;;  %v1791_v52 = vld [vmem:[#allocation3 + $0x40] sm:$0xff]  ;;  %v1792_v53 = vld [vmem:[#allocation3 + $0x48] sm:$0xff]  ;;  %2297 = vst.msk [vmem:[#allocation2 + $0x78] sm:$0xff] %vm204_vm0, %v11786_v36  ;;  %2298 = vst.msk [vmem:[#allocation2 + $0x80] sm:$0xff] %vm204_vm0, %v11786_v36 }
 0x25d   : > { %1764 = vst.msk [vmem:[#allocation3 + $0x68] sm:$0xff] %vm1750_vm9, %v1681_v48  ;;  %1763 = vst.msk [vmem:[#allocation3 + $0x60] sm:$0xff] %vm1750_vm9, %v1679_v49  ;;  %v1819_v56 = vpack.c.bf16 %v1792_v53, %v1791_v52 }
 0x25e   : > { %2300 = vst.msk [vmem:[#allocation2 + $0x90] sm:$0xff] %vm204_vm0, %v11786_v36  ;;  %2301 = vst.msk [vmem:[#allocation2 + $0x98] sm:$0xff] %vm204_vm0, %v11786_v36 }
 0x25f   : > { %7558 = vmatprep.mubr.msk.bf16.mxu0 %vm1874_vm10, %v1819_v56  ;;  %2303 = vst.msk [vmem:[#allocation2 + $0xa8] sm:$0xff] %vm204_vm0, %v11786_v36  ;;  %2304 = vst.msk [vmem:[#allocation2 + $0xb0] sm:$0xff] %vm204_vm0, %v11786_v36 }
 0x260   : > { %v1685_v10 = vpop.permute.xlu1 %1684  ;;  %v1683_v57 = vpop.permute.xlu0 %1682  ;;  %v1793_v11 = vld [vmem:[#allocation3 + $0x50] sm:$0xff]  ;;  %v1794_v12 = vld [vmem:[#allocation3 + $0x58] sm:$0xff]  ;;  %2306 = vst.msk [vmem:[#allocation2 + $0xc0] sm:$0xff] %vm204_vm0, %v11786_v36  ;;  %2307 = vst.msk [vmem:[#allocation2 + $0xc8] sm:$0xff] %vm204_vm0, %v11786_v36 }
 0x261   : > { %1766 = vst.msk [vmem:[#allocation3 + $0x78] sm:$0xff] %vm1750_vm9, %v1685_v10  ;;  %1765 = vst.msk [vmem:[#allocation3 + $0x70] sm:$0xff] %vm1750_vm9, %v1683_v57  ;;  %v1820_v16 = vpack.c.bf16 %v1794_v12, %v1793_v11 }
 0x262   : > { %2309 = vst.msk [vmem:[#allocation2 + $0xd8] sm:$0xff] %vm204_vm0, %v11786_v36  ;;  %2310 = vst.msk [vmem:[#allocation2 + $0xe0] sm:$0xff] %vm204_vm0, %v11786_v36 }
 0x263   : > { %7559 = vmatmul.mubr.msk.bf16.gmra.mxu0 %vm1874_vm10, %v1820_v16  ;;  %2312 = vst.msk [vmem:[#allocation2 + $0xf0] sm:$0xff] %vm204_vm0, %v11786_v36  ;;  %2313 = vst.msk [vmem:[#allocation2 + $0xf8] sm:$0xff] %vm204_vm0, %v11786_v36 }
 0x264   : > { %v1689_v14 = vpop.permute.xlu1 %1688  ;;  %v1687_v15 = vpop.permute.xlu0 %1686  ;;  %v1795_v18 = vld [vmem:[#allocation3 + $0x60] sm:$0xff]  ;;  %v1796_v60 = vld [vmem:[#allocation3 + $0x68] sm:$0xff]  ;;  %2315 = vst.msk [vmem:[#allocation2 + $0x108] sm:$0xff] %vm204_vm0, %v11786_v36  ;;  %2316 = vst.msk [vmem:[#allocation2 + $0x110] sm:$0xff] %vm204_vm0, %v11786_v36 }
 0x265   : > { %1768 = vst.msk [vmem:[#allocation3 + $0x88] sm:$0xff] %vm1750_vm9, %v1689_v14  ;;  %1767 = vst.msk [vmem:[#allocation3 + $0x80] sm:$0xff] %vm1750_vm9, %v1687_v15  ;;  %v1821_v63 = vpack.c.bf16 %v1796_v60, %v1795_v18 }
 0x266   : > { %2318 = vst.msk [vmem:[#allocation2 + $0x120] sm:$0xff] %vm204_vm0, %v11786_v36  ;;  %2319 = vst.msk [vmem:[#allocation2 + $0x128] sm:$0xff] %vm204_vm0, %v11786_v36 }
 0x267   : > { %7562 = vmatprep.mubr.msk.bf16.mxu0 %vm1874_vm10, %v1821_v63  ;;  %2321 = vst.msk [vmem:[#allocation2 + $0x138] sm:$0xff] %vm204_vm0, %v11786_v36  ;;  %2322 = vst.msk [vmem:[#allocation2 + $0x140] sm:$0xff] %vm204_vm0, %v11786_v36 }
 0x268   : > { %v1693_v21 = vpop.permute.xlu1 %1692  ;;  %v1691_v4 = vpop.permute.xlu0 %1690  ;;  %v1797_v5 = vld [vmem:[#allocation3 + $0x70] sm:$0xff]  ;;  %v1798_v29 = vld [vmem:[#allocation3 + $0x78] sm:$0xff]  ;;  %2324 = vst.msk [vmem:[#allocation2 + $0x150] sm:$0xff] %vm204_vm0, %v11786_v36  ;;  %2325 = vst.msk [vmem:[#allocation2 + $0x158] sm:$0xff] %vm204_vm0, %v11786_v36 }
 0x269   : > { %1770 = vst.msk [vmem:[#allocation3 + $0x98] sm:$0xff] %vm1750_vm9, %v1693_v21  ;;  %1769 = vst.msk [vmem:[#allocation3 + $0x90] sm:$0xff] %vm1750_vm9, %v1691_v4  ;;  %v1822_v30 = vpack.c.bf16 %v1798_v29, %v1797_v5 }
 0x26a   : > { %2327 = vst.msk [vmem:[#allocation2 + $0x168] sm:$0xff] %vm204_vm0, %v11786_v36  ;;  %2328 = vst.msk [vmem:[#allocation2 + $0x170] sm:$0xff] %vm204_vm0, %v11786_v36 }
 0x26b   : > { %7563 = vmatmul.mubr.msk.bf16.gmra.mxu0 %vm1874_vm10, %v1822_v30  ;;  %2330 = vst.msk [vmem:[#allocation2 + $0x180] sm:$0xff] %vm204_vm0, %v11786_v36  ;;  %2331 = vst.msk [vmem:[#allocation2 + $0x188] sm:$0xff] %vm204_vm0, %v11786_v36 }
 0x26c   : > { %v1697_v42 = vpop.permute.xlu1 %1696  ;;  %v1695_v43 = vpop.permute.xlu0 %1694  ;;  %v1799_v46 = vld [vmem:[#allocation3 + $0x80] sm:$0xff]  ;;  %v1800_v47 = vld [vmem:[#allocation3 + $0x88] sm:$0xff]  ;;  %2333 = vst.msk [vmem:[#allocation2 + $0x198] sm:$0xff] %vm204_vm0, %v11786_v36  ;;  %2334 = vst.msk [vmem:[#allocation2 + $0x1a0] sm:$0xff] %vm204_vm0, %v11786_v36 }
 0x26d   : > { %1772 = vst.msk [vmem:[#allocation3 + $0xa8] sm:$0xff] %vm1750_vm9, %v1697_v42  ;;  %1771 = vst.msk [vmem:[#allocation3 + $0xa0] sm:$0xff] %vm1750_vm9, %v1695_v43  ;;  %v1823_v50 = vpack.c.bf16 %v1800_v47, %v1799_v46 }
 0x26e   : > { %2287 = vst.msk [vmem:[#allocation2 + $0x28] sm:$0x3] %vm2283_vm11, %v11786_v36  ;;  %2284 = vst.msk [vmem:[#allocation2 + $0x10] sm:$0x3] %vm2283_vm11, %v11786_v36 }
 0x26f   : > { %7566 = vmatprep.mubr.msk.bf16.mxu1 %vm1874_vm10, %v1823_v50  ;;  %2290 = vst.msk [vmem:[#allocation2 + $0x40] sm:$0x3] %vm2283_vm11, %v11786_v36  ;;  %2293 = vst.msk [vmem:[#allocation2 + $0x58] sm:$0x3] %vm2283_vm11, %v11786_v36 }
 0x270   : > { %v1701_v51 = vpop.permute.xlu1 %1700  ;;  %v1699_v54 = vpop.permute.xlu0 %1698  ;;  %v1801_v55 = vld [vmem:[#allocation3 + $0x90] sm:$0xff]  ;;  %v1802_v13 = vld [vmem:[#allocation3 + $0x98] sm:$0xff]  ;;  %2296 = vst.msk [vmem:[#allocation2 + $0x70] sm:$0x3] %vm2283_vm11, %v11786_v36  ;;  %2299 = vst.msk [vmem:[#allocation2 + $0x88] sm:$0x3] %vm2283_vm11, %v11786_v36 }
 0x271   : > { %1774 = vst.msk [vmem:[#allocation3 + $0xb8] sm:$0xff] %vm1750_vm9, %v1701_v51  ;;  %1773 = vst.msk [vmem:[#allocation3 + $0xb0] sm:$0xff] %vm1750_vm9, %v1699_v54  ;;  %v1824_v17 = vpack.c.bf16 %v1802_v13, %v1801_v55 }
 0x272   : > { %2302 = vst.msk [vmem:[#allocation2 + $0xa0] sm:$0x3] %vm2283_vm11, %v11786_v36  ;;  %2305 = vst.msk [vmem:[#allocation2 + $0xb8] sm:$0x3] %vm2283_vm11, %v11786_v36 }
 0x273   : > { %7567 = vmatmul.mubr.msk.bf16.vlgmr.msra.gmra.mxu1 %vm1874_vm10, %v1824_v17  ;;  %2308 = vst.msk [vmem:[#allocation2 + $0xd0] sm:$0x3] %vm2283_vm11, %v11786_v36  ;;  %2311 = vst.msk [vmem:[#allocation2 + $0xe8] sm:$0x3] %vm2283_vm11, %v11786_v36 }
 0x274   : > { %v1705_v58 = vpop.permute.xlu1 %1704  ;;  %v1703_v59 = vpop.permute.xlu0 %1702  ;;  %v1803_v0 = vld [vmem:[#allocation3 + $0xa0] sm:$0xff]  ;;  %v1804_v2 = vld [vmem:[#allocation3 + $0xa8] sm:$0xff]  ;;  %2314 = vst.msk [vmem:[#allocation2 + $0x100] sm:$0x3] %vm2283_vm11, %v11786_v36  ;;  %2317 = vst.msk [vmem:[#allocation2 + $0x118] sm:$0x3] %vm2283_vm11, %v11786_v36 }
 0x275   : > { %1776 = vst.msk [vmem:[#allocation3 + $0xc8] sm:$0xff] %vm1750_vm9, %v1705_v58  ;;  %1775 = vst.msk [vmem:[#allocation3 + $0xc0] sm:$0xff] %vm1750_vm9, %v1703_v59  ;;  %v1825_v1 = vpack.c.bf16 %v1804_v2, %v1803_v0 }
 0x276   : > { %2320 = vst.msk [vmem:[#allocation2 + $0x130] sm:$0x3] %vm2283_vm11, %v11786_v36  ;;  %2323 = vst.msk [vmem:[#allocation2 + $0x148] sm:$0x3] %vm2283_vm11, %v11786_v36 }
 0x277   : > { %7570 = vmatprep.mubr.msk.bf16.mxu1 %vm1874_vm10, %v1825_v1  ;;  %2326 = vst.msk [vmem:[#allocation2 + $0x160] sm:$0x3] %vm2283_vm11, %v11786_v36  ;;  %2329 = vst.msk [vmem:[#allocation2 + $0x178] sm:$0x3] %vm2283_vm11, %v11786_v36 }
 0x278   : > { %v1709_v6 = vpop.permute.xlu1 %1708  ;;  %v1707_v3 = vpop.permute.xlu0 %1706  ;;  %v1805_v61 = vld [vmem:[#allocation3 + $0xb0] sm:$0xff]  ;;  %v1806_v62 = vld [vmem:[#allocation3 + $0xb8] sm:$0xff]  ;;  %2332 = vst.msk [vmem:[#allocation2 + $0x190] sm:$0x3] %vm2283_vm11, %v11786_v36  ;;  %2335 = vst.msk [vmem:[#allocation2 + $0x1a8] sm:$0x3] %vm2283_vm11, %v11786_v36 }
 0x279   : > { %1778 = vst.msk [vmem:[#allocation3 + $0xd8] sm:$0xff] %vm1750_vm9, %v1709_v6  ;;  %1777 = vst.msk [vmem:[#allocation3 + $0xd0] sm:$0xff] %vm1750_vm9, %v1707_v3  ;;  %v1826_v7 = vpack.c.bf16 %v1806_v62, %v1805_v61 }
 0x27b   : > { %7571 = vmatmul.mubr.msk.bf16.gmra.mxu1 %vm1874_vm10, %v1826_v7 }
 0x27c   : > { %v1713_v8 = vpop.permute.xlu1 %1712  ;;  %v1711_v9 = vpop.permute.xlu0 %1710  ;;  %v1807_v19 = vld [vmem:[#allocation3 + $0xc0] sm:$0xff]  ;;  %v1808_v20 = vld [vmem:[#allocation3 + $0xc8] sm:$0xff] }
 0x27d   : > { %1780 = vst.msk [vmem:[#allocation3 + $0xe8] sm:$0xff] %vm1750_vm9, %v1713_v8  ;;  %1779 = vst.msk [vmem:[#allocation3 + $0xe0] sm:$0xff] %vm1750_vm9, %v1711_v9  ;;  %v1827_v22 = vpack.c.bf16 %v1808_v20, %v1807_v19 }
 0x27f   : > { %7574 = vmatprep.mubr.msk.bf16.mxu1 %vm1874_vm10, %v1827_v22 }
 0x280   : > { %v1717_v23 = vpop.permute.xlu1 %1716  ;;  %v1715_v24 = vpop.permute.xlu0 %1714  ;;  %v1809_v25 = vld [vmem:[#allocation3 + $0xd0] sm:$0xff]  ;;  %v1810_v26 = vld [vmem:[#allocation3 + $0xd8] sm:$0xff] }
 0x281   : > { %1782 = vst.msk [vmem:[#allocation3 + $0xf8] sm:$0xff] %vm1750_vm9, %v1717_v23  ;;  %1781 = vst.msk [vmem:[#allocation3 + $0xf0] sm:$0xff] %vm1750_vm9, %v1715_v24  ;;  %v1828_v27 = vpack.c.bf16 %v1810_v26, %v1809_v25 }
 0x283   : > { %7575 = vmatmul.mubr.msk.bf16.gmra.mxu1 %vm1874_vm10, %v1828_v27 }
 0x284   : > { %v1811_v28 = vld [vmem:[#allocation3 + $0xe0] sm:$0xff]  ;;  %v1812_v31 = vld [vmem:[#allocation3 + $0xe8] sm:$0xff] }
 0x285   : > { %v1829_v32 = vpack.c.bf16 %v1812_v31, %v1811_v28 }
 0x287   : > { %7578 = vmatprep.mubr.msk.bf16.mxu1 %vm1874_vm10, %v1829_v32 }
 0x288   : > { %v1813_v33 = vld [vmem:[#allocation3 + $0xf0] sm:$0xff]  ;;  %v1814_v34 = vld [vmem:[#allocation3 + $0xf8] sm:$0xff] }
 0x289   : > { %v1830_v35 = vpack.c.bf16 %v1814_v34, %v1813_v33 }
 0x28b   : > { %7579 = vmatmul.mubr.msk.bf16.gmra.mxu1 %vm1874_vm10, %v1830_v35 }
 0x313   : > { %v7552_v38 = vpop.f32.mrf.mxu0 }
 0x314   : > { %v1970_v39 = vadd.f32 %v7552_v38, %v9003_v37 }
 0x315   : > { %v1961_v40 = vpop.f32.mrf.mxu0 }
 0x316   : > { %v2090_v41 = vadd.f32 3.0, %v1970_v39  ;;  %v1962_v44 = vadd.f32 %v9003_v37, %v1961_v40 }
 0x317   : > { %v7553_v45 = vpop.f32.mrf.mxu0 }
 0x318   : > { %v2122_v48 = vmax.f32 %v2090_v41, 0.0  ;;  %v2088_v49 = vadd.f32 3.0, %v1962_v44  ;;  %v1973_v52 = vadd.f32 %v7553_v45, %v9003_v37 }
 0x319   : > { %v1964_v53 = vpop.f32.mrf.mxu0 }
 0x31a   : > { %v2154_v56 = vmin.f32 %v2122_v48, 6.0  ;;  %v2120_v10 = vmax.f32 %v2088_v49, 0.0  ;;  %v2091_v57 = vadd.f32 3.0, %v1973_v52  ;;  %v1965_v11 = vadd.f32 %v9003_v37, %v1964_v53 }
 0x31b   : > { %v7556_v12 = vpop.f32.mrf.mxu0 }
 0x31c   : > { %v2186_v16 = vmul.f32 %v2154_v56, %v1970_v39  ;;  %v2152_v14 = vmin.f32 %v2120_v10, 6.0  ;;  %v2123_v15 = vmax.f32 %v2091_v57, 0.0  ;;  %v2089_v18 = vadd.f32 3.0, %v1965_v11 }
 0x31d   : > { %v1986_v60 = vadd.f32 %v7556_v12, %v9003_v37  ;;  %v1977_v63 = vpop.f32.mrf.mxu0 }
 0x31e   : > { %v2218_v21 = vmul.f32 0.16666667, %v2186_v16  ;;  %v2184_v4 = vmul.f32 %v2152_v14, %v1962_v44  ;;  %v2155_v5 = vmin.f32 %v2123_v15, 6.0  ;;  %v2121_v29 = vmax.f32 %v2089_v18, 0.0 }
 0x31f   : > { %v2094_v30 = vadd.f32 3.0, %v1986_v60  ;;  %v1978_v42 = vadd.f32 %v9003_v37, %v1977_v63  ;;  %v7557_v43 = vpop.f32.mrf.mxu0 }
 0x320   : > { %v2216_v46 = vmul.f32 0.16666667, %v2184_v4  ;;  %v2187_v47 = vmul.f32 %v2155_v5, %v1973_v52  ;;  %v2153_v50 = vmin.f32 %v2121_v29, 6.0  ;;  %v1989_v51 = vadd.f32 %v7557_v43, %v9003_v37  ;;  %2251 = vst.msk [vmem:[%s9050_s16 + $0x10] sm:$0xff] %vm2248_vm12, %v2218_v21 }
 0x321   : > { %v2126_v54 = vmax.f32 %v2094_v30, 0.0  ;;  %v2092_v55 = vadd.f32 3.0, %v1978_v42  ;;  %v1980_v13 = vpop.f32.mrf.mxu0 }
 0x322   : > { %v2219_v17 = vmul.f32 0.16666667, %v2187_v47  ;;  %v2185_v58 = vmul.f32 %v2153_v50, %v1965_v11  ;;  %v2095_v59 = vadd.f32 3.0, %v1989_v51  ;;  %v1981_v0 = vadd.f32 %v9003_v37, %v1980_v13  ;;  %2368 = vrot.lane.b32.xlu0 %v2216_v46, %s7734_s13  ;;  %2249 = vst.msk [vmem:[%s9050_s16] sm:$0xff] %vm2248_vm12, %v2216_v46 }
 0x323   : > { %v2158_v2 = vmin.f32 %v2126_v54, 6.0  ;;  %v2124_v1 = vmax.f32 %v2092_v55, 0.0  ;;  %v7560_v6 = vpop.f32.mrf.mxu0 }
 0x324   : > { %v2217_v3 = vmul.f32 0.16666667, %v2185_v58  ;;  %v2127_v61 = vmax.f32 %v2095_v59, 0.0  ;;  %v2093_v62 = vadd.f32 3.0, %v1981_v0  ;;  %v2002_v7 = vadd.f32 %v7560_v6, %v9003_v37  ;;  %2252 = vst.msk [vmem:[%s9050_s16 + $0x18] sm:$0xff] %vm2248_vm12, %v2219_v17 }
 0x325   : > { %v2190_v8 = vmul.f32 %v2158_v2, %v1986_v60  ;;  %v2156_v9 = vmin.f32 %v2124_v1, 6.0  ;;  %v1993_v19 = vpop.f32.mrf.mxu0 }
 0x326   : > { %v2159_v20 = vmin.f32 %v2127_v61, 6.0  ;;  %v2125_v22 = vmax.f32 %v2093_v62, 0.0  ;;  %v2098_v23 = vadd.f32 3.0, %v2002_v7  ;;  %v1994_v24 = vadd.f32 %v9003_v37, %v1993_v19  ;;  %2370 = vrot.lane.b32.xlu1 %v2217_v3, %s7734_s13  ;;  %2372 = vrot.lane.b32.xlu0 %v2218_v21, %s7734_s13  ;;  %2250 = vst.msk [vmem:[%s9050_s16 + $0x8] sm:$0xff] %vm2248_vm12, %v2217_v3 }
 0x327   : > { %v2222_v25 = vmul.f32 0.16666667, %v2190_v8  ;;  %v2188_v26 = vmul.f32 %v2156_v9, %v1978_v42  ;;  %v7561_v27 = vpop.f32.mrf.mxu0 }
 0x328   : > { %v2191_v28 = vmul.f32 %v2159_v20, %v1989_v51  ;;  %v2157_v31 = vmin.f32 %v2125_v22, 6.0  ;;  %v2130_v32 = vmax.f32 %v2098_v23, 0.0  ;;  %v2096_v33 = vadd.f32 3.0, %v1994_v24 }
 0x329   : > { %v2220_v34 = vmul.f32 0.16666667, %v2188_v26  ;;  %v2005_v35 = vadd.f32 %v7561_v27, %v9003_v37  ;;  %v1996_v38 = vpop.f32.mrf.mxu0  ;;  %2255 = vst.msk [vmem:[%s9050_s16 + $0x30] sm:$0xff] %vm2248_vm12, %v2222_v25 }
 0x32a   : > { %v2223_v39 = vmul.f32 0.16666667, %v2191_v28  ;;  %v2189_v40 = vmul.f32 %v2157_v31, %v1981_v0  ;;  %v2162_v41 = vmin.f32 %v2130_v32, 6.0  ;;  %v2128_v44 = vmax.f32 %v2096_v33, 0.0  ;;  %2374 = vrot.lane.b32.xlu1 %v2219_v17, %s7734_s13 }
 0x32b   : > { %v2099_v45 = vadd.f32 3.0, %v2005_v35  ;;  %v1997_v48 = vadd.f32 %v9003_v37, %v1996_v38  ;;  %2376 = vrot.lane.b32.xlu0 %v2220_v34, %s7734_s13  ;;  %v7564_v49 = vpop.f32.mrf.mxu0  ;;  %2253 = vst.msk [vmem:[%s9050_s16 + $0x20] sm:$0xff] %vm2248_vm12, %v2220_v34 }
 0x32c   : > { %v2221_v52 = vmul.f32 0.16666667, %v2189_v40  ;;  %v2194_v53 = vmul.f32 %v2162_v41, %v2002_v7  ;;  %v2160_v56 = vmin.f32 %v2128_v44, 6.0  ;;  %v2018_v10 = vadd.f32 %v7564_v49, %v9003_v37  ;;  %2256 = vst.msk [vmem:[%s9050_s16 + $0x38] sm:$0xff] %vm2248_vm12, %v2223_v39 }
 0x32d   : > { %v2131_v57 = vmax.f32 %v2099_v45, 0.0  ;;  %v2097_v11 = vadd.f32 3.0, %v1997_v48  ;;  %v2009_v12 = vpop.f32.mrf.mxu0 }
 0x32e   : > { %v2226_v16 = vmul.f32 0.16666667, %v2194_v53  ;;  %v2192_v14 = vmul.f32 %v2160_v56, %v1994_v24  ;;  %v2102_v15 = vadd.f32 3.0, %v2018_v10  ;;  %v2010_v18 = vadd.f32 %v9003_v37, %v2009_v12  ;;  %2378 = vrot.lane.b32.xlu1 %v2221_v52, %s7734_s13  ;;  %2254 = vst.msk [vmem:[%s9050_s16 + $0x28] sm:$0xff] %vm2248_vm12, %v2221_v52 }
 0x32f   : > { %v2163_v60 = vmin.f32 %v2131_v57, 6.0  ;;  %v2129_v63 = vmax.f32 %v2097_v11, 0.0  ;;  %2380 = vrot.lane.b32.xlu0 %v2222_v25, %s7734_s13  ;;  %v7565_v21 = vpop.f32.mrf.mxu0 }
 0x330   : > { %v2224_v4 = vmul.f32 0.16666667, %v2192_v14  ;;  %v2134_v5 = vmax.f32 %v2102_v15, 0.0  ;;  %v2100_v29 = vadd.f32 3.0, %v2010_v18  ;;  %v2021_v30 = vadd.f32 %v7565_v21, %v9003_v37  ;;  %2259 = vst.msk [vmem:[%s9050_s16 + $0x50] sm:$0xff] %vm2248_vm12, %v2226_v16 }
 0x331   : > { %v2195_v42 = vmul.f32 %v2163_v60, %v2005_v35  ;;  %v2161_v43 = vmin.f32 %v2129_v63, 6.0  ;;  %v2012_v46 = vpop.f32.mrf.mxu0 }
 0x332   : > { %v2166_v47 = vmin.f32 %v2134_v5, 6.0  ;;  %v2132_v50 = vmax.f32 %v2100_v29, 0.0  ;;  %v2103_v51 = vadd.f32 3.0, %v2021_v30  ;;  %v2013_v54 = vadd.f32 %v9003_v37, %v2012_v46  ;;  %2382 = vrot.lane.b32.xlu1 %v2223_v39, %s7734_s13  ;;  %2257 = vst.msk [vmem:[%s9050_s16 + $0x40] sm:$0xff] %vm2248_vm12, %v2224_v4 }
 0x333   : > { %v2227_v55 = vmul.f32 0.16666667, %v2195_v42  ;;  %v2193_v13 = vmul.f32 %v2161_v43, %v1997_v48  ;;  %2384 = vrot.lane.b32.xlu0 %v2224_v4, %s7734_s13  ;;  %v7568_v17 = vpop.f32.mrf.mxu1 }
 0x334   : > { %v2198_v58 = vmul.f32 %v2166_v47, %v2018_v10  ;;  %v2164_v59 = vmin.f32 %v2132_v50, 6.0  ;;  %v2135_v0 = vmax.f32 %v2103_v51, 0.0  ;;  %v2101_v2 = vadd.f32 3.0, %v2013_v54 }
 0x335   : > { %v2225_v1 = vmul.f32 0.16666667, %v2193_v13  ;;  %v2034_v6 = vadd.f32 %v7568_v17, %v9003_v37  ;;  %v2025_v3 = vpop.f32.mrf.mxu1  ;;  %2260 = vst.msk [vmem:[%s9050_s16 + $0x58] sm:$0xff] %vm2248_vm12, %v2227_v55 }
 0x336   : > { %v2230_v61 = vmul.f32 0.16666667, %v2198_v58  ;;  %v2196_v62 = vmul.f32 %v2164_v59, %v2010_v18  ;;  %v2167_v7 = vmin.f32 %v2135_v0, 6.0  ;;  %v2133_v8 = vmax.f32 %v2101_v2, 0.0 }
 0x337   : > { %v2106_v9 = vadd.f32 3.0, %v2034_v6  ;;  %v2026_v19 = vadd.f32 %v9003_v37, %v2025_v3  ;;  %2386 = vrot.lane.b32.xlu1 %v2225_v1, %s7734_s13  ;;  %2388 = vrot.lane.b32.xlu0 %v2226_v16, %s7734_s13  ;;  %v7569_v20 = vpop.f32.mrf.mxu1  ;;  %2258 = vst.msk [vmem:[%s9050_s16 + $0x48] sm:$0xff] %vm2248_vm12, %v2225_v1 }
 0x338   : > { %v2228_v22 = vmul.f32 0.16666667, %v2196_v62  ;;  %v2199_v23 = vmul.f32 %v2167_v7, %v2021_v30  ;;  %v2165_v24 = vmin.f32 %v2133_v8, 6.0  ;;  %v2037_v25 = vadd.f32 %v7569_v20, %v9003_v37  ;;  %2263 = vst.msk [vmem:[%s9050_s16 + $0x70] sm:$0xff] %vm2248_vm12, %v2230_v61 }
 0x339   : > { %v2138_v26 = vmax.f32 %v2106_v9, 0.0  ;;  %v2104_v27 = vadd.f32 3.0, %v2026_v19  ;;  %v2028_v28 = vpop.f32.mrf.mxu1 }
 0x33a   : > { %v2231_v31 = vmul.f32 0.16666667, %v2199_v23  ;;  %v2197_v32 = vmul.f32 %v2165_v24, %v2013_v54  ;;  %v2107_v33 = vadd.f32 3.0, %v2037_v25  ;;  %v2029_v34 = vadd.f32 %v9003_v37, %v2028_v28  ;;  %2261 = vst.msk [vmem:[%s9050_s16 + $0x60] sm:$0xff] %vm2248_vm12, %v2228_v22 }
 0x33b   : > { %v2170_v35 = vmin.f32 %v2138_v26, 6.0  ;;  %v2136_v38 = vmax.f32 %v2104_v27, 0.0  ;;  %2390 = vrot.lane.b32.xlu1 %v2227_v55, %s7734_s13  ;;  %2392 = vrot.lane.b32.xlu0 %v2228_v22, %s7734_s13  ;;  %v7572_v39 = vpop.f32.mrf.mxu1 }
 0x33c   : > { %v2229_v40 = vmul.f32 0.16666667, %v2197_v32  ;;  %v2139_v41 = vmax.f32 %v2107_v33, 0.0  ;;  %v2105_v44 = vadd.f32 3.0, %v2029_v34  ;;  %v2050_v45 = vadd.f32 %v7572_v39, %v9003_v37  ;;  %2264 = vst.msk [vmem:[%s9050_s16 + $0x78] sm:$0xff] %vm2248_vm12, %v2231_v31 }
 0x33d   : > { %v2202_v48 = vmul.f32 %v2170_v35, %v2034_v6  ;;  %v2168_v49 = vmin.f32 %v2136_v38, 6.0  ;;  %v2041_v52 = vpop.f32.mrf.mxu1 }
 0x33e   : > { %v2171_v53 = vmin.f32 %v2139_v41, 6.0  ;;  %v2137_v56 = vmax.f32 %v2105_v44, 0.0  ;;  %v2110_v10 = vadd.f32 3.0, %v2050_v45  ;;  %v2042_v57 = vadd.f32 %v9003_v37, %v2041_v52  ;;  %2262 = vst.msk [vmem:[%s9050_s16 + $0x68] sm:$0xff] %vm2248_vm12, %v2229_v40 }
 0x33f   : > { %v2234_v11 = vmul.f32 0.16666667, %v2202_v48  ;;  %v2200_v12 = vmul.f32 %v2168_v49, %v2026_v19  ;;  %2394 = vrot.lane.b32.xlu1 %v2229_v40, %s7734_s13  ;;  %2396 = vrot.lane.b32.xlu0 %v2230_v61, %s7734_s13  ;;  %v7573_v16 = vpop.f32.mrf.mxu1 }
 0x340   : > { %v2203_v14 = vmul.f32 %v2171_v53, %v2037_v25  ;;  %v2169_v15 = vmin.f32 %v2137_v56, 6.0  ;;  %v2142_v18 = vmax.f32 %v2110_v10, 0.0  ;;  %v2108_v60 = vadd.f32 3.0, %v2042_v57 }
 0x341   : > { %v2232_v63 = vmul.f32 0.16666667, %v2200_v12  ;;  %v2053_v21 = vadd.f32 %v7573_v16, %v9003_v37  ;;  %v2044_v4 = vpop.f32.mrf.mxu1  ;;  %2267 = vst.msk [vmem:[%s9050_s16 + $0x90] sm:$0xff] %vm2248_vm12, %v2234_v11 }
 0x342   : > { %v2235_v5 = vmul.f32 0.16666667, %v2203_v14  ;;  %v2201_v29 = vmul.f32 %v2169_v15, %v2029_v34  ;;  %v2174_v30 = vmin.f32 %v2142_v18, 6.0  ;;  %v2140_v42 = vmax.f32 %v2108_v60, 0.0 }
 0x343   : > { %v2111_v43 = vadd.f32 3.0, %v2053_v21  ;;  %v2045_v46 = vadd.f32 %v9003_v37, %v2044_v4  ;;  %2398 = vrot.lane.b32.xlu1 %v2231_v31, %s7734_s13  ;;  %2400 = vrot.lane.b32.xlu0 %v2232_v63, %s7734_s13  ;;  %v7576_v47 = vpop.f32.mrf.mxu1  ;;  %2265 = vst.msk [vmem:[%s9050_s16 + $0x80] sm:$0xff] %vm2248_vm12, %v2232_v63 }
 0x344   : > { %v2233_v50 = vmul.f32 0.16666667, %v2201_v29  ;;  %v2206_v51 = vmul.f32 %v2174_v30, %v2050_v45  ;;  %v2172_v54 = vmin.f32 %v2140_v42, 6.0  ;;  %v2066_v55 = vadd.f32 %v7576_v47, %v9003_v37  ;;  %2268 = vst.msk [vmem:[%s9050_s16 + $0x98] sm:$0xff] %vm2248_vm12, %v2235_v5 }
 0x345   : > { %v2143_v13 = vmax.f32 %v2111_v43, 0.0  ;;  %v2109_v17 = vadd.f32 3.0, %v2045_v46  ;;  %v2057_v58 = vpop.f32.mrf.mxu1 }
 0x346   : > { %v2238_v59 = vmul.f32 0.16666667, %v2206_v51  ;;  %v2204_v0 = vmul.f32 %v2172_v54, %v2042_v57  ;;  %v2114_v2 = vadd.f32 3.0, %v2066_v55  ;;  %v2058_v1 = vadd.f32 %v9003_v37, %v2057_v58  ;;  %2266 = vst.msk [vmem:[%s9050_s16 + $0x88] sm:$0xff] %vm2248_vm12, %v2233_v50  ;;  %v2562_v58 = vld [vmem:[#allocation2 + $0x9] sm:$0xff] }
 0x347   : > { %v2175_v6 = vmin.f32 %v2143_v13, 6.0  ;;  %v2141_v3 = vmax.f32 %v2109_v17, 0.0  ;;  %2402 = vrot.lane.b32.xlu1 %v2233_v50, %s7734_s13  ;;  %2404 = vrot.lane.b32.xlu0 %v2234_v11, %s7734_s13  ;;  %v7577_v61 = vpop.f32.mrf.mxu1 }
 0x348   : > { %v2236_v62 = vmul.f32 0.16666667, %v2204_v0  ;;  %v2146_v7 = vmax.f32 %v2114_v2, 0.0  ;;  %v2112_v8 = vadd.f32 3.0, %v2058_v1  ;;  %v2069_v9 = vadd.f32 %v7577_v61, %v9003_v37  ;;  %2271 = vst.msk [vmem:[%s9050_s16 + $0xb0] sm:$0xff] %vm2248_vm12, %v2238_v59  ;;  %v2561_v2 = vld [vmem:[#allocation2 + $0x1] sm:$0xff] }
 0x349   : > { %v2207_v19 = vmul.f32 %v2175_v6, %v2053_v21  ;;  %v2173_v20 = vmin.f32 %v2141_v3, 6.0  ;;  %v2060_v22 = vpop.f32.mrf.mxu1  ;;  %v2497_v6 = vld [vmem:[#allocation2] sm:$0xff]  ;;  %v2498_v3 = vld [vmem:[#allocation2 + $0x8] sm:$0xff] }
 0x34a   : > { %v2178_v23 = vmin.f32 %v2146_v7, 6.0  ;;  %v2144_v24 = vmax.f32 %v2112_v8, 0.0  ;;  %v2115_v25 = vadd.f32 3.0, %v2069_v9  ;;  %v2061_v26 = vadd.f32 %v9003_v37, %v2060_v22  ;;  %2269 = vst.msk [vmem:[%s9050_s16 + $0xa0] sm:$0xff] %vm2248_vm12, %v2236_v62 }
 0x34b   : > { %v2239_v27 = vmul.f32 0.16666667, %v2207_v19  ;;  %v2205_v28 = vmul.f32 %v2173_v20, %v2045_v46  ;;  %2406 = vrot.lane.b32.xlu1 %v2235_v5, %s7734_s13  ;;  %2408 = vrot.lane.b32.xlu0 %v2236_v62, %s7734_s13  ;;  %v7580_v31 = vpop.f32.mrf.mxu1  ;;  %2529 = vst.msk [vmem:[#allocation3] sm:$0xff] %vm204_vm0, %v2497_v6  ;;  %2530 = vst.msk [vmem:[#allocation3 + $0x8] sm:$0xff] %vm204_vm0, %v2498_v3 }
 0x34c   : > { %v2210_v32 = vmul.f32 %v2178_v23, %v2066_v55  ;;  %v2176_v33 = vmin.f32 %v2144_v24, 6.0  ;;  %v2147_v34 = vmax.f32 %v2115_v25, 0.0  ;;  %v2113_v35 = vadd.f32 3.0, %v2061_v26 }
 0x34d   : > { %v2237_v38 = vmul.f32 0.16666667, %v2205_v28  ;;  %v2082_v39 = vadd.f32 %v7580_v31, %v9003_v37  ;;  %v2073_v40 = vpop.f32.mrf.mxu1  ;;  %2272 = vst.msk [vmem:[%s9050_s16 + $0xb8] sm:$0xff] %vm2248_vm12, %v2239_v27 }
 0x34e   : > { %v2242_v41 = vmul.f32 0.16666667, %v2210_v32  ;;  %v2208_v44 = vmul.f32 %v2176_v33, %v2058_v1  ;;  %v2179_v45 = vmin.f32 %v2147_v34, 6.0  ;;  %v2145_v48 = vmax.f32 %v2113_v35, 0.0  ;;  %v9181_v1 = vld [vmem:[#allocation2 + $0x2] sm:$0xff] }
 0x34f   : > { %v2118_v49 = vadd.f32 3.0, %v2082_v39  ;;  %v2074_v52 = vadd.f32 %v9003_v37, %v2073_v40  ;;  %2410 = vrot.lane.b32.xlu1 %v2237_v38, %s7734_s13  ;;  %2412 = vrot.lane.b32.xlu0 %v2238_v59, %s7734_s13  ;;  %v7581_v53 = vpop.f32.mrf.mxu1  ;;  %2270 = vst.msk [vmem:[%s9050_s16 + $0xa8] sm:$0xff] %vm2248_vm12, %v2237_v38  ;;  %v9164_v59 = vld [vmem:[#allocation2 + $0xa] sm:$0xff] }
 0x350   : > { %v2240_v56 = vmul.f32 0.16666667, %v2208_v44  ;;  %v2211_v10 = vmul.f32 %v2179_v45, %v2069_v9  ;;  %v2177_v57 = vmin.f32 %v2145_v48, 6.0  ;;  %v2085_v11 = vadd.f32 %v7581_v53, %v9003_v37  ;;  %2275 = vst.msk [vmem:[%s9050_s16 + $0xd0] sm:$0xff] %vm2248_vm12, %v2242_v41 }
 0x351   : > { %v2150_v12 = vmax.f32 %v2118_v49, 0.0  ;;  %v2116_v16 = vadd.f32 3.0, %v2074_v52  ;;  %v2076_v14 = vpop.f32.mrf.mxu1  ;;  %4726 = vst.msk [vmem:[#allocation2 + $0x10] sm:$0x3] %vm2283_vm11, %v11786_v36 }
 0x352   : > { %v2243_v15 = vmul.f32 0.16666667, %v2211_v10  ;;  %v2209_v18 = vmul.f32 %v2177_v57, %v2061_v26  ;;  %v2119_v60 = vadd.f32 3.0, %v2085_v11  ;;  %v2077_v63 = vadd.f32 %v9003_v37, %v2076_v14  ;;  %2273 = vst.msk [vmem:[%s9050_s16 + $0xc0] sm:$0xff] %vm2248_vm12, %v2240_v56 }
 0x353   : > { %v2182_v21 = vmin.f32 %v2150_v12, 6.0  ;;  %v2148_v4 = vmax.f32 %v2116_v16, 0.0  ;;  %2414 = vrot.lane.b32.xlu1 %v2239_v27, %s7734_s13  ;;  %2416 = vrot.lane.b32.xlu0 %v2240_v56, %s7734_s13  ;;  %4724 = vst.msk [vmem:[#allocation2] sm:$0xff] %vm204_vm0, %v11786_v36  ;;  %4725 = vst.msk [vmem:[#allocation2 + $0x8] sm:$0xff] %vm204_vm0, %v11786_v36 }
 0x354   : > { %v2241_v5 = vmul.f32 0.16666667, %v2209_v18  ;;  %v2151_v29 = vmax.f32 %v2119_v60, 0.0  ;;  %v2117_v30 = vadd.f32 3.0, %v2077_v63  ;;  %2276 = vst.msk [vmem:[%s9050_s16 + $0xd8] sm:$0xff] %vm2248_vm12, %v2243_v15 }
 0x355   : > { %v2214_v42 = vmul.f32 %v2182_v21, %v2082_v39  ;;  %v2180_v43 = vmin.f32 %v2148_v4, 6.0 }
 0x356   : > { %v2183_v46 = vmin.f32 %v2151_v29, 6.0  ;;  %v2149_v47 = vmax.f32 %v2117_v30, 0.0  ;;  %2274 = vst.msk [vmem:[%s9050_s16 + $0xc8] sm:$0xff] %vm2248_vm12, %v2241_v5 }
 0x357   : > { %v2246_v37 = vmul.f32 0.16666667, %v2214_v42  ;;  %v2212_v50 = vmul.f32 %v2180_v43, %v2074_v52  ;;  %2418 = vrot.lane.b32.xlu1 %v2241_v5, %s7734_s13  ;;  %2420 = vrot.lane.b32.xlu0 %v2242_v41, %s7734_s13 }
 0x358   : > { %v2215_v51 = vmul.f32 %v2183_v46, %v2085_v11  ;;  %v2181_v54 = vmin.f32 %v2149_v47, 6.0 }
 0x359   : > { %v2244_v55 = vmul.f32 0.16666667, %v2212_v50  ;;  %2279 = vst.msk [vmem:[%s9050_s16 + $0xf0] sm:$0xff] %vm2248_vm12, %v2246_v37 }
 0x35a   : > { %v2247_v13 = vmul.f32 0.16666667, %v2215_v51  ;;  %v2213_v17 = vmul.f32 %v2181_v54, %v2077_v63 }
 0x35b   : > { %2422 = vrot.lane.b32.xlu1 %v2243_v15, %s7734_s13  ;;  %2424 = vrot.lane.b32.xlu0 %v2244_v55, %s7734_s13  ;;  %2277 = vst.msk [vmem:[%s9050_s16 + $0xe0] sm:$0xff] %vm2248_vm12, %v2244_v55 }
 0x35c   : > { %v2245_v0 = vmul.f32 0.16666667, %v2213_v17  ;;  %2280 = vst.msk [vmem:[%s9050_s16 + $0xf8] sm:$0xff] %vm2248_vm12, %v2247_v13 }
 0x35e   : > { %2278 = vst.msk [vmem:[%s9050_s16 + $0xe8] sm:$0xff] %vm2248_vm12, %v2245_v0 }
 0x35f   : > { %2426 = vrot.lane.b32.xlu1 %v2245_v0, %s7734_s13  ;;  %2428 = vrot.lane.b32.xlu0 %v2246_v37, %s7734_s13 }
 0x363   : > { %2430 = vrot.lane.b32.xlu1 %v2247_v13, %s7734_s13  ;;  %2625 = vrot.lane.b32.xlu0 %v2561_v2, %s7725_s18 }
 0x367   : > { %2627 = vrot.lane.b32.xlu1 %v2562_v58, %s7725_s18 }
 0x394   : > { %v2369_v61 = vpop.permute.xlu0 %2368 }
 0x395   : > { %2465 = vst.msk [vmem:[#allocation2 + $0x19] sm:$0xff] %vm2248_vm12, %v2369_v61 }
 0x398   : > { %v2371_v62 = vpop.permute.xlu1 %2370  ;;  %v2373_v7 = vpop.permute.xlu0 %2372 }
 0x399   : > { %2466 = vst.msk [vmem:[#allocation2 + $0x21] sm:$0xff] %vm2248_vm12, %v2371_v62  ;;  %2467 = vst.msk [vmem:[#allocation2 + $0x31] sm:$0xff] %vm2248_vm12, %v2373_v7 }
 0x39c   : > { %v2375_v8 = vpop.permute.xlu1 %2374  ;;  %v9192_v9 = vld [vmem:[#allocation2 + $0x19] sm:$0xff] }
 0x39d   : > { %11894 = vst [vmem:[#allocation4_spill] sm:$0xff] %v9192_v9  ;;  %v9194_v19 = vld [vmem:[#allocation2 + $0x18] sm:$0xff]  ;;  %2468 = vst.msk [vmem:[#allocation2 + $0x39] sm:$0xff] %vm2248_vm12, %v2375_v8  ;;  %v2377_v20 = vpop.permute.xlu0 %2376  ;;  %2629 = vrot.lane.b32.xlu0 %v9192_v9, %s7725_s18 }
 0x39e   : > { %2531 = vst.msk [vmem:[#allocation3 + $0x10] sm:$0xff] %vm204_vm0, %v9194_v19 }
 0x39f   : > { %2469 = vst.msk [vmem:[#allocation2 + $0x49] sm:$0xff] %vm2248_vm12, %v2377_v20 }
 0x3a0   : > { %v2379_v22 = vpop.permute.xlu1 %2378  ;;  %v9202_v23 = vld [vmem:[#allocation2 + $0x21] sm:$0xff]  ;;  %v9204_v24 = vld [vmem:[#allocation2 + $0x31] sm:$0xff] }
 0x3a1   : > { %11895 = vst [vmem:[#allocation5_spill] sm:$0xff] %v9202_v23  ;;  %11896 = vst [vmem:[#allocation6_spill] sm:$0xff] %v9204_v24  ;;  %v9206_v25 = vld [vmem:[#allocation2 + $0x1a] sm:$0xff]  ;;  %v2381_v26 = vpop.permute.xlu0 %2380  ;;  %2631 = vrot.lane.b32.xlu1 %v9202_v23, %s7725_s18  ;;  %2633 = vrot.lane.b32.xlu0 %v9204_v24, %s7725_s18  ;;  %v9213_v27 = vld [vmem:[#allocation2 + $0x22] sm:$0xff] }
 0x3a2   : > { %2470 = vst.msk [vmem:[#allocation2 + $0x51] sm:$0xff] %vm2248_vm12, %v2379_v22  ;;  %v9215_v28 = vld [vmem:[#allocation2 + $0x20] sm:$0xff]  ;;  %v9217_v31 = vld [vmem:[#allocation2 + $0x30] sm:$0xff]  ;;  %2471 = vst.msk [vmem:[#allocation2 + $0x61] sm:$0xff] %vm2248_vm12, %v2381_v26 }
 0x3a3   : > { %4727 = vst.msk [vmem:[#allocation2 + $0x18] sm:$0xff] %vm204_vm0, %v11786_v36  ;;  %2532 = vst.msk [vmem:[#allocation3 + $0x18] sm:$0xff] %vm204_vm0, %v9215_v28  ;;  %v9250_v41 = vld [vmem:[#allocation2 + $0x31] sm:$0xff] }
 0x3a4   : > { %2533 = vst.msk [vmem:[#allocation3 + $0x20] sm:$0xff] %vm204_vm0, %v9217_v31  ;;  %4728 = vst.msk [vmem:[#allocation2 + $0x20] sm:$0xff] %vm204_vm0, %v11786_v36  ;;  %v2383_v32 = vpop.permute.xlu1 %2382  ;;  %v9230_v33 = vld [vmem:[#allocation2 + $0x39] sm:$0xff] }
 0x3a5   : > { %4729 = vst.msk [vmem:[#allocation2 + $0x28] sm:$0x3] %vm2283_vm11, %v11786_v36  ;;  %11897 = vst [vmem:[#allocation7_spill] sm:$0xff] %v9230_v33  ;;  %v2385_v34 = vpop.permute.xlu0 %2384  ;;  %2635 = vrot.lane.b32.xlu1 %v9230_v33, %s7725_s18  ;;  %v9237_v38 = vld [vmem:[#allocation2 + $0x38] sm:$0xff] }
 0x3a6   : > { %2472 = vst.msk [vmem:[#allocation2 + $0x69] sm:$0xff] %vm2248_vm12, %v2383_v32  ;;  %v9235_v35 = vld [vmem:[#allocation2 + $0x49] sm:$0xff]  ;;  %2473 = vst.msk [vmem:[#allocation2 + $0x79] sm:$0xff] %vm2248_vm12, %v2385_v34  ;;  %v9244_v40 = vld [vmem:[#allocation2 + $0x32] sm:$0xff] }
 0x3a7   : > { %11898 = vst [vmem:[#allocation8_spill] sm:$0xff] %v9235_v35  ;;  %v9239_v39 = vld [vmem:[#allocation2 + $0x48] sm:$0xff]  ;;  %2637 = vrot.lane.b32.xlu0 %v9235_v35, %s7725_s18  ;;  %2534 = vst.msk [vmem:[#allocation3 + $0x28] sm:$0xff] %vm204_vm0, %v9237_v38  ;;  %v9252_v44 = vld [vmem:[#allocation2 + $0x32] sm:$0xff] }
 0x3a8   : > { %2535 = vst.msk [vmem:[#allocation3 + $0x30] sm:$0xff] %vm204_vm0, %v9239_v39  ;;  %11899 = vst [vmem:[#allocation9_spill] sm:$0xff] %v9250_v41  ;;  %v9254_v45 = vld [vmem:[#allocation2 + $0x3a] sm:$0xff]  ;;  %v9286_v16 = vld [vmem:[#allocation2 + $0x49] sm:$0xff] }
 0x3a9   : > { %11900 = vst [vmem:[#allocation10_spill] sm:$0xff] %v9252_v44  ;;  %v9256_v48 = vld [vmem:[#allocation2 + $0x39] sm:$0xff]  ;;  %4730 = vst.msk [vmem:[#allocation2 + $0x30] sm:$0xff] %vm204_vm0, %v11786_v36  ;;  %v9262_v52 = vld [vmem:[#allocation2 + $0x51] sm:$0xff]  ;;  %v2387_v53 = vpop.permute.xlu1 %2386  ;;  %v2389_v56 = vpop.permute.xlu0 %2388 }
 0x3aa   : > { %11901 = vst [vmem:[#allocation11_spill] sm:$0xff] %v9256_v48  ;;  %v9260_v49 = vld [vmem:[#allocation2 + $0x3a] sm:$0xff]  ;;  %11903 = vst [vmem:[#allocation13_spill] sm:$0xff] %v9262_v52  ;;  %2639 = vrot.lane.b32.xlu1 %v9262_v52, %s7725_s18  ;;  %v9272_v57 = vld [vmem:[#allocation2 + $0x50] sm:$0xff] }
 0x3ab   : > { %11902 = vst [vmem:[#allocation12_spill] sm:$0xff] %v9260_v49  ;;  %4732 = vst.msk [vmem:[#allocation2 + $0x40] sm:$0x3] %vm2283_vm11, %v11786_v36  ;;  %v9270_v10 = vld [vmem:[#allocation2 + $0x61] sm:$0xff]  ;;  %v9280_v12 = vld [vmem:[#allocation2 + $0x4a] sm:$0xff] }
 0x3ac   : > { %4731 = vst.msk [vmem:[#allocation2 + $0x38] sm:$0xff] %vm204_vm0, %v11786_v36  ;;  %11904 = vst [vmem:[#allocation14_spill] sm:$0xff] %v9270_v10  ;;  %v9274_v11 = vld [vmem:[#allocation2 + $0x60] sm:$0xff]  ;;  %2641 = vrot.lane.b32.xlu0 %v9270_v10, %s7725_s18  ;;  %v9288_v14 = vld [vmem:[#allocation2 + $0x4a] sm:$0xff] }
 0x3ad   : > { %2474 = vst.msk [vmem:[#allocation2 + $0x81] sm:$0xff] %vm2248_vm12, %v2387_v53  ;;  %2475 = vst.msk [vmem:[#allocation2 + $0x91] sm:$0xff] %vm2248_vm12, %v2389_v56  ;;  %v9290_v15 = vld [vmem:[#allocation2 + $0x52] sm:$0xff]  ;;  %v9298_v63 = vld [vmem:[#allocation2 + $0x69] sm:$0xff]  ;;  %v2391_v21 = vpop.permute.xlu1 %2390  ;;  %v2393_v4 = vpop.permute.xlu0 %2392 }
 0x3ae   : > { %2536 = vst.msk [vmem:[#allocation3 + $0x38] sm:$0xff] %vm204_vm0, %v9272_v57  ;;  %2537 = vst.msk [vmem:[#allocation3 + $0x40] sm:$0xff] %vm204_vm0, %v9274_v11  ;;  %v9292_v18 = vld [vmem:[#allocation2 + $0x51] sm:$0xff]  ;;  %2643 = vrot.lane.b32.xlu1 %v9298_v63, %s7725_s18  ;;  %v9306_v5 = vld [vmem:[#allocation2 + $0x79] sm:$0xff] }
 0x3af   : > { %11905 = vst [vmem:[#allocation15_spill] sm:$0xff] %v9286_v16  ;;  %11906 = vst [vmem:[#allocation16_spill] sm:$0xff] %v9288_v14  ;;  %v9296_v60 = vld [vmem:[#allocation2 + $0x52] sm:$0xff]  ;;  %v9308_v29 = vld [vmem:[#allocation2 + $0x68] sm:$0xff] }
 0x3b0   : > { %11907 = vst [vmem:[#allocation17_spill] sm:$0xff] %v9292_v18  ;;  %4733 = vst.msk [vmem:[#allocation2 + $0x48] sm:$0xff] %vm204_vm0, %v11786_v36  ;;  %v9310_v30 = vld [vmem:[#allocation2 + $0x78] sm:$0xff]  ;;  %2645 = vrot.lane.b32.xlu0 %v9306_v5, %s7725_s18  ;;  %v9316_v42 = vld [vmem:[#allocation2 + $0x62] sm:$0xff] }
 0x3b1   : > { %11908 = vst [vmem:[#allocation18_spill] sm:$0xff] %v9296_v60  ;;  %11909 = vst [vmem:[#allocation19_spill] sm:$0xff] %v9298_v63  ;;  %v9322_v43 = vld [vmem:[#allocation2 + $0x61] sm:$0xff]  ;;  %v9326_v47 = vld [vmem:[#allocation2 + $0x6a] sm:$0xff]  ;;  %v2395_v51 = vpop.permute.xlu1 %2394  ;;  %v2397_v54 = vpop.permute.xlu0 %2396 }
 0x3b2   : > { %4735 = vst.msk [vmem:[#allocation2 + $0x58] sm:$0x3] %vm2283_vm11, %v11786_v36  ;;  %11910 = vst [vmem:[#allocation20_spill] sm:$0xff] %v9306_v5  ;;  %v9324_v46 = vld [vmem:[#allocation2 + $0x62] sm:$0xff]  ;;  %v9332_v50 = vld [vmem:[#allocation2 + $0x6a] sm:$0xff] }
 0x3b3   : > { %4734 = vst.msk [vmem:[#allocation2 + $0x50] sm:$0xff] %vm204_vm0, %v11786_v36  ;;  %2538 = vst.msk [vmem:[#allocation3 + $0x48] sm:$0xff] %vm204_vm0, %v9308_v29  ;;  %v9328_v37 = vld [vmem:[#allocation2 + $0x69] sm:$0xff]  ;;  %v9358_v2 = vld [vmem:[#allocation2 + $0x79] sm:$0xff] }
 0x3b4   : > { %2476 = vst.msk [vmem:[#allocation2 + $0x99] sm:$0xff] %vm2248_vm12, %v2391_v21  ;;  %2477 = vst.msk [vmem:[#allocation2 + $0xa9] sm:$0xff] %vm2248_vm12, %v2393_v4  ;;  %v9338_v55 = vld [vmem:[#allocation2 + $0x81] sm:$0xff]  ;;  %v9340_v13 = vld [vmem:[#allocation2 + $0x91] sm:$0xff] }
 0x3b5   : > { %2539 = vst.msk [vmem:[#allocation3 + $0x50] sm:$0xff] %vm204_vm0, %v9310_v30  ;;  %11911 = vst [vmem:[#allocation21_spill] sm:$0xff] %v9322_v43  ;;  %2647 = vrot.lane.b32.xlu1 %v9338_v55, %s7725_s18  ;;  %2649 = vrot.lane.b32.xlu0 %v9340_v13, %s7725_s18  ;;  %v9348_v17 = vld [vmem:[#allocation2 + $0x80] sm:$0xff]  ;;  %v9350_v58 = vld [vmem:[#allocation2 + $0x90] sm:$0xff]  ;;  %v2399_v7 = vpop.permute.xlu1 %2398  ;;  %v2401_v8 = vpop.permute.xlu0 %2400 }
 0x3b6   : > { %11912 = vst [vmem:[#allocation22_spill] sm:$0xff] %v9324_v46  ;;  %11913 = vst [vmem:[#allocation23_spill] sm:$0xff] %v9328_v37  ;;  %v9352_v0 = vld [vmem:[#allocation2 + $0x7a] sm:$0xff]  ;;  %v9362_v3 = vld [vmem:[#allocation2 + $0x82] sm:$0xff]  ;;  %v11932_v46 = vmov 0.0  }
 0x3b7   : > { %4736 = vst.msk [vmem:[#allocation2 + $0x60] sm:$0xff] %vm204_vm0, %v11786_v36  ;;  %11914 = vst [vmem:[#allocation24_spill] sm:$0xff] %v9332_v50  ;;  %v9360_v6 = vld [vmem:[#allocation2 + $0x7a] sm:$0xff]  ;;  %v9368_v62 = vld [vmem:[#allocation2 + $0x82] sm:$0xff] }
 0x3b8   : > { %4738 = vst.msk [vmem:[#allocation2 + $0x70] sm:$0x3] %vm2283_vm11, %v11786_v36  ;;  %11915 = vst [vmem:[#allocation25_spill] sm:$0xff] %v9338_v55  ;;  %v9364_v61 = vld [vmem:[#allocation2 + $0x81] sm:$0xff]  ;;  %v9394_v53 = vld [vmem:[#allocation2 + $0x91] sm:$0xff] }
 0x3b9   : > { %4737 = vst.msk [vmem:[#allocation2 + $0x68] sm:$0xff] %vm204_vm0, %v11786_v36  ;;  %11916 = vst [vmem:[#allocation26_spill] sm:$0xff] %v9340_v13 }
 0x3ba   : > { %2478 = vst.msk [vmem:[#allocation2 + $0xb1] sm:$0xff] %vm2248_vm12, %v2395_v51  ;;  %2479 = vst.msk [vmem:[#allocation2 + $0xc1] sm:$0xff] %vm2248_vm12, %v2397_v54  ;;  %v2403_v54 = vpop.permute.xlu1 %2402 }
 0x3bb   : > { %2540 = vst.msk [vmem:[#allocation3 + $0x58] sm:$0xff] %vm204_vm0, %v9348_v17  ;;  %2541 = vst.msk [vmem:[#allocation3 + $0x60] sm:$0xff] %vm204_vm0, %v9350_v58  ;;  %v9370_v20 = vld [vmem:[#allocation2 + $0x99] sm:$0xff]  ;;  %v9372_v22 = vld [vmem:[#allocation2 + $0xa9] sm:$0xff] }
 0x3bc   : > { %11917 = vst [vmem:[#allocation27_spill] sm:$0xff] %v9358_v2  ;;  %11918 = vst [vmem:[#allocation28_spill] sm:$0xff] %v9360_v6  ;;  %2651 = vrot.lane.b32.xlu1 %v9370_v20, %s7725_s18  ;;  %2653 = vrot.lane.b32.xlu0 %v9372_v22, %s7725_s18  ;;  %v9384_v26 = vld [vmem:[#allocation2 + $0x98] sm:$0xff]  ;;  %v9386_v32 = vld [vmem:[#allocation2 + $0xa8] sm:$0xff] }
 0x3bd   : > { %11919 = vst [vmem:[#allocation29_spill] sm:$0xff] %v9364_v61  ;;  %4739 = vst.msk [vmem:[#allocation2 + $0x78] sm:$0xff] %vm204_vm0, %v11786_v36  ;;  %v9388_v34 = vld [vmem:[#allocation2 + $0x92] sm:$0xff]  ;;  %v9398_v21 = vld [vmem:[#allocation2 + $0x9a] sm:$0xff] }
 0x3be   : > { %11920 = vst [vmem:[#allocation30_spill] sm:$0xff] %v9368_v62  ;;  %11921 = vst [vmem:[#allocation31_spill] sm:$0xff] %v9370_v20  ;;  %v9396_v56 = vld [vmem:[#allocation2 + $0x92] sm:$0xff]  ;;  %v9404_v51 = vld [vmem:[#allocation2 + $0x9a] sm:$0xff]  ;;  %v2407_v14 = vpop.permute.xlu1 %2406 }
 0x3bf   : > { %11922 = vst [vmem:[#allocation32_spill] sm:$0xff] %v9372_v22  ;;  %4741 = vst.msk [vmem:[#allocation2 + $0x88] sm:$0x3] %vm2283_vm11, %v11786_v36  ;;  %v9400_v4 = vld [vmem:[#allocation2 + $0x99] sm:$0xff] }
 0x3c0   : > { %4740 = vst.msk [vmem:[#allocation2 + $0x80] sm:$0xff] %vm204_vm0, %v11786_v36  ;;  %2542 = vst.msk [vmem:[#allocation3 + $0x68] sm:$0xff] %vm204_vm0, %v9384_v26 }
 0x3c1   : > { %2480 = vst.msk [vmem:[#allocation2 + $0xc9] sm:$0xff] %vm2248_vm12, %v2399_v7  ;;  %2481 = vst.msk [vmem:[#allocation2 + $0xd9] sm:$0xff] %vm2248_vm12, %v2401_v8  ;;  %v2405_v7 = vpop.permute.xlu0 %2404  ;;  %v9406_v8 = vld [vmem:[#allocation2 + $0xb1] sm:$0xff]  ;;  %v9408_v62 = vld [vmem:[#allocation2 + $0xc1] sm:$0xff] }
 0x3c2   : > { %2543 = vst.msk [vmem:[#allocation3 + $0x70] sm:$0xff] %vm204_vm0, %v9386_v32  ;;  %11923 = vst [vmem:[#allocation33_spill] sm:$0xff] %v9394_v53  ;;  %2655 = vrot.lane.b32.xlu1 %v9406_v8, %s7725_s18  ;;  %2657 = vrot.lane.b32.xlu0 %v9408_v62, %s7725_s18  ;;  %v9424_v6 = vld [vmem:[#allocation2 + $0xaa] sm:$0xff]  ;;  %v9440_v60 = vld [vmem:[#allocation2 + $0xb2] sm:$0xff]  ;;  %v2411_v2 = vpop.permute.xlu1 %2410 }
 0x3c3   : > { %11924 = vst [vmem:[#allocation34_spill] sm:$0xff] %v9396_v56  ;;  %11925 = vst [vmem:[#allocation35_spill] sm:$0xff] %v9400_v4  ;;  %v9422_v56 = vld [vmem:[#allocation2 + $0xc0] sm:$0xff]  ;;  %v9436_v50 = vld [vmem:[#allocation2 + $0xb1] sm:$0xff] }
 0x3c4   : > { %4742 = vst.msk [vmem:[#allocation2 + $0x90] sm:$0xff] %vm204_vm0, %v11786_v36  ;;  %11926 = vst [vmem:[#allocation36_spill] sm:$0xff] %v9404_v51  ;;  %v9420_v51 = vld [vmem:[#allocation2 + $0xb0] sm:$0xff] }
 0x3c5   : > { %11927 = vst [vmem:[#allocation37_spill] sm:$0xff] %v9406_v8  ;;  %11928 = vst [vmem:[#allocation38_spill] sm:$0xff] %v9408_v62  ;;  %v2409_v49 = vpop.permute.xlu0 %2408 }
 0x3c6   : > { %4744 = vst.msk [vmem:[#allocation2 + $0xa0] sm:$0x3] %vm2283_vm11, %v11786_v36  ;;  %11931 = vst [vmem:[#allocation41_spill] sm:$0xff] %v9436_v50  ;;  %v2415_v41 = vpop.permute.xlu1 %2414 }
 0x3c7   : > { %4743 = vst.msk [vmem:[#allocation2 + $0x98] sm:$0xff] %vm204_vm0, %v11786_v36  ;;  %2544 = vst.msk [vmem:[#allocation3 + $0x78] sm:$0xff] %vm204_vm0, %v9420_v51  ;;  %v9434_v36 = vld [vmem:[#allocation2 + $0xb2] sm:$0xff] }
 0x3c8   : > { %2482 = vst.msk [vmem:[#allocation2 + $0xe1] sm:$0xff] %vm2248_vm12, %v2403_v54  ;;  %2483 = vst.msk [vmem:[#allocation2 + $0xf1] sm:$0xff] %vm2248_vm12, %v2405_v7  ;;  %v9430_v54 = vld [vmem:[#allocation2 + $0xa9] sm:$0xff]  ;;  %v9444_v4 = vld [vmem:[#allocation2 + $0xd9] sm:$0xff] }
 0x3c9   : > { %2545 = vst.msk [vmem:[#allocation3 + $0x80] sm:$0xff] %vm204_vm0, %v9422_v56  ;;  %11929 = vst [vmem:[#allocation39_spill] sm:$0xff] %v9430_v54  ;;  %v9432_v7 = vld [vmem:[#allocation2 + $0xaa] sm:$0xff]  ;;  %2661 = vrot.lane.b32.xlu0 %v9444_v4, %s7725_s18  ;;  %v9460_v50 = vld [vmem:[#allocation2 + $0xc2] sm:$0xff]  ;;  %v2413_v37 = vpop.permute.xlu0 %2412 }
 0x3ca   : > { %11930 = vst [vmem:[#allocation40_spill] sm:$0xff] %v9432_v7  ;;  %4745 = vst.msk [vmem:[#allocation2 + $0xa8] sm:$0xff] %vm204_vm0, %v11932_v46  ;;  %v9442_v44 = vld [vmem:[#allocation2 + $0xc9] sm:$0xff]  ;;  %v9458_v7 = vld [vmem:[#allocation2 + $0xd8] sm:$0xff] }
 0x3cb   : > { %11933 = vst [vmem:[#allocation42_spill] sm:$0xff] %v9440_v60  ;;  %11934 = vst [vmem:[#allocation43_spill] sm:$0xff] %v9442_v44  ;;  %2659 = vrot.lane.b32.xlu1 %v9442_v44, %s7725_s18  ;;  %v9456_v60 = vld [vmem:[#allocation2 + $0xc8] sm:$0xff]  ;;  %v2419_v44 = vpop.permute.xlu1 %2418 }
 0x3cc   : > { %11935 = vst [vmem:[#allocation44_spill] sm:$0xff] %v9444_v4  ;;  %4747 = vst.msk [vmem:[#allocation2 + $0xb8] sm:$0x3] %vm2283_vm11, %v11932_v46  ;;  %v9470_v54 = vld [vmem:[#allocation2 + $0xca] sm:$0xff] }
 0x3cd   : > { %4746 = vst.msk [vmem:[#allocation2 + $0xb0] sm:$0xff] %vm204_vm0, %v11932_v46  ;;  %2546 = vst.msk [vmem:[#allocation3 + $0x88] sm:$0xff] %vm204_vm0, %v9456_v60  ;;  %v9472_v53 = vld [vmem:[#allocation2 + $0xc9] sm:$0xff] }
 0x3ce   : > { %2484 = vst.msk [vmem:[#allocation2 + $0xf9] sm:$0xff] %vm2248_vm12, %v2407_v14  ;;  %2485 = vst.msk [vmem:[#allocation2 + $0x109] sm:$0xff] %vm2248_vm12, %v2409_v49  ;;  %v9466_v14 = vld [vmem:[#allocation2 + $0xc1] sm:$0xff]  ;;  %v9476_v61 = vld [vmem:[#allocation2 + $0xca] sm:$0xff] }
 0x3cf   : > { %2547 = vst.msk [vmem:[#allocation3 + $0x90] sm:$0xff] %vm204_vm0, %v9458_v7  ;;  %11936 = vst [vmem:[#allocation45_spill] sm:$0xff] %v9466_v14  ;;  %v9468_v49 = vld [vmem:[#allocation2 + $0xc2] sm:$0xff]  ;;  %v9480_v18 = vld [vmem:[#allocation2 + $0xf1] sm:$0xff]  ;;  %v2423_v20 = vpop.permute.xlu1 %2422 }
 0x3d0   : > { %11937 = vst [vmem:[#allocation46_spill] sm:$0xff] %v9468_v49  ;;  %11938 = vst [vmem:[#allocation47_spill] sm:$0xff] %v9472_v53  ;;  %v9478_v43 = vld [vmem:[#allocation2 + $0xe1] sm:$0xff]  ;;  %2665 = vrot.lane.b32.xlu0 %v9480_v18, %s7725_s18  ;;  %v9494_v49 = vld [vmem:[#allocation2 + $0xf0] sm:$0xff] }
 0x3d1   : > { %4748 = vst.msk [vmem:[#allocation2 + $0xc0] sm:$0xff] %vm204_vm0, %v11932_v46  ;;  %11939 = vst [vmem:[#allocation48_spill] sm:$0xff] %v9476_v61  ;;  %2663 = vrot.lane.b32.xlu1 %v9478_v43, %s7725_s18  ;;  %v9492_v61 = vld [vmem:[#allocation2 + $0xe0] sm:$0xff] }
 0x3d2   : > { %11940 = vst [vmem:[#allocation49_spill] sm:$0xff] %v9478_v43  ;;  %11941 = vst [vmem:[#allocation50_spill] sm:$0xff] %v9480_v18  ;;  %v9496_v53 = vld [vmem:[#allocation2 + $0xda] sm:$0xff]  ;;  %v9506_v14 = vld [vmem:[#allocation2 + $0xe2] sm:$0xff]  ;;  %v2417_v18 = vpop.permute.xlu0 %2416 }
 0x3d3   : > { %4750 = vst.msk [vmem:[#allocation2 + $0xd0] sm:$0x3] %vm2283_vm11, %v11932_v46  ;;  %v9508_v16 = vld [vmem:[#allocation2 + $0xe1] sm:$0xff]  ;;  %v2427_v63 = vpop.permute.xlu1 %2426 }
 0x3d4   : > { %4749 = vst.msk [vmem:[#allocation2 + $0xc8] sm:$0xff] %vm204_vm0, %v11932_v46  ;;  %2548 = vst.msk [vmem:[#allocation3 + $0x98] sm:$0xff] %vm204_vm0, %v9492_v61  ;;  %v9512_v48 = vld [vmem:[#allocation2 + $0xe2] sm:$0xff] }
 0x3d5   : > { %2486 = vst.msk [vmem:[#allocation2 + $0x111] sm:$0xff] %vm2248_vm12, %v2411_v2  ;;  %2487 = vst.msk [vmem:[#allocation2 + $0x121] sm:$0xff] %vm2248_vm12, %v2413_v37  ;;  %v9502_v2 = vld [vmem:[#allocation2 + $0xd9] sm:$0xff]  ;;  %v9516_v4 = vld [vmem:[#allocation2 + $0x109] sm:$0xff] }
 0x3d6   : > { %2549 = vst.msk [vmem:[#allocation3 + $0xa0] sm:$0xff] %vm204_vm0, %v9494_v49  ;;  %11942 = vst [vmem:[#allocation51_spill] sm:$0xff] %v9502_v2  ;;  %v9504_v37 = vld [vmem:[#allocation2 + $0xda] sm:$0xff]  ;;  %2669 = vrot.lane.b32.xlu0 %v9516_v4, %s7725_s18  ;;  %v2421_v62 = vpop.permute.xlu0 %2420 }
 0x3d7   : > { %11943 = vst [vmem:[#allocation52_spill] sm:$0xff] %v9504_v37  ;;  %11944 = vst [vmem:[#allocation53_spill] sm:$0xff] %v9508_v16  ;;  %v9514_v43 = vld [vmem:[#allocation2 + $0xf9] sm:$0xff]  ;;  %v9530_v37 = vld [vmem:[#allocation2 + $0x108] sm:$0xff]  ;;  %v2431_v33 = vpop.permute.xlu1 %2430 }
 0x3d8   : > { %4751 = vst.msk [vmem:[#allocation2 + $0xd8] sm:$0xff] %vm204_vm0, %v11932_v46  ;;  %11945 = vst [vmem:[#allocation54_spill] sm:$0xff] %v9512_v48  ;;  %2667 = vrot.lane.b32.xlu1 %v9514_v43, %s7725_s18  ;;  %v9528_v48 = vld [vmem:[#allocation2 + $0xf8] sm:$0xff] }
 0x3d9   : > { %11946 = vst [vmem:[#allocation55_spill] sm:$0xff] %v9514_v43  ;;  %11947 = vst [vmem:[#allocation56_spill] sm:$0xff] %v9516_v4  ;;  %v9532_v16 = vld [vmem:[#allocation2 + $0xf2] sm:$0xff]  ;;  %v9542_v2 = vld [vmem:[#allocation2 + $0xfa] sm:$0xff] }
 0x3da   : > { %4753 = vst.msk [vmem:[#allocation2 + $0xe8] sm:$0x3] %vm2283_vm11, %v11932_v46  ;;  %v9544_v43 = vld [vmem:[#allocation2 + $0xf9] sm:$0xff]  ;;  %v2425_v13 = vpop.permute.xlu0 %2424 }
 0x3db   : > { %4752 = vst.msk [vmem:[#allocation2 + $0xe0] sm:$0xff] %vm204_vm0, %v11932_v46  ;;  %2550 = vst.msk [vmem:[#allocation3 + $0xa8] sm:$0xff] %vm204_vm0, %v9528_v48  ;;  %v9548_v4 = vld [vmem:[#allocation2 + $0xfa] sm:$0xff] }
 0x3dc   : > { %2488 = vst.msk [vmem:[#allocation2 + $0x129] sm:$0xff] %vm2248_vm12, %v2415_v41  ;;  %2489 = vst.msk [vmem:[#allocation2 + $0x139] sm:$0xff] %vm2248_vm12, %v2417_v18  ;;  %v9538_v41 = vld [vmem:[#allocation2 + $0xf1] sm:$0xff]  ;;  %v9552_v22 = vld [vmem:[#allocation2 + $0x121] sm:$0xff] }
 0x3dd   : > { %2551 = vst.msk [vmem:[#allocation3 + $0xb0] sm:$0xff] %vm204_vm0, %v9530_v37  ;;  %11948 = vst [vmem:[#allocation57_spill] sm:$0xff] %v9538_v41  ;;  %v9540_v18 = vld [vmem:[#allocation2 + $0xf2] sm:$0xff]  ;;  %2673 = vrot.lane.b32.xlu0 %v9552_v22, %s7725_s18 }
 0x3de   : > { %11949 = vst [vmem:[#allocation58_spill] sm:$0xff] %v9540_v18  ;;  %11950 = vst [vmem:[#allocation59_spill] sm:$0xff] %v9544_v43  ;;  %v9550_v8 = vld [vmem:[#allocation2 + $0x111] sm:$0xff]  ;;  %v9566_v18 = vld [vmem:[#allocation2 + $0x120] sm:$0xff]  ;;  %v2429_v10 = vpop.permute.xlu0 %2428 }
 0x3df   : > { %4754 = vst.msk [vmem:[#allocation2 + $0xf0] sm:$0xff] %vm204_vm0, %v11932_v46  ;;  %11951 = vst [vmem:[#allocation60_spill] sm:$0xff] %v9548_v4  ;;  %2671 = vrot.lane.b32.xlu1 %v9550_v8, %s7725_s18  ;;  %v9564_v4 = vld [vmem:[#allocation2 + $0x110] sm:$0xff] }
 0x3e0   : > { %11952 = vst [vmem:[#allocation61_spill] sm:$0xff] %v9550_v8  ;;  %11953 = vst [vmem:[#allocation62_spill] sm:$0xff] %v9552_v22  ;;  %v9568_v43 = vld [vmem:[#allocation2 + $0x10a] sm:$0xff]  ;;  %v9578_v41 = vld [vmem:[#allocation2 + $0x112] sm:$0xff] }
 0x3e1   : > { %4756 = vst.msk [vmem:[#allocation2 + $0x100] sm:$0x3] %vm2283_vm11, %v11932_v46  ;;  %v9580_v8 = vld [vmem:[#allocation2 + $0x111] sm:$0xff] }
 0x3e2   : > { %4755 = vst.msk [vmem:[#allocation2 + $0xf8] sm:$0xff] %vm204_vm0, %v11932_v46  ;;  %2552 = vst.msk [vmem:[#allocation3 + $0xb8] sm:$0xff] %vm204_vm0, %v9564_v4  ;;  %v9584_v22 = vld [vmem:[#allocation2 + $0x112] sm:$0xff]  ;;  %v2626_v9 = vpop.permute.xlu0 %2625 }
 0x3e3   : > { %2490 = vst.msk [vmem:[#allocation2 + $0x141] sm:$0xff] %vm2248_vm12, %v2419_v44  ;;  %2491 = vst.msk [vmem:[#allocation2 + $0x151] sm:$0xff] %vm2248_vm12, %v2421_v62  ;;  %v9574_v44 = vld [vmem:[#allocation2 + $0x109] sm:$0xff]  ;;  %v9588_v5 = vld [vmem:[#allocation2 + $0x139] sm:$0xff] }
 0x3e4   : > { %2553 = vst.msk [vmem:[#allocation3 + $0xc0] sm:$0xff] %vm204_vm0, %v9566_v18  ;;  %11954 = vst [vmem:[#allocation63_spill] sm:$0xff] %v9574_v44  ;;  %v9576_v62 = vld [vmem:[#allocation2 + $0x10a] sm:$0xff]  ;;  %2677 = vrot.lane.b32.xlu0 %v9588_v5, %s7725_s18 }
 0x3e5   : > { %11955 = vst [vmem:[#allocation64_spill] sm:$0xff] %v9576_v62  ;;  %11956 = vst [vmem:[#allocation65_spill] sm:$0xff] %v9580_v8  ;;  %v9586_v55 = vld [vmem:[#allocation2 + $0x129] sm:$0xff]  ;;  %v9602_v62 = vld [vmem:[#allocation2 + $0x138] sm:$0xff] }
 0x3e6   : > { %4757 = vst.msk [vmem:[#allocation2 + $0x108] sm:$0xff] %vm204_vm0, %v11932_v46  ;;  %11957 = vst [vmem:[#allocation66_spill] sm:$0xff] %v9584_v22  ;;  %2675 = vrot.lane.b32.xlu1 %v9586_v55, %s7725_s18  ;;  %v9600_v22 = vld [vmem:[#allocation2 + $0x128] sm:$0xff] }
 0x3e7   : > { %11958 = vst [vmem:[#allocation67_spill] sm:$0xff] %v9586_v55  ;;  %11959 = vst [vmem:[#allocation68_spill] sm:$0xff] %v9588_v5  ;;  %v9604_v8 = vld [vmem:[#allocation2 + $0x122] sm:$0xff]  ;;  %v9614_v44 = vld [vmem:[#allocation2 + $0x12a] sm:$0xff] }
 0x3e8   : > { %4759 = vst.msk [vmem:[#allocation2 + $0x118] sm:$0x3] %vm2283_vm11, %v11932_v46  ;;  %11960 = vst [vmem:[#allocation69_spill] sm:$0xff] %v9600_v22  ;;  %v9616_v55 = vld [vmem:[#allocation2 + $0x129] sm:$0xff] }
 0x3e9   : > { %4758 = vst.msk [vmem:[#allocation2 + $0x110] sm:$0xff] %vm204_vm0, %v11932_v46  ;;  %11961 = vst [vmem:[#allocation70_spill] sm:$0xff] %v9602_v62  ;;  %v9620_v5 = vld [vmem:[#allocation2 + $0x12a] sm:$0xff] }
 0x3ea   : > { %2492 = vst.msk [vmem:[#allocation2 + $0x159] sm:$0xff] %vm2248_vm12, %v2423_v20  ;;  %2493 = vst.msk [vmem:[#allocation2 + $0x169] sm:$0xff] %vm2248_vm12, %v2425_v13  ;;  %v9610_v20 = vld [vmem:[#allocation2 + $0x121] sm:$0xff]  ;;  %v9624_v35 = vld [vmem:[#allocation2 + $0x151] sm:$0xff] }
 0x3eb   : > { %2554 = vst.msk [vmem:[#allocation3 + $0xc8] sm:$0xff] %vm204_vm0, %v9600_v22  ;;  %2555 = vst.msk [vmem:[#allocation3 + $0xd0] sm:$0xff] %vm204_vm0, %v9602_v62  ;;  %v9612_v13 = vld [vmem:[#allocation2 + $0x122] sm:$0xff]  ;;  %2681 = vrot.lane.b32.xlu0 %v9624_v35, %s7725_s18 }
 0x3ec   : > { %11962 = vst [vmem:[#allocation71_spill] sm:$0xff] %v9610_v20  ;;  %11963 = vst [vmem:[#allocation72_spill] sm:$0xff] %v9612_v13  ;;  %v9622_v52 = vld [vmem:[#allocation2 + $0x141] sm:$0xff]  ;;  %v9638_v13 = vld [vmem:[#allocation2 + $0x150] sm:$0xff] }
 0x3ed   : > { %11964 = vst [vmem:[#allocation73_spill] sm:$0xff] %v9616_v55  ;;  %4760 = vst.msk [vmem:[#allocation2 + $0x120] sm:$0xff] %vm204_vm0, %v11932_v46  ;;  %2679 = vrot.lane.b32.xlu1 %v9622_v52, %s7725_s18  ;;  %v9640_v55 = vld [vmem:[#allocation2 + $0x13a] sm:$0xff]  ;;  %v9650_v20 = vld [vmem:[#allocation2 + $0x142] sm:$0xff] }
 0x3ee   : > { %11965 = vst [vmem:[#allocation74_spill] sm:$0xff] %v9620_v5  ;;  %11966 = vst [vmem:[#allocation75_spill] sm:$0xff] %v9622_v52  ;;  %v9636_v5 = vld [vmem:[#allocation2 + $0x140] sm:$0xff] }
 0x3ef   : > { %11967 = vst [vmem:[#allocation76_spill] sm:$0xff] %v9624_v35  ;;  %4762 = vst.msk [vmem:[#allocation2 + $0x130] sm:$0x3] %vm2283_vm11, %v11932_v46  ;;  %v9652_v52 = vld [vmem:[#allocation2 + $0x141] sm:$0xff] }
 0x3f0   : > { %4761 = vst.msk [vmem:[#allocation2 + $0x128] sm:$0xff] %vm204_vm0, %v11932_v46  ;;  %11968 = vst [vmem:[#allocation77_spill] sm:$0xff] %v9636_v5  ;;  %v9656_v35 = vld [vmem:[#allocation2 + $0x142] sm:$0xff] }
 0x3f1   : > { %2494 = vst.msk [vmem:[#allocation2 + $0x171] sm:$0xff] %vm2248_vm12, %v2427_v63  ;;  %2495 = vst.msk [vmem:[#allocation2 + $0x181] sm:$0xff] %vm2248_vm12, %v2429_v10  ;;  %v9646_v63 = vld [vmem:[#allocation2 + $0x139] sm:$0xff]  ;;  %v9660_v23 = vld [vmem:[#allocation2 + $0x169] sm:$0xff] }
 0x3f2   : > { %11969 = vst [vmem:[#allocation78_spill] sm:$0xff] %v9638_v13  ;;  %2556 = vst.msk [vmem:[#allocation3 + $0xd8] sm:$0xff] %vm204_vm0, %v9636_v5  ;;  %v9648_v10 = vld [vmem:[#allocation2 + $0x13a] sm:$0xff]  ;;  %2685 = vrot.lane.b32.xlu0 %v9660_v23, %s7725_s18  ;;  %v2628_v5 = vpop.permute.xlu1 %2627 }
 0x3f3   : > { %2557 = vst.msk [vmem:[#allocation3 + $0xe0] sm:$0xff] %vm204_vm0, %v9638_v13  ;;  %11970 = vst [vmem:[#allocation79_spill] sm:$0xff] %v9646_v63  ;;  %v9658_v24 = vld [vmem:[#allocation2 + $0x159] sm:$0xff] }
 0x3f4   : > { %11971 = vst [vmem:[#allocation80_spill] sm:$0xff] %v9648_v10  ;;  %11972 = vst [vmem:[#allocation81_spill] sm:$0xff] %v9652_v52  ;;  %2683 = vrot.lane.b32.xlu1 %v9658_v24, %s7725_s18  ;;  %v9674_v10 = vld [vmem:[#allocation2 + $0x168] sm:$0xff]  ;;  %v9676_v52 = vld [vmem:[#allocation2 + $0x152] sm:$0xff] }
 0x3f5   : > { %4763 = vst.msk [vmem:[#allocation2 + $0x138] sm:$0xff] %vm204_vm0, %v11932_v46  ;;  %11973 = vst [vmem:[#allocation82_spill] sm:$0xff] %v9656_v35  ;;  %v9672_v35 = vld [vmem:[#allocation2 + $0x158] sm:$0xff] }
 0x3f6   : > { %11974 = vst [vmem:[#allocation83_spill] sm:$0xff] %v9658_v24  ;;  %11975 = vst [vmem:[#allocation84_spill] sm:$0xff] %v9660_v23  ;;  %v9684_v63 = vld [vmem:[#allocation2 + $0x152] sm:$0xff]  ;;  %v9686_v24 = vld [vmem:[#allocation2 + $0x15a] sm:$0xff]  ;;  %2817 = vrot.lane.b32.xlu0 %v9181_v1, %s7726_s19 }
 0x3f7   : > { %4765 = vst.msk [vmem:[#allocation2 + $0x148] sm:$0x3] %vm2283_vm11, %v11932_v46  ;;  %11976 = vst [vmem:[#allocation85_spill] sm:$0xff] %v9672_v35  ;;  %v9688_v23 = vld [vmem:[#allocation2 + $0x159] sm:$0xff] }
 0x3f8   : > { %4764 = vst.msk [vmem:[#allocation2 + $0x140] sm:$0xff] %vm204_vm0, %v11932_v46  ;;  %11977 = vst [vmem:[#allocation86_spill] sm:$0xff] %v9674_v10  ;;  %v9694_v13 = vld [vmem:[#allocation2 + $0x171] sm:$0xff]  ;;  %v9727_v1 = vld [vmem:[#allocation2 + $0x180] sm:$0xff] }
 0x3f9   : > { %2496 = vst.msk [vmem:[#allocation2 + $0x189] sm:$0xff] %vm2248_vm12, %v2431_v33  ;;  %v9682_v33 = vld [vmem:[#allocation2 + $0x151] sm:$0xff]  ;;  %11979 = vst [vmem:[#allocation88_spill] sm:$0xff] %v9684_v63  ;;  %2687 = vrot.lane.b32.xlu1 %v9694_v13, %s7725_s18 }
 0x3fa   : > { %2721 = vst.msk [vmem:[#allocation3] sm:$0xff] %vm397_vm1, %v2626_v9  ;;  %11978 = vst [vmem:[#allocation87_spill] sm:$0xff] %v9682_v33  ;;  %v9692_v9 = vld [vmem:[#allocation2 + $0x15a] sm:$0xff]  ;;  %v9709_v63 = vld [vmem:[#allocation2 + $0x172] sm:$0xff]  ;;  %2821 = vrot.lane.b32.xlu0 %v9206_v25, %s7726_s19 }
 0x3fb   : > { %2558 = vst.msk [vmem:[#allocation3 + $0xe8] sm:$0xff] %vm204_vm0, %v9672_v35  ;;  %2559 = vst.msk [vmem:[#allocation3 + $0xf0] sm:$0xff] %vm204_vm0, %v9674_v10  ;;  %v9696_v35 = vld [vmem:[#allocation2 + $0x169] sm:$0xff]  ;;  %v9719_v10 = vld [vmem:[#allocation2 + $0x172] sm:$0xff] }
 0x3fc   : > { %11980 = vst [vmem:[#allocation89_spill] sm:$0xff] %v9688_v23  ;;  %4766 = vst.msk [vmem:[#allocation2 + $0x150] sm:$0xff] %vm204_vm0, %v11932_v46  ;;  %v9711_v23 = vld [vmem:[#allocation2 + $0x170] sm:$0xff] }
 0x3fd   : > { %11981 = vst [vmem:[#allocation90_spill] sm:$0xff] %v9692_v9  ;;  %11982 = vst [vmem:[#allocation91_spill] sm:$0xff] %v9694_v13  ;;  %v9707_v9 = vld [vmem:[#allocation2 + $0x16a] sm:$0xff]  ;;  %2819 = vrot.lane.b32.xlu1 %v9164_v59, %s7726_s19 }
 0x3fe   : > { %11983 = vst [vmem:[#allocation92_spill] sm:$0xff] %v9696_v35  ;;  %4768 = vst.msk [vmem:[#allocation2 + $0x160] sm:$0x3] %vm2283_vm11, %v11932_v46  ;;  %v9715_v35 = vld [vmem:[#allocation2 + $0x171] sm:$0xff]  ;;  %2825 = vrot.lane.b32.xlu0 %v9244_v40, %s7726_s19 }
 0x3ff   : > { %4767 = vst.msk [vmem:[#allocation2 + $0x158] sm:$0xff] %vm204_vm0, %v11932_v46  ;;  %11984 = vst [vmem:[#allocation93_spill] sm:$0xff] %v9711_v23  ;;  %v9717_v33 = vld [vmem:[#allocation2 + $0x16a] sm:$0xff] }
 0x400   : > { %2722 = vst.msk [vmem:[#allocation3 + $0x8] sm:$0xff] %vm397_vm1, %v2628_v5  ;;  %11985 = vst [vmem:[#allocation94_spill] sm:$0xff] %v9715_v35  ;;  %v9729_v5 = vld [vmem:[#allocation2 + $0x181] sm:$0xff]  ;;  %v9741_v35 = vld [vmem:[#allocation2 + $0x18a] sm:$0xff] }
 0x401   : > { %2560 = vst.msk [vmem:[#allocation3 + $0xf8] sm:$0xff] %vm204_vm0, %v9711_v23  ;;  %11986 = vst [vmem:[#allocation95_spill] sm:$0xff] %v9717_v33  ;;  %v9731_v13 = vld [vmem:[#allocation2 + $0x182] sm:$0xff]  ;;  %2823 = vrot.lane.b32.xlu1 %v9213_v27, %s7726_s19 }
 0x402   : > { %11987 = vst [vmem:[#allocation96_spill] sm:$0xff] %v9719_v10  ;;  %4769 = vst.msk [vmem:[#allocation2 + $0x168] sm:$0xff] %vm204_vm0, %v11932_v46  ;;  %v9737_v10 = vld [vmem:[#allocation2 + $0x188] sm:$0xff]  ;;  %2829 = vrot.lane.b32.xlu0 %v9280_v12, %s7726_s19 }
 0x403   : > { %4771 = vst.msk [vmem:[#allocation2 + $0x178] sm:$0x3] %vm2283_vm11, %v11932_v46  ;;  %11988 = vst [vmem:[#allocation97_spill] sm:$0xff] %v9727_v1  ;;  %v9739_v33 = vld [vmem:[#allocation2 + $0x189] sm:$0xff] }
 0x404   : > { %4770 = vst.msk [vmem:[#allocation2 + $0x170] sm:$0xff] %vm204_vm0, %v11932_v46  ;;  %11989 = vst [vmem:[#allocation98_spill] sm:$0xff] %v9731_v13 }
 0x405   : > { %11990 = vst [vmem:[#allocation99_spill] sm:$0xff] %v9737_v10  ;;  %11991 = vst [vmem:[#allocation100_spill] sm:$0xff] %v9741_v35  ;;  %2827 = vrot.lane.b32.xlu1 %v9254_v45, %s7726_s19 }
 0x406   : > { %4772 = vst.msk [vmem:[#allocation2 + $0x180] sm:$0xff] %vm204_vm0, %v11932_v46  ;;  %4773 = vst.msk [vmem:[#allocation2 + $0x188] sm:$0xff] %vm204_vm0, %v11932_v46  ;;  %2833 = vrot.lane.b32.xlu0 %v9316_v42, %s7726_s19 }
 0x407   : > { %4774 = vst.msk [vmem:[#allocation2 + $0x190] sm:$0x3] %vm2283_vm11, %v11932_v46 }
 0x409   : > { %2831 = vrot.lane.b32.xlu1 %v9290_v15, %s7726_s19 }
 0x40a   : > { %2837 = vrot.lane.b32.xlu0 %v9352_v0, %s7726_s19 }
 0x40d   : > { %2835 = vrot.lane.b32.xlu1 %v9326_v47, %s7726_s19 }
 0x40e   : > { %2841 = vrot.lane.b32.xlu0 %v9388_v34, %s7726_s19 }
 0x40f   : > { %v2630_v59 = vpop.permute.xlu0 %2629 }
 0x410   : > { %2723 = vst.msk [vmem:[#allocation3 + $0x10] sm:$0xff] %vm397_vm1, %v2630_v59 }
 0x411   : > { %2839 = vrot.lane.b32.xlu1 %v9362_v3, %s7726_s19 }
 0x412   : > { %2845 = vrot.lane.b32.xlu0 %v9424_v6, %s7726_s19 }
 0x413   : > { %v2632_v46 = vpop.permute.xlu1 %2631  ;;  %v2634_v35 = vpop.permute.xlu0 %2633 }
 0x414   : > { %2724 = vst.msk [vmem:[#allocation3 + $0x18] sm:$0xff] %vm397_vm1, %v2632_v46  ;;  %2725 = vst.msk [vmem:[#allocation3 + $0x20] sm:$0xff] %vm397_vm1, %v2634_v35 }
 0x415   : > { %2843 = vrot.lane.b32.xlu1 %v9398_v21, %s7726_s19 }
 0x416   : > { %2849 = vrot.lane.b32.xlu0 %v9460_v50, %s7726_s19 }
 0x417   : > { %v2636_v13 = vpop.permute.xlu1 %2635 }
 0x418   : > { %2726 = vst.msk [vmem:[#allocation3 + $0x28] sm:$0xff] %vm397_vm1, %v2636_v13 }
 0x419   : > { %2847 = vrot.lane.b32.xlu1 %v9434_v36, %s7726_s19  ;;  %v2638_v59 = vpop.permute.xlu0 %2637 }
 0x41a   : > { %2853 = vrot.lane.b32.xlu0 %v9496_v53, %s7726_s19  ;;  %2727 = vst.msk [vmem:[#allocation3 + $0x30] sm:$0xff] %vm397_vm1, %v2638_v59 }
 0x41c   : > { %v2640_v46 = vpop.permute.xlu1 %2639 }
 0x41d   : > { %2851 = vrot.lane.b32.xlu1 %v9470_v54, %s7726_s19  ;;  %2728 = vst.msk [vmem:[#allocation3 + $0x38] sm:$0xff] %vm397_vm1, %v2640_v46 }
 0x41e   : > { %2857 = vrot.lane.b32.xlu0 %v9532_v16, %s7726_s19  ;;  %v2642_v35 = vpop.permute.xlu0 %2641 }
 0x41f   : > { %2729 = vst.msk [vmem:[#allocation3 + $0x40] sm:$0xff] %vm397_vm1, %v2642_v35 }
 0x420   : > { %v2644_v13 = vpop.permute.xlu1 %2643 }
 0x421   : > { %2855 = vrot.lane.b32.xlu1 %v9506_v14, %s7726_s19  ;;  %2730 = vst.msk [vmem:[#allocation3 + $0x48] sm:$0xff] %vm397_vm1, %v2644_v13 }
 0x422   : > { %2861 = vrot.lane.b32.xlu0 %v9568_v43, %s7726_s19  ;;  %v2646_v59 = vpop.permute.xlu0 %2645 }
 0x423   : > { %2731 = vst.msk [vmem:[#allocation3 + $0x50] sm:$0xff] %vm397_vm1, %v2646_v59 }
 0x425   : > { %2859 = vrot.lane.b32.xlu1 %v9542_v2, %s7726_s19 }
 0x426   : > { %2865 = vrot.lane.b32.xlu0 %v9604_v8, %s7726_s19 }
 0x427   : > { %v2650_v46 = vpop.permute.xlu0 %2649 }
 0x428   : > { %2733 = vst.msk [vmem:[#allocation3 + $0x60] sm:$0xff] %vm397_vm1, %v2650_v46 }
 0x429   : > { %2863 = vrot.lane.b32.xlu1 %v9578_v41, %s7726_s19 }
 0x42a   : > { %2869 = vrot.lane.b32.xlu0 %v9640_v55, %s7726_s19 }
 0x42d   : > { %2867 = vrot.lane.b32.xlu1 %v9614_v44, %s7726_s19 }
 0x42e   : > { %2873 = vrot.lane.b32.xlu0 %v9676_v52, %s7726_s19  ;;  %v2654_v35 = vpop.permute.xlu0 %2653 }
 0x42f   : > { %2735 = vst.msk [vmem:[#allocation3 + $0x70] sm:$0xff] %vm397_vm1, %v2654_v35 }
 0x431   : > { %2871 = vrot.lane.b32.xlu1 %v9650_v20, %s7726_s19 }
 0x432   : > { %2877 = vrot.lane.b32.xlu0 %v9707_v9, %s7726_s19 }
 0x434   : > { %v2658_v59 = vpop.permute.xlu0 %2657 }
 0x435   : > { %2875 = vrot.lane.b32.xlu1 %v9686_v24, %s7726_s19  ;;  %2737 = vst.msk [vmem:[#allocation3 + $0x80] sm:$0xff] %vm397_vm1, %v2658_v59 }
 0x436   : > { %3009 = vrot.lane.b32.xlu0 %v9194_v19, %s7727_s20  ;;  %v2648_v19 = vpop.permute.xlu1 %2647 }
 0x437   : > { %2732 = vst.msk [vmem:[#allocation3 + $0x58] sm:$0xff] %vm397_vm1, %v2648_v19 }
 0x439   : > { %2879 = vrot.lane.b32.xlu1 %v9709_v63, %s7726_s19 }
 0x43a   : > { %3013 = vrot.lane.b32.xlu0 %v9217_v31, %s7727_s20 }
 0x43b   : > { %v2662_v46 = vpop.permute.xlu0 %2661 }
 0x43c   : > { %2739 = vst.msk [vmem:[#allocation3 + $0x90] sm:$0xff] %vm397_vm1, %v2662_v46 }
 0x43d   : > { %3011 = vrot.lane.b32.xlu1 %v9215_v28, %s7727_s20  ;;  %v2652_v28 = vpop.permute.xlu1 %2651 }
 0x43e   : > { %3017 = vrot.lane.b32.xlu0 %v9239_v39, %s7727_s20  ;;  %2734 = vst.msk [vmem:[#allocation3 + $0x68] sm:$0xff] %vm397_vm1, %v2652_v28 }
 0x441   : > { %3015 = vrot.lane.b32.xlu1 %v9237_v38, %s7727_s20  ;;  %v2656_v13 = vpop.permute.xlu1 %2655 }
 0x442   : > { %3021 = vrot.lane.b32.xlu0 %v9274_v11, %s7727_s20  ;;  %2736 = vst.msk [vmem:[#allocation3 + $0x78] sm:$0xff] %vm397_vm1, %v2656_v13  ;;  %v2666_v35 = vpop.permute.xlu0 %2665 }
 0x443   : > { %2741 = vst.msk [vmem:[#allocation3 + $0xa0] sm:$0xff] %vm397_vm1, %v2666_v35 }
 0x445   : > { %3019 = vrot.lane.b32.xlu1 %v9272_v57, %s7727_s20  ;;  %v2660_v19 = vpop.permute.xlu1 %2659 }
 0x446   : > { %3025 = vrot.lane.b32.xlu0 %v9310_v30, %s7727_s20  ;;  %2738 = vst.msk [vmem:[#allocation3 + $0x88] sm:$0xff] %vm397_vm1, %v2660_v19 }
 0x448   : > { %v2670_v59 = vpop.permute.xlu0 %2669 }
 0x449   : > { %3023 = vrot.lane.b32.xlu1 %v9308_v29, %s7727_s20  ;;  %v2664_v28 = vpop.permute.xlu1 %2663  ;;  %2743 = vst.msk [vmem:[#allocation3 + $0xb0] sm:$0xff] %vm397_vm1, %v2670_v59 }
 0x44a   : > { %3029 = vrot.lane.b32.xlu0 %v9350_v58, %s7727_s20  ;;  %2740 = vst.msk [vmem:[#allocation3 + $0x98] sm:$0xff] %vm397_vm1, %v2664_v28 }
 0x44d   : > { %3027 = vrot.lane.b32.xlu1 %v9348_v17, %s7727_s20  ;;  %v2668_v13 = vpop.permute.xlu1 %2667 }
 0x44e   : > { %3033 = vrot.lane.b32.xlu0 %v9386_v32, %s7727_s20  ;;  %2742 = vst.msk [vmem:[#allocation3 + $0xa8] sm:$0xff] %vm397_vm1, %v2668_v13 }
 0x44f   : > { %v2674_v46 = vpop.permute.xlu0 %2673 }
 0x450   : > { %2745 = vst.msk [vmem:[#allocation3 + $0xc0] sm:$0xff] %vm397_vm1, %v2674_v46 }
 0x451   : > { %3031 = vrot.lane.b32.xlu1 %v9384_v26, %s7727_s20  ;;  %v2672_v19 = vpop.permute.xlu1 %2671 }
 0x452   : > { %3037 = vrot.lane.b32.xlu0 %v9422_v56, %s7727_s20  ;;  %2744 = vst.msk [vmem:[#allocation3 + $0xb8] sm:$0xff] %vm397_vm1, %v2672_v19 }
 0x455   : > { %3035 = vrot.lane.b32.xlu1 %v9420_v51, %s7727_s20 }
 0x456   : > { %3041 = vrot.lane.b32.xlu0 %v9458_v7, %s7727_s20  ;;  %v2678_v35 = vpop.permute.xlu0 %2677 }
 0x457   : > { %2747 = vst.msk [vmem:[#allocation3 + $0xd0] sm:$0xff] %vm397_vm1, %v2678_v35 }
 0x458   : > { %v2676_v28 = vpop.permute.xlu1 %2675 }
 0x459   : > { %3039 = vrot.lane.b32.xlu1 %v9456_v60, %s7727_s20  ;;  %2746 = vst.msk [vmem:[#allocation3 + $0xc8] sm:$0xff] %vm397_vm1, %v2676_v28 }
 0x45a   : > { %3045 = vrot.lane.b32.xlu0 %v9494_v49, %s7727_s20 }
 0x45d   : > { %3043 = vrot.lane.b32.xlu1 %v9492_v61, %s7727_s20  ;;  %v2682_v59 = vpop.permute.xlu0 %2681 }
 0x45e   : > { %3049 = vrot.lane.b32.xlu0 %v9530_v37, %s7727_s20  ;;  %2749 = vst.msk [vmem:[#allocation3 + $0xe0] sm:$0xff] %vm397_vm1, %v2682_v59  ;;  %v11993_v59 = vld [vmem:[#allocation78_spill] sm:$0xff] }
 0x45f   : > { %v2680_v13 = vpop.permute.xlu1 %2679 }
 0x460   : > { %2748 = vst.msk [vmem:[#allocation3 + $0xd8] sm:$0xff] %vm397_vm1, %v2680_v13  ;;  %v11992_v13 = vld [vmem:[#allocation77_spill] sm:$0xff] }
 0x461   : > { %3047 = vrot.lane.b32.xlu1 %v9528_v48, %s7727_s20 }
 0x462   : > { %3053 = vrot.lane.b32.xlu0 %v9566_v18, %s7727_s20 }
 0x464   : > { %v2686_v46 = vpop.permute.xlu0 %2685 }
 0x465   : > { %3051 = vrot.lane.b32.xlu1 %v9564_v4, %s7727_s20  ;;  %2751 = vst.msk [vmem:[#allocation3 + $0xf0] sm:$0xff] %vm397_vm1, %v2686_v46 }
 0x466   : > { %v2684_v19 = vpop.permute.xlu1 %2683  ;;  %3057 = vrot.lane.b32.xlu0 %v9602_v62, %s7727_s20  ;;  %v11994_v62 = vld [vmem:[#allocation85_spill] sm:$0xff] }
 0x467   : > { %2750 = vst.msk [vmem:[#allocation3 + $0xe8] sm:$0xff] %vm397_vm1, %v2684_v19 }
 0x468   : > { %v2818_v35 = vpop.permute.xlu0 %2817 }
 0x469   : > { %3055 = vrot.lane.b32.xlu1 %v9600_v22, %s7727_s20  ;;  %2913 = vst.msk [vmem:[#allocation3] sm:$0xff] %vm590_vm2, %v2818_v35  ;;  %v11995_v22 = vld [vmem:[#allocation86_spill] sm:$0xff] }
 0x46a   : > { %3061 = vrot.lane.b32.xlu0 %v11993_v59, %s7727_s20 }
 0x46b   : > { %v2688_v28 = vpop.permute.xlu1 %2687 }
 0x46c   : > { %2752 = vst.msk [vmem:[#allocation3 + $0xf8] sm:$0xff] %vm397_vm1, %v2688_v28  ;;  %v2822_v46 = vpop.permute.xlu0 %2821 }
 0x46d   : > { %3059 = vrot.lane.b32.xlu1 %v11992_v13, %s7727_s20  ;;  %2915 = vst.msk [vmem:[#allocation3 + $0x10] sm:$0xff] %vm590_vm2, %v2822_v46 }
 0x46e   : > { %3065 = vrot.lane.b32.xlu0 %v11995_v22, %s7727_s20  ;;  %v11996_v22 = vld [vmem:[#allocation4_spill] sm:$0xff] }
 0x46f   : > { %v2820_v19 = vpop.permute.xlu1 %2819 }
 0x470   : > { %2914 = vst.msk [vmem:[#allocation3 + $0x8] sm:$0xff] %vm590_vm2, %v2820_v19  ;;  %v2826_v35 = vpop.permute.xlu0 %2825 }
 0x471   : > { %3063 = vrot.lane.b32.xlu1 %v11994_v62, %s7727_s20  ;;  %2917 = vst.msk [vmem:[#allocation3 + $0x20] sm:$0xff] %vm590_vm2, %v2826_v35 }
 0x472   : > { %3069 = vrot.lane.b32.xlu0 %v9727_v1, %s7727_s20  ;;  %v11997_v1 = vld [vmem:[#allocation5_spill] sm:$0xff] }
 0x473   : > { %v2824_v28 = vpop.permute.xlu1 %2823 }
 0x474   : > { %2916 = vst.msk [vmem:[#allocation3 + $0x18] sm:$0xff] %vm590_vm2, %v2824_v28  ;;  %v2830_v46 = vpop.permute.xlu0 %2829 }
 0x475   : > { %3067 = vrot.lane.b32.xlu1 %v9711_v23, %s7727_s20  ;;  %2919 = vst.msk [vmem:[#allocation3 + $0x30] sm:$0xff] %vm590_vm2, %v2830_v46  ;;  %v11998_v23 = vld [vmem:[#allocation6_spill] sm:$0xff] }
 0x476   : > { %3201 = vrot.lane.b32.xlu0 %v11996_v22, %s7728_s21  ;;  %v11999_v22 = vld [vmem:[#allocation7_spill] sm:$0xff] }
 0x477   : > { %v2828_v19 = vpop.permute.xlu1 %2827 }
 0x478   : > { %2918 = vst.msk [vmem:[#allocation3 + $0x28] sm:$0xff] %vm590_vm2, %v2828_v19  ;;  %v2834_v35 = vpop.permute.xlu0 %2833 }
 0x479   : > { %3071 = vrot.lane.b32.xlu1 %v9737_v10, %s7727_s20  ;;  %2921 = vst.msk [vmem:[#allocation3 + $0x40] sm:$0xff] %vm590_vm2, %v2834_v35  ;;  %v12000_v10 = vld [vmem:[#allocation8_spill] sm:$0xff] }
 0x47a   : > { %3205 = vrot.lane.b32.xlu0 %v11998_v23, %s7728_s21  ;;  %v12001_v23 = vld [vmem:[#allocation13_spill] sm:$0xff] }
 0x47b   : > { %v2832_v28 = vpop.permute.xlu1 %2831 }
 0x47c   : > { %2920 = vst.msk [vmem:[#allocation3 + $0x38] sm:$0xff] %vm590_vm2, %v2832_v28  ;;  %v2838_v46 = vpop.permute.xlu0 %2837 }
 0x47d   : > { %3203 = vrot.lane.b32.xlu1 %v11997_v1, %s7728_s21  ;;  %2923 = vst.msk [vmem:[#allocation3 + $0x50] sm:$0xff] %vm590_vm2, %v2838_v46  ;;  %v12002_v1 = vld [vmem:[#allocation14_spill] sm:$0xff] }
 0x47e   : > { %3209 = vrot.lane.b32.xlu0 %v12000_v10, %s7728_s21  ;;  %v12003_v10 = vld [vmem:[#allocation19_spill] sm:$0xff] }
 0x47f   : > { %v2836_v19 = vpop.permute.xlu1 %2835 }
 0x480   : > { %2922 = vst.msk [vmem:[#allocation3 + $0x48] sm:$0xff] %vm590_vm2, %v2836_v19  ;;  %v2842_v35 = vpop.permute.xlu0 %2841 }
 0x481   : > { %3207 = vrot.lane.b32.xlu1 %v11999_v22, %s7728_s21  ;;  %2925 = vst.msk [vmem:[#allocation3 + $0x60] sm:$0xff] %vm590_vm2, %v2842_v35  ;;  %v12004_v22 = vld [vmem:[#allocation20_spill] sm:$0xff] }
 0x482   : > { %3213 = vrot.lane.b32.xlu0 %v12002_v1, %s7728_s21  ;;  %v12006_v1 = vld [vmem:[#allocation26_spill] sm:$0xff] }
 0x483   : > { %v2840_v28 = vpop.permute.xlu1 %2839 }
 0x484   : > { %2924 = vst.msk [vmem:[#allocation3 + $0x58] sm:$0xff] %vm590_vm2, %v2840_v28  ;;  %v2846_v46 = vpop.permute.xlu0 %2845 }
 0x485   : > { %3211 = vrot.lane.b32.xlu1 %v12001_v23, %s7728_s21  ;;  %2927 = vst.msk [vmem:[#allocation3 + $0x70] sm:$0xff] %vm590_vm2, %v2846_v46  ;;  %v12005_v23 = vld [vmem:[#allocation25_spill] sm:$0xff] }
 0x486   : > { %3217 = vrot.lane.b32.xlu0 %v12004_v22, %s7728_s21  ;;  %v12008_v22 = vld [vmem:[#allocation32_spill] sm:$0xff] }
 0x487   : > { %v2844_v19 = vpop.permute.xlu1 %2843 }
 0x488   : > { %2926 = vst.msk [vmem:[#allocation3 + $0x68] sm:$0xff] %vm590_vm2, %v2844_v19  ;;  %v2850_v35 = vpop.permute.xlu0 %2849 }
 0x489   : > { %3215 = vrot.lane.b32.xlu1 %v12003_v10, %s7728_s21  ;;  %2929 = vst.msk [vmem:[#allocation3 + $0x80] sm:$0xff] %vm590_vm2, %v2850_v35  ;;  %v12007_v10 = vld [vmem:[#allocation31_spill] sm:$0xff] }
 0x48a   : > { %3221 = vrot.lane.b32.xlu0 %v12006_v1, %s7728_s21  ;;  %v12010_v1 = vld [vmem:[#allocation38_spill] sm:$0xff] }
 0x48b   : > { %v2848_v28 = vpop.permute.xlu1 %2847 }
 0x48c   : > { %2928 = vst.msk [vmem:[#allocation3 + $0x78] sm:$0xff] %vm590_vm2, %v2848_v28  ;;  %v2854_v46 = vpop.permute.xlu0 %2853 }
 0x48d   : > { %3219 = vrot.lane.b32.xlu1 %v12005_v23, %s7728_s21  ;;  %2931 = vst.msk [vmem:[#allocation3 + $0x90] sm:$0xff] %vm590_vm2, %v2854_v46  ;;  %v12009_v23 = vld [vmem:[#allocation37_spill] sm:$0xff] }
 0x48e   : > { %3225 = vrot.lane.b32.xlu0 %v12008_v22, %s7728_s21  ;;  %v12012_v22 = vld [vmem:[#allocation44_spill] sm:$0xff] }
 0x48f   : > { %v2852_v19 = vpop.permute.xlu1 %2851 }
 0x490   : > { %2930 = vst.msk [vmem:[#allocation3 + $0x88] sm:$0xff] %vm590_vm2, %v2852_v19  ;;  %v2858_v35 = vpop.permute.xlu0 %2857 }
 0x491   : > { %3223 = vrot.lane.b32.xlu1 %v12007_v10, %s7728_s21  ;;  %2933 = vst.msk [vmem:[#allocation3 + $0xa0] sm:$0xff] %vm590_vm2, %v2858_v35  ;;  %v12011_v10 = vld [vmem:[#allocation43_spill] sm:$0xff] }
 0x492   : > { %3229 = vrot.lane.b32.xlu0 %v12010_v1, %s7728_s21  ;;  %v12014_v1 = vld [vmem:[#allocation50_spill] sm:$0xff] }
 0x493   : > { %v2856_v28 = vpop.permute.xlu1 %2855 }
 0x494   : > { %2932 = vst.msk [vmem:[#allocation3 + $0x98] sm:$0xff] %vm590_vm2, %v2856_v28  ;;  %v2862_v46 = vpop.permute.xlu0 %2861 }
 0x495   : > { %3227 = vrot.lane.b32.xlu1 %v12009_v23, %s7728_s21  ;;  %2935 = vst.msk [vmem:[#allocation3 + $0xb0] sm:$0xff] %vm590_vm2, %v2862_v46  ;;  %v12013_v23 = vld [vmem:[#allocation49_spill] sm:$0xff] }
 0x496   : > { %3233 = vrot.lane.b32.xlu0 %v12012_v22, %s7728_s21  ;;  %v12016_v22 = vld [vmem:[#allocation56_spill] sm:$0xff] }
 0x497   : > { %v2860_v19 = vpop.permute.xlu1 %2859 }
 0x498   : > { %2934 = vst.msk [vmem:[#allocation3 + $0xa8] sm:$0xff] %vm590_vm2, %v2860_v19  ;;  %v2866_v35 = vpop.permute.xlu0 %2865 }
 0x499   : > { %3231 = vrot.lane.b32.xlu1 %v12011_v10, %s7728_s21  ;;  %2937 = vst.msk [vmem:[#allocation3 + $0xc0] sm:$0xff] %vm590_vm2, %v2866_v35  ;;  %v12015_v10 = vld [vmem:[#allocation55_spill] sm:$0xff] }
 0x49a   : > { %3237 = vrot.lane.b32.xlu0 %v12014_v1, %s7728_s21  ;;  %v12018_v1 = vld [vmem:[#allocation62_spill] sm:$0xff] }
 0x49b   : > { %v2864_v28 = vpop.permute.xlu1 %2863 }
 0x49c   : > { %2936 = vst.msk [vmem:[#allocation3 + $0xb8] sm:$0xff] %vm590_vm2, %v2864_v28  ;;  %v2870_v46 = vpop.permute.xlu0 %2869 }
 0x49d   : > { %3235 = vrot.lane.b32.xlu1 %v12013_v23, %s7728_s21  ;;  %2939 = vst.msk [vmem:[#allocation3 + $0xd0] sm:$0xff] %vm590_vm2, %v2870_v46  ;;  %v12017_v23 = vld [vmem:[#allocation61_spill] sm:$0xff] }
 0x49e   : > { %3241 = vrot.lane.b32.xlu0 %v12016_v22, %s7728_s21  ;;  %v12020_v22 = vld [vmem:[#allocation68_spill] sm:$0xff] }
 0x49f   : > { %v2868_v19 = vpop.permute.xlu1 %2867 }
 0x4a0   : > { %2938 = vst.msk [vmem:[#allocation3 + $0xc8] sm:$0xff] %vm590_vm2, %v2868_v19  ;;  %v2874_v35 = vpop.permute.xlu0 %2873 }
 0x4a1   : > { %3239 = vrot.lane.b32.xlu1 %v12015_v10, %s7728_s21  ;;  %2941 = vst.msk [vmem:[#allocation3 + $0xe0] sm:$0xff] %vm590_vm2, %v2874_v35  ;;  %v12019_v10 = vld [vmem:[#allocation67_spill] sm:$0xff] }
 0x4a2   : > { %3245 = vrot.lane.b32.xlu0 %v12018_v1, %s7728_s21  ;;  %v12022_v1 = vld [vmem:[#allocation76_spill] sm:$0xff] }
 0x4a3   : > { %v2872_v28 = vpop.permute.xlu1 %2871 }
 0x4a4   : > { %2940 = vst.msk [vmem:[#allocation3 + $0xd8] sm:$0xff] %vm590_vm2, %v2872_v28  ;;  %v2878_v46 = vpop.permute.xlu0 %2877 }
 0x4a5   : > { %3243 = vrot.lane.b32.xlu1 %v12017_v23, %s7728_s21  ;;  %2943 = vst.msk [vmem:[#allocation3 + $0xf0] sm:$0xff] %vm590_vm2, %v2878_v46  ;;  %v12021_v23 = vld [vmem:[#allocation75_spill] sm:$0xff] }
 0x4a6   : > { %3249 = vrot.lane.b32.xlu0 %v12020_v22, %s7728_s21  ;;  %v12024_v22 = vld [vmem:[#allocation84_spill] sm:$0xff] }
 0x4a7   : > { %v2876_v19 = vpop.permute.xlu1 %2875 }
 0x4a8   : > { %2942 = vst.msk [vmem:[#allocation3 + $0xe8] sm:$0xff] %vm590_vm2, %v2876_v19  ;;  %v3010_v35 = vpop.permute.xlu0 %3009 }
 0x4a9   : > { %3247 = vrot.lane.b32.xlu1 %v12019_v10, %s7728_s21  ;;  %3105 = vst.msk [vmem:[#allocation3] sm:$0xff] %vm784_vm3, %v3010_v35  ;;  %v12023_v10 = vld [vmem:[#allocation83_spill] sm:$0xff] }
 0x4aa   : > { %3253 = vrot.lane.b32.xlu0 %v12022_v1, %s7728_s21 }
 0x4ab   : > { %v2880_v28 = vpop.permute.xlu1 %2879 }
 0x4ac   : > { %2944 = vst.msk [vmem:[#allocation3 + $0xf8] sm:$0xff] %vm590_vm2, %v2880_v28  ;;  %v3014_v46 = vpop.permute.xlu0 %3013 }
 0x4ad   : > { %3251 = vrot.lane.b32.xlu1 %v12021_v23, %s7728_s21  ;;  %3107 = vst.msk [vmem:[#allocation3 + $0x10] sm:$0xff] %vm784_vm3, %v3014_v46  ;;  %v12025_v23 = vld [vmem:[#allocation91_spill] sm:$0xff] }
 0x4ae   : > { %3257 = vrot.lane.b32.xlu0 %v12024_v22, %s7728_s21 }
 0x4af   : > { %v3012_v19 = vpop.permute.xlu1 %3011 }
 0x4b0   : > { %3106 = vst.msk [vmem:[#allocation3 + $0x8] sm:$0xff] %vm784_vm3, %v3012_v19  ;;  %v3018_v35 = vpop.permute.xlu0 %3017 }
 0x4b1   : > { %3255 = vrot.lane.b32.xlu1 %v12023_v10, %s7728_s21  ;;  %3109 = vst.msk [vmem:[#allocation3 + $0x20] sm:$0xff] %vm784_vm3, %v3018_v35 }
 0x4b2   : > { %3261 = vrot.lane.b32.xlu0 %v9729_v5, %s7728_s21 }
 0x4b3   : > { %v3016_v28 = vpop.permute.xlu1 %3015 }
 0x4b4   : > { %3108 = vst.msk [vmem:[#allocation3 + $0x18] sm:$0xff] %vm784_vm3, %v3016_v28  ;;  %v3022_v19 = vpop.permute.xlu0 %3021 }
 0x4b5   : > { %3259 = vrot.lane.b32.xlu1 %v12025_v23, %s7728_s21  ;;  %3111 = vst.msk [vmem:[#allocation3 + $0x30] sm:$0xff] %vm784_vm3, %v3022_v19 }
 0x4b6   : > { %3393 = vrot.lane.b32.xlu0 %v9206_v25, %s7729_s22 }
 0x4b7   : > { %v3020_v1 = vpop.permute.xlu1 %3019 }
 0x4b8   : > { %3110 = vst.msk [vmem:[#allocation3 + $0x28] sm:$0xff] %vm784_vm3, %v3020_v1  ;;  %v3026_v10 = vpop.permute.xlu0 %3025 }
 0x4b9   : > { %3263 = vrot.lane.b32.xlu1 %v9739_v33, %s7728_s21  ;;  %3113 = vst.msk [vmem:[#allocation3 + $0x40] sm:$0xff] %vm784_vm3, %v3026_v10 }
 0x4ba   : > { %3397 = vrot.lane.b32.xlu0 %v9244_v40, %s7729_s22 }
 0x4bb   : > { %v3024_v46 = vpop.permute.xlu1 %3023 }
 0x4bc   : > { %3112 = vst.msk [vmem:[#allocation3 + $0x38] sm:$0xff] %vm784_vm3, %v3024_v46  ;;  %v3030_v28 = vpop.permute.xlu0 %3029 }
 0x4bd   : > { %3395 = vrot.lane.b32.xlu1 %v9213_v27, %s7729_s22  ;;  %3115 = vst.msk [vmem:[#allocation3 + $0x50] sm:$0xff] %vm784_vm3, %v3030_v28  ;;  %v12030_v28 = vld [vmem:[#allocation86_spill] sm:$0xff] }
 0x4be   : > { %3401 = vrot.lane.b32.xlu0 %v9280_v12, %s7729_s22 }
 0x4bf   : > { %v3028_v22 = vpop.permute.xlu1 %3027 }
 0x4c0   : > { %3114 = vst.msk [vmem:[#allocation3 + $0x48] sm:$0xff] %vm784_vm3, %v3028_v22  ;;  %v3034_v35 = vpop.permute.xlu0 %3033 }
 0x4c1   : > { %3399 = vrot.lane.b32.xlu1 %v9254_v45, %s7729_s22  ;;  %3117 = vst.msk [vmem:[#allocation3 + $0x60] sm:$0xff] %vm784_vm3, %v3034_v35 }
 0x4c2   : > { %3405 = vrot.lane.b32.xlu0 %v9316_v42, %s7729_s22 }
 0x4c3   : > { %v3032_v25 = vpop.permute.xlu1 %3031 }
 0x4c4   : > { %3116 = vst.msk [vmem:[#allocation3 + $0x58] sm:$0xff] %vm784_vm3, %v3032_v25  ;;  %v3038_v40 = vpop.permute.xlu0 %3037 }
 0x4c5   : > { %3403 = vrot.lane.b32.xlu1 %v9290_v15, %s7729_s22  ;;  %3119 = vst.msk [vmem:[#allocation3 + $0x70] sm:$0xff] %vm784_vm3, %v3038_v40 }
 0x4c6   : > { %3409 = vrot.lane.b32.xlu0 %v9352_v0, %s7729_s22 }
 0x4c7   : > { %v3036_v27 = vpop.permute.xlu1 %3035 }
 0x4c8   : > { %3118 = vst.msk [vmem:[#allocation3 + $0x68] sm:$0xff] %vm784_vm3, %v3036_v27  ;;  %v3042_v12 = vpop.permute.xlu0 %3041  ;;  %v3552_v27 = vld [vmem:[#allocation2 + $0x198] sm:$0xff] }
 0x4c9   : > { %3407 = vrot.lane.b32.xlu1 %v9326_v47, %s7729_s22  ;;  %3121 = vst.msk [vmem:[#allocation3 + $0x80] sm:$0xff] %vm784_vm3, %v3042_v12  ;;  %v3553_v12 = vld [vmem:[#allocation2 + $0x1a0] sm:$0xff] }
 0x4ca   : > { %3413 = vrot.lane.b32.xlu0 %v9388_v34, %s7729_s22 }
 0x4cb   : > { %v3040_v45 = vpop.permute.xlu1 %3039 }
 0x4cc   : > { %3120 = vst.msk [vmem:[#allocation3 + $0x78] sm:$0xff] %vm784_vm3, %v3040_v45  ;;  %v3046_v42 = vpop.permute.xlu0 %3045 }
 0x4cd   : > { %3411 = vrot.lane.b32.xlu1 %v9362_v3, %s7729_s22  ;;  %3123 = vst.msk [vmem:[#allocation3 + $0x90] sm:$0xff] %vm784_vm3, %v3046_v42 }
 0x4ce   : > { %3417 = vrot.lane.b32.xlu0 %v9424_v6, %s7729_s22 }
 0x4cf   : > { %v3044_v15 = vpop.permute.xlu1 %3043 }
 0x4d0   : > { %3122 = vst.msk [vmem:[#allocation3 + $0x88] sm:$0xff] %vm784_vm3, %v3044_v15  ;;  %v3050_v0 = vpop.permute.xlu0 %3049 }
 0x4d1   : > { %3415 = vrot.lane.b32.xlu1 %v9398_v21, %s7729_s22  ;;  %3125 = vst.msk [vmem:[#allocation3 + $0xa0] sm:$0xff] %vm784_vm3, %v3050_v0  ;;  %v10195_v0 = vld [vmem:[#allocation2 + $0x1a2] sm:$0xff] }
 0x4d2   : > { %3421 = vrot.lane.b32.xlu0 %v9460_v50, %s7729_s22 }
 0x4d3   : > { %v3048_v47 = vpop.permute.xlu1 %3047 }
 0x4d4   : > { %3124 = vst.msk [vmem:[#allocation3 + $0x98] sm:$0xff] %vm784_vm3, %v3048_v47  ;;  %v3054_v34 = vpop.permute.xlu0 %3053  ;;  %v10193_v47 = vld [vmem:[#allocation2 + $0x1a1] sm:$0xff] }
 0x4d5   : > { %3419 = vrot.lane.b32.xlu1 %v9434_v36, %s7729_s22  ;;  %3127 = vst.msk [vmem:[#allocation3 + $0xb0] sm:$0xff] %vm784_vm3, %v3054_v34  ;;  %v10200_v34 = vld [vmem:[#allocation2 + $0x199] sm:$0xff] }
 0x4d6   : > { %3425 = vrot.lane.b32.xlu0 %v9496_v53, %s7729_s22 }
 0x4d7   : > { %v3052_v3 = vpop.permute.xlu1 %3051 }
 0x4d8   : > { %3126 = vst.msk [vmem:[#allocation3 + $0xa8] sm:$0xff] %vm784_vm3, %v3052_v3  ;;  %v3058_v21 = vpop.permute.xlu0 %3057  ;;  %v12034_v3 = vld [vmem:[#allocation9_spill] sm:$0xff] }
 0x4d9   : > { %3423 = vrot.lane.b32.xlu1 %v9470_v54, %s7729_s22  ;;  %3129 = vst.msk [vmem:[#allocation3 + $0xc0] sm:$0xff] %vm784_vm3, %v3058_v21  ;;  %v10204_v21 = vld [vmem:[#allocation2 + $0x19a] sm:$0xff] }
 0x4da   : > { %3429 = vrot.lane.b32.xlu0 %v9532_v16, %s7729_s22 }
 0x4db   : > { %v3056_v6 = vpop.permute.xlu1 %3055 }
 0x4dc   : > { %3128 = vst.msk [vmem:[#allocation3 + $0xb8] sm:$0xff] %vm784_vm3, %v3056_v6  ;;  %v3062_v50 = vpop.permute.xlu0 %3061  ;;  %v12035_v6 = vmov 0.0  }
 0x4dd   : > { %3427 = vrot.lane.b32.xlu1 %v9506_v14, %s7729_s22  ;;  %3131 = vst.msk [vmem:[#allocation3 + $0xd0] sm:$0xff] %vm784_vm3, %v3062_v50 }
 0x4de   : > { %3433 = vrot.lane.b32.xlu0 %v9568_v43, %s7729_s22  ;;  %4777 = vst.msk [vmem:[#allocation2 + $0x1a8] sm:$0x3] %vm2283_vm11, %v12035_v6 }
 0x4df   : > { %v3060_v36 = vpop.permute.xlu1 %3059  ;;  %4775 = vst.msk [vmem:[#allocation2 + $0x198] sm:$0xff] %vm204_vm0, %v12035_v6  ;;  %4776 = vst.msk [vmem:[#allocation2 + $0x1a0] sm:$0xff] %vm204_vm0, %v12035_v6  ;;  %v12061_v6 = vld [vmem:[#allocation92_spill] sm:$0xff] }
 0x4e0   : > { %3130 = vst.msk [vmem:[#allocation3 + $0xc8] sm:$0xff] %vm784_vm3, %v3060_v36  ;;  %v3066_v54 = vpop.permute.xlu0 %3065 }
 0x4e1   : > { %3431 = vrot.lane.b32.xlu1 %v9542_v2, %s7729_s22  ;;  %3133 = vst.msk [vmem:[#allocation3 + $0xe0] sm:$0xff] %vm784_vm3, %v3066_v54  ;;  %v12037_v54 = vld [vmem:[#allocation15_spill] sm:$0xff] }
 0x4e2   : > { %3437 = vrot.lane.b32.xlu0 %v9604_v8, %s7729_s22 }
 0x4e3   : > { %v3064_v53 = vpop.permute.xlu1 %3063 }
 0x4e4   : > { %3132 = vst.msk [vmem:[#allocation3 + $0xd8] sm:$0xff] %vm784_vm3, %v3064_v53  ;;  %v3070_v14 = vpop.permute.xlu0 %3069  ;;  %v12036_v53 = vld [vmem:[#allocation11_spill] sm:$0xff] }
 0x4e5   : > { %3435 = vrot.lane.b32.xlu1 %v9578_v41, %s7729_s22  ;;  %3135 = vst.msk [vmem:[#allocation3 + $0xf0] sm:$0xff] %vm784_vm3, %v3070_v14 }
 0x4e6   : > { %3441 = vrot.lane.b32.xlu0 %v9640_v55, %s7729_s22 }
 0x4e7   : > { %v3068_v16 = vpop.permute.xlu1 %3067 }
 0x4e8   : > { %3134 = vst.msk [vmem:[#allocation3 + $0xe8] sm:$0xff] %vm784_vm3, %v3068_v16  ;;  %v3202_v2 = vpop.permute.xlu0 %3201 }
 0x4e9   : > { %3439 = vrot.lane.b32.xlu1 %v9614_v44, %s7729_s22  ;;  %3297 = vst.msk [vmem:[#allocation3] sm:$0xff] %vm977_vm4, %v3202_v2  ;;  %v12039_v2 = vld [vmem:[#allocation21_spill] sm:$0xff] }
 0x4ea   : > { %3445 = vrot.lane.b32.xlu0 %v9676_v52, %s7729_s22  ;;  %v12026_v52 = vld [vmem:[#allocation98_spill] sm:$0xff] }
 0x4eb   : > { %v3072_v43 = vpop.permute.xlu1 %3071 }
 0x4ec   : > { %3136 = vst.msk [vmem:[#allocation3 + $0xf8] sm:$0xff] %vm784_vm3, %v3072_v43  ;;  %v3206_v41 = vpop.permute.xlu0 %3205  ;;  %v12038_v43 = vld [vmem:[#allocation17_spill] sm:$0xff] }
 0x4ed   : > { %3443 = vrot.lane.b32.xlu1 %v9650_v20, %s7729_s22  ;;  %3299 = vst.msk [vmem:[#allocation3 + $0x10] sm:$0xff] %vm977_vm4, %v3206_v41 }
 0x4ee   : > { %3449 = vrot.lane.b32.xlu0 %v9707_v9, %s7729_s22 }
 0x4ef   : > { %v3204_v8 = vpop.permute.xlu1 %3203 }
 0x4f0   : > { %3298 = vst.msk [vmem:[#allocation3 + $0x8] sm:$0xff] %vm977_vm4, %v3204_v8  ;;  %v3210_v44 = vpop.permute.xlu0 %3209 }
 0x4f1   : > { %3447 = vrot.lane.b32.xlu1 %v9686_v24, %s7729_s22  ;;  %3301 = vst.msk [vmem:[#allocation3 + $0x20] sm:$0xff] %vm977_vm4, %v3210_v44  ;;  %v12027_v24 = vld [vmem:[#allocation100_spill] sm:$0xff]  ;;  %v12041_v44 = vld [vmem:[#allocation27_spill] sm:$0xff] }
 0x4f2   : > { %3453 = vrot.lane.b32.xlu0 %v12026_v52, %s7729_s22 }
 0x4f3   : > { %v3208_v55 = vpop.permute.xlu1 %3207 }
 0x4f4   : > { %3300 = vst.msk [vmem:[#allocation3 + $0x18] sm:$0xff] %vm977_vm4, %v3208_v55  ;;  %v3214_v23 = vpop.permute.xlu0 %3213  ;;  %v12040_v55 = vld [vmem:[#allocation23_spill] sm:$0xff] }
 0x4f5   : > { %3451 = vrot.lane.b32.xlu1 %v9709_v63, %s7729_s22  ;;  %3303 = vst.msk [vmem:[#allocation3 + $0x30] sm:$0xff] %vm977_vm4, %v3214_v23 }
 0x4f6   : > { %3586 = vrot.lane.b32.xlu0 %v9217_v31, %s7730_s23 }
 0x4f7   : > { %v3212_v20 = vpop.permute.xlu1 %3211 }
 0x4f8   : > { %3302 = vst.msk [vmem:[#allocation3 + $0x28] sm:$0xff] %vm977_vm4, %v3212_v20  ;;  %v3218_v1 = vpop.permute.xlu0 %3217 }
 0x4f9   : > { %3455 = vrot.lane.b32.xlu1 %v12027_v24, %s7729_s22  ;;  %3305 = vst.msk [vmem:[#allocation3 + $0x40] sm:$0xff] %vm977_vm4, %v3218_v1  ;;  %v12043_v1 = vld [vmem:[#allocation33_spill] sm:$0xff] }
 0x4fa   : > { %3590 = vrot.lane.b32.xlu0 %v9239_v39, %s7730_s23 }
 0x4fb   : > { %v3216_v9 = vpop.permute.xlu1 %3215 }
 0x4fc   : > { %3304 = vst.msk [vmem:[#allocation3 + $0x38] sm:$0xff] %vm977_vm4, %v3216_v9  ;;  %v3222_v19 = vpop.permute.xlu0 %3221  ;;  %v12042_v9 = vld [vmem:[#allocation29_spill] sm:$0xff] }
 0x4fd   : > { %3588 = vrot.lane.b32.xlu1 %v9237_v38, %s7730_s23  ;;  %3307 = vst.msk [vmem:[#allocation3 + $0x50] sm:$0xff] %vm977_vm4, %v3222_v19 }
 0x4fe   : > { %3594 = vrot.lane.b32.xlu0 %v9274_v11, %s7730_s23 }
 0x4ff   : > { %v3220_v63 = vpop.permute.xlu1 %3219 }
 0x500   : > { %3306 = vst.msk [vmem:[#allocation3 + $0x48] sm:$0xff] %vm977_vm4, %v3220_v63  ;;  %v3226_v46 = vpop.permute.xlu0 %3225 }
 0x501   : > { %3592 = vrot.lane.b32.xlu1 %v9272_v57, %s7730_s23  ;;  %3309 = vst.msk [vmem:[#allocation3 + $0x60] sm:$0xff] %vm977_vm4, %v3226_v46  ;;  %v12045_v46 = vld [vmem:[#allocation39_spill] sm:$0xff] }
 0x502   : > { %3598 = vrot.lane.b32.xlu0 %v9310_v30, %s7730_s23 }
 0x503   : > { %v3224_v31 = vpop.permute.xlu1 %3223 }
 0x504   : > { %3308 = vst.msk [vmem:[#allocation3 + $0x58] sm:$0xff] %vm977_vm4, %v3224_v31  ;;  %v3230_v39 = vpop.permute.xlu0 %3229  ;;  %v12044_v31 = vld [vmem:[#allocation35_spill] sm:$0xff] }
 0x505   : > { %3596 = vrot.lane.b32.xlu1 %v9308_v29, %s7730_s23  ;;  %3311 = vst.msk [vmem:[#allocation3 + $0x70] sm:$0xff] %vm977_vm4, %v3230_v39 }
 0x506   : > { %3602 = vrot.lane.b32.xlu0 %v9350_v58, %s7730_s23 }
 0x507   : > { %v3228_v38 = vpop.permute.xlu1 %3227 }
 0x508   : > { %3310 = vst.msk [vmem:[#allocation3 + $0x68] sm:$0xff] %vm977_vm4, %v3228_v38  ;;  %v3234_v11 = vpop.permute.xlu0 %3233 }
 0x509   : > { %3600 = vrot.lane.b32.xlu1 %v9348_v17, %s7730_s23  ;;  %3313 = vst.msk [vmem:[#allocation3 + $0x80] sm:$0xff] %vm977_vm4, %v3234_v11  ;;  %v12047_v11 = vld [vmem:[#allocation45_spill] sm:$0xff] }
 0x50a   : > { %3606 = vrot.lane.b32.xlu0 %v9386_v32, %s7730_s23 }
 0x50b   : > { %v3232_v57 = vpop.permute.xlu1 %3231 }
 0x50c   : > { %3312 = vst.msk [vmem:[#allocation3 + $0x78] sm:$0xff] %vm977_vm4, %v3232_v57  ;;  %v3238_v30 = vpop.permute.xlu0 %3237  ;;  %v12046_v57 = vld [vmem:[#allocation41_spill] sm:$0xff] }
 0x50d   : > { %3604 = vrot.lane.b32.xlu1 %v9384_v26, %s7730_s23  ;;  %3315 = vst.msk [vmem:[#allocation3 + $0x90] sm:$0xff] %vm977_vm4, %v3238_v30 }
 0x50e   : > { %3610 = vrot.lane.b32.xlu0 %v9422_v56, %s7730_s23 }
 0x50f   : > { %v3236_v29 = vpop.permute.xlu1 %3235 }
 0x510   : > { %3314 = vst.msk [vmem:[#allocation3 + $0x88] sm:$0xff] %vm977_vm4, %v3236_v29  ;;  %v3242_v58 = vpop.permute.xlu0 %3241 }
 0x511   : > { %3608 = vrot.lane.b32.xlu1 %v9420_v51, %s7730_s23  ;;  %3317 = vst.msk [vmem:[#allocation3 + $0xa0] sm:$0xff] %vm977_vm4, %v3242_v58  ;;  %v12049_v58 = vld [vmem:[#allocation51_spill] sm:$0xff] }
 0x512   : > { %3614 = vrot.lane.b32.xlu0 %v9458_v7, %s7730_s23 }
 0x513   : > { %v3240_v17 = vpop.permute.xlu1 %3239 }
 0x514   : > { %3316 = vst.msk [vmem:[#allocation3 + $0x98] sm:$0xff] %vm977_vm4, %v3240_v17  ;;  %v3246_v32 = vpop.permute.xlu0 %3245  ;;  %v12048_v17 = vld [vmem:[#allocation47_spill] sm:$0xff] }
 0x515   : > { %3612 = vrot.lane.b32.xlu1 %v9456_v60, %s7730_s23  ;;  %3319 = vst.msk [vmem:[#allocation3 + $0xb0] sm:$0xff] %vm977_vm4, %v3246_v32 }
 0x516   : > { %3618 = vrot.lane.b32.xlu0 %v9494_v49, %s7730_s23 }
 0x517   : > { %v3244_v26 = vpop.permute.xlu1 %3243 }
 0x518   : > { %3318 = vst.msk [vmem:[#allocation3 + $0xa8] sm:$0xff] %vm977_vm4, %v3244_v26  ;;  %v3250_v51 = vpop.permute.xlu0 %3249 }
 0x519   : > { %3616 = vrot.lane.b32.xlu1 %v9492_v61, %s7730_s23  ;;  %3321 = vst.msk [vmem:[#allocation3 + $0xc0] sm:$0xff] %vm977_vm4, %v3250_v51  ;;  %v12051_v51 = vld [vmem:[#allocation57_spill] sm:$0xff] }
 0x51a   : > { %3622 = vrot.lane.b32.xlu0 %v9530_v37, %s7730_s23  ;;  %v12029_v37 = vld [vmem:[#allocation70_spill] sm:$0xff] }
 0x51b   : > { %v3248_v56 = vpop.permute.xlu1 %3247 }
 0x51c   : > { %3320 = vst.msk [vmem:[#allocation3 + $0xb8] sm:$0xff] %vm977_vm4, %v3248_v56  ;;  %v3254_v7 = vpop.permute.xlu0 %3253  ;;  %v12050_v56 = vld [vmem:[#allocation53_spill] sm:$0xff] }
 0x51d   : > { %3620 = vrot.lane.b32.xlu1 %v9528_v48, %s7730_s23  ;;  %3323 = vst.msk [vmem:[#allocation3 + $0xd0] sm:$0xff] %vm977_vm4, %v3254_v7  ;;  %v12028_v48 = vld [vmem:[#allocation69_spill] sm:$0xff] }
 0x51e   : > { %3626 = vrot.lane.b32.xlu0 %v9566_v18, %s7730_s23 }
 0x51f   : > { %v3252_v60 = vpop.permute.xlu1 %3251 }
 0x520   : > { %3322 = vst.msk [vmem:[#allocation3 + $0xc8] sm:$0xff] %vm977_vm4, %v3252_v60  ;;  %v3258_v49 = vpop.permute.xlu0 %3257 }
 0x521   : > { %3624 = vrot.lane.b32.xlu1 %v9564_v4, %s7730_s23  ;;  %3325 = vst.msk [vmem:[#allocation3 + $0xe0] sm:$0xff] %vm977_vm4, %v3258_v49  ;;  %v12052_v49 = vld [vmem:[#allocation59_spill] sm:$0xff] }
 0x522   : > { %3630 = vrot.lane.b32.xlu0 %v12029_v37, %s7730_s23 }
 0x523   : > { %v3256_v61 = vpop.permute.xlu1 %3255 }
 0x524   : > { %3324 = vst.msk [vmem:[#allocation3 + $0xd8] sm:$0xff] %vm977_vm4, %v3256_v61  ;;  %v3262_v22 = vpop.permute.xlu0 %3261  ;;  %v7707_v61 = vld [vmem:[%s11753_s1 + $0x44] ss:$0 sps:$4 sm:$0xff]  }
 0x525   : > { %3628 = vrot.lane.b32.xlu1 %v12028_v48, %s7730_s23  ;;  %3327 = vst.msk [vmem:[#allocation3 + $0xf0] sm:$0xff] %vm977_vm4, %v3262_v22  ;;  %v12053_v48 = vld [vmem:[#allocation63_spill] sm:$0xff]  ;;  %7678 = vmatprep.subr.msk.bf16.mxu1 %vm1923_vm6, %v7707_v61  ;;  %v4240_v37 = vsel %vm1923_vm6, %v7707_v61, 0 }
 0x526   : > { %3634 = vrot.lane.b32.xlu0 %v11993_v59, %s7730_s23  ;;  %v12032_v59 = vld [vmem:[#allocation97_spill] sm:$0xff]  ;;  %7583 = vmatpush3.bf16.msra.mxu1 %v4240_v37  ;;  %v12079_v37 = vld [vmem:[#allocation58_spill] sm:$0xff] }
 0x527   : > { %v3260_v10 = vpop.permute.xlu1 %3259 }
 0x528   : > { %3326 = vst.msk [vmem:[#allocation3 + $0xe8] sm:$0xff] %vm977_vm4, %v3260_v10  ;;  %v3394_v18 = vpop.permute.xlu0 %3393 }
 0x529   : > { %3632 = vrot.lane.b32.xlu1 %v11992_v13, %s7730_s23  ;;  %3489 = vst.msk [vmem:[#allocation3] sm:$0xff] %vm1170_vm5, %v3394_v18  ;;  %v12031_v13 = vld [vmem:[#allocation93_spill] sm:$0xff]  ;;  %v12055_v18 = vld [vmem:[#allocation71_spill] sm:$0xff] }
 0x52a   : > { %3638 = vrot.lane.b32.xlu0 %v12030_v28, %s7730_s23 }
 0x52b   : > { %v3264_v4 = vpop.permute.xlu1 %3263 }
 0x52c   : > { %3328 = vst.msk [vmem:[#allocation3 + $0xf8] sm:$0xff] %vm977_vm4, %v3264_v4  ;;  %v3398_v35 = vpop.permute.xlu0 %3397  ;;  %v12054_v4 = vld [vmem:[#allocation65_spill] sm:$0xff] }
 0x52d   : > { %3636 = vrot.lane.b32.xlu1 %v11994_v62, %s7730_s23  ;;  %3491 = vst.msk [vmem:[#allocation3 + $0x10] sm:$0xff] %vm1170_vm5, %v3398_v35  ;;  %v12033_v62 = vld [vmem:[#allocation99_spill] sm:$0xff]  ;;  %v7708_v35 = vld [vmem:[%s11753_s1 + $0x3c] sm:$0xff]  }
 0x52e   : > { %3642 = vrot.lane.b32.xlu0 %v12032_v59, %s7730_s23  ;;  %v12057_v59 = vld [vmem:[#allocation79_spill] sm:$0xff]  ;;  %7584 = vmatprep.subr.bf16.mxu1 %v7708_v35 }
 0x52f   : > { %v3396_v25 = vpop.permute.xlu1 %3395  ;;  %7585 = vmatpush3.bf16.msra.mxu1 %v7708_v35  ;;  %v12082_v35 = vld [vmem:[#allocation66_spill] sm:$0xff] }
 0x530   : > { %3490 = vst.msk [vmem:[#allocation3 + $0x8] sm:$0xff] %vm1170_vm5, %v3396_v25  ;;  %v3402_v45 = vpop.permute.xlu0 %3401 }
 0x531   : > { %3640 = vrot.lane.b32.xlu1 %v12031_v13, %s7730_s23  ;;  %3493 = vst.msk [vmem:[#allocation3 + $0x20] sm:$0xff] %vm1170_vm5, %v3402_v45  ;;  %v12056_v13 = vld [vmem:[#allocation73_spill] sm:$0xff] }
 0x532   : > { %3646 = vrot.lane.b32.xlu0 %v3552_v27, %s7730_s23  ;;  %v7709_v45 = vld [vmem:[%s11753_s1 + $0x34] sm:$0xff]  }
 0x533   : > { %v3400_v40 = vpop.permute.xlu1 %3399  ;;  %7586 = vmatprep.subr.bf16.mxu1 %v7709_v45 }
 0x534   : > { %3492 = vst.msk [vmem:[#allocation3 + $0x18] sm:$0xff] %vm1170_vm5, %v3400_v40  ;;  %v3406_v42 = vpop.permute.xlu0 %3405  ;;  %7587 = vmatpush3.bf16.msra.mxu1 %v7709_v45  ;;  %v12085_v45 = vld [vmem:[#allocation80_spill] sm:$0xff] }
 0x535   : > { %3644 = vrot.lane.b32.xlu1 %v12033_v62, %s7730_s23  ;;  %3495 = vst.msk [vmem:[#allocation3 + $0x30] sm:$0xff] %vm1170_vm5, %v3406_v42  ;;  %v12058_v62 = vld [vmem:[#allocation81_spill] sm:$0xff] }
 0x536   : > { %3778 = vrot.lane.b32.xlu0 %v12034_v3, %s7731_s24  ;;  %v12060_v3 = vld [vmem:[#allocation89_spill] sm:$0xff] }
 0x537   : > { %v3404_v15 = vpop.permute.xlu1 %3403 }
 0x538   : > { %3494 = vst.msk [vmem:[#allocation3 + $0x28] sm:$0xff] %vm1170_vm5, %v3404_v15  ;;  %v3410_v50 = vpop.permute.xlu0 %3409 }
 0x539   : > { %3648 = vrot.lane.b32.xlu1 %v3553_v12, %s7730_s23  ;;  %3497 = vst.msk [vmem:[#allocation3 + $0x40] sm:$0xff] %vm1170_vm5, %v3410_v50  ;;  %v12059_v12 = vld [vmem:[#allocation87_spill] sm:$0xff] }
 0x53a   : > { %3782 = vrot.lane.b32.xlu0 %v12037_v54, %s7731_s24  ;;  %v12062_v54 = vld [vmem:[#allocation94_spill] sm:$0xff] }
 0x53b   : > { %v3408_v36 = vpop.permute.xlu1 %3407 }
 0x53c   : > { %3496 = vst.msk [vmem:[#allocation3 + $0x38] sm:$0xff] %vm1170_vm5, %v3408_v36  ;;  %v3414_v14 = vpop.permute.xlu0 %3413 }
 0x53d   : > { %3780 = vrot.lane.b32.xlu1 %v12036_v53, %s7731_s24  ;;  %3499 = vst.msk [vmem:[#allocation3 + $0x50] sm:$0xff] %vm1170_vm5, %v3414_v14  ;;  %v7710_v53 = vld [vmem:[%s11753_s1 + $0x2c] sm:$0xff]  }
 0x53e   : > { %3786 = vrot.lane.b32.xlu0 %v12039_v2, %s7731_s24  ;;  %7588 = vmatprep.subr.bf16.mxu1 %v7710_v53 }
 0x53f   : > { %v3412_v16 = vpop.permute.xlu1 %3411  ;;  %7589 = vmatpush3.bf16.msra.mxu1 %v7710_v53 }
 0x540   : > { %3498 = vst.msk [vmem:[#allocation3 + $0x48] sm:$0xff] %vm1170_vm5, %v3412_v16  ;;  %v3418_v41 = vpop.permute.xlu0 %3417 }
 0x541   : > { %3784 = vrot.lane.b32.xlu1 %v12038_v43, %s7731_s24  ;;  %3501 = vst.msk [vmem:[#allocation3 + $0x60] sm:$0xff] %vm1170_vm5, %v3418_v41  ;;  %v7711_v43 = vld [vmem:[%s11753_s1 + $0x24] sm:$0xff]  }
 0x542   : > { %3790 = vrot.lane.b32.xlu0 %v12041_v44, %s7731_s24  ;;  %7590 = vmatprep.subr.bf16.mxu1 %v7711_v43 }
 0x543   : > { %v3416_v8 = vpop.permute.xlu1 %3415  ;;  %7591 = vmatpush3.bf16.msra.mxu1 %v7711_v43 }
 0x544   : > { %3500 = vst.msk [vmem:[#allocation3 + $0x58] sm:$0xff] %vm1170_vm5, %v3416_v8  ;;  %v3422_v23 = vpop.permute.xlu0 %3421  ;;  %v12063_v8 = vld [vmem:[#allocation10_spill] sm:$0xff] }
 0x545   : > { %3788 = vrot.lane.b32.xlu1 %v12040_v55, %s7731_s24  ;;  %3503 = vst.msk [vmem:[#allocation3 + $0x70] sm:$0xff] %vm1170_vm5, %v3422_v23  ;;  %v12067_v23 = vld [vmem:[#allocation22_spill] sm:$0xff] }
 0x546   : > { %3794 = vrot.lane.b32.xlu0 %v12043_v1, %s7731_s24 }
 0x547   : > { %v3420_v20 = vpop.permute.xlu1 %3419 }
 0x548   : > { %3502 = vst.msk [vmem:[#allocation3 + $0x68] sm:$0xff] %vm1170_vm5, %v3420_v20  ;;  %v3426_v19 = vpop.permute.xlu0 %3425 }
 0x549   : > { %3792 = vrot.lane.b32.xlu1 %v12042_v9, %s7731_s24  ;;  %3505 = vst.msk [vmem:[#allocation3 + $0x80] sm:$0xff] %vm1170_vm5, %v3426_v19  ;;  %v12069_v19 = vld [vmem:[#allocation28_spill] sm:$0xff] }
 0x54a   : > { %3798 = vrot.lane.b32.xlu0 %v12045_v46, %s7731_s24 }
 0x54b   : > { %v3424_v63 = vpop.permute.xlu1 %3423 }
 0x54c   : > { %3504 = vst.msk [vmem:[#allocation3 + $0x78] sm:$0xff] %vm1170_vm5, %v3424_v63  ;;  %v3430_v39 = vpop.permute.xlu0 %3429  ;;  %v12068_v63 = vld [vmem:[#allocation24_spill] sm:$0xff] }
 0x54d   : > { %3796 = vrot.lane.b32.xlu1 %v12044_v31, %s7731_s24  ;;  %3507 = vst.msk [vmem:[#allocation3 + $0x90] sm:$0xff] %vm1170_vm5, %v3430_v39  ;;  %v12071_v39 = vld [vmem:[#allocation34_spill] sm:$0xff] }
 0x54e   : > { %3802 = vrot.lane.b32.xlu0 %v12047_v11, %s7731_s24 }
 0x54f   : > { %v3428_v38 = vpop.permute.xlu1 %3427 }
 0x550   : > { %3506 = vst.msk [vmem:[#allocation3 + $0x88] sm:$0xff] %vm1170_vm5, %v3428_v38  ;;  %v3434_v30 = vpop.permute.xlu0 %3433  ;;  %v12070_v38 = vld [vmem:[#allocation30_spill] sm:$0xff] }
 0x551   : > { %3800 = vrot.lane.b32.xlu1 %v12046_v57, %s7731_s24  ;;  %3509 = vst.msk [vmem:[#allocation3 + $0xa0] sm:$0xff] %vm1170_vm5, %v3434_v30  ;;  %v12073_v30 = vld [vmem:[#allocation40_spill] sm:$0xff] }
 0x552   : > { %3806 = vrot.lane.b32.xlu0 %v12049_v58, %s7731_s24 }
 0x553   : > { %v3432_v29 = vpop.permute.xlu1 %3431 }
 0x554   : > { %3508 = vst.msk [vmem:[#allocation3 + $0x98] sm:$0xff] %vm1170_vm5, %v3432_v29  ;;  %v3438_v32 = vpop.permute.xlu0 %3437  ;;  %v12072_v29 = vld [vmem:[#allocation36_spill] sm:$0xff] }
 0x555   : > { %3804 = vrot.lane.b32.xlu1 %v12048_v17, %s7731_s24  ;;  %3511 = vst.msk [vmem:[#allocation3 + $0xb0] sm:$0xff] %vm1170_vm5, %v3438_v32  ;;  %v12075_v32 = vld [vmem:[#allocation46_spill] sm:$0xff] }
 0x556   : > { %3810 = vrot.lane.b32.xlu0 %v12051_v51, %s7731_s24 }
 0x557   : > { %v3436_v26 = vpop.permute.xlu1 %3435 }
 0x558   : > { %3510 = vst.msk [vmem:[#allocation3 + $0xa8] sm:$0xff] %vm1170_vm5, %v3436_v26  ;;  %v3442_v7 = vpop.permute.xlu0 %3441  ;;  %v12074_v26 = vld [vmem:[#allocation42_spill] sm:$0xff] }
 0x559   : > { %3808 = vrot.lane.b32.xlu1 %v12050_v56, %s7731_s24  ;;  %3513 = vst.msk [vmem:[#allocation3 + $0xc0] sm:$0xff] %vm1170_vm5, %v3442_v7  ;;  %v12077_v7 = vld [vmem:[#allocation52_spill] sm:$0xff] }
 0x55a   : > { %3814 = vrot.lane.b32.xlu0 %v12053_v48, %s7731_s24  ;;  %v12078_v48 = vld [vmem:[#allocation54_spill] sm:$0xff] }
 0x55b   : > { %v3440_v60 = vpop.permute.xlu1 %3439 }
 0x55c   : > { %3512 = vst.msk [vmem:[#allocation3 + $0xb8] sm:$0xff] %vm1170_vm5, %v3440_v60  ;;  %v3446_v22 = vpop.permute.xlu0 %3445  ;;  %v12076_v60 = vld [vmem:[#allocation48_spill] sm:$0xff] }
 0x55d   : > { %3812 = vrot.lane.b32.xlu1 %v12052_v49, %s7731_s24  ;;  %3515 = vst.msk [vmem:[#allocation3 + $0xd0] sm:$0xff] %vm1170_vm5, %v3446_v22 }
 0x55e   : > { %3818 = vrot.lane.b32.xlu0 %v12055_v18, %s7731_s24  ;;  %v12081_v18 = vld [vmem:[#allocation64_spill] sm:$0xff] }
 0x55f   : > { %v3444_v10 = vpop.permute.xlu1 %3443 }
 0x560   : > { %3514 = vst.msk [vmem:[#allocation3 + $0xc8] sm:$0xff] %vm1170_vm5, %v3444_v10  ;;  %v3450_v25 = vpop.permute.xlu0 %3449 }
 0x561   : > { %3816 = vrot.lane.b32.xlu1 %v12054_v4, %s7731_s24  ;;  %3517 = vst.msk [vmem:[#allocation3 + $0xe0] sm:$0xff] %vm1170_vm5, %v3450_v25  ;;  %v12080_v4 = vld [vmem:[#allocation60_spill] sm:$0xff] }
 0x562   : > { %3822 = vrot.lane.b32.xlu0 %v12057_v59, %s7731_s24 }
 0x563   : > { %v3448_v28 = vpop.permute.xlu1 %3447 }
 0x564   : > { %3516 = vst.msk [vmem:[#allocation3 + $0xd8] sm:$0xff] %vm1170_vm5, %v3448_v28  ;;  %v3454_v40 = vpop.permute.xlu0 %3453 }
 0x565   : > { %3820 = vrot.lane.b32.xlu1 %v12056_v13, %s7731_s24  ;;  %3519 = vst.msk [vmem:[#allocation3 + $0xf0] sm:$0xff] %vm1170_vm5, %v3454_v40  ;;  %v12083_v13 = vld [vmem:[#allocation72_spill] sm:$0xff]  ;;  %v12084_v40 = vld [vmem:[#allocation74_spill] sm:$0xff] }
 0x566   : > { %3826 = vrot.lane.b32.xlu0 %v12059_v12, %s7731_s24 }
 0x567   : > { %v3452_v27 = vpop.permute.xlu1 %3451 }
 0x568   : > { %3518 = vst.msk [vmem:[#allocation3 + $0xe8] sm:$0xff] %vm1170_vm5, %v3452_v27  ;;  %v3587_v42 = vpop.permute.xlu0 %3586 }
 0x569   : > { %3824 = vrot.lane.b32.xlu1 %v12058_v62, %s7731_s24  ;;  %3682 = vst.msk [vmem:[#allocation3] sm:$0xff] %vm1364_vm7, %v3587_v42  ;;  %v12087_v42 = vld [vmem:[#allocation88_spill] sm:$0xff] }
 0x56a   : > { %3830 = vrot.lane.b32.xlu0 %v12061_v6, %s7731_s24 }
 0x56b   : > { %v3456_v15 = vpop.permute.xlu1 %3455 }
 0x56c   : > { %3520 = vst.msk [vmem:[#allocation3 + $0xf8] sm:$0xff] %vm1170_vm5, %v3456_v15  ;;  %v3591_v50 = vpop.permute.xlu0 %3590  ;;  %v12086_v15 = vld [vmem:[#allocation82_spill] sm:$0xff] }
 0x56d   : > { %3828 = vrot.lane.b32.xlu1 %v12060_v3, %s7731_s24  ;;  %3684 = vst.msk [vmem:[#allocation3 + $0x10] sm:$0xff] %vm1364_vm7, %v3591_v50  ;;  %v12089_v50 = vld [vmem:[#allocation95_spill] sm:$0xff] }
 0x56e   : > { %3834 = vrot.lane.b32.xlu0 %v9729_v5, %s7731_s24 }
 0x56f   : > { %v3589_v36 = vpop.permute.xlu1 %3588 }
 0x570   : > { %3683 = vst.msk [vmem:[#allocation3 + $0x8] sm:$0xff] %vm1364_vm7, %v3589_v36  ;;  %v3595_v14 = vpop.permute.xlu0 %3594  ;;  %v12088_v36 = vld [vmem:[#allocation90_spill] sm:$0xff] }
 0x571   : > { %3832 = vrot.lane.b32.xlu1 %v12062_v54, %s7731_s24  ;;  %3686 = vst.msk [vmem:[#allocation3 + $0x20] sm:$0xff] %vm1364_vm7, %v3595_v14 }
 0x572   : > { %3838 = vrot.lane.b32.xlu0 %v10200_v34, %s7731_s24  ;;  %v12065_v34 = vld [vmem:[#allocation16_spill] sm:$0xff] }
 0x573   : > { %v3593_v16 = vpop.permute.xlu1 %3592 }
 0x574   : > { %3685 = vst.msk [vmem:[#allocation3 + $0x18] sm:$0xff] %vm1364_vm7, %v3593_v16  ;;  %v3599_v2 = vpop.permute.xlu0 %3598  ;;  %v12090_v16 = vld [vmem:[#allocation96_spill] sm:$0xff] }
 0x575   : > { %3836 = vrot.lane.b32.xlu1 %v9739_v33, %s7731_s24  ;;  %3688 = vst.msk [vmem:[#allocation3 + $0x30] sm:$0xff] %vm1364_vm7, %v3599_v2  ;;  %v12064_v33 = vld [vmem:[#allocation12_spill] sm:$0xff] }
 0x576   : > { %3970 = vrot.lane.b32.xlu0 %v12063_v8, %s7732_s8 }
 0x577   : > { %v3597_v5 = vpop.permute.xlu1 %3596 }
 0x578   : > { %3687 = vst.msk [vmem:[#allocation3 + $0x28] sm:$0xff] %vm1364_vm7, %v3597_v5  ;;  %v3603_v55 = vpop.permute.xlu0 %3602 }
 0x579   : > { %3840 = vrot.lane.b32.xlu1 %v10193_v47, %s7731_s24  ;;  %3690 = vst.msk [vmem:[#allocation3 + $0x40] sm:$0xff] %vm1364_vm7, %v3603_v55  ;;  %v12066_v47 = vld [vmem:[#allocation18_spill] sm:$0xff] }
 0x57a   : > { %3974 = vrot.lane.b32.xlu0 %v12065_v34, %s7732_s8 }
 0x57b   : > { %v3601_v41 = vpop.permute.xlu1 %3600 }
 0x57c   : > { %3689 = vst.msk [vmem:[#allocation3 + $0x38] sm:$0xff] %vm1364_vm7, %v3601_v41  ;;  %v3607_v20 = vpop.permute.xlu0 %3606 }
 0x57d   : > { %3972 = vrot.lane.b32.xlu1 %v12064_v33, %s7732_s8  ;;  %3692 = vst.msk [vmem:[#allocation3 + $0x50] sm:$0xff] %vm1364_vm7, %v3607_v20 }
 0x57e   : > { %3978 = vrot.lane.b32.xlu0 %v12067_v23, %s7732_s8 }
 0x57f   : > { %v3605_v44 = vpop.permute.xlu1 %3604 }
 0x580   : > { %3691 = vst.msk [vmem:[#allocation3 + $0x48] sm:$0xff] %vm1364_vm7, %v3605_v44  ;;  %v3611_v1 = vpop.permute.xlu0 %3610 }
 0x581   : > { %3976 = vrot.lane.b32.xlu1 %v12066_v47, %s7732_s8  ;;  %3694 = vst.msk [vmem:[#allocation3 + $0x60] sm:$0xff] %vm1364_vm7, %v3611_v1 }
 0x582   : > { %3982 = vrot.lane.b32.xlu0 %v12069_v19, %s7732_s8 }
 0x583   : > { %v3609_v9 = vpop.permute.xlu1 %3608 }
 0x584   : > { %3693 = vst.msk [vmem:[#allocation3 + $0x58] sm:$0xff] %vm1364_vm7, %v3609_v9  ;;  %v3615_v46 = vpop.permute.xlu0 %3614 }
 0x585   : > { %3980 = vrot.lane.b32.xlu1 %v12068_v63, %s7732_s8  ;;  %3696 = vst.msk [vmem:[#allocation3 + $0x70] sm:$0xff] %vm1364_vm7, %v3615_v46 }
 0x586   : > { %3986 = vrot.lane.b32.xlu0 %v12071_v39, %s7732_s8 }
 0x587   : > { %v3613_v31 = vpop.permute.xlu1 %3612 }
 0x588   : > { %3695 = vst.msk [vmem:[#allocation3 + $0x68] sm:$0xff] %vm1364_vm7, %v3613_v31  ;;  %v3619_v11 = vpop.permute.xlu0 %3618 }
 0x589   : > { %3984 = vrot.lane.b32.xlu1 %v12070_v38, %s7732_s8  ;;  %3698 = vst.msk [vmem:[#allocation3 + $0x80] sm:$0xff] %vm1364_vm7, %v3619_v11 }
 0x58a   : > { %3990 = vrot.lane.b32.xlu0 %v12073_v30, %s7732_s8 }
 0x58b   : > { %v3617_v57 = vpop.permute.xlu1 %3616 }
 0x58c   : > { %3697 = vst.msk [vmem:[#allocation3 + $0x78] sm:$0xff] %vm1364_vm7, %v3617_v57  ;;  %v3623_v58 = vpop.permute.xlu0 %3622 }
 0x58d   : > { %3988 = vrot.lane.b32.xlu1 %v12072_v29, %s7732_s8  ;;  %3700 = vst.msk [vmem:[#allocation3 + $0x90] sm:$0xff] %vm1364_vm7, %v3623_v58 }
 0x58e   : > { %3994 = vrot.lane.b32.xlu0 %v12075_v32, %s7732_s8 }
 0x58f   : > { %v3621_v17 = vpop.permute.xlu1 %3620 }
 0x590   : > { %3699 = vst.msk [vmem:[#allocation3 + $0x88] sm:$0xff] %vm1364_vm7, %v3621_v17  ;;  %v3627_v51 = vpop.permute.xlu0 %3626 }
 0x591   : > { %3992 = vrot.lane.b32.xlu1 %v12074_v26, %s7732_s8  ;;  %3702 = vst.msk [vmem:[#allocation3 + $0xa0] sm:$0xff] %vm1364_vm7, %v3627_v51 }
 0x592   : > { %3998 = vrot.lane.b32.xlu0 %v12077_v7, %s7732_s8 }
 0x593   : > { %v3625_v56 = vpop.permute.xlu1 %3624 }
 0x594   : > { %3701 = vst.msk [vmem:[#allocation3 + $0x98] sm:$0xff] %vm1364_vm7, %v3625_v56  ;;  %v3631_v49 = vpop.permute.xlu0 %3630 }
 0x595   : > { %3996 = vrot.lane.b32.xlu1 %v12076_v60, %s7732_s8  ;;  %3704 = vst.msk [vmem:[#allocation3 + $0xb0] sm:$0xff] %vm1364_vm7, %v3631_v49 }
 0x596   : > { %4002 = vrot.lane.b32.xlu0 %v12079_v37, %s7732_s8 }
 0x597   : > { %v3629_v61 = vpop.permute.xlu1 %3628 }
 0x598   : > { %3703 = vst.msk [vmem:[#allocation3 + $0xa8] sm:$0xff] %vm1364_vm7, %v3629_v61  ;;  %v3635_v22 = vpop.permute.xlu0 %3634 }
 0x599   : > { %4000 = vrot.lane.b32.xlu1 %v12078_v48, %s7732_s8  ;;  %3706 = vst.msk [vmem:[#allocation3 + $0xc0] sm:$0xff] %vm1364_vm7, %v3635_v22 }
 0x59a   : > { %4006 = vrot.lane.b32.xlu0 %v12081_v18, %s7732_s8 }
 0x59b   : > { %v3633_v10 = vpop.permute.xlu1 %3632 }
 0x59c   : > { %3705 = vst.msk [vmem:[#allocation3 + $0xb8] sm:$0xff] %vm1364_vm7, %v3633_v10  ;;  %v3639_v25 = vpop.permute.xlu0 %3638 }
 0x59d   : > { %4004 = vrot.lane.b32.xlu1 %v12080_v4, %s7732_s8  ;;  %3708 = vst.msk [vmem:[#allocation3 + $0xd0] sm:$0xff] %vm1364_vm7, %v3639_v25 }
 0x59e   : > { %4010 = vrot.lane.b32.xlu0 %v12083_v13, %s7732_s8 }
 0x59f   : > { %v3637_v28 = vpop.permute.xlu1 %3636 }
 0x5a0   : > { %3707 = vst.msk [vmem:[#allocation3 + $0xc8] sm:$0xff] %vm1364_vm7, %v3637_v28  ;;  %v3643_v27 = vpop.permute.xlu0 %3642 }
 0x5a1   : > { %4008 = vrot.lane.b32.xlu1 %v12082_v35, %s7732_s8  ;;  %3710 = vst.msk [vmem:[#allocation3 + $0xe0] sm:$0xff] %vm1364_vm7, %v3643_v27 }
 0x5a2   : > { %4014 = vrot.lane.b32.xlu0 %v12085_v45, %s7732_s8 }
 0x5a3   : > { %v3641_v59 = vpop.permute.xlu1 %3640 }
 0x5a4   : > { %3709 = vst.msk [vmem:[#allocation3 + $0xd8] sm:$0xff] %vm1364_vm7, %v3641_v59  ;;  %v3647_v12 = vpop.permute.xlu0 %3646 }
 0x5a5   : > { %4012 = vrot.lane.b32.xlu1 %v12084_v40, %s7732_s8  ;;  %3712 = vst.msk [vmem:[#allocation3 + $0xf0] sm:$0xff] %vm1364_vm7, %v3647_v12 }
 0x5a6   : > { %4018 = vrot.lane.b32.xlu0 %v12087_v42, %s7732_s8 }
 0x5a7   : > { %v3645_v62 = vpop.permute.xlu1 %3644 }
 0x5a8   : > { %3711 = vst.msk [vmem:[#allocation3 + $0xe8] sm:$0xff] %vm1364_vm7, %v3645_v62  ;;  %v3779_v6 = vpop.permute.xlu0 %3778 }
 0x5a9   : > { %4016 = vrot.lane.b32.xlu1 %v12086_v15, %s7732_s8  ;;  %3874 = vst.msk [vmem:[#allocation3] sm:$0xff] %vm1557_vm8, %v3779_v6 }
 0x5aa   : > { %4022 = vrot.lane.b32.xlu0 %v12089_v50, %s7732_s8 }
 0x5ab   : > { %v3649_v3 = vpop.permute.xlu1 %3648 }
 0x5ac   : > { %3713 = vst.msk [vmem:[#allocation3 + $0xf8] sm:$0xff] %vm1364_vm7, %v3649_v3  ;;  %v3783_v54 = vpop.permute.xlu0 %3782 }
 0x5ad   : > { %4020 = vrot.lane.b32.xlu1 %v12088_v36, %s7732_s8  ;;  %3876 = vst.msk [vmem:[#allocation3 + $0x10] sm:$0xff] %vm1557_vm8, %v3783_v54 }
 0x5ae   : > { %4026 = vrot.lane.b32.xlu0 %v12026_v52, %s7732_s8 }
 0x5af   : > { %v3781_v53 = vpop.permute.xlu1 %3780 }
 0x5b0   : > { %3875 = vst.msk [vmem:[#allocation3 + $0x8] sm:$0xff] %vm1557_vm8, %v3781_v53  ;;  %v3787_v43 = vpop.permute.xlu0 %3786 }
 0x5b1   : > { %4024 = vrot.lane.b32.xlu1 %v12090_v16, %s7732_s8  ;;  %3878 = vst.msk [vmem:[#allocation3 + $0x20] sm:$0xff] %vm1557_vm8, %v3787_v43 }
 0x5b2   : > { %4030 = vrot.lane.b32.xlu0 %v10204_v21, %s7732_s8 }
 0x5b3   : > { %v3785_v14 = vpop.permute.xlu1 %3784 }
 0x5b4   : > { %3877 = vst.msk [vmem:[#allocation3 + $0x18] sm:$0xff] %vm1557_vm8, %v3785_v14  ;;  %v3791_v2 = vpop.permute.xlu0 %3790 }
 0x5b5   : > { %4028 = vrot.lane.b32.xlu1 %v12027_v24, %s7732_s8  ;;  %3880 = vst.msk [vmem:[#allocation3 + $0x30] sm:$0xff] %vm1557_vm8, %v3791_v2 }
 0x5b7   : > { %v3789_v5 = vpop.permute.xlu1 %3788 }
 0x5b8   : > { %3879 = vst.msk [vmem:[#allocation3 + $0x28] sm:$0xff] %vm1557_vm8, %v3789_v5  ;;  %v3795_v8 = vpop.permute.xlu0 %3794 }
 0x5b9   : > { %4032 = vrot.lane.b32.xlu1 %v10195_v0, %s7732_s8  ;;  %3882 = vst.msk [vmem:[#allocation3 + $0x40] sm:$0xff] %vm1557_vm8, %v3795_v8 }
 0x5bb   : > { %v3793_v52 = vpop.permute.xlu1 %3792 }
 0x5bc   : > { %3881 = vst.msk [vmem:[#allocation3 + $0x38] sm:$0xff] %vm1557_vm8, %v3793_v52  ;;  %v3799_v24 = vpop.permute.xlu0 %3798 }
 0x5bd   : > { %3884 = vst.msk [vmem:[#allocation3 + $0x50] sm:$0xff] %vm1557_vm8, %v3799_v24 }
 0x5bf   : > { %v3797_v41 = vpop.permute.xlu1 %3796 }
 0x5c0   : > { %3883 = vst.msk [vmem:[#allocation3 + $0x48] sm:$0xff] %vm1557_vm8, %v3797_v41  ;;  %v3803_v55 = vpop.permute.xlu0 %3802 }
 0x5c1   : > { %3886 = vst.msk [vmem:[#allocation3 + $0x60] sm:$0xff] %vm1557_vm8, %v3803_v55 }
 0x5c3   : > { %v3801_v21 = vpop.permute.xlu1 %3800 }
 0x5c4   : > { %3885 = vst.msk [vmem:[#allocation3 + $0x58] sm:$0xff] %vm1557_vm8, %v3801_v21  ;;  %v3807_v0 = vpop.permute.xlu0 %3806 }
 0x5c5   : > { %3888 = vst.msk [vmem:[#allocation3 + $0x70] sm:$0xff] %vm1557_vm8, %v3807_v0 }
 0x5c7   : > { %v3805_v33 = vpop.permute.xlu1 %3804 }
 0x5c8   : > { %3887 = vst.msk [vmem:[#allocation3 + $0x68] sm:$0xff] %vm1557_vm8, %v3805_v33  ;;  %v3811_v44 = vpop.permute.xlu0 %3810 }
 0x5c9   : > { %3890 = vst.msk [vmem:[#allocation3 + $0x80] sm:$0xff] %vm1557_vm8, %v3811_v44 }
 0x5cb   : > { %v3809_v34 = vpop.permute.xlu1 %3808 }
 0x5cc   : > { %3889 = vst.msk [vmem:[#allocation3 + $0x78] sm:$0xff] %vm1557_vm8, %v3809_v34  ;;  %v3815_v47 = vpop.permute.xlu0 %3814 }
 0x5cd   : > { %3892 = vst.msk [vmem:[#allocation3 + $0x90] sm:$0xff] %vm1557_vm8, %v3815_v47 }
 0x5cf   : > { %v3813_v20 = vpop.permute.xlu1 %3812 }
 0x5d0   : > { %3891 = vst.msk [vmem:[#allocation3 + $0x88] sm:$0xff] %vm1557_vm8, %v3813_v20  ;;  %v3819_v9 = vpop.permute.xlu0 %3818 }
 0x5d1   : > { %3894 = vst.msk [vmem:[#allocation3 + $0xa0] sm:$0xff] %vm1557_vm8, %v3819_v9 }
 0x5d3   : > { %v3817_v23 = vpop.permute.xlu1 %3816 }
 0x5d4   : > { %3893 = vst.msk [vmem:[#allocation3 + $0x98] sm:$0xff] %vm1557_vm8, %v3817_v23  ;;  %v3823_v63 = vpop.permute.xlu0 %3822 }
 0x5d5   : > { %3896 = vst.msk [vmem:[#allocation3 + $0xb0] sm:$0xff] %vm1557_vm8, %v3823_v63 }
 0x5d7   : > { %v3821_v1 = vpop.permute.xlu1 %3820 }
 0x5d8   : > { %3895 = vst.msk [vmem:[#allocation3 + $0xa8] sm:$0xff] %vm1557_vm8, %v3821_v1  ;;  %v3827_v31 = vpop.permute.xlu0 %3826 }
 0x5d9   : > { %3898 = vst.msk [vmem:[#allocation3 + $0xc0] sm:$0xff] %vm1557_vm8, %v3827_v31 }
 0x5db   : > { %v3825_v19 = vpop.permute.xlu1 %3824 }
 0x5dc   : > { %3897 = vst.msk [vmem:[#allocation3 + $0xb8] sm:$0xff] %vm1557_vm8, %v3825_v19  ;;  %v3831_v38 = vpop.permute.xlu0 %3830 }
 0x5dd   : > { %3900 = vst.msk [vmem:[#allocation3 + $0xd0] sm:$0xff] %vm1557_vm8, %v3831_v38 }
 0x5df   : > { %v3829_v46 = vpop.permute.xlu1 %3828 }
 0x5e0   : > { %3899 = vst.msk [vmem:[#allocation3 + $0xc8] sm:$0xff] %vm1557_vm8, %v3829_v46  ;;  %v3835_v57 = vpop.permute.xlu0 %3834 }
 0x5e1   : > { %3902 = vst.msk [vmem:[#allocation3 + $0xe0] sm:$0xff] %vm1557_vm8, %v3835_v57 }
 0x5e3   : > { %v3833_v39 = vpop.permute.xlu1 %3832 }
 0x5e4   : > { %3901 = vst.msk [vmem:[#allocation3 + $0xd8] sm:$0xff] %vm1557_vm8, %v3833_v39  ;;  %v3839_v29 = vpop.permute.xlu0 %3838 }
 0x5e5   : > { %3904 = vst.msk [vmem:[#allocation3 + $0xf0] sm:$0xff] %vm1557_vm8, %v3839_v29 }
 0x5e7   : > { %v3837_v11 = vpop.permute.xlu1 %3836 }
 0x5e8   : > { %3903 = vst.msk [vmem:[#allocation3 + $0xe8] sm:$0xff] %vm1557_vm8, %v3837_v11  ;;  %v3971_v17 = vpop.permute.xlu0 %3970 }
 0x5e9   : > { %4066 = vst.msk [vmem:[#allocation3] sm:$0xff] %vm1750_vm9, %v3971_v17 }
 0x5eb   : > { %v3841_v30 = vpop.permute.xlu1 %3840 }
 0x5ec   : > { %3905 = vst.msk [vmem:[#allocation3 + $0xf8] sm:$0xff] %vm1557_vm8, %v3841_v30  ;;  %v3975_v26 = vpop.permute.xlu0 %3974 }
 0x5ed   : > { %4068 = vst.msk [vmem:[#allocation3 + $0x10] sm:$0xff] %vm1750_vm9, %v3975_v26 }
 0x5ef   : > { %v3973_v58 = vpop.permute.xlu1 %3972 }
 0x5f0   : > { %4067 = vst.msk [vmem:[#allocation3 + $0x8] sm:$0xff] %vm1750_vm9, %v3973_v58  ;;  %v3979_v56 = vpop.permute.xlu0 %3978  ;;  %v4098_v7 = vld [vmem:[#allocation3] sm:$0xff] }
 0x5f1   : > { %4070 = vst.msk [vmem:[#allocation3 + $0x20] sm:$0xff] %vm1750_vm9, %v3979_v56 }
 0x5f3   : > { %v3977_v32 = vpop.permute.xlu1 %3976 }
 0x5f4   : > { %4069 = vst.msk [vmem:[#allocation3 + $0x18] sm:$0xff] %vm1750_vm9, %v3977_v32  ;;  %v3983_v60 = vpop.permute.xlu0 %3982  ;;  %v4100_v10 = vld [vmem:[#allocation3 + $0x10] sm:$0xff] }
 0x5f5   : > { %4072 = vst.msk [vmem:[#allocation3 + $0x30] sm:$0xff] %vm1750_vm9, %v3983_v60 }
 0x5f7   : > { %v3981_v51 = vpop.permute.xlu1 %3980  ;;  %v4099_v61 = vld [vmem:[#allocation3 + $0x8] sm:$0xff] }
 0x5f8   : > { %4071 = vst.msk [vmem:[#allocation3 + $0x28] sm:$0xff] %vm1750_vm9, %v3981_v51  ;;  %v4130_v49 = vpack.c.bf16 %v4099_v61, %v4098_v7  ;;  %v3987_v37 = vpop.permute.xlu0 %3986  ;;  %v4102_v25 = vld [vmem:[#allocation3 + $0x20] sm:$0xff] }
 0x5f9   : > { %4074 = vst.msk [vmem:[#allocation3 + $0x40] sm:$0xff] %vm1750_vm9, %v3987_v37 }
 0x5fa   : > { %7592 = vmatprep.mubr.msk.bf16.mxu1 %vm1874_vm10, %v4130_v49 }
 0x5fb   : > { %v3985_v48 = vpop.permute.xlu1 %3984  ;;  %v4101_v22 = vld [vmem:[#allocation3 + $0x18] sm:$0xff] }
 0x5fc   : > { %4073 = vst.msk [vmem:[#allocation3 + $0x38] sm:$0xff] %vm1750_vm9, %v3985_v48  ;;  %v4131_v4 = vpack.c.bf16 %v4101_v22, %v4100_v10  ;;  %v3991_v28 = vpop.permute.xlu0 %3990  ;;  %v4104_v40 = vld [vmem:[#allocation3 + $0x30] sm:$0xff] }
 0x5fd   : > { %4076 = vst.msk [vmem:[#allocation3 + $0x50] sm:$0xff] %vm1750_vm9, %v3991_v28  ;;  %v10493_v28 = vld [vmem:[%s11754_s2 + $0x1] ss:$0 sm:$0xff] }
 0x5fe   : > { %7593 = vmatmul.mubr.msk.bf16.vlgmr.msra.gmra.mxu1 %vm1874_vm10, %v4131_v4 }
 0x5ff   : > { %v3989_v18 = vpop.permute.xlu1 %3988  ;;  %v4103_v35 = vld [vmem:[#allocation3 + $0x28] sm:$0xff] }
 0x600   : > { %4075 = vst.msk [vmem:[#allocation3 + $0x48] sm:$0xff] %vm1750_vm9, %v3989_v18  ;;  %v4132_v13 = vpack.c.bf16 %v4103_v35, %v4102_v25  ;;  %v3995_v27 = vpop.permute.xlu0 %3994  ;;  %v4106_v42 = vld [vmem:[#allocation3 + $0x40] sm:$0xff] }
 0x601   : > { %4078 = vst.msk [vmem:[#allocation3 + $0x60] sm:$0xff] %vm1750_vm9, %v3995_v27 }
 0x602   : > { %7596 = vmatprep.mubr.msk.bf16.mxu1 %vm1874_vm10, %v4132_v13 }
 0x603   : > { %v3993_v59 = vpop.permute.xlu1 %3992  ;;  %v4105_v45 = vld [vmem:[#allocation3 + $0x38] sm:$0xff] }
 0x604   : > { %4077 = vst.msk [vmem:[#allocation3 + $0x58] sm:$0xff] %vm1750_vm9, %v3993_v59  ;;  %v4133_v62 = vpack.c.bf16 %v4105_v45, %v4104_v40  ;;  %v3999_v15 = vpop.permute.xlu0 %3998  ;;  %v4108_v53 = vld [vmem:[#allocation3 + $0x50] sm:$0xff] }
 0x605   : > { %4080 = vst.msk [vmem:[#allocation3 + $0x70] sm:$0xff] %vm1750_vm9, %v3999_v15 }
 0x606   : > { %7597 = vmatmul.mubr.msk.bf16.gmra.mxu1 %vm1874_vm10, %v4133_v62 }
 0x607   : > { %v3997_v12 = vpop.permute.xlu1 %3996  ;;  %v4107_v3 = vld [vmem:[#allocation3 + $0x48] sm:$0xff] }
 0x608   : > { %4079 = vst.msk [vmem:[#allocation3 + $0x68] sm:$0xff] %vm1750_vm9, %v3997_v12  ;;  %v4134_v6 = vpack.c.bf16 %v4107_v3, %v4106_v42  ;;  %v4003_v50 = vpop.permute.xlu0 %4002  ;;  %v4110_v5 = vld [vmem:[#allocation3 + $0x60] sm:$0xff] }
 0x609   : > { %4082 = vst.msk [vmem:[#allocation3 + $0x80] sm:$0xff] %vm1750_vm9, %v4003_v50 }
 0x60a   : > { %7600 = vmatprep.mubr.msk.bf16.mxu1 %vm1874_vm10, %v4134_v6 }
 0x60b   : > { %v4001_v36 = vpop.permute.xlu1 %4000  ;;  %v4109_v54 = vld [vmem:[#allocation3 + $0x58] sm:$0xff] }
 0x60c   : > { %4081 = vst.msk [vmem:[#allocation3 + $0x78] sm:$0xff] %vm1750_vm9, %v4001_v36  ;;  %v4135_v16 = vpack.c.bf16 %v4109_v54, %v4108_v53  ;;  %v4007_v43 = vpop.permute.xlu0 %4006  ;;  %v4112_v24 = vld [vmem:[#allocation3 + $0x70] sm:$0xff] }
 0x60d   : > { %4084 = vst.msk [vmem:[#allocation3 + $0x90] sm:$0xff] %vm1750_vm9, %v4007_v43 }
 0x60e   : > { %7601 = vmatmul.mubr.msk.bf16.gmra.mxu1 %vm1874_vm10, %v4135_v16 }
 0x60f   : > { %v4005_v14 = vpop.permute.xlu1 %4004  ;;  %v4111_v2 = vld [vmem:[#allocation3 + $0x68] sm:$0xff] }
 0x610   : > { %4083 = vst.msk [vmem:[#allocation3 + $0x88] sm:$0xff] %vm1750_vm9, %v4005_v14  ;;  %v4136_v52 = vpack.c.bf16 %v4111_v2, %v4110_v5  ;;  %v4011_v41 = vpop.permute.xlu0 %4010  ;;  %v4114_v34 = vld [vmem:[#allocation3 + $0x80] sm:$0xff] }
 0x611   : > { %4086 = vst.msk [vmem:[#allocation3 + $0xa0] sm:$0xff] %vm1750_vm9, %v4011_v41 }
 0x612   : > { %7604 = vmatprep.mubr.msk.bf16.mxu1 %vm1874_vm10, %v4136_v52 }
 0x613   : > { %v4009_v8 = vpop.permute.xlu1 %4008  ;;  %v4113_v21 = vld [vmem:[#allocation3 + $0x78] sm:$0xff] }
 0x614   : > { %4085 = vst.msk [vmem:[#allocation3 + $0x98] sm:$0xff] %vm1750_vm9, %v4009_v8  ;;  %v4137_v55 = vpack.c.bf16 %v4113_v21, %v4112_v24  ;;  %v4015_v0 = vpop.permute.xlu0 %4014  ;;  %v4116_v9 = vld [vmem:[#allocation3 + $0x90] sm:$0xff] }
 0x615   : > { %4088 = vst.msk [vmem:[#allocation3 + $0xb0] sm:$0xff] %vm1750_vm9, %v4015_v0 }
 0x616   : > { %7605 = vmatmul.mubr.msk.bf16.gmra.mxu1 %vm1874_vm10, %v4137_v55 }
 0x617   : > { %v4013_v33 = vpop.permute.xlu1 %4012  ;;  %v4115_v44 = vld [vmem:[#allocation3 + $0x88] sm:$0xff] }
 0x618   : > { %4087 = vst.msk [vmem:[#allocation3 + $0xa8] sm:$0xff] %vm1750_vm9, %v4013_v33  ;;  %v4138_v20 = vpack.c.bf16 %v4115_v44, %v4114_v34  ;;  %v4019_v23 = vpop.permute.xlu0 %4018  ;;  %v4118_v46 = vld [vmem:[#allocation3 + $0xa0] sm:$0xff] }
 0x619   : > { %4090 = vst.msk [vmem:[#allocation3 + $0xc0] sm:$0xff] %vm1750_vm9, %v4019_v23 }
 0x61a   : > { %7608 = vmatprep.mubr.msk.bf16.mxu1 %vm1874_vm10, %v4138_v20 }
 0x61b   : > { %v4017_v47 = vpop.permute.xlu1 %4016  ;;  %v4117_v1 = vld [vmem:[#allocation3 + $0x98] sm:$0xff] }
 0x61c   : > { %4089 = vst.msk [vmem:[#allocation3 + $0xb8] sm:$0xff] %vm1750_vm9, %v4017_v47  ;;  %v4139_v63 = vpack.c.bf16 %v4117_v1, %v4116_v9  ;;  %v4023_v31 = vpop.permute.xlu0 %4022  ;;  %v4120_v29 = vld [vmem:[#allocation3 + $0xb0] sm:$0xff] }
 0x61d   : > { %4092 = vst.msk [vmem:[#allocation3 + $0xd0] sm:$0xff] %vm1750_vm9, %v4023_v31 }
 0x61e   : > { %7609 = vmatmul.mubr.msk.bf16.gmra.mxu1 %vm1874_vm10, %v4139_v63 }
 0x61f   : > { %v4021_v19 = vpop.permute.xlu1 %4020  ;;  %v4119_v38 = vld [vmem:[#allocation3 + $0xa8] sm:$0xff] }
 0x620   : > { %4091 = vst.msk [vmem:[#allocation3 + $0xc8] sm:$0xff] %vm1750_vm9, %v4021_v19  ;;  %v4140_v39 = vpack.c.bf16 %v4119_v38, %v4118_v46  ;;  %v4027_v11 = vpop.permute.xlu0 %4026  ;;  %v4122_v26 = vld [vmem:[#allocation3 + $0xc0] sm:$0xff] }
 0x621   : > { %4094 = vst.msk [vmem:[#allocation3 + $0xe0] sm:$0xff] %vm1750_vm9, %v4027_v11 }
 0x622   : > { %7612 = vmatprep.mubr.msk.bf16.mxu1 %vm1874_vm10, %v4140_v39 }
 0x623   : > { %v4025_v57 = vpop.permute.xlu1 %4024  ;;  %v4121_v30 = vld [vmem:[#allocation3 + $0xb8] sm:$0xff] }
 0x624   : > { %4093 = vst.msk [vmem:[#allocation3 + $0xd8] sm:$0xff] %vm1750_vm9, %v4025_v57  ;;  %v4141_v17 = vpack.c.bf16 %v4121_v30, %v4120_v29  ;;  %v4031_v56 = vpop.permute.xlu0 %4030  ;;  %v4124_v7 = vld [vmem:[#allocation3 + $0xd0] sm:$0xff] }
 0x625   : > { %4096 = vst.msk [vmem:[#allocation3 + $0xf0] sm:$0xff] %vm1750_vm9, %v4031_v56 }
 0x626   : > { %7613 = vmatmul.mubr.msk.bf16.gmra.mxu1 %vm1874_vm10, %v4141_v17 }
 0x627   : > { %v4029_v58 = vpop.permute.xlu1 %4028  ;;  %v4123_v32 = vld [vmem:[#allocation3 + $0xc8] sm:$0xff] }
 0x628   : > { %4095 = vst.msk [vmem:[#allocation3 + $0xe8] sm:$0xff] %vm1750_vm9, %v4029_v58  ;;  %v4142_v51 = vpack.c.bf16 %v4123_v32, %v4122_v26  ;;  %v4126_v48 = vld [vmem:[#allocation3 + $0xe0] sm:$0xff] }
 0x62a   : > { %7616 = vmatprep.mubr.msk.bf16.mxu1 %vm1874_vm10, %v4142_v51 }
 0x62b   : > { %v4033_v60 = vpop.permute.xlu1 %4032  ;;  %v4125_v61 = vld [vmem:[#allocation3 + $0xd8] sm:$0xff] }
 0x62c   : > { %4097 = vst.msk [vmem:[#allocation3 + $0xf8] sm:$0xff] %vm1750_vm9, %v4033_v60  ;;  %v4143_v49 = vpack.c.bf16 %v4125_v61, %v4124_v7  ;;  %v4128_v22 = vld [vmem:[#allocation3 + $0xf0] sm:$0xff] }
 0x62e   : > { %7617 = vmatmul.mubr.msk.bf16.gmra.mxu1 %vm1874_vm10, %v4143_v49 }
 0x62f   : > { %v4127_v37 = vld [vmem:[#allocation3 + $0xe8] sm:$0xff] }
 0x630   : > { %v4144_v10 = vpack.c.bf16 %v4127_v37, %v4126_v48 }
 0x632   : > { %7620 = vmatprep.mubr.msk.bf16.mxu1 %vm1874_vm10, %v4144_v10 }
 0x633   : > { %v4129_v4 = vld [vmem:[#allocation3 + $0xf8] sm:$0xff] }
 0x634   : > { %v4145_v18 = vpack.c.bf16 %v4129_v4, %v4128_v22 }
 0x636   : > { %7621 = vmatmul.mubr.msk.bf16.gmra.mxu1 %vm1874_vm10, %v4145_v18 }
 0x6be   : > { %v7594_v25 = vpop.f32.mrf.mxu1 }
 0x6bf   : > { %v4285_v35 = vadd.f32 %v7594_v25, %v10493_v28 }
 0x6c0   : > { %v4276_v13 = vpop.f32.mrf.mxu1 }
 0x6c1   : > { %v4405_v59 = vadd.f32 3.0, %v4285_v35  ;;  %v4277_v27 = vadd.f32 %v10493_v28, %v4276_v13 }
 0x6c2   : > { %v7595_v40 = vpop.f32.mrf.mxu1 }
 0x6c3   : > { %v4437_v45 = vmax.f32 %v4405_v59, 0.0  ;;  %v4403_v62 = vadd.f32 3.0, %v4277_v27  ;;  %v4288_v12 = vadd.f32 %v7595_v40, %v10493_v28 }
 0x6c4   : > { %v4279_v15 = vpop.f32.mrf.mxu1 }
 0x6c5   : > { %v4435_v42 = vmax.f32 %v4403_v62, 0.0  ;;  %v4406_v3 = vadd.f32 3.0, %v4288_v12  ;;  %v4280_v6 = vadd.f32 %v10493_v28, %v4279_v15  ;;  %v4469_v36 = vmin.f32 %v4437_v45, 6.0 }
 0x6c6   : > { %v7598_v50 = vpop.f32.mrf.mxu1 }
 0x6c7   : > { %v4467_v53 = vmin.f32 %v4435_v42, 6.0  ;;  %v4438_v54 = vmax.f32 %v4406_v3, 0.0  ;;  %v4404_v16 = vadd.f32 3.0, %v4280_v6  ;;  %v4301_v14 = vadd.f32 %v7598_v50, %v10493_v28 }
 0x6c8   : > { %v4292_v43 = vpop.f32.mrf.mxu1  ;;  %v4501_v52 = vmul.f32 %v4469_v36, %v4285_v35 }
 0x6c9   : > { %v4499_v5 = vmul.f32 %v4467_v53, %v4277_v27  ;;  %v4436_v2 = vmax.f32 %v4404_v16, 0.0  ;;  %v4470_v8 = vmin.f32 %v4438_v54, 6.0  ;;  %v4409_v41 = vadd.f32 3.0, %v4301_v14 }
 0x6ca   : > { %v4293_v24 = vadd.f32 %v10493_v28, %v4292_v43  ;;  %v7599_v21 = vpop.f32.mrf.mxu1  ;;  %v10507_v1 = vmul.f32 0.16666667, %v4501_v52 }
 0x6cb   : > { %v10501_v55 = vmul.f32 0.16666667, %v4499_v5  ;;  %v4468_v33 = vmin.f32 %v4436_v2, 6.0  ;;  %v4304_v0 = vadd.f32 %v7599_v21, %v10493_v28  ;;  %v4441_v34 = vmax.f32 %v4409_v41, 0.0 }
 0x6cc   : > { %v4407_v44 = vadd.f32 3.0, %v4293_v24  ;;  %v4295_v20 = vpop.f32.mrf.mxu1  ;;  %v4502_v63 = vmul.f32 %v4470_v8, %v4288_v12 }
 0x6cd   : > { %v4500_v47 = vmul.f32 %v4468_v33, %v4280_v6  ;;  %v4410_v23 = vadd.f32 3.0, %v4304_v0  ;;  %v4296_v9 = vadd.f32 %v10493_v28, %v4295_v20  ;;  %4595 = vrot.lane.b32.xlu0 %v10501_v55, %s7735_s10  ;;  %v4473_v11 = vmin.f32 %v4441_v34, 6.0 }
 0x6ce   : > { %v4439_v19 = vmax.f32 %v4407_v44, 0.0  ;;  %v7602_v31 = vpop.f32.mrf.mxu1  ;;  %v10517_v60 = vmul.f32 0.16666667, %v4502_v63 }
 0x6cf   : > { %v10509_v46 = vmul.f32 0.16666667, %v4500_v47  ;;  %v4442_v38 = vmax.f32 %v4410_v23, 0.0  ;;  %v4408_v39 = vadd.f32 3.0, %v4296_v9  ;;  %v4317_v57 = vadd.f32 %v7602_v31, %v10493_v28 }
 0x6d0   : > { %v4471_v29 = vmin.f32 %v4439_v19, 6.0  ;;  %v4308_v30 = vpop.f32.mrf.mxu1  ;;  %v4505_v48 = vmul.f32 %v4473_v11, %v4301_v14 }
 0x6d1   : > { %v4440_v17 = vmax.f32 %v4408_v39, 0.0  ;;  %v4413_v58 = vadd.f32 3.0, %v4317_v57  ;;  %v4309_v26 = vadd.f32 %v10493_v28, %v4308_v30  ;;  %4597 = vrot.lane.b32.xlu1 %v10509_v46, %s7735_s10  ;;  %4599 = vrot.lane.b32.xlu0 %v10507_v1, %s7735_s10  ;;  %v4474_v56 = vmin.f32 %v4442_v38, 6.0 }
 0x6d2   : > { %v4503_v32 = vmul.f32 %v4471_v29, %v4293_v24  ;;  %v7603_v51 = vpop.f32.mrf.mxu1  ;;  %v10530_v12 = vmul.f32 0.16666667, %v4505_v48 }
 0x6d3   : > { %v4472_v7 = vmin.f32 %v4440_v17, 6.0  ;;  %v4445_v61 = vmax.f32 %v4413_v58, 0.0  ;;  %v4411_v49 = vadd.f32 3.0, %v4309_v26  ;;  %v4320_v10 = vadd.f32 %v7603_v51, %v10493_v28 }
 0x6d4   : > { %v10519_v37 = vmul.f32 0.16666667, %v4503_v32  ;;  %v4311_v22 = vpop.f32.mrf.mxu1  ;;  %v4506_v25 = vmul.f32 %v4474_v56, %v4304_v0 }
 0x6d5   : > { %v4504_v4 = vmul.f32 %v4472_v7, %v4296_v9  ;;  %v4443_v18 = vmax.f32 %v4411_v49, 0.0  ;;  %4601 = vrot.lane.b32.xlu1 %v10517_v60, %s7735_s10  ;;  %v4414_v35 = vadd.f32 3.0, %v4320_v10  ;;  %v4312_v13 = vadd.f32 %v10493_v28, %v4311_v22 }
 0x6d6   : > { %4603 = vrot.lane.b32.xlu0 %v10519_v37, %s7735_s10  ;;  %v7606_v59 = vpop.f32.mrf.mxu1  ;;  %v4477_v40 = vmin.f32 %v4445_v61, 6.0  ;;  %v10535_v53 = vmul.f32 0.16666667, %v4506_v25 }
 0x6d7   : > { %v10527_v27 = vmul.f32 0.16666667, %v4504_v4  ;;  %v4475_v45 = vmin.f32 %v4443_v18, 6.0  ;;  %v4333_v62 = vadd.f32 %v7606_v59, %v10493_v28  ;;  %v4446_v15 = vmax.f32 %v4414_v35, 0.0 }
 0x6d8   : > { %v4412_v42 = vadd.f32 3.0, %v4312_v13  ;;  %v4324_v3 = vpop.f32.mrf.mxu1  ;;  %v4509_v14 = vmul.f32 %v4477_v40, %v4317_v57 }
 0x6d9   : > { %v4507_v6 = vmul.f32 %v4475_v45, %v4309_v26  ;;  %v4417_v36 = vadd.f32 3.0, %v4333_v62  ;;  %v4325_v50 = vadd.f32 %v10493_v28, %v4324_v3  ;;  %4605 = vrot.lane.b32.xlu1 %v10527_v27, %s7735_s10  ;;  %v4478_v52 = vmin.f32 %v4446_v15, 6.0 }
 0x6da   : > { %v4444_v54 = vmax.f32 %v4412_v42, 0.0  ;;  %4607 = vrot.lane.b32.xlu0 %v10530_v12, %s7735_s10  ;;  %v7607_v16 = vpop.f32.mrf.mxu1  ;;  %v10547_v20 = vmul.f32 0.16666667, %v4509_v14 }
 0x6db   : > { %v10539_v43 = vmul.f32 0.16666667, %v4507_v6  ;;  %v4415_v5 = vadd.f32 3.0, %v4325_v50  ;;  %v4336_v2 = vadd.f32 %v7607_v16, %v10493_v28  ;;  %v4449_v41 = vmax.f32 %v4417_v36, 0.0 }
 0x6dc   : > { %v4476_v8 = vmin.f32 %v4444_v54, 6.0  ;;  %v4327_v24 = vpop.f32.mrf.mxu1  ;;  %v4510_v63 = vmul.f32 %v4478_v52, %v4320_v10 }
 0x6dd   : > { %v4447_v21 = vmax.f32 %v4415_v5, 0.0  ;;  %v4418_v33 = vadd.f32 3.0, %v4336_v2  ;;  %v4328_v0 = vadd.f32 %v10493_v28, %v4327_v24  ;;  %4609 = vrot.lane.b32.xlu1 %v10535_v53, %s7735_s10  ;;  %v4481_v31 = vmin.f32 %v4449_v41, 6.0 }
 0x6de   : > { %v4508_v34 = vmul.f32 %v4476_v8, %v4312_v13  ;;  %4611 = vrot.lane.b32.xlu0 %v10539_v43, %s7735_s10  ;;  %v7610_v44 = vpop.f32.mrf.mxu1  ;;  %v10560_v51 = vmul.f32 0.16666667, %v4510_v63 }
 0x6df   : > { %v4479_v47 = vmin.f32 %v4447_v21, 6.0  ;;  %v4450_v23 = vmax.f32 %v4418_v33, 0.0  ;;  %v4416_v9 = vadd.f32 3.0, %v4328_v0  ;;  %v4349_v38 = vadd.f32 %v7610_v44, %v10493_v28 }
 0x6e0   : > { %v10549_v19 = vmul.f32 0.16666667, %v4508_v34  ;;  %v4340_v39 = vpop.f32.mrf.mxu1  ;;  %v4513_v7 = vmul.f32 %v4481_v31, %v4333_v62 }
 0x6e1   : > { %v4511_v57 = vmul.f32 %v4479_v47, %v4325_v50  ;;  %v4448_v11 = vmax.f32 %v4416_v9, 0.0  ;;  %v4421_v29 = vadd.f32 3.0, %v4349_v38  ;;  %v4341_v30 = vadd.f32 %v10493_v28, %v4340_v39 }
 0x6e2   : > { %4613 = vrot.lane.b32.xlu1 %v10549_v19, %s7735_s10  ;;  %4615 = vrot.lane.b32.xlu0 %v10547_v20, %s7735_s10  ;;  %v7611_v17 = vpop.f32.mrf.mxu1  ;;  %v4482_v26 = vmin.f32 %v4450_v23, 6.0  ;;  %v10570_v45 = vmul.f32 0.16666667, %v4513_v7 }
 0x6e3   : > { %v10557_v58 = vmul.f32 0.16666667, %v4511_v57  ;;  %v4480_v32 = vmin.f32 %v4448_v11, 6.0  ;;  %v4352_v56 = vadd.f32 %v7611_v17, %v10493_v28  ;;  %v4453_v61 = vmax.f32 %v4421_v29, 0.0 }
 0x6e4   : > { %v4419_v49 = vadd.f32 3.0, %v4341_v30  ;;  %v4343_v48 = vpop.f32.mrf.mxu1  ;;  %v4514_v35 = vmul.f32 %v4482_v26, %v4336_v2 }
 0x6e5   : > { %v4512_v10 = vmul.f32 %v4480_v32, %v4328_v0  ;;  %v4422_v22 = vadd.f32 3.0, %v4352_v56  ;;  %v4344_v4 = vadd.f32 %v10493_v28, %v4343_v48  ;;  %v4485_v62 = vmin.f32 %v4453_v61, 6.0 }
 0x6e6   : > { %v4451_v18 = vmax.f32 %v4419_v49, 0.0  ;;  %4617 = vrot.lane.b32.xlu1 %v10560_v51, %s7735_s10  ;;  %4619 = vrot.lane.b32.xlu0 %v10557_v58, %s7735_s10  ;;  %v7614_v25 = vpop.f32.mrf.mxu1  ;;  %v10577_v14 = vmul.f32 0.16666667, %v4514_v35 }
 0x6e7   : > { %v10567_v13 = vmul.f32 0.16666667, %v4512_v10  ;;  %v4420_v59 = vadd.f32 3.0, %v4344_v4  ;;  %v4365_v40 = vadd.f32 %v7614_v25, %v10493_v28  ;;  %v4454_v42 = vmax.f32 %v4422_v22, 0.0 }
 0x6e8   : > { %v4483_v15 = vmin.f32 %v4451_v18, 6.0  ;;  %v4356_v3 = vpop.f32.mrf.mxu1  ;;  %v4517_v8 = vmul.f32 %v4485_v62, %v4349_v38 }
 0x6e9   : > { %v4452_v6 = vmax.f32 %v4420_v59, 0.0  ;;  %v4425_v36 = vadd.f32 3.0, %v4365_v40  ;;  %v4357_v50 = vadd.f32 %v10493_v28, %v4356_v3  ;;  %v4486_v24 = vmin.f32 %v4454_v42, 6.0 }
 0x6ea   : > { %v4515_v54 = vmul.f32 %v4483_v15, %v4341_v30  ;;  %4621 = vrot.lane.b32.xlu1 %v10567_v13, %s7735_s10  ;;  %4623 = vrot.lane.b32.xlu0 %v10570_v45, %s7735_s10  ;;  %v7615_v16 = vpop.f32.mrf.mxu1  ;;  %v10590_v39 = vmul.f32 0.16666667, %v4517_v8 }
 0x6eb   : > { %v4484_v5 = vmin.f32 %v4452_v6, 6.0  ;;  %v4457_v2 = vmax.f32 %v4425_v36, 0.0  ;;  %v4423_v52 = vadd.f32 3.0, %v4357_v50  ;;  %v4368_v21 = vadd.f32 %v7615_v16, %v10493_v28 }
 0x6ec   : > { %v10579_v41 = vmul.f32 0.16666667, %v4515_v54  ;;  %v4359_v33 = vpop.f32.mrf.mxu1  ;;  %v4518_v57 = vmul.f32 %v4486_v24, %v4352_v56 }
 0x6ed   : > { %v4516_v0 = vmul.f32 %v4484_v5, %v4344_v4  ;;  %v4455_v34 = vmax.f32 %v4423_v52, 0.0  ;;  %v4489_v44 = vmin.f32 %v4457_v2, 6.0  ;;  %v4426_v47 = vadd.f32 3.0, %v4368_v21 }
 0x6ee   : > { %v4360_v23 = vadd.f32 %v10493_v28, %v4359_v33  ;;  %4625 = vrot.lane.b32.xlu1 %v10577_v14, %s7735_s10  ;;  %4627 = vrot.lane.b32.xlu0 %v10579_v41, %s7735_s10  ;;  %v7618_v9 = vpop.f32.mrf.mxu1  ;;  %v10600_v4 = vmul.f32 0.16666667, %v4518_v57 }
 0x6ef   : > { %v10587_v63 = vmul.f32 0.16666667, %v4516_v0  ;;  %v4487_v31 = vmin.f32 %v4455_v34, 6.0  ;;  %v4381_v38 = vadd.f32 %v7618_v9, %v10493_v28  ;;  %v4458_v11 = vmax.f32 %v4426_v47, 0.0 }
 0x6f0   : > { %v4424_v29 = vadd.f32 3.0, %v4360_v23  ;;  %v4372_v30 = vpop.f32.mrf.mxu1  ;;  %v4521_v7 = vmul.f32 %v4489_v44, %v4365_v40 }
 0x6f1   : > { %v4519_v17 = vmul.f32 %v4487_v31, %v4357_v50  ;;  %v4429_v26 = vadd.f32 3.0, %v4381_v38  ;;  %v4373_v32 = vadd.f32 %v10493_v28, %v4372_v30  ;;  %v4490_v18 = vmin.f32 %v4458_v11, 6.0 }
 0x6f2   : > { %v4456_v61 = vmax.f32 %v4424_v29, 0.0  ;;  %4629 = vrot.lane.b32.xlu1 %v10587_v63, %s7735_s10  ;;  %4631 = vrot.lane.b32.xlu0 %v10590_v39, %s7735_s10  ;;  %v7619_v49 = vpop.f32.mrf.mxu1  ;;  %v10607_v3 = vmul.f32 0.16666667, %v4521_v7 }
 0x6f3   : > { %v10597_v48 = vmul.f32 0.16666667, %v4519_v17  ;;  %v4461_v10 = vmax.f32 %v4429_v26, 0.0  ;;  %v4427_v56 = vadd.f32 3.0, %v4373_v32  ;;  %v4384_v22 = vadd.f32 %v7619_v49, %v10493_v28 }
 0x6f4   : > { %v4488_v25 = vmin.f32 %v4456_v61, 6.0  ;;  %v4375_v35 = vpop.f32.mrf.mxu1  ;;  %v4522_v54 = vmul.f32 %v4490_v18, %v4368_v21 }
 0x6f5   : > { %v4459_v59 = vmax.f32 %v4427_v56, 0.0  ;;  %v4430_v40 = vadd.f32 3.0, %v4384_v22  ;;  %v4376_v62 = vadd.f32 %v10493_v28, %v4375_v35  ;;  %v4493_v6 = vmin.f32 %v4461_v10, 6.0 }
 0x6f6   : > { %v4520_v15 = vmul.f32 %v4488_v25, %v4360_v23  ;;  %4633 = vrot.lane.b32.xlu1 %v10600_v4, %s7735_s10  ;;  %4635 = vrot.lane.b32.xlu0 %v10597_v48, %s7735_s10  ;;  %v7622_v42 = vpop.f32.mrf.mxu1  ;;  %v4554_v9 = vmul.f32 0.16666667, %v4522_v54 }
 0x6f7   : > { %v4491_v36 = vmin.f32 %v4459_v59, 6.0  ;;  %v4428_v50 = vadd.f32 3.0, %v4376_v62  ;;  %v4462_v5 = vmax.f32 %v4430_v40, 0.0  ;;  %v4397_v2 = vadd.f32 %v7622_v42, %v10493_v28 }
 0x6f8   : > { %v10609_v16 = vmul.f32 0.16666667, %v4520_v15  ;;  %v4388_v52 = vpop.f32.mrf.mxu1  ;;  %v4525_v44 = vmul.f32 %v4493_v6, %v4381_v38 }
 0x6f9   : > { %v4523_v8 = vmul.f32 %v4491_v36, %v4373_v32  ;;  %v4460_v24 = vmax.f32 %v4428_v50, 0.0  ;;  %v4433_v33 = vadd.f32 3.0, %v4397_v2  ;;  %v4389_v0 = vadd.f32 %v10493_v28, %v4388_v52 }
 0x6fa   : > { %4637 = vrot.lane.b32.xlu1 %v10609_v16, %s7735_s10  ;;  %4639 = vrot.lane.b32.xlu0 %v10607_v3, %s7735_s10  ;;  %v7623_v34 = vpop.f32.mrf.mxu1  ;;  %v4494_v31 = vmin.f32 %v4462_v5, 6.0  ;;  %v4557_v38 = vmul.f32 0.16666667, %v4525_v44  ;;  %v4908_v44 = vld [vmem:[#allocation2 + $0x8] sm:$0xff] }
 0x6fb   : > { %v10617_v21 = vmul.f32 0.16666667, %v4523_v8  ;;  %v4492_v47 = vmin.f32 %v4460_v24, 6.0  ;;  %v4400_v23 = vadd.f32 %v7623_v34, %v10493_v28  ;;  %v4465_v57 = vmax.f32 %v4433_v33, 0.0  ;;  %v4907_v33 = vld [vmem:[#allocation2] sm:$0xff]  ;;  %4940 = vst.msk [vmem:[#allocation3 + $0x8] sm:$0xff] %vm204_vm0, %v4908_v44 }
 0x6fc   : > { %v4431_v11 = vadd.f32 3.0, %v4389_v0  ;;  %v4391_v29 = vpop.f32.mrf.mxu1  ;;  %v4526_v49 = vmul.f32 %v4494_v31, %v4384_v22  ;;  %4939 = vst.msk [vmem:[#allocation3] sm:$0xff] %vm204_vm0, %v4907_v33 }
 0x6fd   : > { %v4524_v30 = vmul.f32 %v4492_v47, %v4376_v62  ;;  %v4434_v17 = vadd.f32 3.0, %v4400_v23  ;;  %v4392_v26 = vadd.f32 %v10493_v28, %v4391_v29  ;;  %v4497_v10 = vmin.f32 %v4465_v57, 6.0 }
 0x6fe   : > { %v4463_v32 = vmax.f32 %v4431_v11, 0.0  ;;  %4641 = vrot.lane.b32.xlu1 %v4554_v9, %s7735_s10  ;;  %4643 = vrot.lane.b32.xlu0 %v10617_v21, %s7735_s10  ;;  %v4558_v59 = vmul.f32 0.16666667, %v4526_v49 }
 0x6ff   : > { %v4556_v7 = vmul.f32 0.16666667, %v4524_v30  ;;  %v4432_v61 = vadd.f32 3.0, %v4392_v26  ;;  %v4466_v18 = vmax.f32 %v4434_v17, 0.0  ;;  %v4529_v40 = vmul.f32 %v4497_v10, %v4397_v2 }
 0x700   : > { %v4495_v56 = vmin.f32 %v4463_v32, 6.0 }
 0x701   : > { %v4464_v25 = vmax.f32 %v4432_v61, 0.0  ;;  %v4498_v15 = vmin.f32 %v4466_v18, 6.0  ;;  %v4561_v6 = vmul.f32 0.16666667, %v4529_v40 }
 0x702   : > { %v4527_v35 = vmul.f32 %v4495_v56, %v4389_v0  ;;  %4645 = vrot.lane.b32.xlu1 %v4556_v7, %s7735_s10  ;;  %4647 = vrot.lane.b32.xlu0 %v4557_v38, %s7735_s10 }
 0x703   : > { %v4496_v28 = vmin.f32 %v4464_v25, 6.0  ;;  %v4530_v36 = vmul.f32 %v4498_v15, %v4400_v23 }
 0x704   : > { %v4559_v62 = vmul.f32 0.16666667, %v4527_v35 }
 0x705   : > { %v4528_v42 = vmul.f32 %v4496_v28, %v4392_v26  ;;  %v4562_v50 = vmul.f32 0.16666667, %v4530_v36 }
 0x706   : > { %4649 = vrot.lane.b32.xlu1 %v4558_v59, %s7735_s10  ;;  %4651 = vrot.lane.b32.xlu0 %v4559_v62, %s7735_s10 }
 0x707   : > { %v4560_v22 = vmul.f32 0.16666667, %v4528_v42 }
 0x70a   : > { %4653 = vrot.lane.b32.xlu1 %v4560_v22, %s7735_s10  ;;  %4655 = vrot.lane.b32.xlu0 %v4561_v6, %s7735_s10 }
 0x70e   : > { %4657 = vrot.lane.b32.xlu1 %v4562_v50, %s7735_s10  ;;  %4778 = vrot.lane.b32.xlu0 %v10501_v55, %s7736_s11 }
 0x712   : > { %4780 = vrot.lane.b32.xlu1 %v10509_v46, %s7736_s11  ;;  %4782 = vrot.lane.b32.xlu0 %v10507_v1, %s7736_s11 }
 0x716   : > { %4784 = vrot.lane.b32.xlu1 %v10517_v60, %s7736_s11  ;;  %4786 = vrot.lane.b32.xlu0 %v10519_v37, %s7736_s11 }
 0x71a   : > { %4788 = vrot.lane.b32.xlu1 %v10527_v27, %s7736_s11  ;;  %4790 = vrot.lane.b32.xlu0 %v10530_v12, %s7736_s11  ;;  %v4971_v12 = vld [vmem:[#allocation2 + $0x1] sm:$0xff] }
 0x71e   : > { %4792 = vrot.lane.b32.xlu1 %v10535_v53, %s7736_s11  ;;  %4794 = vrot.lane.b32.xlu0 %v10539_v43, %s7736_s11 }
 0x722   : > { %4796 = vrot.lane.b32.xlu1 %v10549_v19, %s7736_s11  ;;  %4798 = vrot.lane.b32.xlu0 %v10547_v20, %s7736_s11  ;;  %v4972_v20 = vld [vmem:[#allocation2 + $0x9] sm:$0xff] }
 0x726   : > { %4800 = vrot.lane.b32.xlu1 %v10560_v51, %s7736_s11  ;;  %4802 = vrot.lane.b32.xlu0 %v10557_v58, %s7736_s11 }
 0x72a   : > { %4804 = vrot.lane.b32.xlu1 %v10567_v13, %s7736_s11  ;;  %4806 = vrot.lane.b32.xlu0 %v10570_v45, %s7736_s11 }
 0x72e   : > { %4808 = vrot.lane.b32.xlu1 %v10577_v14, %s7736_s11  ;;  %4810 = vrot.lane.b32.xlu0 %v10579_v41, %s7736_s11 }
 0x732   : > { %4812 = vrot.lane.b32.xlu1 %v10587_v63, %s7736_s11  ;;  %4814 = vrot.lane.b32.xlu0 %v10590_v39, %s7736_s11 }
 0x736   : > { %4816 = vrot.lane.b32.xlu1 %v10600_v4, %s7736_s11  ;;  %4818 = vrot.lane.b32.xlu0 %v10597_v48, %s7736_s11 }
 0x73a   : > { %4820 = vrot.lane.b32.xlu1 %v10609_v16, %s7736_s11  ;;  %4822 = vrot.lane.b32.xlu0 %v10607_v3, %s7736_s11 }
 0x73e   : > { %4824 = vrot.lane.b32.xlu1 %v4554_v9, %s7736_s11  ;;  %4826 = vrot.lane.b32.xlu0 %v10617_v21, %s7736_s11 }
 0x73f   : > { %v4596_v55 = vpop.permute.xlu0 %4595 }
 0x740   : > { %4692 = vst.msk [vmem:[%s9050_s16] sm:$0xff] %vm4691_vm13, %v4596_v55 }
 0x742   : > { %4828 = vrot.lane.b32.xlu1 %v4556_v7, %s7736_s11  ;;  %4830 = vrot.lane.b32.xlu0 %v4557_v38, %s7736_s11 }
 0x743   : > { %v4598_v1 = vpop.permute.xlu1 %4597  ;;  %v4600_v46 = vpop.permute.xlu0 %4599 }
 0x744   : > { %4693 = vst.msk [vmem:[%s9050_s16 + $0x8] sm:$0xff] %vm4691_vm13, %v4598_v1  ;;  %4694 = vst.msk [vmem:[%s9050_s16 + $0x10] sm:$0xff] %vm4691_vm13, %v4600_v46 }
 0x746   : > { %4832 = vrot.lane.b32.xlu1 %v4558_v59, %s7736_s11  ;;  %4834 = vrot.lane.b32.xlu0 %v4559_v62, %s7736_s11 }
 0x747   : > { %v4602_v60 = vpop.permute.xlu1 %4601 }
 0x748   : > { %4695 = vst.msk [vmem:[%s9050_s16 + $0x18] sm:$0xff] %vm4691_vm13, %v4602_v60  ;;  %v4604_v37 = vpop.permute.xlu0 %4603 }
 0x749   : > { %4696 = vst.msk [vmem:[%s9050_s16 + $0x20] sm:$0xff] %vm4691_vm13, %v4604_v37 }
 0x74a   : > { %4836 = vrot.lane.b32.xlu1 %v4560_v22, %s7736_s11  ;;  %4838 = vrot.lane.b32.xlu0 %v4561_v6, %s7736_s11 }
 0x74b   : > { %v4606_v27 = vpop.permute.xlu1 %4605 }
 0x74c   : > { %4697 = vst.msk [vmem:[%s9050_s16 + $0x28] sm:$0xff] %vm4691_vm13, %v4606_v27  ;;  %v4608_v53 = vpop.permute.xlu0 %4607 }
 0x74d   : > { %4698 = vst.msk [vmem:[%s9050_s16 + $0x30] sm:$0xff] %vm4691_vm13, %v4608_v53 }
 0x74e   : > { %4840 = vrot.lane.b32.xlu1 %v4562_v50, %s7736_s11  ;;  %5035 = vrot.lane.b32.xlu0 %v4971_v12, %s7725_s18 }
 0x74f   : > { %v4610_v43 = vpop.permute.xlu1 %4609 }
 0x750   : > { %4699 = vst.msk [vmem:[%s9050_s16 + $0x38] sm:$0xff] %vm4691_vm13, %v4610_v43  ;;  %v4612_v19 = vpop.permute.xlu0 %4611 }
 0x751   : > { %4700 = vst.msk [vmem:[%s9050_s16 + $0x40] sm:$0xff] %vm4691_vm13, %v4612_v19 }
 0x752   : > { %5037 = vrot.lane.b32.xlu1 %v4972_v20, %s7725_s18 }
 0x754   : > { %v4614_v58 = vpop.permute.xlu1 %4613  ;;  %v4616_v51 = vpop.permute.xlu0 %4615 }
 0x755   : > { %4701 = vst.msk [vmem:[%s9050_s16 + $0x48] sm:$0xff] %vm4691_vm13, %v4614_v58  ;;  %4702 = vst.msk [vmem:[%s9050_s16 + $0x50] sm:$0xff] %vm4691_vm13, %v4616_v51 }
 0x758   : > { %v4618_v13 = vpop.permute.xlu1 %4617  ;;  %v4620_v45 = vpop.permute.xlu0 %4619 }
 0x759   : > { %4703 = vst.msk [vmem:[%s9050_s16 + $0x58] sm:$0xff] %vm4691_vm13, %v4618_v13  ;;  %4704 = vst.msk [vmem:[%s9050_s16 + $0x60] sm:$0xff] %vm4691_vm13, %v4620_v45 }
 0x75c   : > { %v4622_v14 = vpop.permute.xlu1 %4621  ;;  %v4624_v41 = vpop.permute.xlu0 %4623 }
 0x75d   : > { %4705 = vst.msk [vmem:[%s9050_s16 + $0x68] sm:$0xff] %vm4691_vm13, %v4622_v14  ;;  %4706 = vst.msk [vmem:[%s9050_s16 + $0x70] sm:$0xff] %vm4691_vm13, %v4624_v41 }
 0x760   : > { %v4626_v63 = vpop.permute.xlu1 %4625  ;;  %v4628_v39 = vpop.permute.xlu0 %4627 }
 0x761   : > { %4707 = vst.msk [vmem:[%s9050_s16 + $0x78] sm:$0xff] %vm4691_vm13, %v4626_v63  ;;  %4708 = vst.msk [vmem:[%s9050_s16 + $0x80] sm:$0xff] %vm4691_vm13, %v4628_v39 }
 0x764   : > { %v4630_v48 = vpop.permute.xlu1 %4629  ;;  %v4632_v4 = vpop.permute.xlu0 %4631 }
 0x765   : > { %4709 = vst.msk [vmem:[%s9050_s16 + $0x88] sm:$0xff] %vm4691_vm13, %v4630_v48  ;;  %4710 = vst.msk [vmem:[%s9050_s16 + $0x90] sm:$0xff] %vm4691_vm13, %v4632_v4 }
 0x768   : > { %v4634_v3 = vpop.permute.xlu1 %4633  ;;  %v4636_v54 = vpop.permute.xlu0 %4635 }
 0x769   : > { %4711 = vst.msk [vmem:[%s9050_s16 + $0x98] sm:$0xff] %vm4691_vm13, %v4634_v3  ;;  %4712 = vst.msk [vmem:[%s9050_s16 + $0xa0] sm:$0xff] %vm4691_vm13, %v4636_v54 }
 0x76c   : > { %v4638_v16 = vpop.permute.xlu1 %4637  ;;  %v4640_v5 = vpop.permute.xlu0 %4639 }
 0x76d   : > { %4713 = vst.msk [vmem:[%s9050_s16 + $0xa8] sm:$0xff] %vm4691_vm13, %v4638_v16  ;;  %4714 = vst.msk [vmem:[%s9050_s16 + $0xb0] sm:$0xff] %vm4691_vm13, %v4640_v5 }
 0x770   : > { %v4642_v2 = vpop.permute.xlu1 %4641  ;;  %v4644_v52 = vpop.permute.xlu0 %4643 }
 0x771   : > { %4715 = vst.msk [vmem:[%s9050_s16 + $0xb8] sm:$0xff] %vm4691_vm13, %v4642_v2  ;;  %4716 = vst.msk [vmem:[%s9050_s16 + $0xc0] sm:$0xff] %vm4691_vm13, %v4644_v52 }
 0x774   : > { %v4646_v8 = vpop.permute.xlu1 %4645  ;;  %v4648_v24 = vpop.permute.xlu0 %4647 }
 0x775   : > { %4717 = vst.msk [vmem:[%s9050_s16 + $0xc8] sm:$0xff] %vm4691_vm13, %v4646_v8  ;;  %4718 = vst.msk [vmem:[%s9050_s16 + $0xd0] sm:$0xff] %vm4691_vm13, %v4648_v24 }
 0x778   : > { %v4650_v0 = vpop.permute.xlu1 %4649  ;;  %v4652_v34 = vpop.permute.xlu0 %4651 }
 0x779   : > { %4719 = vst.msk [vmem:[%s9050_s16 + $0xd8] sm:$0xff] %vm4691_vm13, %v4650_v0  ;;  %4720 = vst.msk [vmem:[%s9050_s16 + $0xe0] sm:$0xff] %vm4691_vm13, %v4652_v34 }
 0x77c   : > { %v4654_v21 = vpop.permute.xlu1 %4653  ;;  %v4656_v47 = vpop.permute.xlu0 %4655 }
 0x77d   : > { %4721 = vst.msk [vmem:[%s9050_s16 + $0xe8] sm:$0xff] %vm4691_vm13, %v4654_v21  ;;  %4722 = vst.msk [vmem:[%s9050_s16 + $0xf0] sm:$0xff] %vm4691_vm13, %v4656_v47 }
 0x780   : > { %v4658_v23 = vpop.permute.xlu1 %4657  ;;  %v4779_v9 = vpop.permute.xlu0 %4778 }
 0x781   : > { %4723 = vst.msk [vmem:[%s9050_s16 + $0xf8] sm:$0xff] %vm4691_vm13, %v4658_v23 }
 0x782   : > { %4875 = vst.msk [vmem:[#allocation2 + $0x19] sm:$0xff] %vm4874_vm14, %v4779_v9 }
 0x784   : > { %v4781_v31 = vpop.permute.xlu1 %4780  ;;  %v4783_v57 = vpop.permute.xlu0 %4782 }
 0x785   : > { %4876 = vst.msk [vmem:[#allocation2 + $0x21] sm:$0xff] %vm4874_vm14, %v4781_v31  ;;  %4877 = vst.msk [vmem:[#allocation2 + $0x31] sm:$0xff] %vm4874_vm14, %v4783_v57 }
 0x788   : > { %v4785_v11 = vpop.permute.xlu1 %4784  ;;  %v4787_v29 = vpop.permute.xlu0 %4786 }
 0x789   : > { %v10758_v30 = vld [vmem:[#allocation2 + $0x19] sm:$0xff]  ;;  %4878 = vst.msk [vmem:[#allocation2 + $0x39] sm:$0xff] %vm4874_vm14, %v4785_v11  ;;  %4879 = vst.msk [vmem:[#allocation2 + $0x49] sm:$0xff] %vm4874_vm14, %v4787_v29 }
 0x78a   : > { %v10760_v17 = vld [vmem:[#allocation2 + $0x18] sm:$0xff]  ;;  %5039 = vrot.lane.b32.xlu0 %v10758_v30, %s7725_s18 }
 0x78b   : > { %4941 = vst.msk [vmem:[#allocation3 + $0x10] sm:$0xff] %vm204_vm0, %v10760_v17 }
 0x78c   : > { %v4789_v26 = vpop.permute.xlu1 %4788  ;;  %v4791_v32 = vpop.permute.xlu0 %4790  ;;  %v10768_v38 = vld [vmem:[#allocation2 + $0x21] sm:$0xff]  ;;  %v10770_v7 = vld [vmem:[#allocation2 + $0x31] sm:$0xff] }
 0x78d   : > { %4880 = vst.msk [vmem:[#allocation2 + $0x51] sm:$0xff] %vm4874_vm14, %v4789_v26  ;;  %4881 = vst.msk [vmem:[#allocation2 + $0x61] sm:$0xff] %vm4874_vm14, %v4791_v32  ;;  %5041 = vrot.lane.b32.xlu1 %v10768_v38, %s7725_s18  ;;  %v10778_v61 = vld [vmem:[#allocation2 + $0x20] sm:$0xff]  ;;  %v10780_v49 = vld [vmem:[#allocation2 + $0x30] sm:$0xff] }
 0x78e   : > { %5043 = vrot.lane.b32.xlu0 %v10770_v7, %s7725_s18  ;;  %4942 = vst.msk [vmem:[#allocation3 + $0x18] sm:$0xff] %vm204_vm0, %v10778_v61  ;;  %4943 = vst.msk [vmem:[#allocation3 + $0x20] sm:$0xff] %vm204_vm0, %v10780_v49 }
 0x790   : > { %v4793_v10 = vpop.permute.xlu1 %4792  ;;  %v4795_v56 = vpop.permute.xlu0 %4794  ;;  %v10786_v18 = vld [vmem:[#allocation2 + $0x39] sm:$0xff]  ;;  %v10788_v25 = vld [vmem:[#allocation2 + $0x49] sm:$0xff] }
 0x791   : > { %4882 = vst.msk [vmem:[#allocation2 + $0x69] sm:$0xff] %vm4874_vm14, %v4793_v10  ;;  %4883 = vst.msk [vmem:[#allocation2 + $0x79] sm:$0xff] %vm4874_vm14, %v4795_v56  ;;  %5045 = vrot.lane.b32.xlu1 %v10786_v18, %s7725_s18  ;;  %v10796_v35 = vld [vmem:[#allocation2 + $0x38] sm:$0xff]  ;;  %v10798_v28 = vld [vmem:[#allocation2 + $0x48] sm:$0xff] }
 0x792   : > { %5047 = vrot.lane.b32.xlu0 %v10788_v25, %s7725_s18  ;;  %4944 = vst.msk [vmem:[#allocation3 + $0x28] sm:$0xff] %vm204_vm0, %v10796_v35  ;;  %4945 = vst.msk [vmem:[#allocation3 + $0x30] sm:$0xff] %vm204_vm0, %v10798_v28 }
 0x794   : > { %v4797_v59 = vpop.permute.xlu1 %4796  ;;  %v4799_v40 = vpop.permute.xlu0 %4798  ;;  %v10804_v62 = vld [vmem:[#allocation2 + $0x51] sm:$0xff]  ;;  %v10806_v15 = vld [vmem:[#allocation2 + $0x61] sm:$0xff] }
 0x795   : > { %4884 = vst.msk [vmem:[#allocation2 + $0x81] sm:$0xff] %vm4874_vm14, %v4797_v59  ;;  %4885 = vst.msk [vmem:[#allocation2 + $0x91] sm:$0xff] %vm4874_vm14, %v4799_v40  ;;  %5049 = vrot.lane.b32.xlu1 %v10804_v62, %s7725_s18  ;;  %v10814_v42 = vld [vmem:[#allocation2 + $0x50] sm:$0xff]  ;;  %v10816_v22 = vld [vmem:[#allocation2 + $0x60] sm:$0xff] }
 0x796   : > { %5051 = vrot.lane.b32.xlu0 %v10806_v15, %s7725_s18  ;;  %4946 = vst.msk [vmem:[#allocation3 + $0x38] sm:$0xff] %vm204_vm0, %v10814_v42  ;;  %4947 = vst.msk [vmem:[#allocation3 + $0x40] sm:$0xff] %vm204_vm0, %v10816_v22 }
 0x798   : > { %v4801_v6 = vpop.permute.xlu1 %4800  ;;  %v4803_v36 = vpop.permute.xlu0 %4802  ;;  %v10822_v50 = vld [vmem:[#allocation2 + $0x69] sm:$0xff]  ;;  %v10824_v55 = vld [vmem:[#allocation2 + $0x79] sm:$0xff] }
 0x799   : > { %4886 = vst.msk [vmem:[#allocation2 + $0x99] sm:$0xff] %vm4874_vm14, %v4801_v6  ;;  %4887 = vst.msk [vmem:[#allocation2 + $0xa9] sm:$0xff] %vm4874_vm14, %v4803_v36  ;;  %5053 = vrot.lane.b32.xlu1 %v10822_v50, %s7725_s18  ;;  %v10832_v1 = vld [vmem:[#allocation2 + $0x68] sm:$0xff]  ;;  %v10834_v46 = vld [vmem:[#allocation2 + $0x78] sm:$0xff] }
 0x79a   : > { %5055 = vrot.lane.b32.xlu0 %v10824_v55, %s7725_s18  ;;  %4948 = vst.msk [vmem:[#allocation3 + $0x48] sm:$0xff] %vm204_vm0, %v10832_v1  ;;  %4949 = vst.msk [vmem:[#allocation3 + $0x50] sm:$0xff] %vm204_vm0, %v10834_v46 }
 0x79c   : > { %v4805_v60 = vpop.permute.xlu1 %4804  ;;  %v4807_v37 = vpop.permute.xlu0 %4806  ;;  %v10840_v27 = vld [vmem:[#allocation2 + $0x81] sm:$0xff]  ;;  %v10842_v12 = vld [vmem:[#allocation2 + $0x91] sm:$0xff] }
 0x79d   : > { %4888 = vst.msk [vmem:[#allocation2 + $0xb1] sm:$0xff] %vm4874_vm14, %v4805_v60  ;;  %4889 = vst.msk [vmem:[#allocation2 + $0xc1] sm:$0xff] %vm4874_vm14, %v4807_v37  ;;  %5057 = vrot.lane.b32.xlu1 %v10840_v27, %s7725_s18  ;;  %v10850_v53 = vld [vmem:[#allocation2 + $0x80] sm:$0xff]  ;;  %v10852_v43 = vld [vmem:[#allocation2 + $0x90] sm:$0xff] }
 0x79e   : > { %5059 = vrot.lane.b32.xlu0 %v10842_v12, %s7725_s18  ;;  %4950 = vst.msk [vmem:[#allocation3 + $0x58] sm:$0xff] %vm204_vm0, %v10850_v53  ;;  %4951 = vst.msk [vmem:[#allocation3 + $0x60] sm:$0xff] %vm204_vm0, %v10852_v43 }
 0x7a0   : > { %v4809_v20 = vpop.permute.xlu1 %4808  ;;  %v4811_v19 = vpop.permute.xlu0 %4810  ;;  %v10858_v58 = vld [vmem:[#allocation2 + $0x99] sm:$0xff]  ;;  %v4985_v51 = vld [vmem:[#allocation2 + $0xa9] sm:$0xff] }
 0x7a1   : > { %4890 = vst.msk [vmem:[#allocation2 + $0xc9] sm:$0xff] %vm4874_vm14, %v4809_v20  ;;  %4891 = vst.msk [vmem:[#allocation2 + $0xd9] sm:$0xff] %vm4874_vm14, %v4811_v19  ;;  %5061 = vrot.lane.b32.xlu1 %v10858_v58, %s7725_s18  ;;  %v10865_v13 = vld [vmem:[#allocation2 + $0x98] sm:$0xff]  ;;  %v10867_v45 = vld [vmem:[#allocation2 + $0xa8] sm:$0xff] }
 0x7a2   : > { %5063 = vrot.lane.b32.xlu0 %v4985_v51, %s7725_s18  ;;  %4952 = vst.msk [vmem:[#allocation3 + $0x68] sm:$0xff] %vm204_vm0, %v10865_v13  ;;  %4953 = vst.msk [vmem:[#allocation3 + $0x70] sm:$0xff] %vm204_vm0, %v10867_v45 }
 0x7a4   : > { %v4813_v14 = vpop.permute.xlu1 %4812  ;;  %v4815_v41 = vpop.permute.xlu0 %4814  ;;  %v4986_v63 = vld [vmem:[#allocation2 + $0xb1] sm:$0xff]  ;;  %v4987_v39 = vld [vmem:[#allocation2 + $0xc1] sm:$0xff] }
 0x7a5   : > { %4892 = vst.msk [vmem:[#allocation2 + $0xe1] sm:$0xff] %vm4874_vm14, %v4813_v14  ;;  %4893 = vst.msk [vmem:[#allocation2 + $0xf1] sm:$0xff] %vm4874_vm14, %v4815_v41  ;;  %5065 = vrot.lane.b32.xlu1 %v4986_v63, %s7725_s18  ;;  %v10877_v48 = vld [vmem:[#allocation2 + $0xb0] sm:$0xff]  ;;  %v10879_v4 = vld [vmem:[#allocation2 + $0xc0] sm:$0xff] }
 0x7a6   : > { %5067 = vrot.lane.b32.xlu0 %v4987_v39, %s7725_s18  ;;  %4954 = vst.msk [vmem:[#allocation3 + $0x78] sm:$0xff] %vm204_vm0, %v10877_v48  ;;  %4955 = vst.msk [vmem:[#allocation3 + $0x80] sm:$0xff] %vm204_vm0, %v10879_v4 }
 0x7a8   : > { %v4817_v3 = vpop.permute.xlu1 %4816  ;;  %v4819_v54 = vpop.permute.xlu0 %4818  ;;  %v4988_v16 = vld [vmem:[#allocation2 + $0xc9] sm:$0xff]  ;;  %v4989_v5 = vld [vmem:[#allocation2 + $0xd9] sm:$0xff] }
 0x7a9   : > { %4894 = vst.msk [vmem:[#allocation2 + $0xf9] sm:$0xff] %vm4874_vm14, %v4817_v3  ;;  %4895 = vst.msk [vmem:[#allocation2 + $0x109] sm:$0xff] %vm4874_vm14, %v4819_v54  ;;  %5069 = vrot.lane.b32.xlu1 %v4988_v16, %s7725_s18  ;;  %v10889_v2 = vld [vmem:[#allocation2 + $0xc8] sm:$0xff]  ;;  %v10891_v52 = vld [vmem:[#allocation2 + $0xd8] sm:$0xff] }
 0x7aa   : > { %5071 = vrot.lane.b32.xlu0 %v4989_v5, %s7725_s18  ;;  %4956 = vst.msk [vmem:[#allocation3 + $0x88] sm:$0xff] %vm204_vm0, %v10889_v2  ;;  %4957 = vst.msk [vmem:[#allocation3 + $0x90] sm:$0xff] %vm204_vm0, %v10891_v52 }
 0x7ac   : > { %v4821_v8 = vpop.permute.xlu1 %4820  ;;  %v4823_v24 = vpop.permute.xlu0 %4822  ;;  %v4990_v33 = vld [vmem:[#allocation2 + $0xe1] sm:$0xff]  ;;  %v4991_v0 = vld [vmem:[#allocation2 + $0xf1] sm:$0xff] }
 0x7ad   : > { %4896 = vst.msk [vmem:[#allocation2 + $0x111] sm:$0xff] %vm4874_vm14, %v4821_v8  ;;  %4897 = vst.msk [vmem:[#allocation2 + $0x121] sm:$0xff] %vm4874_vm14, %v4823_v24  ;;  %5073 = vrot.lane.b32.xlu1 %v4990_v33, %s7725_s18  ;;  %v10901_v34 = vld [vmem:[#allocation2 + $0xe0] sm:$0xff]  ;;  %v10903_v44 = vld [vmem:[#allocation2 + $0xf0] sm:$0xff] }
 0x7ae   : > { %5075 = vrot.lane.b32.xlu0 %v4991_v0, %s7725_s18  ;;  %4958 = vst.msk [vmem:[#allocation3 + $0x98] sm:$0xff] %vm204_vm0, %v10901_v34  ;;  %4959 = vst.msk [vmem:[#allocation3 + $0xa0] sm:$0xff] %vm204_vm0, %v10903_v44  ;;  %v5163_v24 = vld [vmem:[#allocation2 + $0x2] sm:$0xff] }
 0x7b0   : > { %v4825_v21 = vpop.permute.xlu1 %4824  ;;  %v4827_v47 = vpop.permute.xlu0 %4826  ;;  %v4992_v23 = vld [vmem:[#allocation2 + $0xf9] sm:$0xff]  ;;  %v4993_v9 = vld [vmem:[#allocation2 + $0x109] sm:$0xff] }
 0x7b1   : > { %4898 = vst.msk [vmem:[#allocation2 + $0x129] sm:$0xff] %vm4874_vm14, %v4825_v21  ;;  %4899 = vst.msk [vmem:[#allocation2 + $0x139] sm:$0xff] %vm4874_vm14, %v4827_v47  ;;  %5077 = vrot.lane.b32.xlu1 %v4992_v23, %s7725_s18  ;;  %v10913_v31 = vld [vmem:[#allocation2 + $0xf8] sm:$0xff]  ;;  %v10915_v57 = vld [vmem:[#allocation2 + $0x108] sm:$0xff] }
 0x7b2   : > { %5079 = vrot.lane.b32.xlu0 %v4993_v9, %s7725_s18  ;;  %4960 = vst.msk [vmem:[#allocation3 + $0xa8] sm:$0xff] %vm204_vm0, %v10913_v31  ;;  %4961 = vst.msk [vmem:[#allocation3 + $0xb0] sm:$0xff] %vm204_vm0, %v10915_v57  ;;  %v5164_v47 = vld [vmem:[#allocation2 + $0xa] sm:$0xff]  ;;  %v10964_v23 = vld [vmem:[#allocation2 + $0x1a] sm:$0xff] }
 0x7b3   : > { %v10969_v9 = vld [vmem:[#allocation2 + $0x22] sm:$0xff] }
 0x7b4   : > { %v4829_v11 = vpop.permute.xlu1 %4828  ;;  %v4831_v29 = vpop.permute.xlu0 %4830  ;;  %v4994_v26 = vld [vmem:[#allocation2 + $0x111] sm:$0xff]  ;;  %v4995_v32 = vld [vmem:[#allocation2 + $0x121] sm:$0xff] }
 0x7b5   : > { %4900 = vst.msk [vmem:[#allocation2 + $0x141] sm:$0xff] %vm4874_vm14, %v4829_v11  ;;  %4901 = vst.msk [vmem:[#allocation2 + $0x151] sm:$0xff] %vm4874_vm14, %v4831_v29  ;;  %5081 = vrot.lane.b32.xlu1 %v4994_v26, %s7725_s18  ;;  %v10925_v10 = vld [vmem:[#allocation2 + $0x110] sm:$0xff]  ;;  %v10927_v56 = vld [vmem:[#allocation2 + $0x120] sm:$0xff] }
 0x7b6   : > { %5083 = vrot.lane.b32.xlu0 %v4995_v32, %s7725_s18  ;;  %4962 = vst.msk [vmem:[#allocation3 + $0xb8] sm:$0xff] %vm204_vm0, %v10925_v10  ;;  %4963 = vst.msk [vmem:[#allocation3 + $0xc0] sm:$0xff] %vm204_vm0, %v10927_v56  ;;  %v10971_v11 = vld [vmem:[#allocation2 + $0x32] sm:$0xff]  ;;  %v10977_v29 = vld [vmem:[#allocation2 + $0x3a] sm:$0xff] }
 0x7b7   : > { %v10979_v26 = vld [vmem:[#allocation2 + $0x4a] sm:$0xff]  ;;  %v10985_v32 = vld [vmem:[#allocation2 + $0x52] sm:$0xff] }
 0x7b8   : > { %v4833_v59 = vpop.permute.xlu1 %4832  ;;  %v4835_v40 = vpop.permute.xlu0 %4834  ;;  %v4996_v6 = vld [vmem:[#allocation2 + $0x129] sm:$0xff]  ;;  %v4997_v36 = vld [vmem:[#allocation2 + $0x139] sm:$0xff] }
 0x7b9   : > { %4902 = vst.msk [vmem:[#allocation2 + $0x159] sm:$0xff] %vm4874_vm14, %v4833_v59  ;;  %4903 = vst.msk [vmem:[#allocation2 + $0x169] sm:$0xff] %vm4874_vm14, %v4835_v40  ;;  %5085 = vrot.lane.b32.xlu1 %v4996_v6, %s7725_s18  ;;  %v10937_v60 = vld [vmem:[#allocation2 + $0x128] sm:$0xff]  ;;  %v10939_v37 = vld [vmem:[#allocation2 + $0x138] sm:$0xff] }
 0x7ba   : > { %5087 = vrot.lane.b32.xlu0 %v4997_v36, %s7725_s18  ;;  %4964 = vst.msk [vmem:[#allocation3 + $0xc8] sm:$0xff] %vm204_vm0, %v10937_v60  ;;  %4965 = vst.msk [vmem:[#allocation3 + $0xd0] sm:$0xff] %vm204_vm0, %v10939_v37  ;;  %v10987_v59 = vld [vmem:[#allocation2 + $0x62] sm:$0xff]  ;;  %v10993_v40 = vld [vmem:[#allocation2 + $0x6a] sm:$0xff] }
 0x7bb   : > { %v10995_v6 = vld [vmem:[#allocation2 + $0x7a] sm:$0xff]  ;;  %v11001_v36 = vld [vmem:[#allocation2 + $0x82] sm:$0xff] }
 0x7bc   : > { %v4837_v20 = vpop.permute.xlu1 %4836  ;;  %v4839_v19 = vpop.permute.xlu0 %4838  ;;  %v4998_v51 = vld [vmem:[#allocation2 + $0x141] sm:$0xff]  ;;  %v4999_v14 = vld [vmem:[#allocation2 + $0x151] sm:$0xff] }
 0x7bd   : > { %4904 = vst.msk [vmem:[#allocation2 + $0x171] sm:$0xff] %vm4874_vm14, %v4837_v20  ;;  %4905 = vst.msk [vmem:[#allocation2 + $0x181] sm:$0xff] %vm4874_vm14, %v4839_v19  ;;  %5089 = vrot.lane.b32.xlu1 %v4998_v51, %s7725_s18  ;;  %v10949_v41 = vld [vmem:[#allocation2 + $0x140] sm:$0xff]  ;;  %v4935_v63 = vld [vmem:[#allocation2 + $0x150] sm:$0xff] }
 0x7be   : > { %5091 = vrot.lane.b32.xlu0 %v4999_v14, %s7725_s18  ;;  %4966 = vst.msk [vmem:[#allocation3 + $0xd8] sm:$0xff] %vm204_vm0, %v10949_v41  ;;  %4967 = vst.msk [vmem:[#allocation3 + $0xe0] sm:$0xff] %vm204_vm0, %v4935_v63  ;;  %v11003_v20 = vld [vmem:[#allocation2 + $0x92] sm:$0xff]  ;;  %v11009_v19 = vld [vmem:[#allocation2 + $0x9a] sm:$0xff] }
 0x7bf   : > { %v11011_v51 = vld [vmem:[#allocation2 + $0xaa] sm:$0xff]  ;;  %v11017_v14 = vld [vmem:[#allocation2 + $0xb2] sm:$0xff]  ;;  %v11019_v63 = vld [vmem:[#allocation2 + $0xc2] sm:$0xff] }
 0x7c0   : > { %v4841_v39 = vpop.permute.xlu1 %4840  ;;  %v5000_v3 = vld [vmem:[#allocation2 + $0x159] sm:$0xff]  ;;  %v5001_v54 = vld [vmem:[#allocation2 + $0x169] sm:$0xff]  ;;  %v5036_v16 = vpop.permute.xlu0 %5035 }
 0x7c1   : > { %4906 = vst.msk [vmem:[#allocation2 + $0x189] sm:$0xff] %vm4874_vm14, %v4841_v39  ;;  %5093 = vrot.lane.b32.xlu1 %v5000_v3, %s7725_s18  ;;  %v4936_v5 = vld [vmem:[#allocation2 + $0x158] sm:$0xff]  ;;  %v4937_v8 = vld [vmem:[#allocation2 + $0x168] sm:$0xff] }
 0x7c2   : > { %5095 = vrot.lane.b32.xlu0 %v5001_v54, %s7725_s18  ;;  %5131 = vst.msk [vmem:[#allocation3] sm:$0xff] %vm397_vm1, %v5036_v16  ;;  %v11025_v39 = vld [vmem:[#allocation2 + $0xca] sm:$0xff]  ;;  %v5181_v3 = vld [vmem:[#allocation2 + $0xda] sm:$0xff]  ;;  %v5182_v54 = vld [vmem:[#allocation2 + $0xe2] sm:$0xff] }
 0x7c3   : > { %4968 = vst.msk [vmem:[#allocation3 + $0xe8] sm:$0xff] %vm204_vm0, %v4936_v5  ;;  %4969 = vst.msk [vmem:[#allocation3 + $0xf0] sm:$0xff] %vm204_vm0, %v4937_v8  ;;  %v5183_v16 = vld [vmem:[#allocation2 + $0xf2] sm:$0xff]  ;;  %v5184_v5 = vld [vmem:[#allocation2 + $0xfa] sm:$0xff] }
 0x7c4   : > { %v5002_v33 = vld [vmem:[#allocation2 + $0x171] sm:$0xff]  ;;  %v5038_v0 = vpop.permute.xlu1 %5037 }
 0x7c5   : > { %5097 = vrot.lane.b32.xlu1 %v5002_v33, %s7725_s18  ;;  %5132 = vst.msk [vmem:[#allocation3 + $0x8] sm:$0xff] %vm397_vm1, %v5038_v0  ;;  %v4938_v21 = vld [vmem:[#allocation2 + $0x170] sm:$0xff]  ;;  %v5187_v33 = vld [vmem:[#allocation2 + $0x122] sm:$0xff] }
 0x7c6   : > { %5227 = vrot.lane.b32.xlu0 %v5163_v24, %s7726_s19  ;;  %4970 = vst.msk [vmem:[#allocation3 + $0xf8] sm:$0xff] %vm204_vm0, %v4938_v21  ;;  %v5185_v8 = vld [vmem:[#allocation2 + $0x10a] sm:$0xff]  ;;  %v5186_v24 = vld [vmem:[#allocation2 + $0x112] sm:$0xff]  ;;  %v5189_v21 = vld [vmem:[#allocation2 + $0x13a] sm:$0xff] }
 0x7c7   : > { %v5188_v0 = vld [vmem:[#allocation2 + $0x12a] sm:$0xff] }
 0x7c9   : > { %5229 = vrot.lane.b32.xlu1 %v5164_v47, %s7726_s19 }
 0x7ca   : > { %5231 = vrot.lane.b32.xlu0 %v10964_v23, %s7726_s19 }
 0x7cd   : > { %5233 = vrot.lane.b32.xlu1 %v10969_v9, %s7726_s19 }
 0x7ce   : > { %5235 = vrot.lane.b32.xlu0 %v10971_v11, %s7726_s19 }
 0x7d1   : > { %5237 = vrot.lane.b32.xlu1 %v10977_v29, %s7726_s19 }
 0x7d2   : > { %5239 = vrot.lane.b32.xlu0 %v10979_v26, %s7726_s19 }
 0x7d5   : > { %5241 = vrot.lane.b32.xlu1 %v10985_v32, %s7726_s19 }
 0x7d6   : > { %5243 = vrot.lane.b32.xlu0 %v10987_v59, %s7726_s19 }
 0x7d9   : > { %5245 = vrot.lane.b32.xlu1 %v10993_v40, %s7726_s19 }
 0x7da   : > { %5247 = vrot.lane.b32.xlu0 %v10995_v6, %s7726_s19 }
 0x7dd   : > { %5249 = vrot.lane.b32.xlu1 %v11001_v36, %s7726_s19 }
 0x7de   : > { %5251 = vrot.lane.b32.xlu0 %v11003_v20, %s7726_s19 }
 0x7e1   : > { %5253 = vrot.lane.b32.xlu1 %v11009_v19, %s7726_s19 }
 0x7e2   : > { %5255 = vrot.lane.b32.xlu0 %v11011_v51, %s7726_s19 }
 0x7e5   : > { %5257 = vrot.lane.b32.xlu1 %v11017_v14, %s7726_s19 }
 0x7e6   : > { %5259 = vrot.lane.b32.xlu0 %v11019_v63, %s7726_s19 }
 0x7e9   : > { %5261 = vrot.lane.b32.xlu1 %v11025_v39, %s7726_s19 }
 0x7ea   : > { %5263 = vrot.lane.b32.xlu0 %v5181_v3, %s7726_s19  ;;  %v5190_v3 = vld [vmem:[#allocation2 + $0x142] sm:$0xff] }
 0x7ed   : > { %5265 = vrot.lane.b32.xlu1 %v5182_v54, %s7726_s19  ;;  %v5191_v54 = vld [vmem:[#allocation2 + $0x152] sm:$0xff] }
 0x7ee   : > { %5267 = vrot.lane.b32.xlu0 %v5183_v16, %s7726_s19 }
 0x7f1   : > { %5269 = vrot.lane.b32.xlu1 %v5184_v5, %s7726_s19 }
 0x7f2   : > { %5271 = vrot.lane.b32.xlu0 %v5185_v8, %s7726_s19  ;;  %v5192_v8 = vld [vmem:[#allocation2 + $0x15a] sm:$0xff] }
 0x7f5   : > { %5273 = vrot.lane.b32.xlu1 %v5186_v24, %s7726_s19  ;;  %v5193_v24 = vld [vmem:[#allocation2 + $0x16a] sm:$0xff] }
 0x7f6   : > { %5275 = vrot.lane.b32.xlu0 %v5187_v33, %s7726_s19 }
 0x7f9   : > { %5277 = vrot.lane.b32.xlu1 %v5188_v0, %s7726_s19 }
 0x7fa   : > { %5279 = vrot.lane.b32.xlu0 %v5189_v21, %s7726_s19  ;;  %v5194_v21 = vld [vmem:[#allocation2 + $0x172] sm:$0xff] }
 0x7fc   : > { %v5040_v47 = vpop.permute.xlu0 %5039 }
 0x7fd   : > { %5133 = vst.msk [vmem:[#allocation3 + $0x10] sm:$0xff] %vm397_vm1, %v5040_v47  ;;  %5281 = vrot.lane.b32.xlu1 %v5190_v3, %s7726_s19 }
 0x7fe   : > { %5283 = vrot.lane.b32.xlu0 %v5191_v54, %s7726_s19 }
 0x7ff   : > { %v5042_v16 = vpop.permute.xlu1 %5041 }
 0x800   : > { %v5044_v5 = vpop.permute.xlu0 %5043  ;;  %5134 = vst.msk [vmem:[#allocation3 + $0x18] sm:$0xff] %vm397_vm1, %v5042_v16 }
 0x801   : > { %5135 = vst.msk [vmem:[#allocation3 + $0x20] sm:$0xff] %vm397_vm1, %v5044_v5  ;;  %5285 = vrot.lane.b32.xlu1 %v5192_v8, %s7726_s19 }
 0x802   : > { %5287 = vrot.lane.b32.xlu0 %v5193_v24, %s7726_s19 }
 0x803   : > { %v5046_v33 = vpop.permute.xlu1 %5045 }
 0x804   : > { %v5048_v0 = vpop.permute.xlu0 %5047  ;;  %5136 = vst.msk [vmem:[#allocation3 + $0x28] sm:$0xff] %vm397_vm1, %v5046_v33 }
 0x805   : > { %5137 = vst.msk [vmem:[#allocation3 + $0x30] sm:$0xff] %vm397_vm1, %v5048_v0  ;;  %5289 = vrot.lane.b32.xlu1 %v5194_v21, %s7726_s19 }
 0x806   : > { %5419 = vrot.lane.b32.xlu0 %v10760_v17, %s7727_s20 }
 0x807   : > { %v5050_v47 = vpop.permute.xlu1 %5049 }
 0x808   : > { %v5052_v3 = vpop.permute.xlu0 %5051  ;;  %5138 = vst.msk [vmem:[#allocation3 + $0x38] sm:$0xff] %vm397_vm1, %v5050_v47 }
 0x809   : > { %5139 = vst.msk [vmem:[#allocation3 + $0x40] sm:$0xff] %vm397_vm1, %v5052_v3  ;;  %5421 = vrot.lane.b32.xlu1 %v10778_v61, %s7727_s20 }
 0x80a   : > { %5423 = vrot.lane.b32.xlu0 %v10780_v49, %s7727_s20 }
 0x80b   : > { %v5054_v54 = vpop.permute.xlu1 %5053 }
 0x80c   : > { %v5056_v16 = vpop.permute.xlu0 %5055  ;;  %5140 = vst.msk [vmem:[#allocation3 + $0x48] sm:$0xff] %vm397_vm1, %v5054_v54 }
 0x80d   : > { %5141 = vst.msk [vmem:[#allocation3 + $0x50] sm:$0xff] %vm397_vm1, %v5056_v16  ;;  %5425 = vrot.lane.b32.xlu1 %v10796_v35, %s7727_s20 }
 0x80e   : > { %5427 = vrot.lane.b32.xlu0 %v10798_v28, %s7727_s20 }
 0x80f   : > { %v5058_v17 = vpop.permute.xlu1 %5057 }
 0x810   : > { %v5060_v5 = vpop.permute.xlu0 %5059  ;;  %5142 = vst.msk [vmem:[#allocation3 + $0x58] sm:$0xff] %vm397_vm1, %v5058_v17 }
 0x811   : > { %5143 = vst.msk [vmem:[#allocation3 + $0x60] sm:$0xff] %vm397_vm1, %v5060_v5  ;;  %5429 = vrot.lane.b32.xlu1 %v10814_v42, %s7727_s20 }
 0x812   : > { %5431 = vrot.lane.b32.xlu0 %v10816_v22, %s7727_s20 }
 0x813   : > { %v5062_v61 = vpop.permute.xlu1 %5061 }
 0x814   : > { %v5064_v8 = vpop.permute.xlu0 %5063  ;;  %5144 = vst.msk [vmem:[#allocation3 + $0x68] sm:$0xff] %vm397_vm1, %v5062_v61 }
 0x815   : > { %5145 = vst.msk [vmem:[#allocation3 + $0x70] sm:$0xff] %vm397_vm1, %v5064_v8  ;;  %5433 = vrot.lane.b32.xlu1 %v10832_v1, %s7727_s20 }
 0x816   : > { %5435 = vrot.lane.b32.xlu0 %v10834_v46, %s7727_s20 }
 0x817   : > { %v5066_v24 = vpop.permute.xlu1 %5065 }
 0x818   : > { %v5068_v33 = vpop.permute.xlu0 %5067  ;;  %5146 = vst.msk [vmem:[#allocation3 + $0x78] sm:$0xff] %vm397_vm1, %v5066_v24 }
 0x819   : > { %5147 = vst.msk [vmem:[#allocation3 + $0x80] sm:$0xff] %vm397_vm1, %v5068_v33  ;;  %5437 = vrot.lane.b32.xlu1 %v10850_v53, %s7727_s20 }
 0x81a   : > { %5439 = vrot.lane.b32.xlu0 %v10852_v43, %s7727_s20 }
 0x81b   : > { %v5070_v0 = vpop.permute.xlu1 %5069 }
 0x81c   : > { %v5072_v21 = vpop.permute.xlu0 %5071  ;;  %5148 = vst.msk [vmem:[#allocation3 + $0x88] sm:$0xff] %vm397_vm1, %v5070_v0 }
 0x81d   : > { %5149 = vst.msk [vmem:[#allocation3 + $0x90] sm:$0xff] %vm397_vm1, %v5072_v21  ;;  %5441 = vrot.lane.b32.xlu1 %v10865_v13, %s7727_s20 }
 0x81e   : > { %5443 = vrot.lane.b32.xlu0 %v10867_v45, %s7727_s20 }
 0x81f   : > { %v5074_v47 = vpop.permute.xlu1 %5073 }
 0x820   : > { %v5076_v3 = vpop.permute.xlu0 %5075  ;;  %5150 = vst.msk [vmem:[#allocation3 + $0x98] sm:$0xff] %vm397_vm1, %v5074_v47 }
 0x821   : > { %5151 = vst.msk [vmem:[#allocation3 + $0xa0] sm:$0xff] %vm397_vm1, %v5076_v3  ;;  %5445 = vrot.lane.b32.xlu1 %v10877_v48, %s7727_s20 }
 0x822   : > { %5447 = vrot.lane.b32.xlu0 %v10879_v4, %s7727_s20 }
 0x823   : > { %v5078_v54 = vpop.permute.xlu1 %5077 }
 0x824   : > { %v5080_v16 = vpop.permute.xlu0 %5079  ;;  %5152 = vst.msk [vmem:[#allocation3 + $0xa8] sm:$0xff] %vm397_vm1, %v5078_v54 }
 0x825   : > { %5153 = vst.msk [vmem:[#allocation3 + $0xb0] sm:$0xff] %vm397_vm1, %v5080_v16  ;;  %5449 = vrot.lane.b32.xlu1 %v10889_v2, %s7727_s20  ;;  %v7712_v16 = vld [vmem:[%s11753_s1 + $0x68] ss:$0 sps:$4 sm:$0xff]  }
 0x826   : > { %5451 = vrot.lane.b32.xlu0 %v10891_v52, %s7727_s20  ;;  %7679 = vmatprep.subr.msk.bf16.mxu0 %vm1923_vm6, %v7712_v16 }
 0x827   : > { %v5082_v17 = vpop.permute.xlu1 %5081 }
 0x828   : > { %v5084_v5 = vpop.permute.xlu0 %5083  ;;  %5154 = vst.msk [vmem:[#allocation3 + $0xb8] sm:$0xff] %vm397_vm1, %v5082_v17 }
 0x829   : > { %5155 = vst.msk [vmem:[#allocation3 + $0xc0] sm:$0xff] %vm397_vm1, %v5084_v5  ;;  %5453 = vrot.lane.b32.xlu1 %v10901_v34, %s7727_s20  ;;  %v7713_v5 = vld [vmem:[%s11753_s1 + $0x60] sm:$0xff]  }
 0x82a   : > { %5455 = vrot.lane.b32.xlu0 %v10903_v44, %s7727_s20 }
 0x82b   : > { %v5086_v61 = vpop.permute.xlu1 %5085 }
 0x82c   : > { %v5088_v8 = vpop.permute.xlu0 %5087  ;;  %5156 = vst.msk [vmem:[#allocation3 + $0xc8] sm:$0xff] %vm397_vm1, %v5086_v61 }
 0x82d   : > { %5157 = vst.msk [vmem:[#allocation3 + $0xd0] sm:$0xff] %vm397_vm1, %v5088_v8  ;;  %5457 = vrot.lane.b32.xlu1 %v10913_v31, %s7727_s20 }
 0x82e   : > { %5459 = vrot.lane.b32.xlu0 %v10915_v57, %s7727_s20 }
 0x82f   : > { %v5090_v24 = vpop.permute.xlu1 %5089 }
 0x830   : > { %v5092_v33 = vpop.permute.xlu0 %5091  ;;  %5158 = vst.msk [vmem:[#allocation3 + $0xd8] sm:$0xff] %vm397_vm1, %v5090_v24 }
 0x831   : > { %5159 = vst.msk [vmem:[#allocation3 + $0xe0] sm:$0xff] %vm397_vm1, %v5092_v33  ;;  %5461 = vrot.lane.b32.xlu1 %v10925_v10, %s7727_s20 }
 0x832   : > { %5463 = vrot.lane.b32.xlu0 %v10927_v56, %s7727_s20 }
 0x833   : > { %v5094_v0 = vpop.permute.xlu1 %5093 }
 0x834   : > { %v5096_v21 = vpop.permute.xlu0 %5095  ;;  %5160 = vst.msk [vmem:[#allocation3 + $0xe8] sm:$0xff] %vm397_vm1, %v5094_v0 }
 0x835   : > { %5161 = vst.msk [vmem:[#allocation3 + $0xf0] sm:$0xff] %vm397_vm1, %v5096_v21  ;;  %5465 = vrot.lane.b32.xlu1 %v10937_v60, %s7727_s20 }
 0x836   : > { %5467 = vrot.lane.b32.xlu0 %v10939_v37, %s7727_s20 }
 0x837   : > { %v5098_v47 = vpop.permute.xlu1 %5097 }
 0x838   : > { %v5228_v3 = vpop.permute.xlu0 %5227  ;;  %5162 = vst.msk [vmem:[#allocation3 + $0xf8] sm:$0xff] %vm397_vm1, %v5098_v47 }
 0x839   : > { %5323 = vst.msk [vmem:[#allocation3] sm:$0xff] %vm590_vm2, %v5228_v3  ;;  %5611 = vrot.lane.b32.xlu1 %v10758_v30, %s7728_s21 }
 0x83a   : > { %5613 = vrot.lane.b32.xlu0 %v10768_v38, %s7728_s21 }
 0x83b   : > { %v5230_v56 = vpop.permute.xlu1 %5229 }
 0x83c   : > { %v5232_v54 = vpop.permute.xlu0 %5231  ;;  %5324 = vst.msk [vmem:[#allocation3 + $0x8] sm:$0xff] %vm590_vm2, %v5230_v56 }
 0x83d   : > { %5325 = vst.msk [vmem:[#allocation3 + $0x10] sm:$0xff] %vm590_vm2, %v5232_v54  ;;  %5615 = vrot.lane.b32.xlu1 %v10770_v7, %s7728_s21 }
 0x83e   : > { %5617 = vrot.lane.b32.xlu0 %v10786_v18, %s7728_s21 }
 0x83f   : > { %v5234_v60 = vpop.permute.xlu1 %5233 }
 0x840   : > { %v5236_v37 = vpop.permute.xlu0 %5235  ;;  %5326 = vst.msk [vmem:[#allocation3 + $0x18] sm:$0xff] %vm590_vm2, %v5234_v60 }
 0x841   : > { %5327 = vst.msk [vmem:[#allocation3 + $0x20] sm:$0xff] %vm590_vm2, %v5236_v37  ;;  %5803 = vrot.lane.b32.xlu1 %v10964_v23, %s7729_s22 }
 0x842   : > { %5805 = vrot.lane.b32.xlu0 %v10969_v9, %s7729_s22  ;;  %v6649_v9 = vsel %vm1923_vm6, %v7712_v16, 0 }
 0x843   : > { %v5238_v30 = vpop.permute.xlu1 %5237  ;;  %7625 = vmatpush3.bf16.msra.mxu0 %v6649_v9 }
 0x844   : > { %v5240_v38 = vpop.permute.xlu0 %5239  ;;  %5328 = vst.msk [vmem:[#allocation3 + $0x28] sm:$0xff] %vm590_vm2, %v5238_v30  ;;  %7626 = vmatprep.subr.bf16.mxu0 %v7713_v5 }
 0x845   : > { %5329 = vst.msk [vmem:[#allocation3 + $0x30] sm:$0xff] %vm590_vm2, %v5240_v38  ;;  %5807 = vrot.lane.b32.xlu1 %v10971_v11, %s7729_s22 }
 0x846   : > { %5809 = vrot.lane.b32.xlu0 %v10977_v29, %s7729_s22 }
 0x847   : > { %v5242_v23 = vpop.permute.xlu1 %5241  ;;  %7627 = vmatpush3.bf16.msra.mxu0 %v7713_v5 }
 0x848   : > { %v5244_v17 = vpop.permute.xlu0 %5243  ;;  %5330 = vst.msk [vmem:[#allocation3 + $0x38] sm:$0xff] %vm590_vm2, %v5242_v23 }
 0x849   : > { %5331 = vst.msk [vmem:[#allocation3 + $0x40] sm:$0xff] %vm590_vm2, %v5244_v17  ;;  %5995 = vrot.lane.b32.xlu1 %v10780_v49, %s7730_s23  ;;  %v7714_v49 = vld [vmem:[%s11753_s1 + $0x58] sm:$0xff]  }
 0x84a   : > { %5997 = vrot.lane.b32.xlu0 %v10796_v35, %s7730_s23  ;;  %7628 = vmatprep.subr.bf16.mxu0 %v7714_v49 }
 0x84b   : > { %v5246_v61 = vpop.permute.xlu1 %5245  ;;  %7629 = vmatpush3.bf16.msra.mxu0 %v7714_v49 }
 0x84c   : > { %v5248_v8 = vpop.permute.xlu0 %5247  ;;  %5332 = vst.msk [vmem:[#allocation3 + $0x48] sm:$0xff] %vm590_vm2, %v5246_v61 }
 0x84d   : > { %5333 = vst.msk [vmem:[#allocation3 + $0x50] sm:$0xff] %vm590_vm2, %v5248_v8  ;;  %5999 = vrot.lane.b32.xlu1 %v10798_v28, %s7730_s23  ;;  %v7715_v28 = vld [vmem:[%s11753_s1 + $0x50] sm:$0xff]  }
 0x84e   : > { %6001 = vrot.lane.b32.xlu0 %v10814_v42, %s7730_s23  ;;  %7630 = vmatprep.subr.bf16.mxu0 %v7715_v28 }
 0x84f   : > { %v5250_v35 = vpop.permute.xlu1 %5249  ;;  %7631 = vmatpush3.bf16.msra.mxu0 %v7715_v28 }
 0x850   : > { %v5252_v24 = vpop.permute.xlu0 %5251  ;;  %5334 = vst.msk [vmem:[#allocation3 + $0x58] sm:$0xff] %vm590_vm2, %v5250_v35 }
 0x851   : > { %5335 = vst.msk [vmem:[#allocation3 + $0x60] sm:$0xff] %vm590_vm2, %v5252_v24  ;;  %6187 = vrot.lane.b32.xlu1 %v10770_v7, %s7731_s24  ;;  %v7716_v7 = vld [vmem:[%s11753_s1 + $0x48] sm:$0xff]  }
 0x852   : > { %6189 = vrot.lane.b32.xlu0 %v10786_v18, %s7731_s24  ;;  %7632 = vmatprep.subr.bf16.mxu0 %v7716_v7 }
 0x853   : > { %v5254_v42 = vpop.permute.xlu1 %5253  ;;  %7633 = vmatpush3.bf16.msra.mxu0 %v7716_v7 }
 0x854   : > { %v5256_v33 = vpop.permute.xlu0 %5255  ;;  %5336 = vst.msk [vmem:[#allocation3 + $0x68] sm:$0xff] %vm590_vm2, %v5254_v42 }
 0x855   : > { %5337 = vst.msk [vmem:[#allocation3 + $0x70] sm:$0xff] %vm590_vm2, %v5256_v33  ;;  %6191 = vrot.lane.b32.xlu1 %v10788_v25, %s7731_s24 }
 0x856   : > { %6193 = vrot.lane.b32.xlu0 %v10804_v62, %s7731_s24 }
 0x857   : > { %v5258_v18 = vpop.permute.xlu1 %5257 }
 0x858   : > { %v5260_v0 = vpop.permute.xlu0 %5259  ;;  %5338 = vst.msk [vmem:[#allocation3 + $0x78] sm:$0xff] %vm590_vm2, %v5258_v18 }
 0x859   : > { %5339 = vst.msk [vmem:[#allocation3 + $0x80] sm:$0xff] %vm590_vm2, %v5260_v0  ;;  %6379 = vrot.lane.b32.xlu1 %v10971_v11, %s7732_s8  ;;  %v5561_v0 = vld [vmem:[#allocation2 + $0xc1] sm:$0xff] }
 0x85a   : > { %6381 = vrot.lane.b32.xlu0 %v10977_v29, %s7732_s8 }
 0x85b   : > { %v5262_v21 = vpop.permute.xlu1 %5261 }
 0x85c   : > { %v5264_v47 = vpop.permute.xlu0 %5263  ;;  %5340 = vst.msk [vmem:[#allocation3 + $0x88] sm:$0xff] %vm590_vm2, %v5262_v21  ;;  %v5562_v21 = vld [vmem:[#allocation2 + $0xc9] sm:$0xff] }
 0x85d   : > { %5341 = vst.msk [vmem:[#allocation3 + $0x90] sm:$0xff] %vm590_vm2, %v5264_v47  ;;  %6383 = vrot.lane.b32.xlu1 %v10979_v26, %s7732_s8 }
 0x85e   : > { %6385 = vrot.lane.b32.xlu0 %v10985_v32, %s7732_s8 }
 0x85f   : > { %v5266_v3 = vpop.permute.xlu1 %5265 }
 0x860   : > { %v5268_v56 = vpop.permute.xlu0 %5267  ;;  %5342 = vst.msk [vmem:[#allocation3 + $0x98] sm:$0xff] %vm590_vm2, %v5266_v3 }
 0x861   : > { %5343 = vst.msk [vmem:[#allocation3 + $0xa0] sm:$0xff] %vm590_vm2, %v5268_v56  ;;  %5619 = vrot.lane.b32.xlu1 %v10788_v25, %s7728_s21 }
 0x862   : > { %5621 = vrot.lane.b32.xlu0 %v10804_v62, %s7728_s21 }
 0x863   : > { %v5270_v11 = vpop.permute.xlu1 %5269 }
 0x864   : > { %v5272_v29 = vpop.permute.xlu0 %5271  ;;  %5344 = vst.msk [vmem:[#allocation3 + $0xa8] sm:$0xff] %vm590_vm2, %v5270_v11 }
 0x865   : > { %5345 = vst.msk [vmem:[#allocation3 + $0xb0] sm:$0xff] %vm590_vm2, %v5272_v29  ;;  %5623 = vrot.lane.b32.xlu1 %v10806_v15, %s7728_s21 }
 0x866   : > { %5625 = vrot.lane.b32.xlu0 %v10822_v50, %s7728_s21 }
 0x867   : > { %v5274_v54 = vpop.permute.xlu1 %5273 }
 0x868   : > { %v5276_v60 = vpop.permute.xlu0 %5275  ;;  %5346 = vst.msk [vmem:[#allocation3 + $0xb8] sm:$0xff] %vm590_vm2, %v5274_v54 }
 0x869   : > { %5347 = vst.msk [vmem:[#allocation3 + $0xc0] sm:$0xff] %vm590_vm2, %v5276_v60  ;;  %5811 = vrot.lane.b32.xlu1 %v10979_v26, %s7729_s22  ;;  %v6138_v60 = vld [vmem:[#allocation2 + $0xe1] sm:$0xff] }
 0x86a   : > { %5813 = vrot.lane.b32.xlu0 %v10985_v32, %s7729_s22 }
 0x86b   : > { %v5278_v25 = vpop.permute.xlu1 %5277 }
 0x86c   : > { %v5280_v62 = vpop.permute.xlu0 %5279  ;;  %5348 = vst.msk [vmem:[#allocation3 + $0xc8] sm:$0xff] %vm590_vm2, %v5278_v25 }
 0x86d   : > { %5349 = vst.msk [vmem:[#allocation3 + $0xd0] sm:$0xff] %vm590_vm2, %v5280_v62  ;;  %5815 = vrot.lane.b32.xlu1 %v10987_v59, %s7729_s22  ;;  %v6327_v62 = vld [vmem:[#allocation2 + $0xc2] sm:$0xff] }
 0x86e   : > { %5817 = vrot.lane.b32.xlu0 %v10993_v40, %s7729_s22 }
 0x86f   : > { %v5282_v37 = vpop.permute.xlu1 %5281 }
 0x870   : > { %v5284_v30 = vpop.permute.xlu0 %5283  ;;  %5350 = vst.msk [vmem:[#allocation3 + $0xd8] sm:$0xff] %vm590_vm2, %v5282_v37  ;;  %v6328_v37 = vld [vmem:[#allocation2 + $0xca] sm:$0xff] }
 0x871   : > { %5351 = vst.msk [vmem:[#allocation3 + $0xe0] sm:$0xff] %vm590_vm2, %v5284_v30  ;;  %6003 = vrot.lane.b32.xlu1 %v10816_v22, %s7730_s23 }
 0x872   : > { %6005 = vrot.lane.b32.xlu0 %v10832_v1, %s7730_s23 }
 0x873   : > { %v5286_v26 = vpop.permute.xlu1 %5285 }
 0x874   : > { %v5288_v32 = vpop.permute.xlu0 %5287  ;;  %5352 = vst.msk [vmem:[#allocation3 + $0xe8] sm:$0xff] %vm590_vm2, %v5286_v26 }
 0x875   : > { %5353 = vst.msk [vmem:[#allocation3 + $0xf0] sm:$0xff] %vm590_vm2, %v5288_v32  ;;  %6007 = vrot.lane.b32.xlu1 %v10834_v46, %s7730_s23 }
 0x876   : > { %6009 = vrot.lane.b32.xlu0 %v10850_v53, %s7730_s23 }
 0x877   : > { %v5290_v38 = vpop.permute.xlu1 %5289 }
 0x878   : > { %v5420_v16 = vpop.permute.xlu0 %5419  ;;  %5354 = vst.msk [vmem:[#allocation3 + $0xf8] sm:$0xff] %vm590_vm2, %v5290_v38 }
 0x879   : > { %5515 = vst.msk [vmem:[#allocation3] sm:$0xff] %vm784_vm3, %v5420_v16  ;;  %6195 = vrot.lane.b32.xlu1 %v10806_v15, %s7731_s24  ;;  %v6329_v16 = vld [vmem:[#allocation2 + $0xda] sm:$0xff] }
 0x87a   : > { %6197 = vrot.lane.b32.xlu0 %v10822_v50, %s7731_s24 }
 0x87b   : > { %v5422_v22 = vpop.permute.xlu1 %5421 }
 0x87c   : > { %v5424_v1 = vpop.permute.xlu0 %5423  ;;  %5516 = vst.msk [vmem:[#allocation3 + $0x8] sm:$0xff] %vm784_vm3, %v5422_v22  ;;  %v6330_v22 = vld [vmem:[#allocation2 + $0xe2] sm:$0xff] }
 0x87d   : > { %5517 = vst.msk [vmem:[#allocation3 + $0x10] sm:$0xff] %vm784_vm3, %v5424_v1  ;;  %6199 = vrot.lane.b32.xlu1 %v10824_v55, %s7731_s24 }
 0x87e   : > { %6201 = vrot.lane.b32.xlu0 %v10840_v27, %s7731_s24 }
 0x87f   : > { %v5426_v46 = vpop.permute.xlu1 %5425 }
 0x880   : > { %v5428_v53 = vpop.permute.xlu0 %5427  ;;  %5518 = vst.msk [vmem:[#allocation3 + $0x18] sm:$0xff] %vm784_vm3, %v5426_v46 }
 0x881   : > { %5519 = vst.msk [vmem:[#allocation3 + $0x20] sm:$0xff] %vm784_vm3, %v5428_v53  ;;  %6387 = vrot.lane.b32.xlu1 %v10987_v59, %s7732_s8 }
 0x882   : > { %6389 = vrot.lane.b32.xlu0 %v10993_v40, %s7732_s8 }
 0x883   : > { %v5430_v15 = vpop.permute.xlu1 %5429 }
 0x884   : > { %v5432_v50 = vpop.permute.xlu0 %5431  ;;  %5520 = vst.msk [vmem:[#allocation3 + $0x28] sm:$0xff] %vm784_vm3, %v5430_v15 }
 0x885   : > { %5521 = vst.msk [vmem:[#allocation3 + $0x30] sm:$0xff] %vm784_vm3, %v5432_v50  ;;  %6391 = vrot.lane.b32.xlu1 %v10995_v6, %s7732_s8 }
 0x886   : > { %6393 = vrot.lane.b32.xlu0 %v11001_v36, %s7732_s8 }
 0x887   : > { %v5434_v23 = vpop.permute.xlu1 %5433 }
 0x888   : > { %v5436_v17 = vpop.permute.xlu0 %5435  ;;  %5522 = vst.msk [vmem:[#allocation3 + $0x38] sm:$0xff] %vm784_vm3, %v5434_v23 }
 0x889   : > { %5523 = vst.msk [vmem:[#allocation3 + $0x40] sm:$0xff] %vm784_vm3, %v5436_v17  ;;  %5627 = vrot.lane.b32.xlu1 %v10824_v55, %s7728_s21 }
 0x88a   : > { %5629 = vrot.lane.b32.xlu0 %v10840_v27, %s7728_s21 }
 0x88b   : > { %v5438_v59 = vpop.permute.xlu1 %5437 }
 0x88c   : > { %v5440_v40 = vpop.permute.xlu0 %5439  ;;  %5524 = vst.msk [vmem:[#allocation3 + $0x48] sm:$0xff] %vm784_vm3, %v5438_v59 }
 0x88d   : > { %5525 = vst.msk [vmem:[#allocation3 + $0x50] sm:$0xff] %vm784_vm3, %v5440_v40  ;;  %5631 = vrot.lane.b32.xlu1 %v10842_v12, %s7728_s21  ;;  %v5565_v40 = vld [vmem:[#allocation2 + $0xf1] sm:$0xff] }
 0x88e   : > { %5633 = vrot.lane.b32.xlu0 %v10858_v58, %s7728_s21 }
 0x88f   : > { %v5442_v9 = vpop.permute.xlu1 %5441 }
 0x890   : > { %v5444_v5 = vpop.permute.xlu0 %5443  ;;  %5526 = vst.msk [vmem:[#allocation3 + $0x58] sm:$0xff] %vm784_vm3, %v5442_v9  ;;  %v5566_v9 = vld [vmem:[#allocation2 + $0xf9] sm:$0xff] }
 0x891   : > { %5527 = vst.msk [vmem:[#allocation3 + $0x60] sm:$0xff] %vm784_vm3, %v5444_v5  ;;  %5819 = vrot.lane.b32.xlu1 %v10995_v6, %s7729_s22 }
 0x892   : > { %5821 = vrot.lane.b32.xlu0 %v11001_v36, %s7729_s22 }
 0x893   : > { %v5446_v55 = vpop.permute.xlu1 %5445 }
 0x894   : > { %v5448_v27 = vpop.permute.xlu0 %5447  ;;  %5528 = vst.msk [vmem:[#allocation3 + $0x68] sm:$0xff] %vm784_vm3, %v5446_v55 }
 0x895   : > { %5529 = vst.msk [vmem:[#allocation3 + $0x70] sm:$0xff] %vm784_vm3, %v5448_v27  ;;  %5823 = vrot.lane.b32.xlu1 %v11003_v20, %s7729_s22 }
 0x896   : > { %5825 = vrot.lane.b32.xlu0 %v11009_v19, %s7729_s22 }
 0x897   : > { %v5450_v12 = vpop.permute.xlu1 %5449 }
 0x898   : > { %v5452_v58 = vpop.permute.xlu0 %5451  ;;  %5530 = vst.msk [vmem:[#allocation3 + $0x78] sm:$0xff] %vm784_vm3, %v5450_v12 }
 0x899   : > { %5531 = vst.msk [vmem:[#allocation3 + $0x80] sm:$0xff] %vm784_vm3, %v5452_v58  ;;  %6011 = vrot.lane.b32.xlu1 %v10852_v43, %s7730_s23  ;;  %v6131_v43 = vld [vmem:[#allocation2 + $0x91] sm:$0xff] }
 0x89a   : > { %6013 = vrot.lane.b32.xlu0 %v10865_v13, %s7730_s23  ;;  %v6132_v13 = vld [vmem:[#allocation2 + $0x99] sm:$0xff] }
 0x89b   : > { %v5454_v6 = vpop.permute.xlu1 %5453  ;;  %v5757_v58 = vld [vmem:[#allocation2 + $0xf2] sm:$0xff] }
 0x89c   : > { %v5456_v36 = vpop.permute.xlu0 %5455  ;;  %5532 = vst.msk [vmem:[#allocation3 + $0x88] sm:$0xff] %vm784_vm3, %v5454_v6  ;;  %v5758_v6 = vld [vmem:[#allocation2 + $0xfa] sm:$0xff] }
 0x89d   : > { %5533 = vst.msk [vmem:[#allocation3 + $0x90] sm:$0xff] %vm784_vm3, %v5456_v36  ;;  %6015 = vrot.lane.b32.xlu1 %v10867_v45, %s7730_s23  ;;  %v6133_v45 = vld [vmem:[#allocation2 + $0xa9] sm:$0xff] }
 0x89e   : > { %6017 = vrot.lane.b32.xlu0 %v10877_v48, %s7730_s23  ;;  %v6134_v48 = vld [vmem:[#allocation2 + $0xb1] sm:$0xff] }
 0x89f   : > { %v5458_v61 = vpop.permute.xlu1 %5457 }
 0x8a0   : > { %v5460_v8 = vpop.permute.xlu0 %5459  ;;  %5534 = vst.msk [vmem:[#allocation3 + $0x98] sm:$0xff] %vm784_vm3, %v5458_v61 }
 0x8a1   : > { %5535 = vst.msk [vmem:[#allocation3 + $0xa0] sm:$0xff] %vm784_vm3, %v5460_v8  ;;  %6203 = vrot.lane.b32.xlu1 %v6131_v43, %s7731_s24 }
 0x8a2   : > { %6205 = vrot.lane.b32.xlu0 %v6132_v13, %s7731_s24 }
 0x8a3   : > { %v5462_v49 = vpop.permute.xlu1 %5461 }
 0x8a4   : > { %v5464_v35 = vpop.permute.xlu0 %5463  ;;  %5536 = vst.msk [vmem:[#allocation3 + $0xa8] sm:$0xff] %vm784_vm3, %v5462_v49 }
 0x8a5   : > { %5537 = vst.msk [vmem:[#allocation3 + $0xb0] sm:$0xff] %vm784_vm3, %v5464_v35  ;;  %6207 = vrot.lane.b32.xlu1 %v6133_v45, %s7731_s24  ;;  %v6142_v35 = vld [vmem:[#allocation2 + $0x111] sm:$0xff] }
 0x8a6   : > { %6209 = vrot.lane.b32.xlu0 %v6134_v48, %s7731_s24 }
 0x8a7   : > { %v5466_v24 = vpop.permute.xlu1 %5465 }
 0x8a8   : > { %v5468_v28 = vpop.permute.xlu0 %5467  ;;  %5538 = vst.msk [vmem:[#allocation3 + $0xb8] sm:$0xff] %vm784_vm3, %v5466_v24 }
 0x8a9   : > { %5539 = vst.msk [vmem:[#allocation3 + $0xc0] sm:$0xff] %vm784_vm3, %v5468_v28  ;;  %6395 = vrot.lane.b32.xlu1 %v11003_v20, %s7732_s8 }
 0x8aa   : > { %6397 = vrot.lane.b32.xlu0 %v11009_v19, %s7732_s8 }
 0x8ab   : > { %v5612_v42 = vpop.permute.xlu1 %5611 }
 0x8ac   : > { %v5614_v33 = vpop.permute.xlu0 %5613  ;;  %5707 = vst.msk [vmem:[#allocation3] sm:$0xff] %vm977_vm4, %v5612_v42 }
 0x8ad   : > { %5708 = vst.msk [vmem:[#allocation3 + $0x8] sm:$0xff] %vm977_vm4, %v5614_v33  ;;  %6399 = vrot.lane.b32.xlu1 %v11011_v51, %s7732_s8  ;;  %v6333_v33 = vld [vmem:[#allocation2 + $0x10a] sm:$0xff] }
 0x8ae   : > { %6401 = vrot.lane.b32.xlu0 %v11017_v14, %s7732_s8 }
 0x8af   : > { %v5616_v7 = vpop.permute.xlu1 %5615 }
 0x8b0   : > { %v5618_v18 = vpop.permute.xlu0 %5617  ;;  %5709 = vst.msk [vmem:[#allocation3 + $0x10] sm:$0xff] %vm977_vm4, %v5616_v7  ;;  %v6334_v7 = vld [vmem:[#allocation2 + $0x112] sm:$0xff] }
 0x8b1   : > { %5710 = vst.msk [vmem:[#allocation3 + $0x18] sm:$0xff] %vm977_vm4, %v5618_v18  ;;  %5635 = vrot.lane.b32.xlu1 %v6133_v45, %s7728_s21 }
 0x8b2   : > { %5637 = vrot.lane.b32.xlu0 %v6134_v48, %s7728_s21 }
 0x8b3   : > { %v5804_v20 = vpop.permute.xlu1 %5803 }
 0x8b4   : > { %v5806_v19 = vpop.permute.xlu0 %5805  ;;  %5899 = vst.msk [vmem:[#allocation3] sm:$0xff] %vm1170_vm5, %v5804_v20 }
 0x8b5   : > { %5900 = vst.msk [vmem:[#allocation3 + $0x8] sm:$0xff] %vm1170_vm5, %v5806_v19  ;;  %5639 = vrot.lane.b32.xlu1 %v5561_v0, %s7728_s21 }
 0x8b6   : > { %5641 = vrot.lane.b32.xlu0 %v5562_v21, %s7728_s21 }
 0x8b7   : > { %v5808_v47 = vpop.permute.xlu1 %5807 }
 0x8b8   : > { %v5810_v3 = vpop.permute.xlu0 %5809  ;;  %5901 = vst.msk [vmem:[#allocation3 + $0x10] sm:$0xff] %vm1170_vm5, %v5808_v47 }
 0x8b9   : > { %5902 = vst.msk [vmem:[#allocation3 + $0x18] sm:$0xff] %vm1170_vm5, %v5810_v3  ;;  %5827 = vrot.lane.b32.xlu1 %v11011_v51, %s7729_s22 }
 0x8ba   : > { %5829 = vrot.lane.b32.xlu0 %v11017_v14, %s7729_s22 }
 0x8bb   : > { %v5996_v56 = vpop.permute.xlu1 %5995 }
 0x8bc   : > { %v5998_v11 = vpop.permute.xlu0 %5997  ;;  %6091 = vst.msk [vmem:[#allocation3] sm:$0xff] %vm1364_vm7, %v5996_v56 }
 0x8bd   : > { %6092 = vst.msk [vmem:[#allocation3 + $0x8] sm:$0xff] %vm1364_vm7, %v5998_v11  ;;  %5831 = vrot.lane.b32.xlu1 %v11019_v63, %s7729_s22  ;;  %v5569_v11 = vld [vmem:[#allocation2 + $0x121] sm:$0xff] }
 0x8be   : > { %5833 = vrot.lane.b32.xlu0 %v11025_v39, %s7729_s22 }
 0x8bf   : > { %v6000_v29 = vpop.permute.xlu1 %5999 }
 0x8c0   : > { %v6002_v54 = vpop.permute.xlu0 %6001  ;;  %6093 = vst.msk [vmem:[#allocation3 + $0x10] sm:$0xff] %vm1364_vm7, %v6000_v29  ;;  %v5570_v29 = vld [vmem:[#allocation2 + $0x129] sm:$0xff] }
 0x8c1   : > { %6094 = vst.msk [vmem:[#allocation3 + $0x18] sm:$0xff] %vm1364_vm7, %v6002_v54  ;;  %6019 = vrot.lane.b32.xlu1 %v10879_v4, %s7730_s23 }
 0x8c2   : > { %6021 = vrot.lane.b32.xlu0 %v10889_v2, %s7730_s23 }
 0x8c3   : > { %v6188_v51 = vpop.permute.xlu1 %6187 }
 0x8c4   : > { %v6190_v14 = vpop.permute.xlu0 %6189  ;;  %6283 = vst.msk [vmem:[#allocation3] sm:$0xff] %vm1557_vm8, %v6188_v51 }
 0x8c5   : > { %6284 = vst.msk [vmem:[#allocation3 + $0x8] sm:$0xff] %vm1557_vm8, %v6190_v14  ;;  %6023 = vrot.lane.b32.xlu1 %v10891_v52, %s7730_s23  ;;  %v6137_v52 = vld [vmem:[#allocation2 + $0xd9] sm:$0xff] }
 0x8c6   : > { %6025 = vrot.lane.b32.xlu0 %v10901_v34, %s7730_s23 }
 0x8c7   : > { %v6192_v63 = vpop.permute.xlu1 %6191 }
 0x8c8   : > { %v6194_v39 = vpop.permute.xlu0 %6193  ;;  %6285 = vst.msk [vmem:[#allocation3 + $0x10] sm:$0xff] %vm1557_vm8, %v6192_v63 }
 0x8c9   : > { %6286 = vst.msk [vmem:[#allocation3 + $0x18] sm:$0xff] %vm1557_vm8, %v6194_v39  ;;  %6211 = vrot.lane.b32.xlu1 %v5561_v0, %s7731_s24  ;;  %v5761_v39 = vld [vmem:[#allocation2 + $0x122] sm:$0xff] }
 0x8ca   : > { %6213 = vrot.lane.b32.xlu0 %v5562_v21, %s7731_s24 }
 0x8cb   : > { %v6380_v4 = vpop.permute.xlu1 %6379 }
 0x8cc   : > { %v6382_v2 = vpop.permute.xlu0 %6381  ;;  %6475 = vst.msk [vmem:[#allocation3] sm:$0xff] %vm1750_vm9, %v6380_v4  ;;  %v5762_v4 = vld [vmem:[#allocation2 + $0x12a] sm:$0xff] }
 0x8cd   : > { %6476 = vst.msk [vmem:[#allocation3 + $0x8] sm:$0xff] %vm1750_vm9, %v6382_v2  ;;  %6215 = vrot.lane.b32.xlu1 %v6137_v52, %s7731_s24 }
 0x8ce   : > { %6217 = vrot.lane.b32.xlu0 %v6138_v60, %s7731_s24 }
 0x8cf   : > { %v6384_v34 = vpop.permute.xlu1 %6383 }
 0x8d0   : > { %v6386_v25 = vpop.permute.xlu0 %6385  ;;  %6477 = vst.msk [vmem:[#allocation3 + $0x10] sm:$0xff] %vm1750_vm9, %v6384_v34  ;;  %v5952_v34 = vld [vmem:[#allocation2 + $0x128] sm:$0xff] }
 0x8d1   : > { %6478 = vst.msk [vmem:[#allocation3 + $0x18] sm:$0xff] %vm1750_vm9, %v6386_v25  ;;  %6403 = vrot.lane.b32.xlu1 %v6327_v62, %s7732_s8 }
 0x8d2   : > { %6405 = vrot.lane.b32.xlu0 %v6328_v37, %s7732_s8  ;;  %v5953_v37 = vld [vmem:[#allocation2 + $0x138] sm:$0xff] }
 0x8d3   : > { %v5620_v30 = vpop.permute.xlu1 %5619  ;;  %v6507_v32 = vld [vmem:[#allocation3] sm:$0xff] }
 0x8d4   : > { %v5622_v26 = vpop.permute.xlu0 %5621  ;;  %v6508_v38 = vld [vmem:[#allocation3 + $0x8] sm:$0xff]  ;;  %5711 = vst.msk [vmem:[#allocation3 + $0x20] sm:$0xff] %vm977_vm4, %v5620_v30 }
 0x8d5   : > { %5712 = vst.msk [vmem:[#allocation3 + $0x28] sm:$0xff] %vm977_vm4, %v5622_v26  ;;  %v6539_v1 = vpack.c.bf16 %v6508_v38, %v6507_v32  ;;  %6407 = vrot.lane.b32.xlu1 %v6329_v16, %s7732_s8 }
 0x8d6   : > { %6409 = vrot.lane.b32.xlu0 %v6330_v22, %s7732_s8 }
 0x8d7   : > { %7634 = vmatprep.mubr.msk.bf16.mxu0 %vm1874_vm10, %v6539_v1  ;;  %v5624_v46 = vpop.permute.xlu1 %5623  ;;  %v6509_v15 = vld [vmem:[#allocation3 + $0x10] sm:$0xff] }
 0x8d8   : > { %v5626_v53 = vpop.permute.xlu0 %5625  ;;  %v6510_v50 = vld [vmem:[#allocation3 + $0x18] sm:$0xff]  ;;  %5713 = vst.msk [vmem:[#allocation3 + $0x30] sm:$0xff] %vm977_vm4, %v5624_v46 }
 0x8d9   : > { %5714 = vst.msk [vmem:[#allocation3 + $0x38] sm:$0xff] %vm977_vm4, %v5626_v53  ;;  %v6540_v23 = vpack.c.bf16 %v6510_v50, %v6509_v15  ;;  %5643 = vrot.lane.b32.xlu1 %v6137_v52, %s7728_s21 }
 0x8da   : > { %5645 = vrot.lane.b32.xlu0 %v6138_v60, %s7728_s21  ;;  %v5951_v60 = vld [vmem:[#allocation2 + $0x120] sm:$0xff] }
 0x8db   : > { %7635 = vmatmul.mubr.msk.bf16.vlgmr.msra.gmra.mxu0 %vm1874_vm10, %v6540_v23  ;;  %v5812_v17 = vpop.permute.xlu1 %5811  ;;  %v6337_v23 = vld [vmem:[#allocation2 + $0x13a] sm:$0xff] }
 0x8dc   : > { %v5814_v59 = vpop.permute.xlu0 %5813  ;;  %5903 = vst.msk [vmem:[#allocation3 + $0x20] sm:$0xff] %vm1170_vm5, %v5812_v17  ;;  %v6338_v17 = vld [vmem:[#allocation2 + $0x142] sm:$0xff] }
 0x8dd   : > { %5904 = vst.msk [vmem:[#allocation3 + $0x28] sm:$0xff] %vm1170_vm5, %v5814_v59  ;;  %5647 = vrot.lane.b32.xlu1 %v5565_v40, %s7728_s21 }
 0x8de   : > { %5649 = vrot.lane.b32.xlu0 %v5566_v9, %s7728_s21 }
 0x8df   : > { %v5816_v5 = vpop.permute.xlu1 %5815 }
 0x8e0   : > { %v5818_v55 = vpop.permute.xlu0 %5817  ;;  %5905 = vst.msk [vmem:[#allocation3 + $0x30] sm:$0xff] %vm1170_vm5, %v5816_v5 }
 0x8e1   : > { %5906 = vst.msk [vmem:[#allocation3 + $0x38] sm:$0xff] %vm1170_vm5, %v5818_v55  ;;  %5835 = vrot.lane.b32.xlu1 %v6329_v16, %s7729_s22  ;;  %v6145_v16 = vld [vmem:[#allocation2 + $0x139] sm:$0xff] }
 0x8e2   : > { %5837 = vrot.lane.b32.xlu0 %v6330_v22, %s7729_s22  ;;  %v6146_v22 = vld [vmem:[#allocation2 + $0x141] sm:$0xff] }
 0x8e3   : > { %v6004_v27 = vpop.permute.xlu1 %6003 }
 0x8e4   : > { %v6006_v12 = vpop.permute.xlu0 %6005  ;;  %6095 = vst.msk [vmem:[#allocation3 + $0x20] sm:$0xff] %vm1364_vm7, %v6004_v27  ;;  %v5380_v27 = vld [vmem:[#allocation2 + $0x140] sm:$0xff] }
 0x8e5   : > { %6096 = vst.msk [vmem:[#allocation3 + $0x28] sm:$0xff] %vm1364_vm7, %v6006_v12  ;;  %5839 = vrot.lane.b32.xlu1 %v5757_v58, %s7729_s22  ;;  %v5381_v12 = vld [vmem:[#allocation2 + $0x150] sm:$0xff] }
 0x8e6   : > { %5841 = vrot.lane.b32.xlu0 %v5758_v6, %s7729_s22 }
 0x8e7   : > { %v6008_v36 = vpop.permute.xlu1 %6007 }
 0x8e8   : > { %v6010_v61 = vpop.permute.xlu0 %6009  ;;  %6097 = vst.msk [vmem:[#allocation3 + $0x30] sm:$0xff] %vm1364_vm7, %v6008_v36 }
 0x8e9   : > { %6098 = vst.msk [vmem:[#allocation3 + $0x38] sm:$0xff] %vm1364_vm7, %v6010_v61  ;;  %6027 = vrot.lane.b32.xlu1 %v10903_v44, %s7730_s23  ;;  %v5382_v61 = vld [vmem:[#allocation2 + $0x158] sm:$0xff] }
 0x8ea   : > { %6029 = vrot.lane.b32.xlu0 %v10913_v31, %s7730_s23 }
 0x8eb   : > { %v6196_v8 = vpop.permute.xlu1 %6195 }
 0x8ec   : > { %v6198_v43 = vpop.permute.xlu0 %6197  ;;  %6287 = vst.msk [vmem:[#allocation3 + $0x20] sm:$0xff] %vm1557_vm8, %v6196_v8 }
 0x8ed   : > { %6288 = vst.msk [vmem:[#allocation3 + $0x28] sm:$0xff] %vm1557_vm8, %v6198_v43  ;;  %6031 = vrot.lane.b32.xlu1 %v10915_v57, %s7730_s23  ;;  %v6141_v57 = vld [vmem:[#allocation2 + $0x109] sm:$0xff] }
 0x8ee   : > { %6033 = vrot.lane.b32.xlu0 %v10925_v10, %s7730_s23 }
 0x8ef   : > { %v6200_v13 = vpop.permute.xlu1 %6199 }
 0x8f0   : > { %v6202_v49 = vpop.permute.xlu0 %6201  ;;  %6289 = vst.msk [vmem:[#allocation3 + $0x30] sm:$0xff] %vm1557_vm8, %v6200_v13  ;;  %v5573_v13 = vld [vmem:[#allocation2 + $0x151] sm:$0xff] }
 0x8f1   : > { %6290 = vst.msk [vmem:[#allocation3 + $0x38] sm:$0xff] %vm1557_vm8, %v6202_v49  ;;  %6219 = vrot.lane.b32.xlu1 %v5565_v40, %s7731_s24 }
 0x8f2   : > { %6221 = vrot.lane.b32.xlu0 %v5566_v9, %s7731_s24 }
 0x8f3   : > { %v6388_v44 = vpop.permute.xlu1 %6387 }
 0x8f4   : > { %v6390_v31 = vpop.permute.xlu0 %6389  ;;  %6479 = vst.msk [vmem:[#allocation3 + $0x20] sm:$0xff] %vm1750_vm9, %v6388_v44 }
 0x8f5   : > { %6480 = vst.msk [vmem:[#allocation3 + $0x28] sm:$0xff] %vm1750_vm9, %v6390_v31  ;;  %6223 = vrot.lane.b32.xlu1 %v6141_v57, %s7731_s24  ;;  %v5574_v31 = vld [vmem:[#allocation2 + $0x159] sm:$0xff] }
 0x8f6   : > { %6225 = vrot.lane.b32.xlu0 %v6142_v35, %s7731_s24 }
 0x8f7   : > { %v6392_v10 = vpop.permute.xlu1 %6391 }
 0x8f8   : > { %v6394_v45 = vpop.permute.xlu0 %6393  ;;  %6481 = vst.msk [vmem:[#allocation3 + $0x30] sm:$0xff] %vm1750_vm9, %v6392_v10  ;;  %v5765_v10 = vld [vmem:[#allocation2 + $0x152] sm:$0xff] }
 0x8f9   : > { %6482 = vst.msk [vmem:[#allocation3 + $0x38] sm:$0xff] %vm1750_vm9, %v6394_v45  ;;  %6411 = vrot.lane.b32.xlu1 %v5757_v58, %s7732_s8 }
 0x8fa   : > { %6413 = vrot.lane.b32.xlu0 %v5758_v6, %s7732_s8 }
 0x8fb   : > { %v5628_v48 = vpop.permute.xlu1 %5627  ;;  %v6511_v28 = vld [vmem:[#allocation3 + $0x20] sm:$0xff] }
 0x8fc   : > { %v5630_v24 = vpop.permute.xlu0 %5629  ;;  %v6512_v42 = vld [vmem:[#allocation3 + $0x28] sm:$0xff]  ;;  %5715 = vst.msk [vmem:[#allocation3 + $0x40] sm:$0xff] %vm977_vm4, %v5628_v48 }
 0x8fd   : > { %5716 = vst.msk [vmem:[#allocation3 + $0x48] sm:$0xff] %vm977_vm4, %v5630_v24  ;;  %v6541_v18 = vpack.c.bf16 %v6512_v42, %v6511_v28  ;;  %6415 = vrot.lane.b32.xlu1 %v6333_v33, %s7732_s8  ;;  %v5766_v24 = vld [vmem:[#allocation2 + $0x15a] sm:$0xff] }
 0x8fe   : > { %6417 = vrot.lane.b32.xlu0 %v6334_v7, %s7732_s8 }
 0x8ff   : > { %7638 = vmatprep.mubr.msk.bf16.mxu0 %vm1874_vm10, %v6541_v18  ;;  %v5632_v20 = vpop.permute.xlu1 %5631  ;;  %v6513_v0 = vld [vmem:[#allocation3 + $0x30] sm:$0xff] }
 0x900   : > { %v5634_v19 = vpop.permute.xlu0 %5633  ;;  %v6514_v21 = vld [vmem:[#allocation3 + $0x38] sm:$0xff]  ;;  %5717 = vst.msk [vmem:[#allocation3 + $0x50] sm:$0xff] %vm977_vm4, %v5632_v20  ;;  %v5958_v20 = vld [vmem:[#allocation2 + $0x170] sm:$0xff] }
 0x901   : > { %5718 = vst.msk [vmem:[#allocation3 + $0x58] sm:$0xff] %vm977_vm4, %v5634_v19  ;;  %v6542_v47 = vpack.c.bf16 %v6514_v21, %v6513_v0  ;;  %5651 = vrot.lane.b32.xlu1 %v6141_v57, %s7728_s21  ;;  %v6149_v21 = vld [vmem:[#allocation2 + $0x169] sm:$0xff] }
 0x902   : > { %5653 = vrot.lane.b32.xlu0 %v6142_v35, %s7728_s21 }
 0x903   : > { %7639 = vmatmul.mubr.msk.bf16.gmra.mxu0 %vm1874_vm10, %v6542_v47  ;;  %v5820_v3 = vpop.permute.xlu1 %5819 }
 0x904   : > { %v5822_v56 = vpop.permute.xlu0 %5821  ;;  %5907 = vst.msk [vmem:[#allocation3 + $0x40] sm:$0xff] %vm1170_vm5, %v5820_v3 }
 0x905   : > { %5908 = vst.msk [vmem:[#allocation3 + $0x48] sm:$0xff] %vm1170_vm5, %v5822_v56  ;;  %5655 = vrot.lane.b32.xlu1 %v5569_v11, %s7728_s21 }
 0x906   : > { %5657 = vrot.lane.b32.xlu0 %v5570_v29, %s7728_s21 }
 0x907   : > { %v5824_v54 = vpop.permute.xlu1 %5823 }
 0x908   : > { %v5826_v51 = vpop.permute.xlu0 %5825  ;;  %5909 = vst.msk [vmem:[#allocation3 + $0x50] sm:$0xff] %vm1170_vm5, %v5824_v54 }
 0x909   : > { %5910 = vst.msk [vmem:[#allocation3 + $0x58] sm:$0xff] %vm1170_vm5, %v5826_v51  ;;  %5843 = vrot.lane.b32.xlu1 %v6333_v33, %s7729_s22  ;;  %v5957_v33 = vld [vmem:[#allocation2 + $0x168] sm:$0xff] }
 0x90a   : > { %5845 = vrot.lane.b32.xlu0 %v6334_v7, %s7729_s22 }
 0x90b   : > { %v6012_v14 = vpop.permute.xlu1 %6011 }
 0x90c   : > { %v6014_v63 = vpop.permute.xlu0 %6013  ;;  %6099 = vst.msk [vmem:[#allocation3 + $0x40] sm:$0xff] %vm1364_vm7, %v6012_v14 }
 0x90d   : > { %6100 = vst.msk [vmem:[#allocation3 + $0x48] sm:$0xff] %vm1364_vm7, %v6014_v63  ;;  %5847 = vrot.lane.b32.xlu1 %v5761_v39, %s7729_s22 }
 0x90e   : > { %5849 = vrot.lane.b32.xlu0 %v5762_v4, %s7729_s22 }
 0x90f   : > { %v6016_v2 = vpop.permute.xlu1 %6015 }
 0x910   : > { %v6018_v52 = vpop.permute.xlu0 %6017  ;;  %6101 = vst.msk [vmem:[#allocation3 + $0x50] sm:$0xff] %vm1364_vm7, %v6016_v2 }
 0x911   : > { %6102 = vst.msk [vmem:[#allocation3 + $0x58] sm:$0xff] %vm1364_vm7, %v6018_v52  ;;  %6035 = vrot.lane.b32.xlu1 %v5951_v60, %s7730_s23 }
 0x912   : > { %6037 = vrot.lane.b32.xlu0 %v5952_v34, %s7730_s23  ;;  %v6342_v34 = vld [vmem:[#allocation2 + $0x172] sm:$0xff] }
 0x913   : > { %v6204_v25 = vpop.permute.xlu1 %6203 }
 0x914   : > { %v6206_v62 = vpop.permute.xlu0 %6205  ;;  %6291 = vst.msk [vmem:[#allocation3 + $0x40] sm:$0xff] %vm1557_vm8, %v6204_v25 }
 0x915   : > { %6292 = vst.msk [vmem:[#allocation3 + $0x48] sm:$0xff] %vm1557_vm8, %v6206_v62  ;;  %6039 = vrot.lane.b32.xlu1 %v5953_v37, %s7730_s23  ;;  %v5385_v37 = vld [vmem:[#allocation2 + $0x180] sm:$0xff] }
 0x916   : > { %6041 = vrot.lane.b32.xlu0 %v10949_v41, %s7730_s23 }
 0x917   : > { %v6208_v30 = vpop.permute.xlu1 %6207 }
 0x918   : > { %v6210_v26 = vpop.permute.xlu0 %6209  ;;  %6293 = vst.msk [vmem:[#allocation3 + $0x50] sm:$0xff] %vm1557_vm8, %v6208_v30 }
 0x919   : > { %6294 = vst.msk [vmem:[#allocation3 + $0x58] sm:$0xff] %vm1557_vm8, %v6210_v26  ;;  %6227 = vrot.lane.b32.xlu1 %v5569_v11, %s7731_s24 }
 0x91a   : > { %6229 = vrot.lane.b32.xlu0 %v5570_v29, %s7731_s24  ;;  %v6150_v29 = vld [vmem:[#allocation2 + $0x171] sm:$0xff] }
 0x91b   : > { %v6396_v32 = vpop.permute.xlu1 %6395 }
 0x91c   : > { %v6398_v38 = vpop.permute.xlu0 %6397  ;;  %6483 = vst.msk [vmem:[#allocation3 + $0x40] sm:$0xff] %vm1750_vm9, %v6396_v32  ;;  %v5386_v32 = vld [vmem:[#allocation2 + $0x188] sm:$0xff] }
 0x91d   : > { %6484 = vst.msk [vmem:[#allocation3 + $0x48] sm:$0xff] %vm1750_vm9, %v6398_v38  ;;  %6231 = vrot.lane.b32.xlu1 %v6145_v16, %s7731_s24 }
 0x91e   : > { %6233 = vrot.lane.b32.xlu0 %v6146_v22, %s7731_s24 }
 0x91f   : > { %v6400_v41 = vpop.permute.xlu1 %6399 }
 0x920   : > { %v6402_v1 = vpop.permute.xlu0 %6401  ;;  %6485 = vst.msk [vmem:[#allocation3 + $0x50] sm:$0xff] %vm1750_vm9, %v6400_v41 }
 0x921   : > { %6486 = vst.msk [vmem:[#allocation3 + $0x58] sm:$0xff] %vm1750_vm9, %v6402_v1  ;;  %6419 = vrot.lane.b32.xlu1 %v5761_v39, %s7732_s8 }
 0x922   : > { %6421 = vrot.lane.b32.xlu0 %v5762_v4, %s7732_s8  ;;  %v6341_v4 = vld [vmem:[#allocation2 + $0x16a] sm:$0xff] }
 0x923   : > { %v5636_v46 = vpop.permute.xlu1 %5635  ;;  %v6515_v15 = vld [vmem:[#allocation3 + $0x40] sm:$0xff] }
 0x924   : > { %v5638_v53 = vpop.permute.xlu0 %5637  ;;  %v6516_v50 = vld [vmem:[#allocation3 + $0x48] sm:$0xff]  ;;  %5719 = vst.msk [vmem:[#allocation3 + $0x60] sm:$0xff] %vm977_vm4, %v5636_v46  ;;  %v5578_v46 = vld [vmem:[#allocation2 + $0x189] sm:$0xff] }
 0x925   : > { %5720 = vst.msk [vmem:[#allocation3 + $0x68] sm:$0xff] %vm977_vm4, %v5638_v53  ;;  %v6543_v59 = vpack.c.bf16 %v6516_v50, %v6515_v15  ;;  %6423 = vrot.lane.b32.xlu1 %v6337_v23, %s7732_s8  ;;  %v5769_v50 = vld [vmem:[#allocation2 + $0x182] sm:$0xff] }
 0x926   : > { %6425 = vrot.lane.b32.xlu0 %v6338_v17, %s7732_s8 }
 0x927   : > { %7642 = vmatprep.mubr.msk.bf16.mxu0 %vm1874_vm10, %v6543_v59  ;;  %v5640_v40 = vpop.permute.xlu1 %5639  ;;  %v6517_v5 = vld [vmem:[#allocation3 + $0x50] sm:$0xff]  ;;  %v5770_v59 = vld [vmem:[#allocation2 + $0x18a] sm:$0xff] }
 0x928   : > { %v5642_v9 = vpop.permute.xlu0 %5641  ;;  %v6518_v55 = vld [vmem:[#allocation3 + $0x58] sm:$0xff]  ;;  %5721 = vst.msk [vmem:[#allocation3 + $0x70] sm:$0xff] %vm977_vm4, %v5640_v40  ;;  %v5961_v40 = vld [vmem:[#allocation2 + $0x198] sm:$0xff] }
 0x929   : > { %5722 = vst.msk [vmem:[#allocation3 + $0x78] sm:$0xff] %vm977_vm4, %v5642_v9  ;;  %v6544_v58 = vpack.c.bf16 %v6518_v55, %v6517_v5  ;;  %5469 = vrot.lane.b32.xlu1 %v5380_v27, %s7727_s20  ;;  %v5962_v55 = vld [vmem:[#allocation2 + $0x1a0] sm:$0xff] }
 0x92a   : > { %5471 = vrot.lane.b32.xlu0 %v5381_v12, %s7727_s20 }
 0x92b   : > { %7643 = vmatmul.mubr.msk.bf16.gmra.mxu0 %vm1874_vm10, %v6544_v58  ;;  %v5828_v6 = vpop.permute.xlu1 %5827 }
 0x92c   : > { %v5830_v36 = vpop.permute.xlu0 %5829  ;;  %5911 = vst.msk [vmem:[#allocation3 + $0x60] sm:$0xff] %vm1170_vm5, %v5828_v6 }
 0x92d   : > { %5912 = vst.msk [vmem:[#allocation3 + $0x68] sm:$0xff] %vm1170_vm5, %v5830_v36  ;;  %5473 = vrot.lane.b32.xlu1 %v5382_v61, %s7727_s20 }
 0x92e   : > { %5659 = vrot.lane.b32.xlu0 %v6145_v16, %s7728_s21 }
 0x92f   : > { %v5832_v8 = vpop.permute.xlu1 %5831 }
 0x930   : > { %v5834_v43 = vpop.permute.xlu0 %5833  ;;  %5913 = vst.msk [vmem:[#allocation3 + $0x70] sm:$0xff] %vm1170_vm5, %v5832_v8 }
 0x931   : > { %5914 = vst.msk [vmem:[#allocation3 + $0x78] sm:$0xff] %vm1170_vm5, %v5834_v43  ;;  %5661 = vrot.lane.b32.xlu1 %v6146_v22, %s7728_s21  ;;  %v5577_v22 = vld [vmem:[#allocation2 + $0x181] sm:$0xff] }
 0x932   : > { %5663 = vrot.lane.b32.xlu0 %v5573_v13, %s7728_s21 }
 0x933   : > { %v6020_v49 = vpop.permute.xlu1 %6019 }
 0x934   : > { %v6022_v44 = vpop.permute.xlu0 %6021  ;;  %6103 = vst.msk [vmem:[#allocation3 + $0x60] sm:$0xff] %vm1364_vm7, %v6020_v49 }
 0x935   : > { %6104 = vst.msk [vmem:[#allocation3 + $0x68] sm:$0xff] %vm1364_vm7, %v6022_v44  ;;  %5665 = vrot.lane.b32.xlu1 %v5574_v31, %s7728_s21 }
 0x936   : > { %5851 = vrot.lane.b32.xlu0 %v6337_v23, %s7729_s22 }
 0x937   : > { %v6024_v57 = vpop.permute.xlu1 %6023 }
 0x938   : > { %v6026_v35 = vpop.permute.xlu0 %6025  ;;  %6105 = vst.msk [vmem:[#allocation3 + $0x70] sm:$0xff] %vm1364_vm7, %v6024_v57 }
 0x939   : > { %6106 = vst.msk [vmem:[#allocation3 + $0x78] sm:$0xff] %vm1364_vm7, %v6026_v35  ;;  %5853 = vrot.lane.b32.xlu1 %v6338_v17, %s7729_s22 }
 0x93a   : > { %5855 = vrot.lane.b32.xlu0 %v5765_v10, %s7729_s22 }
 0x93b   : > { %v6212_v45 = vpop.permute.xlu1 %6211 }
 0x93c   : > { %v6214_v48 = vpop.permute.xlu0 %6213  ;;  %6295 = vst.msk [vmem:[#allocation3 + $0x60] sm:$0xff] %vm1557_vm8, %v6212_v45 }
 0x93d   : > { %6296 = vst.msk [vmem:[#allocation3 + $0x68] sm:$0xff] %vm1557_vm8, %v6214_v48  ;;  %5857 = vrot.lane.b32.xlu1 %v5766_v24, %s7729_s22 }
 0x93e   : > { %6043 = vrot.lane.b32.xlu0 %v5381_v12, %s7730_s23 }
 0x93f   : > { %v6216_v28 = vpop.permute.xlu1 %6215 }
 0x940   : > { %v6218_v42 = vpop.permute.xlu0 %6217  ;;  %6297 = vst.msk [vmem:[#allocation3 + $0x70] sm:$0xff] %vm1557_vm8, %v6216_v28 }
 0x941   : > { %6298 = vst.msk [vmem:[#allocation3 + $0x78] sm:$0xff] %vm1557_vm8, %v6218_v42  ;;  %6045 = vrot.lane.b32.xlu1 %v5382_v61, %s7730_s23  ;;  %v6153_v61 = vld [vmem:[#allocation2 + $0x199] sm:$0xff] }
 0x942   : > { %6047 = vrot.lane.b32.xlu0 %v5957_v33, %s7730_s23 }
 0x943   : > { %v6404_v7 = vpop.permute.xlu1 %6403 }
 0x944   : > { %v6406_v18 = vpop.permute.xlu0 %6405  ;;  %6487 = vst.msk [vmem:[#allocation3 + $0x60] sm:$0xff] %vm1750_vm9, %v6404_v7 }
 0x945   : > { %6488 = vst.msk [vmem:[#allocation3 + $0x68] sm:$0xff] %vm1750_vm9, %v6406_v18  ;;  %6049 = vrot.lane.b32.xlu1 %v5958_v20, %s7730_s23 }
 0x946   : > { %6235 = vrot.lane.b32.xlu0 %v5573_v13, %s7731_s24 }
 0x947   : > { %v6408_v19 = vpop.permute.xlu1 %6407 }
 0x948   : > { %v6410_v0 = vpop.permute.xlu0 %6409  ;;  %6489 = vst.msk [vmem:[#allocation3 + $0x70] sm:$0xff] %vm1750_vm9, %v6408_v19 }
 0x949   : > { %6490 = vst.msk [vmem:[#allocation3 + $0x78] sm:$0xff] %vm1750_vm9, %v6410_v0  ;;  %6237 = vrot.lane.b32.xlu1 %v5574_v31, %s7731_s24  ;;  %v6154_v31 = vld [vmem:[#allocation2 + $0x1a1] sm:$0xff] }
 0x94a   : > { %6239 = vrot.lane.b32.xlu0 %v6149_v21, %s7731_s24 }
 0x94b   : > { %v5644_v47 = vpop.permute.xlu1 %5643  ;;  %v6519_v56 = vld [vmem:[#allocation3 + $0x60] sm:$0xff] }
 0x94c   : > { %v5646_v3 = vpop.permute.xlu0 %5645  ;;  %v6520_v11 = vld [vmem:[#allocation3 + $0x68] sm:$0xff]  ;;  %5723 = vst.msk [vmem:[#allocation3 + $0x80] sm:$0xff] %vm977_vm4, %v5644_v47 }
 0x94d   : > { %5724 = vst.msk [vmem:[#allocation3 + $0x88] sm:$0xff] %vm977_vm4, %v5646_v3  ;;  %v6545_v54 = vpack.c.bf16 %v6520_v11, %v6519_v56  ;;  %6241 = vrot.lane.b32.xlu1 %v6150_v29, %s7731_s24  ;;  %v11566_v11 = vld [vmem:[%s11754_s2 + $0x2] ss:$0 sm:$0xff] }
 0x94e   : > { %6427 = vrot.lane.b32.xlu0 %v5765_v10, %s7732_s8  ;;  %v6345_v10 = vld [vmem:[#allocation2 + $0x19a] sm:$0xff] }
 0x94f   : > { %7646 = vmatprep.mubr.msk.bf16.mxu0 %vm1874_vm10, %v6545_v54  ;;  %v5648_v51 = vpop.permute.xlu1 %5647  ;;  %v6521_v63 = vld [vmem:[#allocation3 + $0x70] sm:$0xff] }
 0x950   : > { %v5650_v14 = vpop.permute.xlu0 %5649  ;;  %v6522_v39 = vld [vmem:[#allocation3 + $0x78] sm:$0xff]  ;;  %5725 = vst.msk [vmem:[#allocation3 + $0x90] sm:$0xff] %vm977_vm4, %v5648_v51 }
 0x951   : > { %5726 = vst.msk [vmem:[#allocation3 + $0x98] sm:$0xff] %vm977_vm4, %v5650_v14  ;;  %v6546_v2 = vpack.c.bf16 %v6522_v39, %v6521_v63  ;;  %6429 = vrot.lane.b32.xlu1 %v5766_v24, %s7732_s8  ;;  %v6346_v24 = vld [vmem:[#allocation2 + $0x1a2] sm:$0xff] }
 0x952   : > { %6431 = vrot.lane.b32.xlu0 %v6341_v4, %s7732_s8 }
 0x953   : > { %7647 = vmatmul.mubr.msk.bf16.gmra.mxu0 %vm1874_vm10, %v6546_v2  ;;  %v5836_v52 = vpop.permute.xlu1 %5835 }
 0x954   : > { %v5838_v60 = vpop.permute.xlu0 %5837  ;;  %5915 = vst.msk [vmem:[#allocation3 + $0x80] sm:$0xff] %vm1170_vm5, %v5836_v52 }
 0x955   : > { %5916 = vst.msk [vmem:[#allocation3 + $0x88] sm:$0xff] %vm1170_vm5, %v5838_v60  ;;  %6433 = vrot.lane.b32.xlu1 %v6342_v34, %s7732_s8 }
 0x956   : > { %5475 = vrot.lane.b32.xlu0 %v5957_v33, %s7727_s20 }
 0x957   : > { %v5840_v25 = vpop.permute.xlu1 %5839 }
 0x958   : > { %v5842_v62 = vpop.permute.xlu0 %5841  ;;  %5917 = vst.msk [vmem:[#allocation3 + $0x90] sm:$0xff] %vm1170_vm5, %v5840_v25 }
 0x959   : > { %5918 = vst.msk [vmem:[#allocation3 + $0x98] sm:$0xff] %vm1170_vm5, %v5842_v62  ;;  %5477 = vrot.lane.b32.xlu1 %v5958_v20, %s7727_s20 }
 0x95a   : > { %5479 = vrot.lane.b32.xlu0 %v5385_v37, %s7727_s20 }
 0x95b   : > { %v6028_v30 = vpop.permute.xlu1 %6027 }
 0x95c   : > { %v6030_v26 = vpop.permute.xlu0 %6029  ;;  %6107 = vst.msk [vmem:[#allocation3 + $0x80] sm:$0xff] %vm1364_vm7, %v6028_v30 }
 0x95d   : > { %6108 = vst.msk [vmem:[#allocation3 + $0x88] sm:$0xff] %vm1364_vm7, %v6030_v26  ;;  %5481 = vrot.lane.b32.xlu1 %v5386_v32, %s7727_s20 }
 0x95e   : > { %5667 = vrot.lane.b32.xlu0 %v6149_v21, %s7728_s21 }
 0x95f   : > { %v6032_v38 = vpop.permute.xlu1 %6031 }
 0x960   : > { %v6034_v16 = vpop.permute.xlu0 %6033  ;;  %6109 = vst.msk [vmem:[#allocation3 + $0x90] sm:$0xff] %vm1364_vm7, %v6032_v38 }
 0x961   : > { %6110 = vst.msk [vmem:[#allocation3 + $0x98] sm:$0xff] %vm1364_vm7, %v6034_v16  ;;  %5669 = vrot.lane.b32.xlu1 %v6150_v29, %s7728_s21 }
 0x962   : > { %5671 = vrot.lane.b32.xlu0 %v5577_v22, %s7728_s21 }
 0x963   : > { %v6220_v41 = vpop.permute.xlu1 %6219 }
 0x964   : > { %v6222_v1 = vpop.permute.xlu0 %6221  ;;  %6299 = vst.msk [vmem:[#allocation3 + $0x80] sm:$0xff] %vm1557_vm8, %v6220_v41 }
 0x965   : > { %6300 = vst.msk [vmem:[#allocation3 + $0x88] sm:$0xff] %vm1557_vm8, %v6222_v1  ;;  %5673 = vrot.lane.b32.xlu1 %v5578_v46, %s7728_s21 }
 0x966   : > { %5859 = vrot.lane.b32.xlu0 %v6341_v4, %s7729_s22 }
 0x967   : > { %v6224_v53 = vpop.permute.xlu1 %6223 }
 0x968   : > { %v6226_v15 = vpop.permute.xlu0 %6225  ;;  %6301 = vst.msk [vmem:[#allocation3 + $0x90] sm:$0xff] %vm1557_vm8, %v6224_v53 }
 0x969   : > { %6302 = vst.msk [vmem:[#allocation3 + $0x98] sm:$0xff] %vm1557_vm8, %v6226_v15  ;;  %5861 = vrot.lane.b32.xlu1 %v6342_v34, %s7729_s22 }
 0x96a   : > { %5863 = vrot.lane.b32.xlu0 %v5769_v50, %s7729_s22 }
 0x96b   : > { %v6412_v23 = vpop.permute.xlu1 %6411 }
 0x96c   : > { %v6414_v17 = vpop.permute.xlu0 %6413  ;;  %6491 = vst.msk [vmem:[#allocation3 + $0x80] sm:$0xff] %vm1750_vm9, %v6412_v23 }
 0x96d   : > { %6492 = vst.msk [vmem:[#allocation3 + $0x88] sm:$0xff] %vm1750_vm9, %v6414_v17  ;;  %5865 = vrot.lane.b32.xlu1 %v5770_v59, %s7729_s22  ;;  %s7737_s22 = smov 6  }
 0x96e   : > { %6051 = vrot.lane.b32.xlu0 %v5385_v37, %s7730_s23 }
 0x96f   : > { %v6416_v9 = vpop.permute.xlu1 %6415 }
 0x970   : > { %v6418_v5 = vpop.permute.xlu0 %6417  ;;  %6493 = vst.msk [vmem:[#allocation3 + $0x90] sm:$0xff] %vm1750_vm9, %v6416_v9 }
 0x971   : > { %6494 = vst.msk [vmem:[#allocation3 + $0x98] sm:$0xff] %vm1750_vm9, %v6418_v5  ;;  %6053 = vrot.lane.b32.xlu1 %v5386_v32, %s7730_s23 }
 0x972   : > { %6055 = vrot.lane.b32.xlu0 %v5961_v40, %s7730_s23 }
 0x973   : > { %v5652_v27 = vpop.permute.xlu1 %5651  ;;  %v6523_v58 = vld [vmem:[#allocation3 + $0x80] sm:$0xff] }
 0x974   : > { %v5654_v12 = vpop.permute.xlu0 %5653  ;;  %v6524_v6 = vld [vmem:[#allocation3 + $0x88] sm:$0xff]  ;;  %5727 = vst.msk [vmem:[#allocation3 + $0xa0] sm:$0xff] %vm977_vm4, %v5652_v27 }
 0x975   : > { %5728 = vst.msk [vmem:[#allocation3 + $0xa8] sm:$0xff] %vm977_vm4, %v5654_v12  ;;  %v6547_v36 = vpack.c.bf16 %v6524_v6, %v6523_v58  ;;  %6057 = vrot.lane.b32.xlu1 %v5962_v55, %s7730_s23 }
 0x976   : > { %6243 = vrot.lane.b32.xlu0 %v5577_v22, %s7731_s24 }
 0x977   : > { %7650 = vmatprep.mubr.msk.bf16.mxu0 %vm1874_vm10, %v6547_v36  ;;  %v5656_v8 = vpop.permute.xlu1 %5655  ;;  %v6525_v13 = vld [vmem:[#allocation3 + $0x90] sm:$0xff] }
 0x978   : > { %v5658_v43 = vpop.permute.xlu0 %5657  ;;  %v6526_v49 = vld [vmem:[#allocation3 + $0x98] sm:$0xff]  ;;  %5729 = vst.msk [vmem:[#allocation3 + $0xb0] sm:$0xff] %vm977_vm4, %v5656_v8 }
 0x979   : > { %5730 = vst.msk [vmem:[#allocation3 + $0xb8] sm:$0xff] %vm977_vm4, %v5658_v43  ;;  %v6548_v44 = vpack.c.bf16 %v6526_v49, %v6525_v13  ;;  %6245 = vrot.lane.b32.xlu1 %v5578_v46, %s7731_s24 }
 0x97a   : > { %6247 = vrot.lane.b32.xlu0 %v6153_v61, %s7731_s24 }
 0x97b   : > { %7651 = vmatmul.mubr.msk.bf16.gmra.mxu0 %vm1874_vm10, %v6548_v44  ;;  %v5844_v57 = vpop.permute.xlu1 %5843 }
 0x97c   : > { %v5846_v35 = vpop.permute.xlu0 %5845  ;;  %5919 = vst.msk [vmem:[#allocation3 + $0xa0] sm:$0xff] %vm1170_vm5, %v5844_v57 }
 0x97d   : > { %5920 = vst.msk [vmem:[#allocation3 + $0xa8] sm:$0xff] %vm1170_vm5, %v5846_v35  ;;  %6249 = vrot.lane.b32.xlu1 %v6154_v31, %s7731_s24 }
 0x97e   : > { %6435 = vrot.lane.b32.xlu0 %v5769_v50, %s7732_s8 }
 0x97f   : > { %v5848_v45 = vpop.permute.xlu1 %5847 }
 0x980   : > { %v5850_v48 = vpop.permute.xlu0 %5849  ;;  %5921 = vst.msk [vmem:[#allocation3 + $0xb0] sm:$0xff] %vm1170_vm5, %v5848_v45 }
 0x981   : > { %5922 = vst.msk [vmem:[#allocation3 + $0xb8] sm:$0xff] %vm1170_vm5, %v5850_v48  ;;  %6437 = vrot.lane.b32.xlu1 %v5770_v59, %s7732_s8 }
 0x982   : > { %6439 = vrot.lane.b32.xlu0 %v6345_v10, %s7732_s8 }
 0x983   : > { %v6036_v28 = vpop.permute.xlu1 %6035 }
 0x984   : > { %v6038_v42 = vpop.permute.xlu0 %6037  ;;  %6111 = vst.msk [vmem:[#allocation3 + $0xa0] sm:$0xff] %vm1364_vm7, %v6036_v28 }
 0x985   : > { %6112 = vst.msk [vmem:[#allocation3 + $0xa8] sm:$0xff] %vm1364_vm7, %v6038_v42  ;;  %6441 = vrot.lane.b32.xlu1 %v6346_v24, %s7732_s8 }
 0x987   : > { %v6040_v33 = vpop.permute.xlu1 %6039 }
 0x988   : > { %v6042_v7 = vpop.permute.xlu0 %6041  ;;  %6113 = vst.msk [vmem:[#allocation3 + $0xb0] sm:$0xff] %vm1364_vm7, %v6040_v33 }
 0x989   : > { %6114 = vst.msk [vmem:[#allocation3 + $0xb8] sm:$0xff] %vm1364_vm7, %v6042_v7 }
 0x98b   : > { %v6228_v18 = vpop.permute.xlu1 %6227 }
 0x98c   : > { %v6230_v20 = vpop.permute.xlu0 %6229  ;;  %6303 = vst.msk [vmem:[#allocation3 + $0xa0] sm:$0xff] %vm1557_vm8, %v6228_v18 }
 0x98d   : > { %6304 = vst.msk [vmem:[#allocation3 + $0xa8] sm:$0xff] %vm1557_vm8, %v6230_v20 }
 0x98f   : > { %v6232_v19 = vpop.permute.xlu1 %6231 }
 0x990   : > { %v6234_v0 = vpop.permute.xlu0 %6233  ;;  %6305 = vst.msk [vmem:[#allocation3 + $0xb0] sm:$0xff] %vm1557_vm8, %v6232_v19 }
 0x991   : > { %6306 = vst.msk [vmem:[#allocation3 + $0xb8] sm:$0xff] %vm1557_vm8, %v6234_v0 }
 0x993   : > { %v6420_v21 = vpop.permute.xlu1 %6419 }
 0x994   : > { %v6422_v47 = vpop.permute.xlu0 %6421  ;;  %6495 = vst.msk [vmem:[#allocation3 + $0xa0] sm:$0xff] %vm1750_vm9, %v6420_v21 }
 0x995   : > { %6496 = vst.msk [vmem:[#allocation3 + $0xa8] sm:$0xff] %vm1750_vm9, %v6422_v47 }
 0x997   : > { %v6424_v3 = vpop.permute.xlu1 %6423 }
 0x998   : > { %v6426_v56 = vpop.permute.xlu0 %6425  ;;  %6497 = vst.msk [vmem:[#allocation3 + $0xb0] sm:$0xff] %vm1750_vm9, %v6424_v3 }
 0x999   : > { %6498 = vst.msk [vmem:[#allocation3 + $0xb8] sm:$0xff] %vm1750_vm9, %v6426_v56 }
 0x99b   : > { %v7636_v29 = vpop.f32.mrf.mxu0  ;;  %v5470_v51 = vpop.permute.xlu1 %5469  ;;  %v6527_v63 = vld [vmem:[#allocation3 + $0xa0] sm:$0xff] }
 0x99c   : > { %v6694_v54 = vadd.f32 %v7636_v29, %v11566_v11  ;;  %v5472_v14 = vpop.permute.xlu0 %5471  ;;  %v6528_v39 = vld [vmem:[#allocation3 + $0xa8] sm:$0xff]  ;;  %5540 = vst.msk [vmem:[#allocation3 + $0xc8] sm:$0xff] %vm784_vm3, %v5470_v51 }
 0x99d   : > { %5541 = vst.msk [vmem:[#allocation3 + $0xd0] sm:$0xff] %vm784_vm3, %v5472_v14  ;;  %v6685_v4 = vpop.f32.mrf.mxu0  ;;  %v6549_v2 = vpack.c.bf16 %v6528_v39, %v6527_v63 }
 0x99e   : > { %v6814_v52 = vadd.f32 3.0, %v6694_v54  ;;  %v6686_v60 = vadd.f32 %v11566_v11, %v6685_v4 }
 0x99f   : > { %v7637_v34 = vpop.f32.mrf.mxu0  ;;  %7654 = vmatprep.mubr.msk.bf16.mxu0 %vm1874_vm10, %v6549_v2  ;;  %v5474_v30 = vpop.permute.xlu1 %5473  ;;  %v6529_v32 = vld [vmem:[#allocation3 + $0xb0] sm:$0xff] }
 0x9a0   : > { %v6846_v25 = vmax.f32 %v6814_v52, 0.0  ;;  %v6812_v62 = vadd.f32 3.0, %v6686_v60  ;;  %v6697_v37 = vadd.f32 %v7637_v34, %v11566_v11  ;;  %v5660_v26 = vpop.permute.xlu0 %5659  ;;  %v6530_v38 = vld [vmem:[#allocation3 + $0xb8] sm:$0xff]  ;;  %5542 = vst.msk [vmem:[#allocation3 + $0xd8] sm:$0xff] %vm784_vm3, %v5474_v30 }
 0x9a1   : > { %5731 = vst.msk [vmem:[#allocation3 + $0xc0] sm:$0xff] %vm977_vm4, %v5660_v26  ;;  %v6688_v16 = vpop.f32.mrf.mxu0  ;;  %v6550_v22 = vpack.c.bf16 %v6530_v38, %v6529_v32 }
 0x9a2   : > { %v6844_v41 = vmax.f32 %v6812_v62, 0.0  ;;  %v6815_v1 = vadd.f32 3.0, %v6697_v37  ;;  %v6689_v46 = vadd.f32 %v11566_v11, %v6688_v16  ;;  %v6878_v53 = vmin.f32 %v6846_v25, 6.0 }
 0x9a3   : > { %7655 = vmatmul.mubr.msk.bf16.gmra.mxu0 %vm1874_vm10, %v6550_v22  ;;  %v5662_v17 = vpop.permute.xlu1 %5661 }
 0x9a4   : > { %v6876_v15 = vmin.f32 %v6844_v41, 6.0  ;;  %v6847_v50 = vmax.f32 %v6815_v1, 0.0  ;;  %v6813_v23 = vadd.f32 3.0, %v6689_v46  ;;  %v5664_v59 = vpop.permute.xlu0 %5663  ;;  %5732 = vst.msk [vmem:[#allocation3 + $0xc8] sm:$0xff] %vm977_vm4, %v5662_v17  ;;  %v6910_v5 = vmul.f32 %v6878_v53, %v6694_v54 }
 0x9a5   : > { %5733 = vst.msk [vmem:[#allocation3 + $0xd0] sm:$0xff] %vm977_vm4, %v5664_v59 }
 0x9a6   : > { %v6908_v40 = vmul.f32 %v6876_v15, %v6686_v60  ;;  %v6845_v9 = vmax.f32 %v6813_v23, 0.0  ;;  %v6879_v27 = vmin.f32 %v6847_v50, 6.0  ;;  %v6942_v61 = vmul.f32 0.16666667, %v6910_v5 }
 0x9a7   : > { %v5666_v58 = vpop.permute.xlu1 %5665 }
 0x9a8   : > { %v6940_v55 = vmul.f32 0.16666667, %v6908_v40  ;;  %v6877_v12 = vmin.f32 %v6845_v9, 6.0  ;;  %v5852_v6 = vpop.permute.xlu0 %5851  ;;  %5734 = vst.msk [vmem:[#allocation3 + $0xd8] sm:$0xff] %vm977_vm4, %v5666_v58  ;;  %v6911_v8 = vmul.f32 %v6879_v27, %v6697_v37 }
 0x9a9   : > { %5923 = vst.msk [vmem:[#allocation3 + $0xc0] sm:$0xff] %vm1170_vm5, %v5852_v6 }
 0x9aa   : > { %v6909_v36 = vmul.f32 %v6877_v12, %v6689_v46  ;;  %7004 = vrot.lane.b32.xlu0 %v6940_v55, %s7737_s22  ;;  %v6943_v44 = vmul.f32 0.16666667, %v6911_v8 }
 0x9ab   : > { %v5854_v13 = vpop.permute.xlu1 %5853 }
 0x9ac   : > { %v6941_v43 = vmul.f32 0.16666667, %v6909_v36  ;;  %v5856_v49 = vpop.permute.xlu0 %5855  ;;  %5924 = vst.msk [vmem:[#allocation3 + $0xc8] sm:$0xff] %vm1170_vm5, %v5854_v13 }
 0x9ad   : > { %5925 = vst.msk [vmem:[#allocation3 + $0xd0] sm:$0xff] %vm1170_vm5, %v5856_v49 }
 0x9ae   : > { %7006 = vrot.lane.b32.xlu1 %v6941_v43, %s7737_s22  ;;  %7008 = vrot.lane.b32.xlu0 %v6942_v61, %s7737_s22 }
 0x9af   : > { %v5858_v31 = vpop.permute.xlu1 %5857 }
 0x9b0   : > { %v6044_v57 = vpop.permute.xlu0 %6043  ;;  %5926 = vst.msk [vmem:[#allocation3 + $0xd8] sm:$0xff] %vm1170_vm5, %v5858_v31 }
 0x9b1   : > { %6115 = vst.msk [vmem:[#allocation3 + $0xc0] sm:$0xff] %vm1364_vm7, %v6044_v57 }
 0x9b2   : > { %7010 = vrot.lane.b32.xlu1 %v6943_v44, %s7737_s22 }
 0x9b3   : > { %v6046_v35 = vpop.permute.xlu1 %6045 }
 0x9b4   : > { %v6048_v10 = vpop.permute.xlu0 %6047  ;;  %6116 = vst.msk [vmem:[#allocation3 + $0xc8] sm:$0xff] %vm1364_vm7, %v6046_v35 }
 0x9b5   : > { %6117 = vst.msk [vmem:[#allocation3 + $0xd0] sm:$0xff] %vm1364_vm7, %v6048_v10 }
 0x9b7   : > { %v6050_v45 = vpop.permute.xlu1 %6049 }
 0x9b8   : > { %v6236_v48 = vpop.permute.xlu0 %6235  ;;  %6118 = vst.msk [vmem:[#allocation3 + $0xd8] sm:$0xff] %vm1364_vm7, %v6050_v45 }
 0x9b9   : > { %6307 = vst.msk [vmem:[#allocation3 + $0xc0] sm:$0xff] %vm1557_vm8, %v6236_v48 }
 0x9bb   : > { %v6238_v24 = vpop.permute.xlu1 %6237 }
 0x9bc   : > { %v6240_v28 = vpop.permute.xlu0 %6239  ;;  %6308 = vst.msk [vmem:[#allocation3 + $0xc8] sm:$0xff] %vm1557_vm8, %v6238_v24 }
 0x9bd   : > { %6309 = vst.msk [vmem:[#allocation3 + $0xd0] sm:$0xff] %vm1557_vm8, %v6240_v28 }
 0x9bf   : > { %v6242_v42 = vpop.permute.xlu1 %6241 }
 0x9c0   : > { %v6428_v33 = vpop.permute.xlu0 %6427  ;;  %6310 = vst.msk [vmem:[#allocation3 + $0xd8] sm:$0xff] %vm1557_vm8, %v6242_v42 }
 0x9c1   : > { %6499 = vst.msk [vmem:[#allocation3 + $0xc0] sm:$0xff] %vm1750_vm9, %v6428_v33 }
 0x9c3   : > { %v7640_v7 = vpop.f32.mrf.mxu0  ;;  %v6430_v20 = vpop.permute.xlu1 %6429 }
 0x9c4   : > { %v6710_v18 = vadd.f32 %v7640_v7, %v11566_v11  ;;  %v6432_v19 = vpop.permute.xlu0 %6431  ;;  %6500 = vst.msk [vmem:[#allocation3 + $0xc8] sm:$0xff] %vm1750_vm9, %v6430_v20 }
 0x9c5   : > { %6501 = vst.msk [vmem:[#allocation3 + $0xd0] sm:$0xff] %vm1750_vm9, %v6432_v19  ;;  %v6701_v0 = vpop.f32.mrf.mxu0 }
 0x9c6   : > { %v6818_v21 = vadd.f32 3.0, %v6710_v18  ;;  %v6702_v47 = vadd.f32 %v11566_v11, %v6701_v0 }
 0x9c7   : > { %v7641_v3 = vpop.f32.mrf.mxu0  ;;  %v6434_v51 = vpop.permute.xlu1 %6433 }
 0x9c8   : > { %v6850_v56 = vmax.f32 %v6818_v21, 0.0  ;;  %v6816_v29 = vadd.f32 3.0, %v6702_v47  ;;  %v6713_v54 = vadd.f32 %v7641_v3, %v11566_v11  ;;  %v5476_v14 = vpop.permute.xlu0 %5475  ;;  %6502 = vst.msk [vmem:[#allocation3 + $0xd8] sm:$0xff] %vm1750_vm9, %v6434_v51  ;;  %v6531_v30 = vld [vmem:[#allocation3 + $0xc0] sm:$0xff] }
 0x9c9   : > { %5543 = vst.msk [vmem:[#allocation3 + $0xe0] sm:$0xff] %vm784_vm3, %v5476_v14  ;;  %v6704_v63 = vpop.f32.mrf.mxu0 }
 0x9ca   : > { %v6848_v39 = vmax.f32 %v6816_v29, 0.0  ;;  %v6819_v4 = vadd.f32 3.0, %v6713_v54  ;;  %v6705_v2 = vadd.f32 %v11566_v11, %v6704_v63  ;;  %v6882_v52 = vmin.f32 %v6850_v56, 6.0 }
 0x9cb   : > { %v5478_v62 = vpop.permute.xlu1 %5477  ;;  %v6532_v26 = vld [vmem:[#allocation3 + $0xc8] sm:$0xff] }
 0x9cc   : > { %v6880_v60 = vmin.f32 %v6848_v39, 6.0  ;;  %v6851_v34 = vmax.f32 %v6819_v4, 0.0  ;;  %v6817_v25 = vadd.f32 3.0, %v6705_v2  ;;  %v5480_v37 = vpop.permute.xlu0 %5479  ;;  %5544 = vst.msk [vmem:[#allocation3 + $0xe8] sm:$0xff] %vm784_vm3, %v5478_v62  ;;  %v6551_v32 = vpack.c.bf16 %v6532_v26, %v6531_v30  ;;  %v6533_v50 = vld [vmem:[#allocation3 + $0xd0] sm:$0xff] }
 0x9cd   : > { %5545 = vst.msk [vmem:[#allocation3 + $0xf0] sm:$0xff] %vm784_vm3, %v5480_v37  ;;  %v6914_v22 = vmul.f32 %v6882_v52, %v6710_v18 }
 0x9ce   : > { %v6912_v38 = vmul.f32 %v6880_v60, %v6702_v47  ;;  %v6849_v16 = vmax.f32 %v6817_v25, 0.0  ;;  %7658 = vmatprep.mubr.msk.bf16.mxu0 %vm1874_vm10, %v6551_v32  ;;  %v6883_v1 = vmin.f32 %v6851_v34, 6.0 }
 0x9cf   : > { %v5482_v53 = vpop.permute.xlu1 %5481  ;;  %v6534_v23 = vld [vmem:[#allocation3 + $0xd8] sm:$0xff]  ;;  %v6946_v40 = vmul.f32 0.16666667, %v6914_v22 }
 0x9d0   : > { %v6944_v41 = vmul.f32 0.16666667, %v6912_v38  ;;  %v6881_v46 = vmin.f32 %v6849_v16, 6.0  ;;  %v5668_v15 = vpop.permute.xlu0 %5667  ;;  %5546 = vst.msk [vmem:[#allocation3 + $0xf8] sm:$0xff] %vm784_vm3, %v5482_v53  ;;  %v6552_v17 = vpack.c.bf16 %v6534_v23, %v6533_v50  ;;  %v6915_v9 = vmul.f32 %v6883_v1, %v6713_v54 }
 0x9d1   : > { %5735 = vst.msk [vmem:[#allocation3 + $0xe0] sm:$0xff] %vm977_vm4, %v5668_v15 }
 0x9d2   : > { %v6913_v59 = vmul.f32 %v6881_v46, %v6705_v2  ;;  %7012 = vrot.lane.b32.xlu0 %v6944_v41, %s7737_s22  ;;  %7659 = vmatmul.mubr.msk.bf16.gmra.mxu0 %vm1874_vm10, %v6552_v17  ;;  %v6947_v12 = vmul.f32 0.16666667, %v6915_v9 }
 0x9d3   : > { %v5670_v55 = vpop.permute.xlu1 %5669 }
 0x9d4   : > { %v6945_v5 = vmul.f32 0.16666667, %v6913_v59  ;;  %v5672_v27 = vpop.permute.xlu0 %5671  ;;  %5736 = vst.msk [vmem:[#allocation3 + $0xe8] sm:$0xff] %vm977_vm4, %v5670_v55 }
 0x9d5   : > { %5737 = vst.msk [vmem:[#allocation3 + $0xf0] sm:$0xff] %vm977_vm4, %v5672_v27 }
 0x9d6   : > { %7014 = vrot.lane.b32.xlu1 %v6945_v5, %s7737_s22  ;;  %7016 = vrot.lane.b32.xlu0 %v6946_v40, %s7737_s22 }
 0x9d7   : > { %v5674_v58 = vpop.permute.xlu1 %5673 }
 0x9d8   : > { %v5860_v6 = vpop.permute.xlu0 %5859  ;;  %5738 = vst.msk [vmem:[#allocation3 + $0xf8] sm:$0xff] %vm977_vm4, %v5674_v58 }
 0x9d9   : > { %5927 = vst.msk [vmem:[#allocation3 + $0xe0] sm:$0xff] %vm1170_vm5, %v5860_v6 }
 0x9da   : > { %7018 = vrot.lane.b32.xlu1 %v6947_v12, %s7737_s22 }
 0x9db   : > { %v5862_v36 = vpop.permute.xlu1 %5861 }
 0x9dc   : > { %v5864_v61 = vpop.permute.xlu0 %5863  ;;  %5928 = vst.msk [vmem:[#allocation3 + $0xe8] sm:$0xff] %vm1170_vm5, %v5862_v36 }
 0x9dd   : > { %5929 = vst.msk [vmem:[#allocation3 + $0xf0] sm:$0xff] %vm1170_vm5, %v5864_v61 }
 0x9df   : > { %v5866_v8 = vpop.permute.xlu1 %5865 }
 0x9e0   : > { %v6052_v43 = vpop.permute.xlu0 %6051  ;;  %5930 = vst.msk [vmem:[#allocation3 + $0xf8] sm:$0xff] %vm1170_vm5, %v5866_v8 }
 0x9e1   : > { %6119 = vst.msk [vmem:[#allocation3 + $0xe0] sm:$0xff] %vm1364_vm7, %v6052_v43 }
 0x9e3   : > { %v6054_v13 = vpop.permute.xlu1 %6053 }
 0x9e4   : > { %v6056_v49 = vpop.permute.xlu0 %6055  ;;  %6120 = vst.msk [vmem:[#allocation3 + $0xe8] sm:$0xff] %vm1364_vm7, %v6054_v13 }
 0x9e5   : > { %6121 = vst.msk [vmem:[#allocation3 + $0xf0] sm:$0xff] %vm1364_vm7, %v6056_v49 }
 0x9e7   : > { %v6058_v44 = vpop.permute.xlu1 %6057 }
 0x9e8   : > { %v6244_v31 = vpop.permute.xlu0 %6243  ;;  %6122 = vst.msk [vmem:[#allocation3 + $0xf8] sm:$0xff] %vm1364_vm7, %v6058_v44 }
 0x9e9   : > { %6311 = vst.msk [vmem:[#allocation3 + $0xe0] sm:$0xff] %vm1557_vm8, %v6244_v31 }
 0x9eb   : > { %v7644_v57 = vpop.f32.mrf.mxu0  ;;  %v6246_v10 = vpop.permute.xlu1 %6245 }
 0x9ec   : > { %v6726_v35 = vadd.f32 %v7644_v57, %v11566_v11  ;;  %v6248_v45 = vpop.permute.xlu0 %6247  ;;  %6312 = vst.msk [vmem:[#allocation3 + $0xe8] sm:$0xff] %vm1557_vm8, %v6246_v10 }
 0x9ed   : > { %6313 = vst.msk [vmem:[#allocation3 + $0xf0] sm:$0xff] %vm1557_vm8, %v6248_v45  ;;  %v6717_v48 = vpop.f32.mrf.mxu0 }
 0x9ee   : > { %v6822_v24 = vadd.f32 3.0, %v6726_v35  ;;  %v6718_v28 = vadd.f32 %v11566_v11, %v6717_v48 }
 0x9ef   : > { %v7645_v42 = vpop.f32.mrf.mxu0  ;;  %v6250_v20 = vpop.permute.xlu1 %6249 }
 0x9f0   : > { %v6854_v33 = vmax.f32 %v6822_v24, 0.0  ;;  %v6820_v7 = vadd.f32 3.0, %v6718_v28  ;;  %v6729_v18 = vadd.f32 %v7645_v42, %v11566_v11  ;;  %v6436_v19 = vpop.permute.xlu0 %6435  ;;  %6314 = vst.msk [vmem:[#allocation3 + $0xf8] sm:$0xff] %vm1557_vm8, %v6250_v20 }
 0x9f1   : > { %6503 = vst.msk [vmem:[#allocation3 + $0xe0] sm:$0xff] %vm1750_vm9, %v6436_v19  ;;  %v6720_v0 = vpop.f32.mrf.mxu0 }
 0x9f2   : > { %v6852_v21 = vmax.f32 %v6820_v7, 0.0  ;;  %v6823_v47 = vadd.f32 3.0, %v6729_v18  ;;  %v6721_v3 = vadd.f32 %v11566_v11, %v6720_v0  ;;  %v6886_v56 = vmin.f32 %v6854_v33, 6.0 }
 0x9f3   : > { %v6438_v14 = vpop.permute.xlu1 %6437 }
 0x9f4   : > { %v6884_v29 = vmin.f32 %v6852_v21, 6.0  ;;  %v6855_v54 = vmax.f32 %v6823_v47, 0.0  ;;  %v6821_v51 = vadd.f32 3.0, %v6721_v3  ;;  %v6440_v63 = vpop.permute.xlu0 %6439  ;;  %6504 = vst.msk [vmem:[#allocation3 + $0xe8] sm:$0xff] %vm1750_vm9, %v6438_v14  ;;  %v6918_v2 = vmul.f32 %v6886_v56, %v6726_v35 }
 0x9f5   : > { %6505 = vst.msk [vmem:[#allocation3 + $0xf0] sm:$0xff] %vm1750_vm9, %v6440_v63 }
 0x9f6   : > { %v6916_v39 = vmul.f32 %v6884_v29, %v6718_v28  ;;  %v6853_v4 = vmax.f32 %v6821_v51, 0.0  ;;  %v6887_v60 = vmin.f32 %v6855_v54, 6.0  ;;  %v6950_v37 = vmul.f32 0.16666667, %v6918_v2 }
 0x9f7   : > { %v6442_v25 = vpop.permute.xlu1 %6441 }
 0x9f8   : > { %v6948_v52 = vmul.f32 0.16666667, %v6916_v39  ;;  %v6885_v34 = vmin.f32 %v6853_v4, 6.0  ;;  %6506 = vst.msk [vmem:[#allocation3 + $0xf8] sm:$0xff] %vm1750_vm9, %v6442_v25  ;;  %v6919_v30 = vmul.f32 %v6887_v60, %v6729_v18  ;;  %v6535_v32 = vld [vmem:[#allocation3 + $0xe0] sm:$0xff] }
 0x9fa   : > { %v6917_v62 = vmul.f32 %v6885_v34, %v6721_v3  ;;  %7020 = vrot.lane.b32.xlu0 %v6948_v52, %s7737_s22  ;;  %v6951_v41 = vmul.f32 0.16666667, %v6919_v30 }
 0x9fb   : > { %v6536_v38 = vld [vmem:[#allocation3 + $0xe8] sm:$0xff] }
 0x9fc   : > { %v6949_v26 = vmul.f32 0.16666667, %v6917_v62  ;;  %v6553_v16 = vpack.c.bf16 %v6536_v38, %v6535_v32  ;;  %v6537_v22 = vld [vmem:[#allocation3 + $0xf0] sm:$0xff] }
 0x9fe   : > { %7022 = vrot.lane.b32.xlu1 %v6949_v26, %s7737_s22  ;;  %7024 = vrot.lane.b32.xlu0 %v6950_v37, %s7737_s22 }
 0x9ff   : > { %7662 = vmatprep.mubr.msk.bf16.mxu0 %vm1874_vm10, %v6553_v16  ;;  %v6538_v1 = vld [vmem:[#allocation3 + $0xf8] sm:$0xff] }
 0xa00   : > { %v6554_v46 = vpack.c.bf16 %v6538_v1, %v6537_v22 }
 0xa02   : > { %7026 = vrot.lane.b32.xlu1 %v6951_v41, %s7737_s22  ;;  %7663 = vmatmul.mubr.msk.bf16.gmra.mxu0 %vm1874_vm10, %v6554_v46 }
 0xa13   : > { %v7648_v53 = vpop.f32.mrf.mxu0 }
 0xa14   : > { %v6742_v15 = vadd.f32 %v7648_v53, %v11566_v11 }
 0xa15   : > { %v6733_v50 = vpop.f32.mrf.mxu0 }
 0xa16   : > { %v6826_v23 = vadd.f32 3.0, %v6742_v15  ;;  %v6734_v17 = vadd.f32 %v11566_v11, %v6733_v50 }
 0xa17   : > { %v7649_v59 = vpop.f32.mrf.mxu0 }
 0xa18   : > { %v6858_v40 = vmax.f32 %v6826_v23, 0.0  ;;  %v6824_v9 = vadd.f32 3.0, %v6734_v17  ;;  %v6745_v5 = vadd.f32 %v7649_v59, %v11566_v11 }
 0xa19   : > { %v6736_v55 = vpop.f32.mrf.mxu0 }
 0xa1a   : > { %v6856_v27 = vmax.f32 %v6824_v9, 0.0  ;;  %v6827_v12 = vadd.f32 3.0, %v6745_v5  ;;  %v6737_v58 = vadd.f32 %v11566_v11, %v6736_v55  ;;  %v6890_v6 = vmin.f32 %v6858_v40, 6.0 }
 0xa1c   : > { %v6888_v36 = vmin.f32 %v6856_v27, 6.0  ;;  %v6859_v61 = vmax.f32 %v6827_v12, 0.0  ;;  %v6825_v8 = vadd.f32 3.0, %v6737_v58  ;;  %v7005_v43 = vpop.permute.xlu0 %7004  ;;  %v6922_v44 = vmul.f32 %v6890_v6, %v6742_v15 }
 0xa1d   : > { %7101 = vst.msk [vmem:[%s9050_s16] sm:$0xff] %vm7100_vm15, %v7005_v43 }
 0xa1e   : > { %v6920_v13 = vmul.f32 %v6888_v36, %v6734_v17  ;;  %v6857_v49 = vmax.f32 %v6825_v8, 0.0  ;;  %v6891_v57 = vmin.f32 %v6859_v61, 6.0  ;;  %v6954_v24 = vmul.f32 0.16666667, %v6922_v44 }
 0xa20   : > { %v6952_v31 = vmul.f32 0.16666667, %v6920_v13  ;;  %v6889_v35 = vmin.f32 %v6857_v49, 6.0  ;;  %v7007_v10 = vpop.permute.xlu1 %7006  ;;  %v7009_v45 = vpop.permute.xlu0 %7008  ;;  %v6923_v28 = vmul.f32 %v6891_v57, %v6745_v5 }
 0xa21   : > { %7102 = vst.msk [vmem:[%s9050_s16 + $0x8] sm:$0xff] %vm7100_vm15, %v7007_v10  ;;  %7103 = vst.msk [vmem:[%s9050_s16 + $0x10] sm:$0xff] %vm7100_vm15, %v7009_v45 }
 0xa22   : > { %v6921_v48 = vmul.f32 %v6889_v35, %v6737_v58  ;;  %7028 = vrot.lane.b32.xlu0 %v6952_v31, %s7737_s22  ;;  %v6955_v7 = vmul.f32 0.16666667, %v6923_v28 }
 0xa24   : > { %v6953_v42 = vmul.f32 0.16666667, %v6921_v48  ;;  %v7011_v33 = vpop.permute.xlu1 %7010 }
 0xa25   : > { %7104 = vst.msk [vmem:[%s9050_s16 + $0x18] sm:$0xff] %vm7100_vm15, %v7011_v33 }
 0xa26   : > { %7030 = vrot.lane.b32.xlu1 %v6953_v42, %s7737_s22  ;;  %7032 = vrot.lane.b32.xlu0 %v6954_v24, %s7737_s22 }
 0xa2a   : > { %7034 = vrot.lane.b32.xlu1 %v6955_v7, %s7737_s22 }
 0xa3b   : > { %v7652_v18 = vpop.f32.mrf.mxu0 }
 0xa3c   : > { %v6758_v20 = vadd.f32 %v7652_v18, %v11566_v11 }
 0xa3d   : > { %v6749_v19 = vpop.f32.mrf.mxu0 }
 0xa3e   : > { %v6830_v0 = vadd.f32 3.0, %v6758_v20  ;;  %v6750_v21 = vadd.f32 %v11566_v11, %v6749_v19 }
 0xa3f   : > { %v7653_v47 = vpop.f32.mrf.mxu0 }
 0xa40   : > { %v6862_v3 = vmax.f32 %v6830_v0, 0.0  ;;  %v6828_v56 = vadd.f32 3.0, %v6750_v21  ;;  %v6761_v29 = vadd.f32 %v7653_v47, %v11566_v11 }
 0xa41   : > { %v6752_v54 = vpop.f32.mrf.mxu0 }
 0xa42   : > { %v6860_v51 = vmax.f32 %v6828_v56, 0.0  ;;  %v6831_v14 = vadd.f32 3.0, %v6761_v29  ;;  %v6753_v63 = vadd.f32 %v11566_v11, %v6752_v54  ;;  %v6894_v39 = vmin.f32 %v6862_v3, 6.0 }
 0xa44   : > { %v6892_v4 = vmin.f32 %v6860_v51, 6.0  ;;  %v6863_v2 = vmax.f32 %v6831_v14, 0.0  ;;  %v6829_v52 = vadd.f32 3.0, %v6753_v63  ;;  %v7013_v60 = vpop.permute.xlu0 %7012  ;;  %v6926_v62 = vmul.f32 %v6894_v39, %v6758_v20 }
 0xa45   : > { %7105 = vst.msk [vmem:[%s9050_s16 + $0x20] sm:$0xff] %vm7100_vm15, %v7013_v60 }
 0xa46   : > { %v6924_v34 = vmul.f32 %v6892_v4, %v6750_v21  ;;  %v6861_v25 = vmax.f32 %v6829_v52, 0.0  ;;  %v6895_v30 = vmin.f32 %v6863_v2, 6.0  ;;  %v6958_v22 = vmul.f32 0.16666667, %v6926_v62 }
 0xa48   : > { %v6956_v37 = vmul.f32 0.16666667, %v6924_v34  ;;  %v6893_v26 = vmin.f32 %v6861_v25, 6.0  ;;  %v7015_v32 = vpop.permute.xlu1 %7014  ;;  %v7017_v38 = vpop.permute.xlu0 %7016  ;;  %v6927_v41 = vmul.f32 %v6895_v30, %v6761_v29 }
 0xa49   : > { %7106 = vst.msk [vmem:[%s9050_s16 + $0x28] sm:$0xff] %vm7100_vm15, %v7015_v32  ;;  %7107 = vst.msk [vmem:[%s9050_s16 + $0x30] sm:$0xff] %vm7100_vm15, %v7017_v38 }
 0xa4a   : > { %v6925_v16 = vmul.f32 %v6893_v26, %v6753_v63  ;;  %7036 = vrot.lane.b32.xlu0 %v6956_v37, %s7737_s22  ;;  %v6959_v53 = vmul.f32 0.16666667, %v6927_v41 }
 0xa4c   : > { %v6957_v1 = vmul.f32 0.16666667, %v6925_v16  ;;  %v7019_v46 = vpop.permute.xlu1 %7018 }
 0xa4d   : > { %7108 = vst.msk [vmem:[%s9050_s16 + $0x38] sm:$0xff] %vm7100_vm15, %v7019_v46 }
 0xa4e   : > { %7038 = vrot.lane.b32.xlu1 %v6957_v1, %s7737_s22  ;;  %7040 = vrot.lane.b32.xlu0 %v6958_v22, %s7737_s22 }
 0xa52   : > { %7042 = vrot.lane.b32.xlu1 %v6959_v53, %s7737_s22 }
 0xa63   : > { %v7656_v15 = vpop.f32.mrf.mxu0 }
 0xa64   : > { %v6774_v50 = vadd.f32 %v7656_v15, %v11566_v11 }
 0xa65   : > { %v6765_v23 = vpop.f32.mrf.mxu0 }
 0xa66   : > { %v6834_v17 = vadd.f32 3.0, %v6774_v50  ;;  %v6766_v59 = vadd.f32 %v11566_v11, %v6765_v23 }
 0xa67   : > { %v7657_v40 = vpop.f32.mrf.mxu0 }
 0xa68   : > { %v6866_v9 = vmax.f32 %v6834_v17, 0.0  ;;  %v6832_v5 = vadd.f32 3.0, %v6766_v59  ;;  %v6777_v55 = vadd.f32 %v7657_v40, %v11566_v11 }
 0xa69   : > { %v6768_v27 = vpop.f32.mrf.mxu0 }
 0xa6a   : > { %v6864_v12 = vmax.f32 %v6832_v5, 0.0  ;;  %v6835_v58 = vadd.f32 3.0, %v6777_v55  ;;  %v6769_v6 = vadd.f32 %v11566_v11, %v6768_v27  ;;  %v6898_v36 = vmin.f32 %v6866_v9, 6.0 }
 0xa6c   : > { %v6896_v61 = vmin.f32 %v6864_v12, 6.0  ;;  %v6867_v8 = vmax.f32 %v6835_v58, 0.0  ;;  %v6833_v43 = vadd.f32 3.0, %v6769_v6  ;;  %v7021_v13 = vpop.permute.xlu0 %7020  ;;  %v6930_v31 = vmul.f32 %v6898_v36, %v6774_v50 }
 0xa6d   : > { %7109 = vst.msk [vmem:[%s9050_s16 + $0x40] sm:$0xff] %vm7100_vm15, %v7021_v13 }
 0xa6e   : > { %v6928_v49 = vmul.f32 %v6896_v61, %v6766_v59  ;;  %v6865_v44 = vmax.f32 %v6833_v43, 0.0  ;;  %v6899_v35 = vmin.f32 %v6867_v8, 6.0  ;;  %v6962_v28 = vmul.f32 0.16666667, %v6930_v31 }
 0xa70   : > { %v6960_v57 = vmul.f32 0.16666667, %v6928_v49  ;;  %v6897_v10 = vmin.f32 %v6865_v44, 6.0  ;;  %v7023_v45 = vpop.permute.xlu1 %7022  ;;  %v7025_v48 = vpop.permute.xlu0 %7024  ;;  %v6931_v42 = vmul.f32 %v6899_v35, %v6777_v55 }
 0xa71   : > { %7110 = vst.msk [vmem:[%s9050_s16 + $0x48] sm:$0xff] %vm7100_vm15, %v7023_v45  ;;  %7111 = vst.msk [vmem:[%s9050_s16 + $0x50] sm:$0xff] %vm7100_vm15, %v7025_v48 }
 0xa72   : > { %v6929_v24 = vmul.f32 %v6897_v10, %v6769_v6  ;;  %7044 = vrot.lane.b32.xlu0 %v6960_v57, %s7737_s22  ;;  %v6963_v18 = vmul.f32 0.16666667, %v6931_v42 }
 0xa74   : > { %v6961_v33 = vmul.f32 0.16666667, %v6929_v24  ;;  %v7027_v7 = vpop.permute.xlu1 %7026 }
 0xa75   : > { %7112 = vst.msk [vmem:[%s9050_s16 + $0x58] sm:$0xff] %vm7100_vm15, %v7027_v7 }
 0xa76   : > { %7046 = vrot.lane.b32.xlu1 %v6961_v33, %s7737_s22  ;;  %7048 = vrot.lane.b32.xlu0 %v6962_v28, %s7737_s22 }
 0xa7a   : > { %7050 = vrot.lane.b32.xlu1 %v6963_v18, %s7737_s22 }
 0xa92   : > { %v7660_v20 = vpop.f32.mrf.mxu0 }
 0xa93   : > { %v6790_v19 = vadd.f32 %v7660_v20, %v11566_v11 }
 0xa94   : > { %v7029_v0 = vpop.permute.xlu0 %7028  ;;  %v6781_v21 = vpop.f32.mrf.mxu0 }
 0xa95   : > { %7113 = vst.msk [vmem:[%s9050_s16 + $0x60] sm:$0xff] %vm7100_vm15, %v7029_v0  ;;  %v6838_v47 = vadd.f32 3.0, %v6790_v19  ;;  %v6782_v3 = vadd.f32 %v11566_v11, %v6781_v21 }
 0xa96   : > { %v7661_v56 = vpop.f32.mrf.mxu0 }
 0xa97   : > { %v6870_v29 = vmax.f32 %v6838_v47, 0.0  ;;  %v6836_v54 = vadd.f32 3.0, %v6782_v3  ;;  %v6793_v51 = vadd.f32 %v7661_v56, %v11566_v11 }
 0xa98   : > { %v7031_v14 = vpop.permute.xlu1 %7030  ;;  %v7033_v63 = vpop.permute.xlu0 %7032 }
 0xa99   : > { %7114 = vst.msk [vmem:[%s9050_s16 + $0x68] sm:$0xff] %vm7100_vm15, %v7031_v14  ;;  %7115 = vst.msk [vmem:[%s9050_s16 + $0x70] sm:$0xff] %vm7100_vm15, %v7033_v63  ;;  %v6784_v39 = vpop.f32.mrf.mxu0  ;;  %v6868_v4 = vmax.f32 %v6836_v54, 0.0  ;;  %v6839_v2 = vadd.f32 3.0, %v6793_v51  ;;  %v6902_v60 = vmin.f32 %v6870_v29, 6.0 }
 0xa9a   : > { %v6785_v52 = vadd.f32 %v11566_v11, %v6784_v39 }
 0xa9b   : > { %v6900_v34 = vmin.f32 %v6868_v4, 6.0  ;;  %v6871_v25 = vmax.f32 %v6839_v2, 0.0  ;;  %v6934_v32 = vmul.f32 %v6902_v60, %v6790_v19 }
 0xa9c   : > { %v6837_v62 = vadd.f32 3.0, %v6785_v52  ;;  %v7035_v37 = vpop.permute.xlu1 %7034 }
 0xa9d   : > { %7116 = vst.msk [vmem:[%s9050_s16 + $0x78] sm:$0xff] %vm7100_vm15, %v7035_v37  ;;  %v6932_v30 = vmul.f32 %v6900_v34, %v6782_v3  ;;  %v6903_v16 = vmin.f32 %v6871_v25, 6.0  ;;  %v6966_v1 = vmul.f32 0.16666667, %v6934_v32 }
 0xa9e   : > { %v6869_v26 = vmax.f32 %v6837_v62, 0.0 }
 0xa9f   : > { %v6964_v38 = vmul.f32 0.16666667, %v6932_v30  ;;  %v6935_v46 = vmul.f32 %v6903_v16, %v6793_v51 }
 0xaa0   : > { %v6901_v22 = vmin.f32 %v6869_v26, 6.0 }
 0xaa1   : > { %7052 = vrot.lane.b32.xlu0 %v6964_v38, %s7737_s22  ;;  %v6967_v15 = vmul.f32 0.16666667, %v6935_v46 }
 0xaa2   : > { %v6933_v41 = vmul.f32 %v6901_v22, %v6785_v52 }
 0xaa4   : > { %v6965_v53 = vmul.f32 0.16666667, %v6933_v41 }
 0xaa5   : > { %7056 = vrot.lane.b32.xlu0 %v6966_v1, %s7737_s22 }
 0xaa6   : > { %7054 = vrot.lane.b32.xlu1 %v6965_v53, %s7737_s22 }
 0xaaa   : > { %7058 = vrot.lane.b32.xlu1 %v6967_v15, %s7737_s22 }
 0xabc   : > { %v7037_v50 = vpop.permute.xlu0 %7036 }
 0xabd   : > { %7117 = vst.msk [vmem:[%s9050_s16 + $0x80] sm:$0xff] %vm7100_vm15, %v7037_v50 }
 0xac0   : > { %v7039_v23 = vpop.permute.xlu1 %7038  ;;  %v7041_v17 = vpop.permute.xlu0 %7040 }
 0xac1   : > { %7118 = vst.msk [vmem:[%s9050_s16 + $0x88] sm:$0xff] %vm7100_vm15, %v7039_v23  ;;  %7119 = vst.msk [vmem:[%s9050_s16 + $0x90] sm:$0xff] %vm7100_vm15, %v7041_v17 }
 0xac2   : > { %v7664_v59 = vpop.f32.mrf.mxu0 }
 0xac3   : > { %v6806_v40 = vadd.f32 %v7664_v59, %v11566_v11 }
 0xac4   : > { %v7043_v9 = vpop.permute.xlu1 %7042  ;;  %v6797_v5 = vpop.f32.mrf.mxu0 }
 0xac5   : > { %7120 = vst.msk [vmem:[%s9050_s16 + $0x98] sm:$0xff] %vm7100_vm15, %v7043_v9  ;;  %v6842_v55 = vadd.f32 3.0, %v6806_v40  ;;  %v6798_v27 = vadd.f32 %v11566_v11, %v6797_v5 }
 0xac6   : > { %v7665_v12 = vpop.f32.mrf.mxu0 }
 0xac7   : > { %v6874_v58 = vmax.f32 %v6842_v55, 0.0  ;;  %v6840_v6 = vadd.f32 3.0, %v6798_v27  ;;  %v6809_v36 = vadd.f32 %v7665_v12, %v11566_v11 }
 0xac8   : > { %v6800_v61 = vpop.f32.mrf.mxu0 }
 0xac9   : > { %v6872_v8 = vmax.f32 %v6840_v6, 0.0  ;;  %v6843_v43 = vadd.f32 3.0, %v6809_v36  ;;  %v6801_v13 = vadd.f32 %v11566_v11, %v6800_v61  ;;  %v6906_v49 = vmin.f32 %v6874_v58, 6.0 }
 0xacb   : > { %v6904_v44 = vmin.f32 %v6872_v8, 6.0  ;;  %v6875_v31 = vmax.f32 %v6843_v43, 0.0  ;;  %v6841_v57 = vadd.f32 3.0, %v6801_v13  ;;  %v6938_v45 = vmul.f32 %v6906_v49, %v6806_v40 }
 0xacd   : > { %v6936_v35 = vmul.f32 %v6904_v44, %v6798_v27  ;;  %v6873_v10 = vmax.f32 %v6841_v57, 0.0  ;;  %v6907_v24 = vmin.f32 %v6875_v31, 6.0  ;;  %v6970_v33 = vmul.f32 0.16666667, %v6938_v45 }
 0xacf   : > { %v6968_v48 = vmul.f32 0.16666667, %v6936_v35  ;;  %v6905_v28 = vmin.f32 %v6873_v10, 6.0  ;;  %v6939_v11 = vmul.f32 %v6907_v24, %v6809_v36 }
 0xad1   : > { %v6937_v42 = vmul.f32 %v6905_v28, %v6801_v13  ;;  %7060 = vrot.lane.b32.xlu0 %v6968_v48, %s7737_s22  ;;  %v6971_v18 = vmul.f32 0.16666667, %v6939_v11 }
 0xad3   : > { %v6969_v7 = vmul.f32 0.16666667, %v6937_v42 }
 0xad5   : > { %7062 = vrot.lane.b32.xlu1 %v6969_v7, %s7737_s22  ;;  %7064 = vrot.lane.b32.xlu0 %v6970_v33, %s7737_s22 }
 0xad9   : > { %7066 = vrot.lane.b32.xlu1 %v6971_v18, %s7737_s22 }
 0xae4   : > { %v7045_v20 = vpop.permute.xlu0 %7044 }
 0xae5   : > { %7121 = vst.msk [vmem:[%s9050_s16 + $0xa0] sm:$0xff] %vm7100_vm15, %v7045_v20 }
 0xae8   : > { %v7047_v19 = vpop.permute.xlu1 %7046  ;;  %v7049_v0 = vpop.permute.xlu0 %7048 }
 0xae9   : > { %7122 = vst.msk [vmem:[%s9050_s16 + $0xa8] sm:$0xff] %vm7100_vm15, %v7047_v19  ;;  %7123 = vst.msk [vmem:[%s9050_s16 + $0xb0] sm:$0xff] %vm7100_vm15, %v7049_v0 }
 0xaec   : > { %v7051_v21 = vpop.permute.xlu1 %7050 }
 0xaed   : > { %7124 = vst.msk [vmem:[%s9050_s16 + $0xb8] sm:$0xff] %vm7100_vm15, %v7051_v21 }
 0xb13   : > { %v7053_v47 = vpop.permute.xlu0 %7052 }
 0xb14   : > { %7125 = vst.msk [vmem:[%s9050_s16 + $0xc0] sm:$0xff] %vm7100_vm15, %v7053_v47 }
 0xb17   : > { %v7057_v56 = vpop.permute.xlu0 %7056 }
 0xb18   : > { %v7055_v3 = vpop.permute.xlu1 %7054  ;;  %7127 = vst.msk [vmem:[%s9050_s16 + $0xd0] sm:$0xff] %vm7100_vm15, %v7057_v56 }
 0xb19   : > { %7126 = vst.msk [vmem:[%s9050_s16 + $0xc8] sm:$0xff] %vm7100_vm15, %v7055_v3 }
 0xb1c   : > { %v7059_v29 = vpop.permute.xlu1 %7058 }
 0xb1d   : > { %7128 = vst.msk [vmem:[%s9050_s16 + $0xd8] sm:$0xff] %vm7100_vm15, %v7059_v29 }
 0xb43   : > { %v7061_v54 = vpop.permute.xlu0 %7060 }
 0xb44   : > { %7129 = vst.msk [vmem:[%s9050_s16 + $0xe0] sm:$0xff] %vm7100_vm15, %v7061_v54 }
 0xb47   : > { %v7063_v51 = vpop.permute.xlu1 %7062  ;;  %v7065_v14 = vpop.permute.xlu0 %7064 }
 0xb48   : > { %7130 = vst.msk [vmem:[%s9050_s16 + $0xe8] sm:$0xff] %vm7100_vm15, %v7063_v51  ;;  %7131 = vst.msk [vmem:[%s9050_s16 + $0xf0] sm:$0xff] %vm7100_vm15, %v7065_v14 }
 0xb4b   : > { %v7067_v63 = vpop.permute.xlu1 %7066 }
 0xb4c   : > { %7132 = vst.msk [vmem:[%s9050_s16 + $0xf8] sm:$0xff] %vm7100_vm15, %v7067_v63 }
 0xb4d PF: > { %s13_s12 = sadd.s32 1, %s7723_s12  }
 0xb4e   : > { %p10_p4 = scmp.ge.s32.totalorder %s13_s12, 4  }
 0xb50   :  { %12 = sbr.rel (!%p10_p4) target bundleno = 1 (0x1), region = 70 }

</bundles_post_ra>
